<compile_context>
chip_gen: v6e
topology: v6e:2x2x1
jax: 0.10.0
libtpu: 0.0.40
codegen_flags: <defaults>
</compile_context>

<pallas_src>
import jax
import jax.numpy as jnp
from jax.experimental import pallas as pl
from jax.experimental.pallas import tpu as pltpu

FEAT_C = 1792  # fc input dim, fixed by Linear(1792, 1) in DeepFakeClassifier


def head_kernel(feat_ref, w_ref, b_ref, out_ref):
    # feat_ref: (bt, C*HW) native dtype (bf16/f32), lane-dense (C*HW % 128 == 0)
    # w_ref:    (1, C*HW) f32 — fc weight with the 1/(H*W) pool scale folded in,
    #           replicated across spatial positions (w_exp[c*HW+hw] = w[c]/HW)
    # b_ref:    (1,) f32 in SMEM
    # out_ref:  (bt, 1) f32
    feat = feat_ref[...].astype(jnp.float32)               # cast after load, accumulate in f32
    # Dropout(p=0.0) is the identity -> nothing to do.
    weighted = feat * w_ref[...]                            # VPU broadcast multiply
    logits = jnp.sum(weighted, axis=-1, keepdims=True)      # fused pool+fc lane reduce
    out_ref[...] = logits + b_ref[0]                        # scalar bias from SMEM


def _round_up(x, m):
    return ((x + m - 1) // m) * m


def _pick_batch_tile(B, per_sample_bytes, itemsize, budget_bytes):
    # Peak VMEM ~= 2x input tile (double buffer) + in-kernel f32 temporaries
    # (cast + product), i.e. ~6x the bf16 tile bytes or ~4x an f32 tile.
    mult = 6 if itemsize < 4 else 4
    cap = budget_bytes // (mult * per_sample_bytes)
    cap = max(8, (cap // 8) * 8)
    if B >= 16:
        # Force >= 2 grid steps so both v7x TensorCores participate.
        half = max(8, ((B // 2) // 8) * 8)
        cap = min(cap, half)
    if B < 16 and B <= cap:
        return B  # single whole-batch block (block == full array; no (8,..) issue)
    return min(cap, _round_up(B, 8))


def deepfake_classifier_head(features_nchw, fc_weight, fc_bias):
    """Classifier head of DeepFakeClassifier on the encoder feature map.

    features_nchw: (B, 1792, H, W) encoder output (NCHW, native dtype, e.g. bf16).
    fc_weight: (1, 1792) torch-Linear layout.  fc_bias: (1,).  Returns (B, 1) f32.
    """
    B, C, H, W = features_nchw.shape
    assert C == FEAT_C
    HW = H * W
    CHW = C * HW  # multiple of 128 since C = 14 * 128 -> perfectly lane-dense

    # Free view: (B, C, H, W) -> (B, C*H*W). No transpose, no dtype up-cast.
    feat = features_nchw.reshape(B, CHW)

    # Fold AdaptiveAvgPool2d((1,1))'s 1/(H*W) into the fc weight and replicate it per
    # spatial position so pooling + fc become a single fused multiply-reduce.
    w_scaled = fc_weight.astype(jnp.float32).reshape(1, C) / float(HW)
    w_exp = jnp.broadcast_to(w_scaled[:, :, None], (1, C, HW)).reshape(1, CHW)
    b = fc_bias.astype(jnp.float32).reshape(1)

    itemsize = feat.dtype.itemsize
    per_sample_bytes = CHW * itemsize
    bt = _pick_batch_tile(B, per_sample_bytes, itemsize, budget_bytes=32 * 1024 * 1024)

    # Pad ragged batches up to a multiple of the batch tile; slice the output after.
    B_pad = B if B % bt == 0 else _round_up(B, bt)
    if B_pad != B:
        feat = jnp.pad(feat, ((0, B_pad - B), (0, 0)))
    grid_b = B_pad // bt

    # Double-buffered input tile + f32 temporaries + resident weight + padded output.
    mult = 6 if itemsize < 4 else 4
    vmem_needed = (mult * bt * per_sample_bytes   # input tiles + in-kernel f32 temps
                   + 2 * CHW * 4                  # replicated weight (buffered)
                   + 2 * bt * 128 * 4             # (bt, 1) output padded to lane 128
                   + (1 << 20))                   # slack
    vmem_limit = int(min(48 * 1024 * 1024, max(vmem_needed, 16 * 1024 * 1024)))

    cost = pl.CostEstimate(
        flops=2 * B * CHW + 2 * B,
        transcendentals=0,
        bytes_accessed=B * per_sample_bytes + CHW * 4 + B * 4,
    )

    out = pl.pallas_call(
        head_kernel,
        out_shape=jax.ShapeDtypeStruct((B_pad, 1), jnp.float32),
        grid=(grid_b,),
        in_specs=[
            pl.BlockSpec((bt, CHW), lambda i: (i, 0)),             # feature tile per step
            pl.BlockSpec((1, CHW), lambda i: (0, 0)),              # weight stays resident
            pl.BlockSpec(memory_space=pltpu.MemorySpace.SMEM),     # scalar bias in SMEM
        ],
        out_specs=pl.BlockSpec((bt, 1), lambda i: (i, 0)),
        compiler_params=pltpu.CompilerParams(
            dimension_semantics=("parallel",),
            vmem_limit_bytes=vmem_limit,
        ),
        cost_estimate=cost,
    )(feat, w_exp, b)
    return out[:B]


def _reference(features_nchw, fc_weight, fc_bias):
    # Pure-JAX reference mirroring the PyTorch head semantics (f32, explicit
    # multiply + sum so there is no MXU precision ambiguity).
    x = features_nchw.astype(jnp.float32)
    pooled = jnp.mean(x, axis=(2, 3))                                  # (B, 1792)
    w = fc_weight.astype(jnp.float32)                                  # (1, 1792)
    return jnp.sum(pooled * w, axis=-1, keepdims=True) + fc_bias.astype(jnp.float32)


if __name__ == "__main__":
    key = jax.random.PRNGKey(0)
    k_feat, k_w, k_b, k_feat2 = jax.random.split(key, 4)

    # Deterministic synthetic fc parameters (torch Linear layout: (1, 1792) / (1,)).
    fc_weight = jax.random.normal(k_w, (1, FEAT_C), dtype=jnp.float32) * 0.02
    fc_bias = jax.random.normal(k_b, (1,), dtype=jnp.float32) * 0.02

    # Case 1: small batch, single grid step, bf16 encoder features (B, 1792, 8, 8).
    B1, H1, W1 = 2, 8, 8
    feats1 = jax.random.normal(k_feat, (B1, FEAT_C, H1, W1), jnp.float32).astype(jnp.bfloat16)
    out1 = jax.block_until_ready(deepfake_classifier_head(feats1, fc_weight, fc_bias))
    ref1 = _reference(feats1, fc_weight, fc_bias)
    assert out1.shape == (B1, 1)
    assert jnp.allclose(out1, ref1, atol=5e-4, rtol=5e-4), (out1, ref1)

    # Case 2: ragged batch >= 16 — exercises multi-step grid, forced >=2 steps,
    # and the pad-then-slice path.
    B2, H2, W2 = 18, 4, 4
    feats2 = jax.random.normal(k_feat2, (B2, FEAT_C, H2, W2), jnp.float32).astype(jnp.bfloat16)
    out2 = jax.block_until_ready(deepfake_classifier_head(feats2, fc_weight, fc_bias))
    ref2 = _reference(feats2, fc_weight, fc_bias)
    assert out2.shape == (B2, 1)
    assert jnp.allclose(out2, ref2, atol=5e-4, rtol=5e-4), (out2, ref2)

    print("KERNEL_OK")
</pallas_src>

<mosaic_0001>
module attributes {stable_mosaic.version = 11 : i64} {
  func.func @head_kernel(%arg0: i32, %arg1: memref<2x114688xbf16, #tpu.memory_space<vmem>>, %arg2: memref<1x114688xf32, #tpu.memory_space<vmem>>, %arg3: memref<1xf32, #tpu.memory_space<smem>>, %arg4: memref<2x1xf32, #tpu.memory_space<vmem>>) attributes {dimension_semantics = [#tpu.dimension_semantics<parallel>], iteration_bounds = array<i64: 1>, scalar_prefetch = 0 : i64, scratch_operands = 0 : i64, tpu.core_type = #tpu.core_type<tc>, window_params = [{transform_indices = @transform_0, window_bounds = array<i64: 2, 114688>}, {pipeline_mode = #tpu.pipeline_mode<synchronous>, transform_indices = @transform_1, window_bounds = array<i64: 1, 114688>}, {transform_indices = @transform_2, window_bounds = array<i64: 1>}, {transform_indices = @transform_3, window_bounds = array<i64: 2, 1>}]} {
    %c0 = arith.constant 0 : index
    %c0_0 = arith.constant 0 : index
    %0 = vector.load %arg1[%c0, %c0_0] : memref<2x114688xbf16, #tpu.memory_space<vmem>>, vector<2x114688xbf16>
    %1 = arith.extf %0 : vector<2x114688xbf16> to vector<2x114688xf32>
    %c0_1 = arith.constant 0 : index
    %c0_2 = arith.constant 0 : index
    %2 = vector.load %arg2[%c0_1, %c0_2] : memref<1x114688xf32, #tpu.memory_space<vmem>>, vector<1x114688xf32>
    %3 = vector.broadcast %2 : vector<1x114688xf32> to vector<2x114688xf32>
    %4 = arith.mulf %1, %3 : vector<2x114688xf32>
    %cst = arith.constant dense<0.000000e+00> : vector<2xf32>
    %5 = vector.multi_reduction <add>, %4, %cst [1] : vector<2x114688xf32> to vector<2xf32>
    %6 = vector.shape_cast %5 : vector<2xf32> to vector<2x1xf32>
    %c0_3 = arith.constant 0 : index
    %7 = memref.load %arg3[%c0_3] : memref<1xf32, #tpu.memory_space<smem>>
    %8 = vector.broadcast %7 : f32 to vector<2x1xf32>
    %9 = arith.addf %6, %8 : vector<2x1xf32>
    %c0_4 = arith.constant 0 : index
    %c0_5 = arith.constant 0 : index
    %10 = vector.load %arg4[%c0_4, %c0_5] : memref<2x1xf32, #tpu.memory_space<vmem>>, vector<2x1xf32>
    tpu.vector_store %arg4[%c0_4, %c0_5], %9 {strides = array<i32>} : memref<2x1xf32, #tpu.memory_space<vmem>>, vector<2x1xf32>,
    return
  }
  func.func @transform_0(%arg0: i32) -> (i32, i32) {
    %c0_i32 = arith.constant 0 : i32
    %c0_i32_0 = arith.constant 0 : i32
    return %arg0, %c0_i32 : i32, i32
  }
  func.func @transform_1(%arg0: i32) -> (i32, i32) {
    %c0_i32 = arith.constant 0 : i32
    %c0_i32_0 = arith.constant 0 : i32
    %c0_i32_1 = arith.constant 0 : i32
    return %c0_i32, %c0_i32_0 : i32, i32
  }
  func.func @transform_2(%arg0: i32) -> i32 {
    %c0_i32 = arith.constant 0 : i32
    %c0_i32_0 = arith.constant 0 : i32
    return %c0_i32 : i32
  }
  func.func @transform_3(%arg0: i32) -> (i32, i32) {
    %c0_i32 = arith.constant 0 : i32
    %c0_i32_0 = arith.constant 0 : i32
    return %arg0, %c0_i32 : i32, i32
  }
}

</mosaic_0001>

<bundles_post_ra>
// kernel: tpu_custom_call.1
= control target key start
LH: loop header
LB: loop body
LE: loop exit
PB: predicated region body
PF: predicated region fallthrough
CT: control target
= control target key end

     0   :  { %9 = vsyncpa [#allocation4], 0  ;;  %s17960_s0 = inlined_call_operand.hbm [shape: bf16[2,114688], index: 0, kind: input, shape index: {}]   ;;  %s17961_s1 = inlined_call_operand.hbm [shape: f32[1,114688], index: 1, kind: input, shape index: {}]   ;;  %s17962_s2 = inlined_call_operand.<no memory space> [shape: f32[1], index: 2, kind: input, shape index: {}]   ;;  %s17963_s3 = inlined_call_operand.vmem [shape: f32[2,1], index: 3, kind: output, shape index: {}]  }
   0x1   :  { %10 = vsyncpa [#allocation6], 0  ;;  %s15219_s12 = smov [#allocation3]   ;;  %s15220_s14 = smov [#allocation5]  }
   0x2   :  { %s17_s13 = sshll.u32 %s15219_s12, 4  ;;  %s27_s15 = sshll.u32 %s15220_s14, 4  ;;  %s18_s13 = int_to_ptr.vmem [resolvable:$true] %s17_s13  ;;  %s28_s15 = int_to_ptr.vmem [resolvable:$true] %s27_s15 }
   0x3   :  { %s15183_s16 = scalar_lea.vmem %s18_s13, 14336  ;;  %p15188_p1 = scmp.lt.s32.totalorder %s18_s13, %s18_s13 }
   0x4   :  { %p15184_p0 = scmp.ne.s32.totalorder %s18_s13, %s15183_s16  ;;  %p15189_p2 = scmp.lt.s32.totalorder %s15183_s16, %s15183_s16 }
   0x6   :  { %p15190_p3 = por %p15189_p2, %p15188_p1 }
   0x8   :  { %p15191_p4 = pnand %p15190_p3, %p15184_p0 }
   0xa   :  { %15194 = shalt.err (!%p15191_p4)
}
   0xb   :  { %20 = dma.hbm_to_vmem [thread:$0]  %s17960_s0, 14336, %s18_s13, [#allocation4]  }
   0xc   :  { %s15203_s19 = scalar_lea.vmem %s28_s15, 14336  ;;  %p15208_p6 = scmp.lt.s32.totalorder %s28_s15, %s28_s15 }
   0xd   :  { %p15204_p5 = scmp.ne.s32.totalorder %s28_s15, %s15203_s19  ;;  %p15209_p7 = scmp.lt.s32.totalorder %s15203_s19, %s15203_s19 }
   0xf   :  { %p15210_p8 = por %p15209_p7, %p15208_p6 }
  0x11   :  { %p15211_p9 = pnand %p15210_p8, %p15204_p5 }
  0x13   :  { %15214 = shalt.err (!%p15211_p9)
}
  0x14   :  { %30 = dma.hbm_to_vmem [thread:$0]  %s17961_s1, 14336, %s28_s15, [#allocation6]  }
  0x15   :  { %15215 = dma.done.wait [#allocation4], 14336  }
  0x16   :  { %15216 = vsyncadd [#allocation4], 4294952960 }
  0x17   :  { %15217 = dma.done.wait [#allocation6], 14336  }
  0x18   :  { %15218 = vsyncadd [#allocation6], 4294952960  ;;  %v599_v0 = vlaneseq  ;;  %v375_v3 = vld [vmem:[#allocation5] sm:$0xff]  ;;  %v15221_v7 = vmov 1983009808   ;;  %v376_v28 = vld [vmem:[#allocation5 + $0x8] sm:$0xff] }
  0x19   :  { %v4186_v8 = vunpack.c.l.s4 %v15221_v7  ;;  %v39_v27 = vld [vmem:[#allocation3] sm:$0xff]  ;;  %v40_v50 = vld [vmem:[#allocation3 + $0x8] sm:$0xff]  ;;  %v377_v55 = vld [vmem:[#allocation5 + $0x10] sm:$0xff]  ;;  %vm13367_vm0 = vcmask 1041408   ;;  %vm15164_vm1 = vcmask 1024  }
  0x1a   :  { %v600_v1 = vshrl.u32 %v599_v0, 7  ;;  %v151_v31 = vunpack.c.l.bf16 %v39_v27  ;;  %v152_v40 = vunpack.c.h.bf16 %v39_v27  ;;  %v153_v57 = vunpack.c.l.bf16 %v40_v50 }
  0x1b   :  { %v4187_v13 = vunpack.c.0.s8 %v4186_v8 }
  0x1c   :  { %v15248_v2 = vsub.s32 0, %v600_v1  ;;  %v15250_v4 = vsub.s32 1, %v600_v1  ;;  %v15252_v5 = vsub.s32 2, %v600_v1  ;;  %v15254_v6 = vsub.s32 3, %v600_v1 }
  0x1d   :  { %v15260_v14 = vsub.s32 4, %v600_v1  ;;  %v15262_v15 = vsub.s32 5, %v600_v1  ;;  %v15264_v16 = vsub.s32 6, %v600_v1  ;;  %v15266_v17 = vsub.s32 7, %v600_v1 }
  0x1e   :  { %v602_v9 = vrot.slane %v375_v3, %v15248_v2  ;;  %v606_v10 = vrot.slane %v375_v3, %v15250_v4  ;;  %v610_v11 = vrot.slane %v375_v3, %v15252_v5  ;;  %v614_v12 = vrot.slane %v375_v3, %v15254_v6 }
  0x1f   :  { %v15268_v20 = vsub.s32 %v4187_v13, %v600_v1  ;;  %v618_v21 = vrot.slane %v375_v3, %v15260_v14  ;;  %v622_v22 = vrot.slane %v375_v3, %v15262_v15  ;;  %v626_v23 = vrot.slane %v375_v3, %v15264_v16 }
  0x20   :  { %v4183_v18 = vcombine.low %v602_v9, %v606_v10  ;;  %v4184_v19 = vcombine.low %v610_v11, %v614_v12  ;;  %v630_v24 = vrot.slane %v375_v3, %v15266_v17  ;;  %v634_v33 = vrot.slane %v376_v28, %v15248_v2 }
  0x21   :  { %v4200_v29 = vcombine.low %v618_v21, %v622_v22  ;;  %v638_v34 = vrot.slane %v376_v28, %v15250_v4  ;;  %v642_v35 = vrot.slane %v376_v28, %v15252_v5  ;;  %v646_v36 = vrot.slane %v376_v28, %v15254_v6 }
  0x22   :  { %v4191_v25 = vrot.slane %v4183_v18, %v15268_v20  ;;  %v4198_v26 = vrot.slane %v4184_v19, %v15268_v20  ;;  %v4201_v30 = vcombine.low %v626_v23, %v630_v24  ;;  %v650_v46 = vrot.slane %v376_v28, %v15260_v14 }
  0x23   :  { %v4208_v37 = vrot.slane %v4200_v29, %v15268_v20  ;;  %v4217_v42 = vcombine.low %v634_v33, %v638_v34  ;;  %v4218_v43 = vcombine.low %v642_v35, %v646_v36  ;;  %v654_v47 = vrot.slane %v376_v28, %v15262_v15 }
  0x24   :  { %v4199_v32 = vcombine.low %v4191_v25, %v4198_v26  ;;  %v4215_v38 = vrot.slane %v4201_v30, %v15268_v20  ;;  %v658_v48 = vrot.slane %v376_v28, %v15264_v16  ;;  %v662_v49 = vrot.slane %v376_v28, %v15266_v17 }
  0x25   :  { %v4225_v51 = vrot.slane %v4217_v42, %v15268_v20  ;;  %v4232_v52 = vrot.slane %v4218_v43, %v15268_v20  ;;  %v4234_v58 = vcombine.low %v650_v46, %v654_v47  ;;  %v666_v0 = vrot.slane %v377_v55, %v15248_v2 }
  0x26   :  { %v8215_v39 = vmul.f32 %v4199_v32, %v151_v31  ;;  %v4216_v41 = vcombine.low %v4208_v37, %v4215_v38  ;;  %v4235_v59 = vcombine.low %v658_v48, %v662_v49  ;;  %v670_v1 = vrot.slane %v377_v55, %v15250_v4 }
  0x27   :  { %v4233_v60 = vcombine.low %v4225_v51, %v4232_v52  ;;  %v674_v3 = vrot.slane %v377_v55, %v15252_v5  ;;  %v678_v7 = vrot.slane %v377_v55, %v15254_v6  ;;  %v4242_v10 = vrot.slane %v4234_v58, %v15268_v20  ;;  %v378_v51 = vld [vmem:[#allocation5 + $0x18] sm:$0xff] }
  0x28   :  { %v8663_v44 = vcombine.high %v8215_v39, %v8215_v39  ;;  %v8670_v45 = vrot.slane %v8215_v39, %v15268_v20  ;;  %v8216_v53 = vmul.f32 %v4216_v41, %v152_v40  ;;  %v4249_v11 = vrot.slane %v4235_v59, %v15268_v20  ;;  %v41_v39 = vld [vmem:[#allocation3 + $0x10] sm:$0xff] }
  0x29   :  { %v8217_v18 = vmul.f32 %v4233_v60, %v153_v57  ;;  %v154_v24 = vunpack.c.h.bf16 %v40_v50  ;;  %v4251_v27 = vcombine.low %v666_v0, %v670_v1  ;;  %v4252_v28 = vcombine.low %v674_v3, %v678_v7 }
  0x2a   :  { %v8677_v54 = vrot.slane %v8663_v44, %v15268_v20  ;;  %v8678_v56 = vcombine.high %v8670_v45, %v8670_v45  ;;  %v8680_v62 = vcombine.high %v8216_v53, %v8216_v53  ;;  %v8687_v63 = vrot.slane %v8216_v53, %v15268_v20 }
  0x2b   :  { %v13368_v8 = vsel %vm13367_vm0, %v8670_v45, 0.0  ;;  %v4250_v26 = vcombine.low %v4242_v10, %v4249_v11  ;;  %v8697_v31 = vcombine.high %v8217_v18, %v8217_v18  ;;  %v8704_v32 = vrot.slane %v8217_v18, %v15268_v20 }
  0x2c   :  { %v8679_v61 = vcombine.high %v8677_v54, %v8677_v54  ;;  %v13369_v9 = vsel %vm13367_vm0, %v8678_v56, 0.0  ;;  %v13371_v13 = vsel %vm13367_vm0, %v8677_v54, 0.0  ;;  %v8694_v19 = vrot.slane %v8680_v62, %v15268_v20 }
  0x2d   :  { %v13370_v12 = vadd.f32 %v13369_v9, %v13368_v8  ;;  %v8695_v21 = vcombine.high %v8687_v63, %v8687_v63  ;;  %v13375_v25 = vsel %vm13367_vm0, %v8687_v63, 0.0  ;;  %v682_v35 = vrot.slane %v377_v55, %v15260_v14 }
  0x2e   :  { %v13373_v22 = vsel %vm13367_vm0, %v8679_v61, 0.0  ;;  %v8696_v30 = vcombine.high %v8694_v19, %v8694_v19  ;;  %v686_v36 = vrot.slane %v377_v55, %v15262_v15  ;;  %v690_v37 = vrot.slane %v377_v55, %v15264_v16 }
  0x2f   :  { %v13372_v23 = vadd.f32 %v13371_v13, %v13370_v12  ;;  %v13377_v33 = vsel %vm13367_vm0, %v8695_v21, 0.0  ;;  %v13379_v38 = vsel %vm13367_vm0, %v8694_v19, 0.0  ;;  %v694_v40 = vrot.slane %v377_v55, %v15266_v17 }
  0x30   :  { %v4259_v41 = vrot.slane %v4251_v27, %v15268_v20  ;;  %v4266_v42 = vrot.slane %v4252_v28, %v15268_v20  ;;  %v8218_v44 = vmul.f32 %v4250_v26, %v154_v24  ;;  %v8711_v45 = vrot.slane %v8697_v31, %v15268_v20 }
  0x31   :  { %v13374_v29 = vadd.f32 %v13373_v22, %v13372_v23  ;;  %v8712_v46 = vcombine.high %v8704_v32, %v8704_v32  ;;  %v13381_v47 = vsel %vm13367_vm0, %v8696_v30, 0.0  ;;  %v155_v49 = vunpack.c.l.bf16 %v41_v39 }
  0x32   :  { %v13383_v50 = vsel %vm13367_vm0, %v8704_v32, 0.0  ;;  %v4267_v52 = vcombine.low %v4259_v41, %v4266_v42  ;;  %v4268_v53 = vcombine.low %v682_v35, %v686_v36  ;;  %v4269_v54 = vcombine.low %v690_v37, %v694_v40 }
  0x33   :  { %v13376_v34 = vadd.f32 %v13375_v25, %v13374_v29  ;;  %v8713_v56 = vcombine.high %v8711_v45, %v8711_v45  ;;  %v8714_v57 = vcombine.high %v8218_v44, %v8218_v44  ;;  %v8721_v58 = vrot.slane %v8218_v44, %v15268_v20 }
  0x34   :  { %v13385_v59 = vsel %vm13367_vm0, %v8712_v46, 0.0  ;;  %v698_v61 = vrot.slane %v378_v51, %v15248_v2  ;;  %v702_v62 = vrot.slane %v378_v51, %v15250_v4  ;;  %v706_v63 = vrot.slane %v378_v51, %v15252_v5  ;;  %v379_v46 = vld [vmem:[#allocation5 + $0x20] sm:$0xff] }
  0x35   :  { %v13378_v43 = vadd.f32 %v13377_v33, %v13376_v34  ;;  %v13387_v0 = vsel %vm13367_vm0, %v8711_v45, 0.0  ;;  %v710_v1 = vrot.slane %v378_v51, %v15254_v6  ;;  %v4276_v3 = vrot.slane %v4268_v53, %v15268_v20  ;;  %v42_v34 = vld [vmem:[#allocation3 + $0x18] sm:$0xff] }
  0x36   :  { %v4283_v7 = vrot.slane %v4269_v54, %v15268_v20  ;;  %v8219_v9 = vmul.f32 %v4267_v52, %v155_v49  ;;  %v8728_v10 = vrot.slane %v8714_v57, %v15268_v20  ;;  %v8729_v11 = vcombine.high %v8721_v58, %v8721_v58 }
  0x37   :  { %v13380_v48 = vadd.f32 %v13379_v38, %v13378_v43  ;;  %v13389_v12 = vsel %vm13367_vm0, %v8713_v56, 0.0  ;;  %v156_v18 = vunpack.c.h.bf16 %v41_v39  ;;  %v13391_v19 = vsel %vm13367_vm0, %v8721_v58, 0.0 }
  0x38   :  { %v4284_v21 = vcombine.low %v4276_v3, %v4283_v7  ;;  %v4285_v22 = vcombine.low %v698_v61, %v702_v62  ;;  %v4286_v23 = vcombine.low %v706_v63, %v710_v1  ;;  %v8730_v25 = vcombine.high %v8728_v10, %v8728_v10 }
  0x39   :  { %v13382_v55 = vadd.f32 %v13381_v47, %v13380_v48  ;;  %v8731_v26 = vcombine.high %v8219_v9, %v8219_v9  ;;  %v8738_v27 = vrot.slane %v8219_v9, %v15268_v20  ;;  %v13393_v28 = vsel %vm13367_vm0, %v8729_v11, 0.0 }
  0x3a   :  { %v714_v30 = vrot.slane %v378_v51, %v15260_v14  ;;  %v718_v31 = vrot.slane %v378_v51, %v15262_v15  ;;  %v722_v32 = vrot.slane %v378_v51, %v15264_v16  ;;  %v13395_v33 = vsel %vm13367_vm0, %v8728_v10, 0.0 }
  0x3b   :  { %v13384_v60 = vadd.f32 %v13383_v50, %v13382_v55  ;;  %v726_v35 = vrot.slane %v378_v51, %v15266_v17  ;;  %v4293_v36 = vrot.slane %v4285_v22, %v15268_v20  ;;  %v4300_v37 = vrot.slane %v4286_v23, %v15268_v20 }
  0x3c   :  { %v8220_v39 = vmul.f32 %v4284_v21, %v156_v18  ;;  %v8745_v40 = vrot.slane %v8731_v26, %v15268_v20  ;;  %v8746_v41 = vcombine.high %v8738_v27, %v8738_v27  ;;  %v13397_v42 = vsel %vm13367_vm0, %v8730_v25, 0.0 }
  0x3d   :  { %v13386_v8 = vadd.f32 %v13385_v59, %v13384_v60  ;;  %v157_v44 = vunpack.c.l.bf16 %v42_v34  ;;  %v13399_v45 = vsel %vm13367_vm0, %v8738_v27, 0.0  ;;  %v4301_v47 = vcombine.low %v4293_v36, %v4300_v37 }
  0x3e   :  { %v4302_v48 = vcombine.low %v714_v30, %v718_v31  ;;  %v4303_v49 = vcombine.low %v722_v32, %v726_v35  ;;  %v8747_v51 = vcombine.high %v8745_v40, %v8745_v40  ;;  %v8748_v52 = vcombine.high %v8220_v39, %v8220_v39 }
  0x3f   :  { %v13388_v13 = vadd.f32 %v13387_v0, %v13386_v8  ;;  %v8755_v53 = vrot.slane %v8220_v39, %v15268_v20  ;;  %v13401_v54 = vsel %vm13367_vm0, %v8746_v41, 0.0  ;;  %v730_v56 = vrot.slane %v379_v46, %v15248_v2  ;;  %v380_v41 = vld [vmem:[#allocation5 + $0x28] sm:$0xff] }
  0x40   :  { %v734_v57 = vrot.slane %v379_v46, %v15250_v4  ;;  %v738_v58 = vrot.slane %v379_v46, %v15252_v5  ;;  %v13403_v59 = vsel %vm13367_vm0, %v8745_v40, 0.0  ;;  %v742_v60 = vrot.slane %v379_v46, %v15254_v6 }
  0x41   :  { %v13390_v24 = vadd.f32 %v13389_v12, %v13388_v13  ;;  %v4310_v61 = vrot.slane %v4302_v48, %v15268_v20  ;;  %v4317_v62 = vrot.slane %v4303_v49, %v15268_v20  ;;  %v8221_v0 = vmul.f32 %v4301_v47, %v157_v44 }
  0x42   :  { %v8762_v1 = vrot.slane %v8748_v52, %v15268_v20  ;;  %v8763_v3 = vcombine.high %v8755_v53, %v8755_v53  ;;  %v13405_v7 = vsel %vm13367_vm0, %v8747_v51, 0.0  ;;  %v158_v9 = vunpack.c.h.bf16 %v42_v34 }
  0x43   :  { %v13392_v29 = vadd.f32 %v13391_v19, %v13390_v24  ;;  %v13407_v10 = vsel %vm13367_vm0, %v8755_v53, 0.0  ;;  %v4318_v11 = vcombine.low %v4310_v61, %v4317_v62  ;;  %v4319_v12 = vcombine.low %v730_v56, %v734_v57 }
  0x44   :  { %v4320_v13 = vcombine.low %v738_v58, %v742_v60  ;;  %v8764_v19 = vcombine.high %v8762_v1, %v8762_v1  ;;  %v8765_v21 = vcombine.high %v8221_v0, %v8221_v0  ;;  %v8772_v22 = vrot.slane %v8221_v0, %v15268_v20 }
  0x45   :  { %v13394_v38 = vadd.f32 %v13393_v28, %v13392_v29  ;;  %v13409_v23 = vsel %vm13367_vm0, %v8763_v3, 0.0  ;;  %v746_v25 = vrot.slane %v379_v46, %v15260_v14  ;;  %v750_v26 = vrot.slane %v379_v46, %v15262_v15  ;;  %v43_v29 = vld [vmem:[#allocation3 + $0x20] sm:$0xff] }
  0x46   :  { %v754_v27 = vrot.slane %v379_v46, %v15264_v16  ;;  %v13411_v28 = vsel %vm13367_vm0, %v8762_v1, 0.0  ;;  %v758_v30 = vrot.slane %v379_v46, %v15266_v17  ;;  %v4327_v31 = vrot.slane %v4319_v12, %v15268_v20 }
  0x47   :  { %v13396_v43 = vadd.f32 %v13395_v33, %v13394_v38  ;;  %v4334_v32 = vrot.slane %v4320_v13, %v15268_v20  ;;  %v8222_v34 = vmul.f32 %v4318_v11, %v158_v9  ;;  %v8779_v35 = vrot.slane %v8765_v21, %v15268_v20 }
  0x48   :  { %v8780_v36 = vcombine.high %v8772_v22, %v8772_v22  ;;  %v13413_v37 = vsel %vm13367_vm0, %v8764_v19, 0.0  ;;  %v159_v39 = vunpack.c.l.bf16 %v43_v29  ;;  %v13415_v40 = vsel %vm13367_vm0, %v8772_v22, 0.0 }
  0x49   :  { %v13398_v50 = vadd.f32 %v13397_v42, %v13396_v43  ;;  %v4335_v42 = vcombine.low %v4327_v31, %v4334_v32  ;;  %v4336_v43 = vcombine.low %v746_v25, %v750_v26  ;;  %v4337_v44 = vcombine.low %v754_v27, %v758_v30 }
  0x4a   :  { %v8781_v46 = vcombine.high %v8779_v35, %v8779_v35  ;;  %v8782_v47 = vcombine.high %v8222_v34, %v8222_v34  ;;  %v8789_v48 = vrot.slane %v8222_v34, %v15268_v20  ;;  %v13417_v49 = vsel %vm13367_vm0, %v8780_v36, 0.0  ;;  %v381_v36 = vld [vmem:[#allocation5 + $0x30] sm:$0xff] }
  0x4b   :  { %v13400_v55 = vadd.f32 %v13399_v45, %v13398_v50  ;;  %v762_v51 = vrot.slane %v380_v41, %v15248_v2  ;;  %v766_v52 = vrot.slane %v380_v41, %v15250_v4  ;;  %v770_v53 = vrot.slane %v380_v41, %v15252_v5 }
  0x4c   :  { %v4344_v56 = vrot.slane %v4336_v43, %v15268_v20  ;;  %v4351_v57 = vrot.slane %v4337_v44, %v15268_v20  ;;  %v8796_v60 = vrot.slane %v8782_v47, %v15268_v20  ;;  %v8797_v61 = vcombine.high %v8789_v48, %v8789_v48 }
  0x4d   :  { %v13402_v63 = vadd.f32 %v13401_v54, %v13400_v55  ;;  %v13419_v54 = vsel %vm13367_vm0, %v8779_v35, 0.0  ;;  %v774_v55 = vrot.slane %v380_v41, %v15254_v6  ;;  %v13421_v62 = vsel %vm13367_vm0, %v8781_v46, 0.0 }
  0x4e   :  { %v160_v0 = vunpack.c.h.bf16 %v43_v29  ;;  %v13423_v1 = vsel %vm13367_vm0, %v8789_v48, 0.0  ;;  %v4352_v3 = vcombine.low %v4344_v56, %v4351_v57  ;;  %v13425_v13 = vsel %vm13367_vm0, %v8797_v61, 0.0 }
  0x4f   :  { %v13404_v8 = vadd.f32 %v13403_v59, %v13402_v63  ;;  %v8223_v59 = vmul.f32 %v4335_v42, %v159_v39  ;;  %v778_v19 = vrot.slane %v380_v41, %v15260_v14  ;;  %v782_v21 = vrot.slane %v380_v41, %v15262_v15 }
  0x50   :  { %v786_v22 = vrot.slane %v380_v41, %v15264_v16  ;;  %v790_v25 = vrot.slane %v380_v41, %v15266_v17  ;;  %v8224_v29 = vmul.f32 %v4352_v3, %v160_v0  ;;  %v794_v46 = vrot.slane %v381_v36, %v15248_v2 }
  0x51   :  { %v13406_v18 = vadd.f32 %v13405_v7, %v13404_v8  ;;  %v4353_v7 = vcombine.low %v762_v51, %v766_v52  ;;  %v4354_v8 = vcombine.low %v770_v53, %v774_v55  ;;  %v8799_v11 = vcombine.high %v8223_v59, %v8223_v59 }
  0x52   :  { %v8806_v12 = vrot.slane %v8223_v59, %v15268_v20  ;;  %v4371_v39 = vcombine.low %v786_v22, %v790_v25  ;;  %v8816_v42 = vcombine.high %v8224_v29, %v8224_v29  ;;  %v8823_v43 = vrot.slane %v8224_v29, %v15268_v20 }
  0x53   :  { %v13408_v24 = vadd.f32 %v13407_v10, %v13406_v18  ;;  %v8798_v10 = vcombine.high %v8796_v60, %v8796_v60  ;;  %v4361_v26 = vrot.slane %v4353_v7, %v15268_v20  ;;  %v4368_v27 = vrot.slane %v4354_v8, %v15268_v20 }
  0x54   :  { %v8813_v30 = vrot.slane %v8799_v11, %v15268_v20  ;;  %v8814_v31 = vcombine.high %v8806_v12, %v8806_v12  ;;  %v13431_v35 = vsel %vm13367_vm0, %v8806_v12, 0.0  ;;  %v798_v47 = vrot.slane %v381_v36, %v15250_v4 }
  0x55   :  { %v13410_v33 = vadd.f32 %v13409_v23, %v13408_v24  ;;  %v13427_v23 = vsel %vm13367_vm0, %v8796_v60, 0.0  ;;  %v44_v24 = vld [vmem:[#allocation3 + $0x28] sm:$0xff]  ;;  %v13429_v32 = vsel %vm13367_vm0, %v8798_v10, 0.0  ;;  %v802_v48 = vrot.slane %v381_v36, %v15252_v5 }
  0x56   :  { %v161_v34 = vunpack.c.l.bf16 %v44_v24  ;;  %v8815_v41 = vcombine.high %v8813_v30, %v8813_v30  ;;  %v13433_v44 = vsel %vm13367_vm0, %v8814_v31, 0.0  ;;  %v4385_v52 = vrot.slane %v4371_v39, %v15268_v20  ;;  %v382_v31 = vld [vmem:[#allocation5 + $0x38] sm:$0xff] }
  0x57   :  { %v13412_v38 = vadd.f32 %v13411_v28, %v13410_v33  ;;  %v8830_v55 = vrot.slane %v8816_v42, %v15268_v20  ;;  %v8831_v56 = vcombine.high %v8823_v43, %v8823_v43  ;;  %v162_v59 = vunpack.c.h.bf16 %v44_v24 }
  0x58   :  { %v13437_v57 = vsel %vm13367_vm0, %v8815_v41, 0.0  ;;  %v13439_v60 = vsel %vm13367_vm0, %v8823_v43, 0.0  ;;  %v810_v10 = vrot.slane %v381_v36, %v15260_v14  ;;  %v814_v11 = vrot.slane %v381_v36, %v15262_v15 }
  0x59   :  { %v13414_v45 = vadd.f32 %v13413_v37, %v13412_v38  ;;  %v4369_v37 = vcombine.low %v4361_v26, %v4368_v27  ;;  %v4370_v38 = vcombine.low %v778_v19, %v782_v21  ;;  %v13441_v8 = vsel %vm13367_vm0, %v8831_v56, 0.0 }
  0x5a   :  { %v818_v12 = vrot.slane %v381_v36, %v15264_v16  ;;  %v822_v19 = vrot.slane %v381_v36, %v15266_v17  ;;  %v826_v41 = vrot.slane %v382_v31, %v15248_v2  ;;  %v830_v42 = vrot.slane %v382_v31, %v15250_v4 }
  0x5b   :  { %v13416_v50 = vadd.f32 %v13415_v40, %v13414_v45  ;;  %v4378_v51 = vrot.slane %v4370_v38, %v15268_v20  ;;  %v834_v43 = vrot.slane %v382_v31, %v15252_v5 }
  0x5d   :  { %v13418_v58 = vadd.f32 %v13417_v49, %v13416_v50  ;;  %v13435_v49 = vsel %vm13367_vm0, %v8813_v30, 0.0  ;;  %v806_v50 = vrot.slane %v381_v36, %v15254_v6  ;;  %v4386_v61 = vcombine.low %v4378_v51, %v4385_v52 }
  0x5f   :  { %v13420_v63 = vadd.f32 %v13419_v54, %v13418_v58  ;;  %v8225_v54 = vmul.f32 %v4369_v37, %v161_v34  ;;  %v8226_v24 = vmul.f32 %v4386_v61, %v162_v59  ;;  %v4405_v34 = vcombine.low %v818_v12, %v822_v19 }
  0x61   :  { %v13422_v9 = vadd.f32 %v13421_v62, %v13420_v63  ;;  %v4387_v62 = vcombine.low %v794_v46, %v798_v47  ;;  %v4388_v63 = vcombine.low %v802_v48, %v806_v50  ;;  %v8833_v3 = vcombine.high %v8225_v54, %v8225_v54 }
  0x62   :  { %v8840_v7 = vrot.slane %v8225_v54, %v15268_v20  ;;  %v8850_v37 = vcombine.high %v8226_v24, %v8226_v24  ;;  %v8857_v38 = vrot.slane %v8226_v24, %v15268_v20  ;;  %v4419_v47 = vrot.slane %v4405_v34, %v15268_v20 }
  0x63   :  { %v13424_v18 = vadd.f32 %v13423_v1, %v13422_v9  ;;  %v8832_v1 = vcombine.high %v8830_v55, %v8830_v55  ;;  %v4395_v21 = vrot.slane %v4387_v62, %v15268_v20  ;;  %v4402_v22 = vrot.slane %v4388_v63, %v15268_v20 }
  0x64   :  { %v8847_v25 = vrot.slane %v8833_v3, %v15268_v20  ;;  %v8848_v26 = vcombine.high %v8840_v7, %v8840_v7  ;;  %v13447_v30 = vsel %vm13367_vm0, %v8840_v7, 0.0  ;;  %v8864_v50 = vrot.slane %v8850_v37, %v15268_v20 }
  0x65   :  { %v13426_v28 = vadd.f32 %v13425_v13, %v13424_v18  ;;  %v13443_v13 = vsel %vm13367_vm0, %v8830_v55, 0.0  ;;  %v45_v18 = vld [vmem:[#allocation3 + $0x30] sm:$0xff]  ;;  %v13445_v27 = vsel %vm13367_vm0, %v8832_v1, 0.0  ;;  %v8865_v51 = vcombine.high %v8857_v38, %v8857_v38 }
  0x66   :  { %v163_v29 = vunpack.c.l.bf16 %v45_v18  ;;  %v8849_v36 = vcombine.high %v8847_v25, %v8847_v25  ;;  %v13449_v39 = vsel %vm13367_vm0, %v8848_v26, 0.0  ;;  %v164_v54 = vunpack.c.h.bf16 %v45_v18  ;;  %v383_v26 = vld [vmem:[#allocation5 + $0x40] sm:$0xff] }
  0x67   :  { %v13428_v33 = vadd.f32 %v13427_v23, %v13426_v28  ;;  %v13455_v55 = vsel %vm13367_vm0, %v8857_v38, 0.0  ;;  %v13457_v63 = vsel %vm13367_vm0, %v8865_v51, 0.0  ;;  %v842_v1 = vrot.slane %v382_v31, %v15260_v14 }
  0x68   :  { %v13453_v52 = vsel %vm13367_vm0, %v8849_v36, 0.0  ;;  %v846_v3 = vrot.slane %v382_v31, %v15262_v15  ;;  %v850_v7 = vrot.slane %v382_v31, %v15264_v16  ;;  %v858_v36 = vrot.slane %v383_v26, %v15248_v2 }
  0x69   :  { %v13430_v40 = vadd.f32 %v13429_v32, %v13428_v33  ;;  %v4403_v32 = vcombine.low %v4395_v21, %v4402_v22  ;;  %v4404_v33 = vcombine.low %v810_v10, %v814_v11  ;;  %v854_v10 = vrot.slane %v382_v31, %v15266_v17 }
  0x6a   :  { %v862_v37 = vrot.slane %v383_v26, %v15250_v4  ;;  %v866_v38 = vrot.slane %v383_v26, %v15252_v5 }
  0x6b   :  { %v13432_v45 = vadd.f32 %v13431_v35, %v13430_v40  ;;  %v4412_v46 = vrot.slane %v4404_v33, %v15268_v20 }
  0x6d   :  { %v13434_v53 = vadd.f32 %v13433_v44, %v13432_v45  ;;  %v13451_v44 = vsel %vm13367_vm0, %v8847_v25, 0.0  ;;  %v838_v45 = vrot.slane %v382_v31, %v15254_v6  ;;  %v4420_v56 = vcombine.low %v4412_v46, %v4419_v47 }
  0x6f   :  { %v13436_v58 = vadd.f32 %v13435_v49, %v13434_v53  ;;  %v8227_v49 = vmul.f32 %v4403_v32, %v163_v29  ;;  %v8228_v18 = vmul.f32 %v4420_v56, %v164_v54  ;;  %v4439_v29 = vcombine.low %v850_v7, %v854_v10 }
  0x71   :  { %v13438_v0 = vadd.f32 %v13437_v57, %v13436_v58  ;;  %v4421_v57 = vcombine.low %v826_v41, %v830_v42  ;;  %v4422_v58 = vcombine.low %v834_v43, %v838_v45  ;;  %v8867_v61 = vcombine.high %v8227_v49, %v8227_v49 }
  0x72   :  { %v8874_v62 = vrot.slane %v8227_v49, %v15268_v20  ;;  %v8884_v32 = vcombine.high %v8228_v18, %v8228_v18  ;;  %v8891_v33 = vrot.slane %v8228_v18, %v15268_v20  ;;  %v4453_v42 = vrot.slane %v4439_v29, %v15268_v20 }
  0x73   :  { %v13440_v9 = vadd.f32 %v13439_v60, %v13438_v0  ;;  %v8866_v60 = vcombine.high %v8864_v50, %v8864_v50  ;;  %v4429_v11 = vrot.slane %v4421_v57, %v15268_v20  ;;  %v4436_v12 = vrot.slane %v4422_v58, %v15268_v20 }
  0x74   :  { %v8881_v19 = vrot.slane %v8867_v61, %v15268_v20  ;;  %v8882_v21 = vcombine.high %v8874_v62, %v8874_v62  ;;  %v13463_v25 = vsel %vm13367_vm0, %v8874_v62, 0.0  ;;  %v8898_v45 = vrot.slane %v8884_v32, %v15268_v20 }
  0x75   :  { %v13442_v23 = vadd.f32 %v13441_v8, %v13440_v9  ;;  %v13459_v8 = vsel %vm13367_vm0, %v8864_v50, 0.0  ;;  %v46_v9 = vld [vmem:[#allocation3 + $0x38] sm:$0xff]  ;;  %v13461_v22 = vsel %vm13367_vm0, %v8866_v60, 0.0  ;;  %v8899_v46 = vcombine.high %v8891_v33, %v8891_v33 }
  0x76   :  { %v165_v24 = vunpack.c.l.bf16 %v46_v9  ;;  %v8883_v31 = vcombine.high %v8881_v19, %v8881_v19  ;;  %v13465_v34 = vsel %vm13367_vm0, %v8882_v21, 0.0  ;;  %v166_v49 = vunpack.c.h.bf16 %v46_v9  ;;  %v384_v21 = vld [vmem:[#allocation5 + $0x48] sm:$0xff] }
  0x77   :  { %v13444_v28 = vadd.f32 %v13443_v13, %v13442_v23  ;;  %v13471_v50 = vsel %vm13367_vm0, %v8891_v33, 0.0  ;;  %v13473_v58 = vsel %vm13367_vm0, %v8899_v46, 0.0  ;;  %v874_v60 = vrot.slane %v383_v26, %v15260_v14 }
  0x78   :  { %v13469_v47 = vsel %vm13367_vm0, %v8883_v31, 0.0  ;;  %v878_v61 = vrot.slane %v383_v26, %v15262_v15  ;;  %v882_v62 = vrot.slane %v383_v26, %v15264_v16  ;;  %v890_v31 = vrot.slane %v384_v21, %v15248_v2 }
  0x79   :  { %v13446_v35 = vadd.f32 %v13445_v27, %v13444_v28  ;;  %v4437_v27 = vcombine.low %v4429_v11, %v4436_v12  ;;  %v4438_v28 = vcombine.low %v842_v1, %v846_v3  ;;  %v886_v1 = vrot.slane %v383_v26, %v15266_v17 }
  0x7a   :  { %v894_v32 = vrot.slane %v384_v21, %v15250_v4  ;;  %v898_v33 = vrot.slane %v384_v21, %v15252_v5 }
  0x7b   :  { %v13448_v40 = vadd.f32 %v13447_v30, %v13446_v35  ;;  %v4446_v41 = vrot.slane %v4438_v28, %v15268_v20 }
  0x7d   :  { %v13450_v48 = vadd.f32 %v13449_v39, %v13448_v40  ;;  %v13467_v39 = vsel %vm13367_vm0, %v8881_v19, 0.0  ;;  %v870_v40 = vrot.slane %v383_v26, %v15254_v6  ;;  %v4454_v51 = vcombine.low %v4446_v41, %v4453_v42 }
  0x7f   :  { %v13452_v53 = vadd.f32 %v13451_v44, %v13450_v48  ;;  %v8229_v44 = vmul.f32 %v4437_v27, %v165_v24  ;;  %v8230_v9 = vmul.f32 %v4454_v51, %v166_v49  ;;  %v4473_v24 = vcombine.low %v882_v62, %v886_v1 }
  0x81   :  { %v13454_v59 = vadd.f32 %v13453_v52, %v13452_v53  ;;  %v4455_v52 = vcombine.low %v858_v36, %v862_v37  ;;  %v4456_v53 = vcombine.low %v866_v38, %v870_v40  ;;  %v8901_v56 = vcombine.high %v8229_v44, %v8229_v44 }
  0x82   :  { %v8908_v57 = vrot.slane %v8229_v44, %v15268_v20  ;;  %v8918_v27 = vcombine.high %v8230_v9, %v8230_v9  ;;  %v8925_v28 = vrot.slane %v8230_v9, %v15268_v20  ;;  %v4487_v37 = vrot.slane %v4473_v24, %v15268_v20 }
  0x83   :  { %v13456_v0 = vadd.f32 %v13455_v55, %v13454_v59  ;;  %v8900_v55 = vcombine.high %v8898_v45, %v8898_v45  ;;  %v4463_v3 = vrot.slane %v4455_v52, %v15268_v20  ;;  %v4470_v7 = vrot.slane %v4456_v53, %v15268_v20 }
  0x84   :  { %v8915_v10 = vrot.slane %v8901_v56, %v15268_v20  ;;  %v8916_v11 = vcombine.high %v8908_v57, %v8908_v57  ;;  %v13479_v19 = vsel %vm13367_vm0, %v8908_v57, 0.0  ;;  %v8932_v40 = vrot.slane %v8918_v27, %v15268_v20 }
  0x85   :  { %v13458_v13 = vadd.f32 %v13457_v63, %v13456_v0  ;;  %v13475_v63 = vsel %vm13367_vm0, %v8898_v45, 0.0  ;;  %v47_v0 = vld [vmem:[#allocation3 + $0x40] sm:$0xff]  ;;  %v13477_v12 = vsel %vm13367_vm0, %v8900_v55, 0.0  ;;  %v8933_v41 = vcombine.high %v8925_v28, %v8925_v28 }
  0x86   :  { %v167_v18 = vunpack.c.l.bf16 %v47_v0  ;;  %v8917_v26 = vcombine.high %v8915_v10, %v8915_v10  ;;  %v13481_v29 = vsel %vm13367_vm0, %v8916_v11, 0.0  ;;  %v168_v44 = vunpack.c.h.bf16 %v47_v0  ;;  %v385_v11 = vld [vmem:[#allocation5 + $0x50] sm:$0xff] }
  0x87   :  { %v13460_v23 = vadd.f32 %v13459_v8, %v13458_v13  ;;  %v13487_v45 = vsel %vm13367_vm0, %v8925_v28, 0.0  ;;  %v13489_v53 = vsel %vm13367_vm0, %v8933_v41, 0.0  ;;  %v906_v55 = vrot.slane %v384_v21, %v15260_v14 }
  0x88   :  { %v13485_v42 = vsel %vm13367_vm0, %v8917_v26, 0.0  ;;  %v910_v56 = vrot.slane %v384_v21, %v15262_v15  ;;  %v914_v57 = vrot.slane %v384_v21, %v15264_v16  ;;  %v922_v26 = vrot.slane %v385_v11, %v15248_v2 }
  0x89   :  { %v13462_v30 = vadd.f32 %v13461_v22, %v13460_v23  ;;  %v4471_v22 = vcombine.low %v4463_v3, %v4470_v7  ;;  %v4472_v23 = vcombine.low %v874_v60, %v878_v61  ;;  %v918_v60 = vrot.slane %v384_v21, %v15266_v17 }
  0x8a   :  { %v926_v27 = vrot.slane %v385_v11, %v15250_v4  ;;  %v930_v28 = vrot.slane %v385_v11, %v15252_v5 }
  0x8b   :  { %v13464_v35 = vadd.f32 %v13463_v25, %v13462_v30  ;;  %v4480_v36 = vrot.slane %v4472_v23, %v15268_v20 }
  0x8d   :  { %v13466_v43 = vadd.f32 %v13465_v34, %v13464_v35  ;;  %v13483_v34 = vsel %vm13367_vm0, %v8915_v10, 0.0  ;;  %v902_v35 = vrot.slane %v384_v21, %v15254_v6  ;;  %v4488_v46 = vcombine.low %v4480_v36, %v4487_v37 }
  0x8f   :  { %v13468_v48 = vadd.f32 %v13467_v39, %v13466_v43  ;;  %v8231_v39 = vmul.f32 %v4471_v22, %v167_v18  ;;  %v8232_v0 = vmul.f32 %v4488_v46, %v168_v44  ;;  %v4507_v18 = vcombine.low %v914_v57, %v918_v60 }
  0x91   :  { %v13470_v54 = vadd.f32 %v13469_v47, %v13468_v48  ;;  %v4489_v47 = vcombine.low %v890_v31, %v894_v32  ;;  %v4490_v48 = vcombine.low %v898_v33, %v902_v35  ;;  %v8935_v51 = vcombine.high %v8231_v39, %v8231_v39 }
  0x92   :  { %v8942_v52 = vrot.slane %v8231_v39, %v15268_v20  ;;  %v8952_v22 = vcombine.high %v8232_v0, %v8232_v0  ;;  %v8959_v23 = vrot.slane %v8232_v0, %v15268_v20  ;;  %v4521_v32 = vrot.slane %v4507_v18, %v15268_v20 }
  0x93   :  { %v13472_v59 = vadd.f32 %v13471_v50, %v13470_v54  ;;  %v8934_v50 = vcombine.high %v8932_v40, %v8932_v40  ;;  %v4497_v61 = vrot.slane %v4489_v47, %v15268_v20  ;;  %v4504_v62 = vrot.slane %v4490_v48, %v15268_v20 }
  0x94   :  { %v8949_v1 = vrot.slane %v8935_v51, %v15268_v20  ;;  %v8950_v3 = vcombine.high %v8942_v52, %v8942_v52  ;;  %v13495_v10 = vsel %vm13367_vm0, %v8942_v52, 0.0  ;;  %v8966_v35 = vrot.slane %v8952_v22, %v15268_v20 }
  0x95   :  { %v13474_v8 = vadd.f32 %v13473_v58, %v13472_v59  ;;  %v13491_v58 = vsel %vm13367_vm0, %v8932_v40, 0.0  ;;  %v48_v59 = vld [vmem:[#allocation3 + $0x48] sm:$0xff]  ;;  %v13493_v7 = vsel %vm13367_vm0, %v8934_v50, 0.0  ;;  %v8967_v36 = vcombine.high %v8959_v23, %v8959_v23 }
  0x96   :  { %v169_v9 = vunpack.c.l.bf16 %v48_v59  ;;  %v8951_v21 = vcombine.high %v8949_v1, %v8949_v1  ;;  %v13497_v24 = vsel %vm13367_vm0, %v8950_v3, 0.0  ;;  %v170_v39 = vunpack.c.h.bf16 %v48_v59  ;;  %v386_v3 = vld [vmem:[#allocation5 + $0x58] sm:$0xff] }
  0x97   :  { %v13476_v13 = vadd.f32 %v13475_v63, %v13474_v8  ;;  %v13503_v40 = vsel %vm13367_vm0, %v8959_v23, 0.0  ;;  %v13505_v48 = vsel %vm13367_vm0, %v8967_v36, 0.0  ;;  %v938_v50 = vrot.slane %v385_v11, %v15260_v14 }
  0x98   :  { %v13501_v37 = vsel %vm13367_vm0, %v8951_v21, 0.0  ;;  %v942_v51 = vrot.slane %v385_v11, %v15262_v15  ;;  %v946_v52 = vrot.slane %v385_v11, %v15264_v16  ;;  %v954_v21 = vrot.slane %v386_v3, %v15248_v2 }
  0x99   :  { %v13478_v25 = vadd.f32 %v13477_v12, %v13476_v13  ;;  %v4505_v12 = vcombine.low %v4497_v61, %v4504_v62  ;;  %v4506_v13 = vcombine.low %v906_v55, %v910_v56  ;;  %v950_v55 = vrot.slane %v385_v11, %v15266_v17 }
  0x9a   :  { %v958_v22 = vrot.slane %v386_v3, %v15250_v4  ;;  %v962_v23 = vrot.slane %v386_v3, %v15252_v5 }
  0x9b   :  { %v13480_v30 = vadd.f32 %v13479_v19, %v13478_v25  ;;  %v4514_v31 = vrot.slane %v4506_v13, %v15268_v20 }
  0x9d   :  { %v13482_v38 = vadd.f32 %v13481_v29, %v13480_v30  ;;  %v13499_v29 = vsel %vm13367_vm0, %v8949_v1, 0.0  ;;  %v934_v30 = vrot.slane %v385_v11, %v15254_v6  ;;  %v4522_v41 = vcombine.low %v4514_v31, %v4521_v32 }
  0x9f   :  { %v13484_v43 = vadd.f32 %v13483_v34, %v13482_v38  ;;  %v8233_v34 = vmul.f32 %v4505_v12, %v169_v9  ;;  %v8234_v59 = vmul.f32 %v4522_v41, %v170_v39  ;;  %v4541_v9 = vcombine.low %v946_v52, %v950_v55 }
  0xa1   :  { %v13486_v49 = vadd.f32 %v13485_v42, %v13484_v43  ;;  %v4523_v42 = vcombine.low %v922_v26, %v926_v27  ;;  %v4524_v43 = vcombine.low %v930_v28, %v934_v30  ;;  %v8969_v46 = vcombine.high %v8233_v34, %v8233_v34 }
  0xa2   :  { %v8976_v47 = vrot.slane %v8233_v34, %v15268_v20  ;;  %v8986_v12 = vcombine.high %v8234_v59, %v8234_v59  ;;  %v8993_v13 = vrot.slane %v8234_v59, %v15268_v20  ;;  %v4555_v27 = vrot.slane %v4541_v9, %v15268_v20 }
  0xa3   :  { %v13488_v54 = vadd.f32 %v13487_v45, %v13486_v49  ;;  %v8968_v45 = vcombine.high %v8966_v35, %v8966_v35  ;;  %v4531_v56 = vrot.slane %v4523_v42, %v15268_v20  ;;  %v4538_v57 = vrot.slane %v4524_v43, %v15268_v20 }
  0xa4   :  { %v8983_v60 = vrot.slane %v8969_v46, %v15268_v20  ;;  %v8984_v61 = vcombine.high %v8976_v47, %v8976_v47  ;;  %v13511_v1 = vsel %vm13367_vm0, %v8976_v47, 0.0  ;;  %v9000_v30 = vrot.slane %v8986_v12, %v15268_v20 }
  0xa5   :  { %v13490_v63 = vadd.f32 %v13489_v53, %v13488_v54  ;;  %v13507_v53 = vsel %vm13367_vm0, %v8966_v35, 0.0  ;;  %v49_v54 = vld [vmem:[#allocation3 + $0x50] sm:$0xff]  ;;  %v13509_v62 = vsel %vm13367_vm0, %v8968_v45, 0.0  ;;  %v9001_v31 = vcombine.high %v8993_v13, %v8993_v13 }
  0xa6   :  { %v171_v0 = vunpack.c.l.bf16 %v49_v54  ;;  %v8985_v11 = vcombine.high %v8983_v60, %v8983_v60  ;;  %v13513_v18 = vsel %vm13367_vm0, %v8984_v61, 0.0  ;;  %v172_v34 = vunpack.c.h.bf16 %v49_v54  ;;  %v387_v61 = vld [vmem:[#allocation5 + $0x60] sm:$0xff] }
  0xa7   :  { %v13492_v8 = vadd.f32 %v13491_v58, %v13490_v63  ;;  %v13519_v35 = vsel %vm13367_vm0, %v8993_v13, 0.0  ;;  %v13521_v43 = vsel %vm13367_vm0, %v9001_v31, 0.0  ;;  %v970_v45 = vrot.slane %v386_v3, %v15260_v14 }
  0xa8   :  { %v13517_v32 = vsel %vm13367_vm0, %v8985_v11, 0.0  ;;  %v974_v46 = vrot.slane %v386_v3, %v15262_v15  ;;  %v978_v47 = vrot.slane %v386_v3, %v15264_v16  ;;  %v986_v11 = vrot.slane %v387_v61, %v15248_v2 }
  0xa9   :  { %v13494_v19 = vadd.f32 %v13493_v7, %v13492_v8  ;;  %v4539_v7 = vcombine.low %v4531_v56, %v4538_v57  ;;  %v4540_v8 = vcombine.low %v938_v50, %v942_v51  ;;  %v982_v50 = vrot.slane %v386_v3, %v15266_v17 }
  0xaa   :  { %v990_v12 = vrot.slane %v387_v61, %v15250_v4  ;;  %v994_v13 = vrot.slane %v387_v61, %v15252_v5 }
  0xab   :  { %v13496_v25 = vadd.f32 %v13495_v10, %v13494_v19  ;;  %v4548_v26 = vrot.slane %v4540_v8, %v15268_v20 }
  0xad   :  { %v13498_v33 = vadd.f32 %v13497_v24, %v13496_v25  ;;  %v13515_v24 = vsel %vm13367_vm0, %v8983_v60, 0.0  ;;  %v966_v25 = vrot.slane %v386_v3, %v15254_v6  ;;  %v4556_v36 = vcombine.low %v4548_v26, %v4555_v27 }
  0xaf   :  { %v13500_v38 = vadd.f32 %v13499_v29, %v13498_v33  ;;  %v8235_v29 = vmul.f32 %v4539_v7, %v171_v0  ;;  %v8236_v54 = vmul.f32 %v4556_v36, %v172_v34  ;;  %v4575_v0 = vcombine.low %v978_v47, %v982_v50 }
  0xb1   :  { %v13502_v44 = vadd.f32 %v13501_v37, %v13500_v38  ;;  %v4557_v37 = vcombine.low %v954_v21, %v958_v22  ;;  %v4558_v38 = vcombine.low %v962_v23, %v966_v25  ;;  %v9003_v41 = vcombine.high %v8235_v29, %v8235_v29 }
  0xb2   :  { %v9010_v42 = vrot.slane %v8235_v29, %v15268_v20  ;;  %v9020_v7 = vcombine.high %v8236_v54, %v8236_v54  ;;  %v9027_v8 = vrot.slane %v8236_v54, %v15268_v20  ;;  %v4589_v22 = vrot.slane %v4575_v0, %v15268_v20 }
  0xb3   :  { %v13504_v49 = vadd.f32 %v13503_v40, %v13502_v44  ;;  %v9002_v40 = vcombine.high %v9000_v30, %v9000_v30  ;;  %v4565_v51 = vrot.slane %v4557_v37, %v15268_v20  ;;  %v4572_v52 = vrot.slane %v4558_v38, %v15268_v20 }
  0xb4   :  { %v9017_v55 = vrot.slane %v9003_v41, %v15268_v20  ;;  %v9018_v56 = vcombine.high %v9010_v42, %v9010_v42  ;;  %v13527_v60 = vsel %vm13367_vm0, %v9010_v42, 0.0  ;;  %v9034_v25 = vrot.slane %v9020_v7, %v15268_v20 }
  0xb5   :  { %v13506_v58 = vadd.f32 %v13505_v48, %v13504_v49  ;;  %v13523_v48 = vsel %vm13367_vm0, %v9000_v30, 0.0  ;;  %v50_v49 = vld [vmem:[#allocation3 + $0x58] sm:$0xff]  ;;  %v13525_v57 = vsel %vm13367_vm0, %v9002_v40, 0.0  ;;  %v9035_v26 = vcombine.high %v9027_v8, %v9027_v8 }
  0xb6   :  { %v173_v59 = vunpack.c.l.bf16 %v50_v49  ;;  %v9019_v3 = vcombine.high %v9017_v55, %v9017_v55  ;;  %v13529_v9 = vsel %vm13367_vm0, %v9018_v56, 0.0  ;;  %v174_v29 = vunpack.c.h.bf16 %v50_v49  ;;  %v388_v56 = vld [vmem:[#allocation5 + $0x68] sm:$0xff] }
  0xb7   :  { %v13508_v63 = vadd.f32 %v13507_v53, %v13506_v58  ;;  %v13535_v30 = vsel %vm13367_vm0, %v9027_v8, 0.0  ;;  %v13537_v38 = vsel %vm13367_vm0, %v9035_v26, 0.0  ;;  %v1002_v40 = vrot.slane %v387_v61, %v15260_v14 }
  0xb8   :  { %v13533_v27 = vsel %vm13367_vm0, %v9019_v3, 0.0  ;;  %v1006_v41 = vrot.slane %v387_v61, %v15262_v15  ;;  %v1010_v42 = vrot.slane %v387_v61, %v15264_v16  ;;  %v1018_v3 = vrot.slane %v388_v56, %v15248_v2 }
  0xb9   :  { %v13510_v10 = vadd.f32 %v13509_v62, %v13508_v63  ;;  %v4573_v62 = vcombine.low %v4565_v51, %v4572_v52  ;;  %v4574_v63 = vcombine.low %v970_v45, %v974_v46  ;;  %v1014_v45 = vrot.slane %v387_v61, %v15266_v17 }
  0xba   :  { %v1022_v7 = vrot.slane %v388_v56, %v15250_v4  ;;  %v1026_v8 = vrot.slane %v388_v56, %v15252_v5 }
  0xbb   :  { %v13512_v19 = vadd.f32 %v13511_v1, %v13510_v10  ;;  %v4582_v21 = vrot.slane %v4574_v63, %v15268_v20 }
  0xbd   :  { %v13514_v28 = vadd.f32 %v13513_v18, %v13512_v19  ;;  %v13531_v18 = vsel %vm13367_vm0, %v9017_v55, 0.0  ;;  %v998_v19 = vrot.slane %v387_v61, %v15254_v6  ;;  %v4590_v31 = vcombine.low %v4582_v21, %v4589_v22 }
  0xbf   :  { %v13516_v33 = vadd.f32 %v13515_v24, %v13514_v28  ;;  %v8237_v24 = vmul.f32 %v4573_v62, %v173_v59  ;;  %v8238_v49 = vmul.f32 %v4590_v31, %v174_v29  ;;  %v4609_v59 = vcombine.low %v1010_v42, %v1014_v45 }
  0xc1   :  { %v13518_v39 = vadd.f32 %v13517_v32, %v13516_v33  ;;  %v4591_v32 = vcombine.low %v986_v11, %v990_v12  ;;  %v4592_v33 = vcombine.low %v994_v13, %v998_v19  ;;  %v9037_v36 = vcombine.high %v8237_v24, %v8237_v24 }
  0xc2   :  { %v9044_v37 = vrot.slane %v8237_v24, %v15268_v20  ;;  %v9054_v62 = vcombine.high %v8238_v49, %v8238_v49  ;;  %v9061_v63 = vrot.slane %v8238_v49, %v15268_v20  ;;  %v4623_v12 = vrot.slane %v4609_v59, %v15268_v20 }
  0xc3   :  { %v13520_v44 = vadd.f32 %v13519_v35, %v13518_v39  ;;  %v9036_v35 = vcombine.high %v9034_v25, %v9034_v25  ;;  %v4599_v46 = vrot.slane %v4591_v32, %v15268_v20  ;;  %v4606_v47 = vrot.slane %v4592_v33, %v15268_v20 }
  0xc4   :  { %v9051_v50 = vrot.slane %v9037_v36, %v15268_v20  ;;  %v9052_v51 = vcombine.high %v9044_v37, %v9044_v37  ;;  %v13543_v55 = vsel %vm13367_vm0, %v9044_v37, 0.0  ;;  %v9068_v19 = vrot.slane %v9054_v62, %v15268_v20 }
  0xc5   :  { %v13522_v53 = vadd.f32 %v13521_v43, %v13520_v44  ;;  %v13539_v43 = vsel %vm13367_vm0, %v9034_v25, 0.0  ;;  %v51_v44 = vld [vmem:[#allocation3 + $0x60] sm:$0xff]  ;;  %v13541_v52 = vsel %vm13367_vm0, %v9036_v35, 0.0  ;;  %v9069_v21 = vcombine.high %v9061_v63, %v9061_v63 }
  0xc6   :  { %v175_v54 = vunpack.c.l.bf16 %v51_v44  ;;  %v9053_v61 = vcombine.high %v9051_v50, %v9051_v50  ;;  %v13545_v0 = vsel %vm13367_vm0, %v9052_v51, 0.0  ;;  %v176_v24 = vunpack.c.h.bf16 %v51_v44  ;;  %v389_v51 = vld [vmem:[#allocation5 + $0x70] sm:$0xff] }
  0xc7   :  { %v13524_v58 = vadd.f32 %v13523_v48, %v13522_v53  ;;  %v13551_v25 = vsel %vm13367_vm0, %v9061_v63, 0.0  ;;  %v13553_v33 = vsel %vm13367_vm0, %v9069_v21, 0.0  ;;  %v1034_v35 = vrot.slane %v388_v56, %v15260_v14 }
  0xc8   :  { %v13549_v22 = vsel %vm13367_vm0, %v9053_v61, 0.0  ;;  %v1038_v36 = vrot.slane %v388_v56, %v15262_v15  ;;  %v1042_v37 = vrot.slane %v388_v56, %v15264_v16  ;;  %v1050_v61 = vrot.slane %v389_v51, %v15248_v2 }
  0xc9   :  { %v13526_v1 = vadd.f32 %v13525_v57, %v13524_v58  ;;  %v4607_v57 = vcombine.low %v4599_v46, %v4606_v47  ;;  %v4608_v58 = vcombine.low %v1002_v40, %v1006_v41  ;;  %v1046_v40 = vrot.slane %v388_v56, %v15266_v17 }
  0xca   :  { %v1054_v62 = vrot.slane %v389_v51, %v15250_v4  ;;  %v1058_v63 = vrot.slane %v389_v51, %v15252_v5 }
  0xcb   :  { %v13528_v10 = vadd.f32 %v13527_v60, %v13526_v1  ;;  %v4616_v11 = vrot.slane %v4608_v58, %v15268_v20 }
  0xcd   :  { %v13530_v23 = vadd.f32 %v13529_v9, %v13528_v10  ;;  %v13547_v9 = vsel %vm13367_vm0, %v9051_v50, 0.0  ;;  %v1030_v10 = vrot.slane %v388_v56, %v15254_v6  ;;  %v4624_v26 = vcombine.low %v4616_v11, %v4623_v12 }
  0xcf   :  { %v13532_v28 = vadd.f32 %v13531_v18, %v13530_v23  ;;  %v8239_v18 = vmul.f32 %v4607_v57, %v175_v54  ;;  %v8240_v44 = vmul.f32 %v4624_v26, %v176_v24  ;;  %v4643_v54 = vcombine.low %v1042_v37, %v1046_v40 }
  0xd1   :  { %v13534_v34 = vadd.f32 %v13533_v27, %v13532_v28  ;;  %v4625_v27 = vcombine.low %v1018_v3, %v1022_v7  ;;  %v4626_v28 = vcombine.low %v1026_v8, %v1030_v10  ;;  %v9071_v31 = vcombine.high %v8239_v18, %v8239_v18 }
  0xd2   :  { %v9078_v32 = vrot.slane %v8239_v18, %v15268_v20  ;;  %v9088_v57 = vcombine.high %v8240_v44, %v8240_v44  ;;  %v9095_v58 = vrot.slane %v8240_v44, %v15268_v20  ;;  %v4657_v7 = vrot.slane %v4643_v54, %v15268_v20 }
  0xd3   :  { %v13536_v39 = vadd.f32 %v13535_v30, %v13534_v34  ;;  %v9070_v30 = vcombine.high %v9068_v19, %v9068_v19  ;;  %v4633_v41 = vrot.slane %v4625_v27, %v15268_v20  ;;  %v4640_v42 = vrot.slane %v4626_v28, %v15268_v20 }
  0xd4   :  { %v9085_v45 = vrot.slane %v9071_v31, %v15268_v20  ;;  %v9086_v46 = vcombine.high %v9078_v32, %v9078_v32  ;;  %v13559_v50 = vsel %vm13367_vm0, %v9078_v32, 0.0  ;;  %v9102_v10 = vrot.slane %v9088_v57, %v15268_v20 }
  0xd5   :  { %v13538_v48 = vadd.f32 %v13537_v38, %v13536_v39  ;;  %v13555_v38 = vsel %vm13367_vm0, %v9068_v19, 0.0  ;;  %v52_v39 = vld [vmem:[#allocation3 + $0x68] sm:$0xff]  ;;  %v13557_v47 = vsel %vm13367_vm0, %v9070_v30, 0.0  ;;  %v9103_v11 = vcombine.high %v9095_v58, %v9095_v58 }
  0xd6   :  { %v177_v49 = vunpack.c.l.bf16 %v52_v39  ;;  %v9087_v56 = vcombine.high %v9085_v45, %v9085_v45  ;;  %v13561_v59 = vsel %vm13367_vm0, %v9086_v46, 0.0  ;;  %v178_v18 = vunpack.c.h.bf16 %v52_v39  ;;  %v390_v46 = vld [vmem:[#allocation5 + $0x78] sm:$0xff] }
  0xd7   :  { %v13540_v53 = vadd.f32 %v13539_v43, %v13538_v48  ;;  %v13567_v19 = vsel %vm13367_vm0, %v9095_v58, 0.0  ;;  %v13569_v28 = vsel %vm13367_vm0, %v9103_v11, 0.0  ;;  %v1066_v30 = vrot.slane %v389_v51, %v15260_v14 }
  0xd8   :  { %v13565_v12 = vsel %vm13367_vm0, %v9087_v56, 0.0  ;;  %v1070_v31 = vrot.slane %v389_v51, %v15262_v15  ;;  %v1074_v32 = vrot.slane %v389_v51, %v15264_v16  ;;  %v1082_v56 = vrot.slane %v390_v46, %v15248_v2 }
  0xd9   :  { %v13542_v60 = vadd.f32 %v13541_v52, %v13540_v53  ;;  %v4641_v52 = vcombine.low %v4633_v41, %v4640_v42  ;;  %v4642_v53 = vcombine.low %v1034_v35, %v1038_v36  ;;  %v1078_v35 = vrot.slane %v389_v51, %v15266_v17 }
  0xda   :  { %v1086_v57 = vrot.slane %v390_v46, %v15250_v4  ;;  %v1090_v58 = vrot.slane %v390_v46, %v15252_v5 }
  0xdb   :  { %v13544_v1 = vadd.f32 %v13543_v55, %v13542_v60  ;;  %v4650_v3 = vrot.slane %v4642_v53, %v15268_v20 }
  0xdd   :  { %v13546_v13 = vadd.f32 %v13545_v0, %v13544_v1  ;;  %v13563_v0 = vsel %vm13367_vm0, %v9085_v45, 0.0  ;;  %v1062_v1 = vrot.slane %v389_v51, %v15254_v6  ;;  %v4658_v21 = vcombine.low %v4650_v3, %v4657_v7 }
  0xdf   :  { %v13548_v23 = vadd.f32 %v13547_v9, %v13546_v13  ;;  %v8241_v9 = vmul.f32 %v4641_v52, %v177_v49  ;;  %v8242_v39 = vmul.f32 %v4658_v21, %v178_v18  ;;  %v4677_v49 = vcombine.low %v1074_v32, %v1078_v35 }
  0xe1   :  { %v13550_v29 = vadd.f32 %v13549_v22, %v13548_v23  ;;  %v4659_v22 = vcombine.low %v1050_v61, %v1054_v62  ;;  %v4660_v23 = vcombine.low %v1058_v63, %v1062_v1  ;;  %v9105_v26 = vcombine.high %v8241_v9, %v8241_v9 }
  0xe2   :  { %v9112_v27 = vrot.slane %v8241_v9, %v15268_v20  ;;  %v9122_v52 = vcombine.high %v8242_v39, %v8242_v39  ;;  %v9129_v53 = vrot.slane %v8242_v39, %v15268_v20  ;;  %v4691_v62 = vrot.slane %v4677_v49, %v15268_v20 }
  0xe3   :  { %v13552_v34 = vadd.f32 %v13551_v25, %v13550_v29  ;;  %v9104_v25 = vcombine.high %v9102_v10, %v9102_v10  ;;  %v4667_v36 = vrot.slane %v4659_v22, %v15268_v20  ;;  %v4674_v37 = vrot.slane %v4660_v23, %v15268_v20 }
  0xe4   :  { %v9119_v40 = vrot.slane %v9105_v26, %v15268_v20  ;;  %v9120_v41 = vcombine.high %v9112_v27, %v9112_v27  ;;  %v13575_v45 = vsel %vm13367_vm0, %v9112_v27, 0.0  ;;  %v9136_v1 = vrot.slane %v9122_v52, %v15268_v20 }
  0xe5   :  { %v13554_v43 = vadd.f32 %v13553_v33, %v13552_v34  ;;  %v13571_v33 = vsel %vm13367_vm0, %v9102_v10, 0.0  ;;  %v53_v34 = vld [vmem:[#allocation3 + $0x70] sm:$0xff]  ;;  %v13573_v42 = vsel %vm13367_vm0, %v9104_v25, 0.0  ;;  %v9137_v3 = vcombine.high %v9129_v53, %v9129_v53 }
  0xe6   :  { %v179_v44 = vunpack.c.l.bf16 %v53_v34  ;;  %v9121_v51 = vcombine.high %v9119_v40, %v9119_v40  ;;  %v13577_v54 = vsel %vm13367_vm0, %v9120_v41, 0.0  ;;  %v180_v9 = vunpack.c.h.bf16 %v53_v34  ;;  %v391_v41 = vld [vmem:[#allocation5 + $0x80] sm:$0xff] }
  0xe7   :  { %v13556_v48 = vadd.f32 %v13555_v38, %v13554_v43  ;;  %v13583_v10 = vsel %vm13367_vm0, %v9129_v53, 0.0  ;;  %v13585_v23 = vsel %vm13367_vm0, %v9137_v3, 0.0  ;;  %v1098_v25 = vrot.slane %v390_v46, %v15260_v14 }
  0xe8   :  { %v13581_v7 = vsel %vm13367_vm0, %v9121_v51, 0.0  ;;  %v1102_v26 = vrot.slane %v390_v46, %v15262_v15  ;;  %v1106_v27 = vrot.slane %v390_v46, %v15264_v16  ;;  %v1114_v51 = vrot.slane %v391_v41, %v15248_v2 }
  0xe9   :  { %v13558_v55 = vadd.f32 %v13557_v47, %v13556_v48  ;;  %v4675_v47 = vcombine.low %v4667_v36, %v4674_v37  ;;  %v4676_v48 = vcombine.low %v1066_v30, %v1070_v31  ;;  %v1110_v30 = vrot.slane %v390_v46, %v15266_v17 }
  0xea   :  { %v1118_v52 = vrot.slane %v391_v41, %v15250_v4  ;;  %v1122_v53 = vrot.slane %v391_v41, %v15252_v5 }
  0xeb   :  { %v13560_v60 = vadd.f32 %v13559_v50, %v13558_v55  ;;  %v4684_v61 = vrot.slane %v4676_v48, %v15268_v20 }
  0xed   :  { %v13562_v8 = vadd.f32 %v13561_v59, %v13560_v60  ;;  %v13579_v59 = vsel %vm13367_vm0, %v9119_v40, 0.0  ;;  %v1094_v60 = vrot.slane %v390_v46, %v15254_v6  ;;  %v4692_v11 = vcombine.low %v4684_v61, %v4691_v62 }
  0xef   :  { %v13564_v13 = vadd.f32 %v13563_v0, %v13562_v8  ;;  %v8243_v0 = vmul.f32 %v4675_v47, %v179_v44  ;;  %v8244_v34 = vmul.f32 %v4692_v11, %v180_v9  ;;  %v4711_v44 = vcombine.low %v1106_v27, %v1110_v30 }
  0xf1   :  { %v13566_v24 = vadd.f32 %v13565_v12, %v13564_v13  ;;  %v4693_v12 = vcombine.low %v1082_v56, %v1086_v57  ;;  %v4694_v13 = vcombine.low %v1090_v58, %v1094_v60  ;;  %v9139_v21 = vcombine.high %v8243_v0, %v8243_v0 }
  0xf2   :  { %v9146_v22 = vrot.slane %v8243_v0, %v15268_v20  ;;  %v9156_v47 = vcombine.high %v8244_v34, %v8244_v34  ;;  %v9163_v48 = vrot.slane %v8244_v34, %v15268_v20  ;;  %v4725_v57 = vrot.slane %v4711_v44, %v15268_v20 }
  0xf3   :  { %v13568_v29 = vadd.f32 %v13567_v19, %v13566_v24  ;;  %v9138_v19 = vcombine.high %v9136_v1, %v9136_v1  ;;  %v4701_v31 = vrot.slane %v4693_v12, %v15268_v20  ;;  %v4708_v32 = vrot.slane %v4694_v13, %v15268_v20 }
  0xf4   :  { %v9153_v35 = vrot.slane %v9139_v21, %v15268_v20  ;;  %v9154_v36 = vcombine.high %v9146_v22, %v9146_v22  ;;  %v13591_v40 = vsel %vm13367_vm0, %v9146_v22, 0.0  ;;  %v9170_v60 = vrot.slane %v9156_v47, %v15268_v20 }
  0xf5   :  { %v13570_v38 = vadd.f32 %v13569_v28, %v13568_v29  ;;  %v13587_v28 = vsel %vm13367_vm0, %v9136_v1, 0.0  ;;  %v54_v29 = vld [vmem:[#allocation3 + $0x78] sm:$0xff]  ;;  %v13589_v37 = vsel %vm13367_vm0, %v9138_v19, 0.0  ;;  %v9171_v61 = vcombine.high %v9163_v48, %v9163_v48 }
  0xf6   :  { %v181_v39 = vunpack.c.l.bf16 %v54_v29  ;;  %v9155_v46 = vcombine.high %v9153_v35, %v9153_v35  ;;  %v13593_v49 = vsel %vm13367_vm0, %v9154_v36, 0.0  ;;  %v182_v0 = vunpack.c.h.bf16 %v54_v29  ;;  %v392_v36 = vld [vmem:[#allocation5 + $0x88] sm:$0xff] }
  0xf7   :  { %v13572_v43 = vadd.f32 %v13571_v33, %v13570_v38  ;;  %v13599_v1 = vsel %vm13367_vm0, %v9163_v48, 0.0  ;;  %v13601_v13 = vsel %vm13367_vm0, %v9171_v61, 0.0  ;;  %v1130_v19 = vrot.slane %v391_v41, %v15260_v14 }
  0xf8   :  { %v13597_v62 = vsel %vm13367_vm0, %v9155_v46, 0.0  ;;  %v1134_v21 = vrot.slane %v391_v41, %v15262_v15  ;;  %v1138_v22 = vrot.slane %v391_v41, %v15264_v16  ;;  %v1146_v46 = vrot.slane %v392_v36, %v15248_v2 }
  0xf9   :  { %v13574_v50 = vadd.f32 %v13573_v42, %v13572_v43  ;;  %v4709_v42 = vcombine.low %v4701_v31, %v4708_v32  ;;  %v4710_v43 = vcombine.low %v1098_v25, %v1102_v26  ;;  %v1142_v25 = vrot.slane %v391_v41, %v15266_v17 }
  0xfa   :  { %v1150_v47 = vrot.slane %v392_v36, %v15250_v4  ;;  %v1154_v48 = vrot.slane %v392_v36, %v15252_v5 }
  0xfb   :  { %v13576_v55 = vadd.f32 %v13575_v45, %v13574_v50  ;;  %v4718_v56 = vrot.slane %v4710_v43, %v15268_v20 }
  0xfd   :  { %v13578_v63 = vadd.f32 %v13577_v54, %v13576_v55  ;;  %v13595_v54 = vsel %vm13367_vm0, %v9153_v35, 0.0  ;;  %v1126_v55 = vrot.slane %v391_v41, %v15254_v6  ;;  %v4726_v3 = vcombine.low %v4718_v56, %v4725_v57 }
  0xff   :  { %v13580_v8 = vadd.f32 %v13579_v59, %v13578_v63  ;;  %v8245_v59 = vmul.f32 %v4709_v42, %v181_v39  ;;  %v8246_v29 = vmul.f32 %v4726_v3, %v182_v0  ;;  %v4745_v39 = vcombine.low %v1138_v22, %v1142_v25 }
 0x101   :  { %v13582_v18 = vadd.f32 %v13581_v7, %v13580_v8  ;;  %v4727_v7 = vcombine.low %v1114_v51, %v1118_v52  ;;  %v4728_v8 = vcombine.low %v1122_v53, %v1126_v55  ;;  %v9173_v11 = vcombine.high %v8245_v59, %v8245_v59 }
 0x102   :  { %v9180_v12 = vrot.slane %v8245_v59, %v15268_v20  ;;  %v9190_v42 = vcombine.high %v8246_v29, %v8246_v29  ;;  %v9197_v43 = vrot.slane %v8246_v29, %v15268_v20  ;;  %v4759_v52 = vrot.slane %v4745_v39, %v15268_v20 }
 0x103   :  { %v13584_v24 = vadd.f32 %v13583_v10, %v13582_v18  ;;  %v9172_v10 = vcombine.high %v9170_v60, %v9170_v60  ;;  %v4735_v26 = vrot.slane %v4727_v7, %v15268_v20  ;;  %v4742_v27 = vrot.slane %v4728_v8, %v15268_v20 }
 0x104   :  { %v9187_v30 = vrot.slane %v9173_v11, %v15268_v20  ;;  %v9188_v31 = vcombine.high %v9180_v12, %v9180_v12  ;;  %v13607_v35 = vsel %vm13367_vm0, %v9180_v12, 0.0  ;;  %v9204_v55 = vrot.slane %v9190_v42, %v15268_v20 }
 0x105   :  { %v13586_v33 = vadd.f32 %v13585_v23, %v13584_v24  ;;  %v13603_v23 = vsel %vm13367_vm0, %v9170_v60, 0.0  ;;  %v55_v24 = vld [vmem:[#allocation3 + $0x80] sm:$0xff]  ;;  %v13605_v32 = vsel %vm13367_vm0, %v9172_v10, 0.0  ;;  %v9205_v56 = vcombine.high %v9197_v43, %v9197_v43 }
 0x106   :  { %v183_v34 = vunpack.c.l.bf16 %v55_v24  ;;  %v9189_v41 = vcombine.high %v9187_v30, %v9187_v30  ;;  %v13609_v44 = vsel %vm13367_vm0, %v9188_v31, 0.0  ;;  %v184_v59 = vunpack.c.h.bf16 %v55_v24  ;;  %v393_v31 = vld [vmem:[#allocation5 + $0x90] sm:$0xff] }
 0x107   :  { %v13588_v38 = vadd.f32 %v13587_v28, %v13586_v33  ;;  %v13615_v60 = vsel %vm13367_vm0, %v9197_v43, 0.0  ;;  %v13617_v8 = vsel %vm13367_vm0, %v9205_v56, 0.0  ;;  %v1162_v10 = vrot.slane %v392_v36, %v15260_v14 }
 0x108   :  { %v13613_v57 = vsel %vm13367_vm0, %v9189_v41, 0.0  ;;  %v1166_v11 = vrot.slane %v392_v36, %v15262_v15  ;;  %v1170_v12 = vrot.slane %v392_v36, %v15264_v16  ;;  %v1178_v41 = vrot.slane %v393_v31, %v15248_v2 }
 0x109   :  { %v13590_v45 = vadd.f32 %v13589_v37, %v13588_v38  ;;  %v4743_v37 = vcombine.low %v4735_v26, %v4742_v27  ;;  %v4744_v38 = vcombine.low %v1130_v19, %v1134_v21  ;;  %v1174_v19 = vrot.slane %v392_v36, %v15266_v17 }
 0x10a   :  { %v1182_v42 = vrot.slane %v393_v31, %v15250_v4  ;;  %v1186_v43 = vrot.slane %v393_v31, %v15252_v5 }
 0x10b   :  { %v13592_v50 = vadd.f32 %v13591_v40, %v13590_v45  ;;  %v4752_v51 = vrot.slane %v4744_v38, %v15268_v20 }
 0x10d   :  { %v13594_v58 = vadd.f32 %v13593_v49, %v13592_v50  ;;  %v13611_v49 = vsel %vm13367_vm0, %v9187_v30, 0.0  ;;  %v1158_v50 = vrot.slane %v392_v36, %v15254_v6  ;;  %v4760_v61 = vcombine.low %v4752_v51, %v4759_v52 }
 0x10f   :  { %v13596_v63 = vadd.f32 %v13595_v54, %v13594_v58  ;;  %v8247_v54 = vmul.f32 %v4743_v37, %v183_v34  ;;  %v8248_v24 = vmul.f32 %v4760_v61, %v184_v59  ;;  %v4779_v34 = vcombine.low %v1170_v12, %v1174_v19 }
 0x111   :  { %v13598_v9 = vadd.f32 %v13597_v62, %v13596_v63  ;;  %v4761_v62 = vcombine.low %v1146_v46, %v1150_v47  ;;  %v4762_v63 = vcombine.low %v1154_v48, %v1158_v50  ;;  %v9207_v3 = vcombine.high %v8247_v54, %v8247_v54 }
 0x112   :  { %v9214_v7 = vrot.slane %v8247_v54, %v15268_v20  ;;  %v9224_v37 = vcombine.high %v8248_v24, %v8248_v24  ;;  %v9231_v38 = vrot.slane %v8248_v24, %v15268_v20  ;;  %v4793_v47 = vrot.slane %v4779_v34, %v15268_v20 }
 0x113   :  { %v13600_v18 = vadd.f32 %v13599_v1, %v13598_v9  ;;  %v9206_v1 = vcombine.high %v9204_v55, %v9204_v55  ;;  %v4769_v21 = vrot.slane %v4761_v62, %v15268_v20  ;;  %v4776_v22 = vrot.slane %v4762_v63, %v15268_v20 }
 0x114   :  { %v9221_v25 = vrot.slane %v9207_v3, %v15268_v20  ;;  %v9222_v26 = vcombine.high %v9214_v7, %v9214_v7  ;;  %v13623_v30 = vsel %vm13367_vm0, %v9214_v7, 0.0  ;;  %v9238_v50 = vrot.slane %v9224_v37, %v15268_v20 }
 0x115   :  { %v13602_v28 = vadd.f32 %v13601_v13, %v13600_v18  ;;  %v13619_v13 = vsel %vm13367_vm0, %v9204_v55, 0.0  ;;  %v56_v18 = vld [vmem:[#allocation3 + $0x88] sm:$0xff]  ;;  %v13621_v27 = vsel %vm13367_vm0, %v9206_v1, 0.0  ;;  %v9239_v51 = vcombine.high %v9231_v38, %v9231_v38 }
 0x116   :  { %v185_v29 = vunpack.c.l.bf16 %v56_v18  ;;  %v9223_v36 = vcombine.high %v9221_v25, %v9221_v25  ;;  %v13625_v39 = vsel %vm13367_vm0, %v9222_v26, 0.0  ;;  %v186_v54 = vunpack.c.h.bf16 %v56_v18  ;;  %v394_v26 = vld [vmem:[#allocation5 + $0x98] sm:$0xff] }
 0x117   :  { %v13604_v33 = vadd.f32 %v13603_v23, %v13602_v28  ;;  %v13631_v55 = vsel %vm13367_vm0, %v9231_v38, 0.0  ;;  %v13633_v63 = vsel %vm13367_vm0, %v9239_v51, 0.0  ;;  %v1194_v1 = vrot.slane %v393_v31, %v15260_v14 }
 0x118   :  { %v13629_v52 = vsel %vm13367_vm0, %v9223_v36, 0.0  ;;  %v1198_v3 = vrot.slane %v393_v31, %v15262_v15  ;;  %v1202_v7 = vrot.slane %v393_v31, %v15264_v16  ;;  %v1210_v36 = vrot.slane %v394_v26, %v15248_v2 }
 0x119   :  { %v13606_v40 = vadd.f32 %v13605_v32, %v13604_v33  ;;  %v4777_v32 = vcombine.low %v4769_v21, %v4776_v22  ;;  %v4778_v33 = vcombine.low %v1162_v10, %v1166_v11  ;;  %v1206_v10 = vrot.slane %v393_v31, %v15266_v17 }
 0x11a   :  { %v1214_v37 = vrot.slane %v394_v26, %v15250_v4  ;;  %v1218_v38 = vrot.slane %v394_v26, %v15252_v5 }
 0x11b   :  { %v13608_v45 = vadd.f32 %v13607_v35, %v13606_v40  ;;  %v4786_v46 = vrot.slane %v4778_v33, %v15268_v20 }
 0x11d   :  { %v13610_v53 = vadd.f32 %v13609_v44, %v13608_v45  ;;  %v13627_v44 = vsel %vm13367_vm0, %v9221_v25, 0.0  ;;  %v1190_v45 = vrot.slane %v393_v31, %v15254_v6  ;;  %v4794_v56 = vcombine.low %v4786_v46, %v4793_v47 }
 0x11f   :  { %v13612_v58 = vadd.f32 %v13611_v49, %v13610_v53  ;;  %v8249_v49 = vmul.f32 %v4777_v32, %v185_v29  ;;  %v8250_v18 = vmul.f32 %v4794_v56, %v186_v54  ;;  %v4813_v29 = vcombine.low %v1202_v7, %v1206_v10 }
 0x121   :  { %v13614_v0 = vadd.f32 %v13613_v57, %v13612_v58  ;;  %v4795_v57 = vcombine.low %v1178_v41, %v1182_v42  ;;  %v4796_v58 = vcombine.low %v1186_v43, %v1190_v45  ;;  %v9241_v61 = vcombine.high %v8249_v49, %v8249_v49 }
 0x122   :  { %v9248_v62 = vrot.slane %v8249_v49, %v15268_v20  ;;  %v9258_v32 = vcombine.high %v8250_v18, %v8250_v18  ;;  %v9265_v33 = vrot.slane %v8250_v18, %v15268_v20  ;;  %v4827_v42 = vrot.slane %v4813_v29, %v15268_v20 }
 0x123   :  { %v13616_v9 = vadd.f32 %v13615_v60, %v13614_v0  ;;  %v9240_v60 = vcombine.high %v9238_v50, %v9238_v50  ;;  %v4803_v11 = vrot.slane %v4795_v57, %v15268_v20  ;;  %v4810_v12 = vrot.slane %v4796_v58, %v15268_v20 }
 0x124   :  { %v9255_v19 = vrot.slane %v9241_v61, %v15268_v20  ;;  %v9256_v21 = vcombine.high %v9248_v62, %v9248_v62  ;;  %v13639_v25 = vsel %vm13367_vm0, %v9248_v62, 0.0  ;;  %v9272_v45 = vrot.slane %v9258_v32, %v15268_v20 }
 0x125   :  { %v13618_v23 = vadd.f32 %v13617_v8, %v13616_v9  ;;  %v13635_v8 = vsel %vm13367_vm0, %v9238_v50, 0.0  ;;  %v57_v9 = vld [vmem:[#allocation3 + $0x90] sm:$0xff]  ;;  %v13637_v22 = vsel %vm13367_vm0, %v9240_v60, 0.0  ;;  %v9273_v46 = vcombine.high %v9265_v33, %v9265_v33 }
 0x126   :  { %v187_v24 = vunpack.c.l.bf16 %v57_v9  ;;  %v9257_v31 = vcombine.high %v9255_v19, %v9255_v19  ;;  %v13641_v34 = vsel %vm13367_vm0, %v9256_v21, 0.0  ;;  %v188_v49 = vunpack.c.h.bf16 %v57_v9  ;;  %v395_v21 = vld [vmem:[#allocation5 + $0xa0] sm:$0xff] }
 0x127   :  { %v13620_v28 = vadd.f32 %v13619_v13, %v13618_v23  ;;  %v13647_v50 = vsel %vm13367_vm0, %v9265_v33, 0.0  ;;  %v13649_v58 = vsel %vm13367_vm0, %v9273_v46, 0.0  ;;  %v1226_v60 = vrot.slane %v394_v26, %v15260_v14 }
 0x128   :  { %v13645_v47 = vsel %vm13367_vm0, %v9257_v31, 0.0  ;;  %v1230_v61 = vrot.slane %v394_v26, %v15262_v15  ;;  %v1234_v62 = vrot.slane %v394_v26, %v15264_v16  ;;  %v1242_v31 = vrot.slane %v395_v21, %v15248_v2 }
 0x129   :  { %v13622_v35 = vadd.f32 %v13621_v27, %v13620_v28  ;;  %v4811_v27 = vcombine.low %v4803_v11, %v4810_v12  ;;  %v4812_v28 = vcombine.low %v1194_v1, %v1198_v3  ;;  %v1238_v1 = vrot.slane %v394_v26, %v15266_v17 }
 0x12a   :  { %v1246_v32 = vrot.slane %v395_v21, %v15250_v4  ;;  %v1250_v33 = vrot.slane %v395_v21, %v15252_v5 }
 0x12b   :  { %v13624_v40 = vadd.f32 %v13623_v30, %v13622_v35  ;;  %v4820_v41 = vrot.slane %v4812_v28, %v15268_v20 }
 0x12d   :  { %v13626_v48 = vadd.f32 %v13625_v39, %v13624_v40  ;;  %v13643_v39 = vsel %vm13367_vm0, %v9255_v19, 0.0  ;;  %v1222_v40 = vrot.slane %v394_v26, %v15254_v6  ;;  %v4828_v51 = vcombine.low %v4820_v41, %v4827_v42 }
 0x12f   :  { %v13628_v53 = vadd.f32 %v13627_v44, %v13626_v48  ;;  %v8251_v44 = vmul.f32 %v4811_v27, %v187_v24  ;;  %v8252_v9 = vmul.f32 %v4828_v51, %v188_v49  ;;  %v4847_v24 = vcombine.low %v1234_v62, %v1238_v1 }
 0x131   :  { %v13630_v59 = vadd.f32 %v13629_v52, %v13628_v53  ;;  %v4829_v52 = vcombine.low %v1210_v36, %v1214_v37  ;;  %v4830_v53 = vcombine.low %v1218_v38, %v1222_v40  ;;  %v9275_v56 = vcombine.high %v8251_v44, %v8251_v44 }
 0x132   :  { %v9282_v57 = vrot.slane %v8251_v44, %v15268_v20  ;;  %v9292_v27 = vcombine.high %v8252_v9, %v8252_v9  ;;  %v9299_v28 = vrot.slane %v8252_v9, %v15268_v20  ;;  %v4861_v37 = vrot.slane %v4847_v24, %v15268_v20 }
 0x133   :  { %v13632_v0 = vadd.f32 %v13631_v55, %v13630_v59  ;;  %v9274_v55 = vcombine.high %v9272_v45, %v9272_v45  ;;  %v4837_v3 = vrot.slane %v4829_v52, %v15268_v20  ;;  %v4844_v7 = vrot.slane %v4830_v53, %v15268_v20 }
 0x134   :  { %v9289_v10 = vrot.slane %v9275_v56, %v15268_v20  ;;  %v9290_v11 = vcombine.high %v9282_v57, %v9282_v57  ;;  %v13655_v19 = vsel %vm13367_vm0, %v9282_v57, 0.0  ;;  %v9306_v40 = vrot.slane %v9292_v27, %v15268_v20 }
 0x135   :  { %v13634_v13 = vadd.f32 %v13633_v63, %v13632_v0  ;;  %v13651_v63 = vsel %vm13367_vm0, %v9272_v45, 0.0  ;;  %v58_v0 = vld [vmem:[#allocation3 + $0x98] sm:$0xff]  ;;  %v13653_v12 = vsel %vm13367_vm0, %v9274_v55, 0.0  ;;  %v9307_v41 = vcombine.high %v9299_v28, %v9299_v28 }
 0x136   :  { %v189_v18 = vunpack.c.l.bf16 %v58_v0  ;;  %v9291_v26 = vcombine.high %v9289_v10, %v9289_v10  ;;  %v13657_v29 = vsel %vm13367_vm0, %v9290_v11, 0.0  ;;  %v190_v44 = vunpack.c.h.bf16 %v58_v0  ;;  %v396_v11 = vld [vmem:[#allocation5 + $0xa8] sm:$0xff] }
 0x137   :  { %v13636_v23 = vadd.f32 %v13635_v8, %v13634_v13  ;;  %v13663_v45 = vsel %vm13367_vm0, %v9299_v28, 0.0  ;;  %v13665_v53 = vsel %vm13367_vm0, %v9307_v41, 0.0  ;;  %v1258_v55 = vrot.slane %v395_v21, %v15260_v14 }
 0x138   :  { %v13661_v42 = vsel %vm13367_vm0, %v9291_v26, 0.0  ;;  %v1262_v56 = vrot.slane %v395_v21, %v15262_v15  ;;  %v1266_v57 = vrot.slane %v395_v21, %v15264_v16  ;;  %v1274_v26 = vrot.slane %v396_v11, %v15248_v2 }
 0x139   :  { %v13638_v30 = vadd.f32 %v13637_v22, %v13636_v23  ;;  %v4845_v22 = vcombine.low %v4837_v3, %v4844_v7  ;;  %v4846_v23 = vcombine.low %v1226_v60, %v1230_v61  ;;  %v1270_v60 = vrot.slane %v395_v21, %v15266_v17 }
 0x13a   :  { %v1278_v27 = vrot.slane %v396_v11, %v15250_v4  ;;  %v1282_v28 = vrot.slane %v396_v11, %v15252_v5 }
 0x13b   :  { %v13640_v35 = vadd.f32 %v13639_v25, %v13638_v30  ;;  %v4854_v36 = vrot.slane %v4846_v23, %v15268_v20 }
 0x13d   :  { %v13642_v43 = vadd.f32 %v13641_v34, %v13640_v35  ;;  %v13659_v34 = vsel %vm13367_vm0, %v9289_v10, 0.0  ;;  %v1254_v35 = vrot.slane %v395_v21, %v15254_v6  ;;  %v4862_v46 = vcombine.low %v4854_v36, %v4861_v37 }
 0x13f   :  { %v13644_v48 = vadd.f32 %v13643_v39, %v13642_v43  ;;  %v8253_v39 = vmul.f32 %v4845_v22, %v189_v18  ;;  %v8254_v0 = vmul.f32 %v4862_v46, %v190_v44  ;;  %v4881_v18 = vcombine.low %v1266_v57, %v1270_v60 }
 0x141   :  { %v13646_v54 = vadd.f32 %v13645_v47, %v13644_v48  ;;  %v4863_v47 = vcombine.low %v1242_v31, %v1246_v32  ;;  %v4864_v48 = vcombine.low %v1250_v33, %v1254_v35  ;;  %v9309_v51 = vcombine.high %v8253_v39, %v8253_v39 }
 0x142   :  { %v9316_v52 = vrot.slane %v8253_v39, %v15268_v20  ;;  %v9326_v22 = vcombine.high %v8254_v0, %v8254_v0  ;;  %v9333_v23 = vrot.slane %v8254_v0, %v15268_v20  ;;  %v4895_v32 = vrot.slane %v4881_v18, %v15268_v20 }
 0x143   :  { %v13648_v59 = vadd.f32 %v13647_v50, %v13646_v54  ;;  %v9308_v50 = vcombine.high %v9306_v40, %v9306_v40  ;;  %v4871_v61 = vrot.slane %v4863_v47, %v15268_v20  ;;  %v4878_v62 = vrot.slane %v4864_v48, %v15268_v20 }
 0x144   :  { %v9323_v1 = vrot.slane %v9309_v51, %v15268_v20  ;;  %v9324_v3 = vcombine.high %v9316_v52, %v9316_v52  ;;  %v13671_v10 = vsel %vm13367_vm0, %v9316_v52, 0.0  ;;  %v9340_v35 = vrot.slane %v9326_v22, %v15268_v20 }
 0x145   :  { %v13650_v8 = vadd.f32 %v13649_v58, %v13648_v59  ;;  %v13667_v58 = vsel %vm13367_vm0, %v9306_v40, 0.0  ;;  %v59_v59 = vld [vmem:[#allocation3 + $0xa0] sm:$0xff]  ;;  %v13669_v7 = vsel %vm13367_vm0, %v9308_v50, 0.0  ;;  %v9341_v36 = vcombine.high %v9333_v23, %v9333_v23 }
 0x146   :  { %v191_v9 = vunpack.c.l.bf16 %v59_v59  ;;  %v9325_v21 = vcombine.high %v9323_v1, %v9323_v1  ;;  %v13673_v24 = vsel %vm13367_vm0, %v9324_v3, 0.0  ;;  %v192_v39 = vunpack.c.h.bf16 %v59_v59  ;;  %v397_v3 = vld [vmem:[#allocation5 + $0xb0] sm:$0xff] }
 0x147   :  { %v13652_v13 = vadd.f32 %v13651_v63, %v13650_v8  ;;  %v13679_v40 = vsel %vm13367_vm0, %v9333_v23, 0.0  ;;  %v13681_v48 = vsel %vm13367_vm0, %v9341_v36, 0.0  ;;  %v1290_v50 = vrot.slane %v396_v11, %v15260_v14 }
 0x148   :  { %v13677_v37 = vsel %vm13367_vm0, %v9325_v21, 0.0  ;;  %v1294_v51 = vrot.slane %v396_v11, %v15262_v15  ;;  %v1298_v52 = vrot.slane %v396_v11, %v15264_v16  ;;  %v1306_v21 = vrot.slane %v397_v3, %v15248_v2 }
 0x149   :  { %v13654_v25 = vadd.f32 %v13653_v12, %v13652_v13  ;;  %v4879_v12 = vcombine.low %v4871_v61, %v4878_v62  ;;  %v4880_v13 = vcombine.low %v1258_v55, %v1262_v56  ;;  %v1302_v55 = vrot.slane %v396_v11, %v15266_v17 }
 0x14a   :  { %v1310_v22 = vrot.slane %v397_v3, %v15250_v4  ;;  %v1314_v23 = vrot.slane %v397_v3, %v15252_v5 }
 0x14b   :  { %v13656_v30 = vadd.f32 %v13655_v19, %v13654_v25  ;;  %v4888_v31 = vrot.slane %v4880_v13, %v15268_v20 }
 0x14d   :  { %v13658_v38 = vadd.f32 %v13657_v29, %v13656_v30  ;;  %v13675_v29 = vsel %vm13367_vm0, %v9323_v1, 0.0  ;;  %v1286_v30 = vrot.slane %v396_v11, %v15254_v6  ;;  %v4896_v41 = vcombine.low %v4888_v31, %v4895_v32 }
 0x14f   :  { %v13660_v43 = vadd.f32 %v13659_v34, %v13658_v38  ;;  %v8255_v34 = vmul.f32 %v4879_v12, %v191_v9  ;;  %v8256_v59 = vmul.f32 %v4896_v41, %v192_v39  ;;  %v4915_v9 = vcombine.low %v1298_v52, %v1302_v55 }
 0x151   :  { %v13662_v49 = vadd.f32 %v13661_v42, %v13660_v43  ;;  %v4897_v42 = vcombine.low %v1274_v26, %v1278_v27  ;;  %v4898_v43 = vcombine.low %v1282_v28, %v1286_v30  ;;  %v9343_v46 = vcombine.high %v8255_v34, %v8255_v34 }
 0x152   :  { %v9350_v47 = vrot.slane %v8255_v34, %v15268_v20  ;;  %v9360_v12 = vcombine.high %v8256_v59, %v8256_v59  ;;  %v9367_v13 = vrot.slane %v8256_v59, %v15268_v20  ;;  %v4929_v27 = vrot.slane %v4915_v9, %v15268_v20 }
 0x153   :  { %v13664_v54 = vadd.f32 %v13663_v45, %v13662_v49  ;;  %v9342_v45 = vcombine.high %v9340_v35, %v9340_v35  ;;  %v4905_v56 = vrot.slane %v4897_v42, %v15268_v20  ;;  %v4912_v57 = vrot.slane %v4898_v43, %v15268_v20 }
 0x154   :  { %v9357_v60 = vrot.slane %v9343_v46, %v15268_v20  ;;  %v9358_v61 = vcombine.high %v9350_v47, %v9350_v47  ;;  %v13687_v1 = vsel %vm13367_vm0, %v9350_v47, 0.0  ;;  %v9374_v30 = vrot.slane %v9360_v12, %v15268_v20 }
 0x155   :  { %v13666_v63 = vadd.f32 %v13665_v53, %v13664_v54  ;;  %v13683_v53 = vsel %vm13367_vm0, %v9340_v35, 0.0  ;;  %v60_v54 = vld [vmem:[#allocation3 + $0xa8] sm:$0xff]  ;;  %v13685_v62 = vsel %vm13367_vm0, %v9342_v45, 0.0  ;;  %v9375_v31 = vcombine.high %v9367_v13, %v9367_v13 }
 0x156   :  { %v193_v0 = vunpack.c.l.bf16 %v60_v54  ;;  %v9359_v11 = vcombine.high %v9357_v60, %v9357_v60  ;;  %v13689_v18 = vsel %vm13367_vm0, %v9358_v61, 0.0  ;;  %v194_v34 = vunpack.c.h.bf16 %v60_v54  ;;  %v398_v61 = vld [vmem:[#allocation5 + $0xb8] sm:$0xff] }
 0x157   :  { %v13668_v8 = vadd.f32 %v13667_v58, %v13666_v63  ;;  %v13695_v35 = vsel %vm13367_vm0, %v9367_v13, 0.0  ;;  %v13697_v43 = vsel %vm13367_vm0, %v9375_v31, 0.0  ;;  %v1322_v45 = vrot.slane %v397_v3, %v15260_v14 }
 0x158   :  { %v13693_v32 = vsel %vm13367_vm0, %v9359_v11, 0.0  ;;  %v1326_v46 = vrot.slane %v397_v3, %v15262_v15  ;;  %v1330_v47 = vrot.slane %v397_v3, %v15264_v16  ;;  %v1338_v11 = vrot.slane %v398_v61, %v15248_v2 }
 0x159   :  { %v13670_v19 = vadd.f32 %v13669_v7, %v13668_v8  ;;  %v4913_v7 = vcombine.low %v4905_v56, %v4912_v57  ;;  %v4914_v8 = vcombine.low %v1290_v50, %v1294_v51  ;;  %v1334_v50 = vrot.slane %v397_v3, %v15266_v17 }
 0x15a   :  { %v1342_v12 = vrot.slane %v398_v61, %v15250_v4  ;;  %v1346_v13 = vrot.slane %v398_v61, %v15252_v5 }
 0x15b   :  { %v13672_v25 = vadd.f32 %v13671_v10, %v13670_v19  ;;  %v4922_v26 = vrot.slane %v4914_v8, %v15268_v20 }
 0x15d   :  { %v13674_v33 = vadd.f32 %v13673_v24, %v13672_v25  ;;  %v13691_v24 = vsel %vm13367_vm0, %v9357_v60, 0.0  ;;  %v1318_v25 = vrot.slane %v397_v3, %v15254_v6  ;;  %v4930_v36 = vcombine.low %v4922_v26, %v4929_v27 }
 0x15f   :  { %v13676_v38 = vadd.f32 %v13675_v29, %v13674_v33  ;;  %v8257_v29 = vmul.f32 %v4913_v7, %v193_v0  ;;  %v8258_v54 = vmul.f32 %v4930_v36, %v194_v34  ;;  %v4949_v0 = vcombine.low %v1330_v47, %v1334_v50 }
 0x161   :  { %v13678_v44 = vadd.f32 %v13677_v37, %v13676_v38  ;;  %v4931_v37 = vcombine.low %v1306_v21, %v1310_v22  ;;  %v4932_v38 = vcombine.low %v1314_v23, %v1318_v25  ;;  %v9377_v41 = vcombine.high %v8257_v29, %v8257_v29 }
 0x162   :  { %v9384_v42 = vrot.slane %v8257_v29, %v15268_v20  ;;  %v9394_v7 = vcombine.high %v8258_v54, %v8258_v54  ;;  %v9401_v8 = vrot.slane %v8258_v54, %v15268_v20  ;;  %v4963_v22 = vrot.slane %v4949_v0, %v15268_v20 }
 0x163   :  { %v13680_v49 = vadd.f32 %v13679_v40, %v13678_v44  ;;  %v9376_v40 = vcombine.high %v9374_v30, %v9374_v30  ;;  %v4939_v51 = vrot.slane %v4931_v37, %v15268_v20  ;;  %v4946_v52 = vrot.slane %v4932_v38, %v15268_v20 }
 0x164   :  { %v9391_v55 = vrot.slane %v9377_v41, %v15268_v20  ;;  %v9392_v56 = vcombine.high %v9384_v42, %v9384_v42  ;;  %v13703_v60 = vsel %vm13367_vm0, %v9384_v42, 0.0  ;;  %v9408_v25 = vrot.slane %v9394_v7, %v15268_v20 }
 0x165   :  { %v13682_v58 = vadd.f32 %v13681_v48, %v13680_v49  ;;  %v13699_v48 = vsel %vm13367_vm0, %v9374_v30, 0.0  ;;  %v61_v49 = vld [vmem:[#allocation3 + $0xb0] sm:$0xff]  ;;  %v13701_v57 = vsel %vm13367_vm0, %v9376_v40, 0.0  ;;  %v9409_v26 = vcombine.high %v9401_v8, %v9401_v8 }
 0x166   :  { %v195_v59 = vunpack.c.l.bf16 %v61_v49  ;;  %v9393_v3 = vcombine.high %v9391_v55, %v9391_v55  ;;  %v13705_v9 = vsel %vm13367_vm0, %v9392_v56, 0.0  ;;  %v196_v29 = vunpack.c.h.bf16 %v61_v49  ;;  %v399_v56 = vld [vmem:[#allocation5 + $0xc0] sm:$0xff] }
 0x167   :  { %v13684_v63 = vadd.f32 %v13683_v53, %v13682_v58  ;;  %v13711_v30 = vsel %vm13367_vm0, %v9401_v8, 0.0  ;;  %v13713_v38 = vsel %vm13367_vm0, %v9409_v26, 0.0  ;;  %v1354_v40 = vrot.slane %v398_v61, %v15260_v14 }
 0x168   :  { %v13709_v27 = vsel %vm13367_vm0, %v9393_v3, 0.0  ;;  %v1358_v41 = vrot.slane %v398_v61, %v15262_v15  ;;  %v1362_v42 = vrot.slane %v398_v61, %v15264_v16  ;;  %v1370_v3 = vrot.slane %v399_v56, %v15248_v2 }
 0x169   :  { %v13686_v10 = vadd.f32 %v13685_v62, %v13684_v63  ;;  %v4947_v62 = vcombine.low %v4939_v51, %v4946_v52  ;;  %v4948_v63 = vcombine.low %v1322_v45, %v1326_v46  ;;  %v1366_v45 = vrot.slane %v398_v61, %v15266_v17 }
 0x16a   :  { %v1374_v7 = vrot.slane %v399_v56, %v15250_v4  ;;  %v1378_v8 = vrot.slane %v399_v56, %v15252_v5 }
 0x16b   :  { %v13688_v19 = vadd.f32 %v13687_v1, %v13686_v10  ;;  %v4956_v21 = vrot.slane %v4948_v63, %v15268_v20 }
 0x16d   :  { %v13690_v28 = vadd.f32 %v13689_v18, %v13688_v19  ;;  %v13707_v18 = vsel %vm13367_vm0, %v9391_v55, 0.0  ;;  %v1350_v19 = vrot.slane %v398_v61, %v15254_v6  ;;  %v4964_v31 = vcombine.low %v4956_v21, %v4963_v22 }
 0x16f   :  { %v13692_v33 = vadd.f32 %v13691_v24, %v13690_v28  ;;  %v8259_v24 = vmul.f32 %v4947_v62, %v195_v59  ;;  %v8260_v49 = vmul.f32 %v4964_v31, %v196_v29  ;;  %v4983_v59 = vcombine.low %v1362_v42, %v1366_v45 }
 0x171   :  { %v13694_v39 = vadd.f32 %v13693_v32, %v13692_v33  ;;  %v4965_v32 = vcombine.low %v1338_v11, %v1342_v12  ;;  %v4966_v33 = vcombine.low %v1346_v13, %v1350_v19  ;;  %v9411_v36 = vcombine.high %v8259_v24, %v8259_v24 }
 0x172   :  { %v9418_v37 = vrot.slane %v8259_v24, %v15268_v20  ;;  %v9428_v62 = vcombine.high %v8260_v49, %v8260_v49  ;;  %v9435_v63 = vrot.slane %v8260_v49, %v15268_v20  ;;  %v4997_v12 = vrot.slane %v4983_v59, %v15268_v20 }
 0x173   :  { %v13696_v44 = vadd.f32 %v13695_v35, %v13694_v39  ;;  %v9410_v35 = vcombine.high %v9408_v25, %v9408_v25  ;;  %v4973_v46 = vrot.slane %v4965_v32, %v15268_v20  ;;  %v4980_v47 = vrot.slane %v4966_v33, %v15268_v20 }
 0x174   :  { %v9425_v50 = vrot.slane %v9411_v36, %v15268_v20  ;;  %v9426_v51 = vcombine.high %v9418_v37, %v9418_v37  ;;  %v13719_v55 = vsel %vm13367_vm0, %v9418_v37, 0.0  ;;  %v9442_v19 = vrot.slane %v9428_v62, %v15268_v20 }
 0x175   :  { %v13698_v53 = vadd.f32 %v13697_v43, %v13696_v44  ;;  %v13715_v43 = vsel %vm13367_vm0, %v9408_v25, 0.0  ;;  %v62_v44 = vld [vmem:[#allocation3 + $0xb8] sm:$0xff]  ;;  %v13717_v52 = vsel %vm13367_vm0, %v9410_v35, 0.0  ;;  %v9443_v21 = vcombine.high %v9435_v63, %v9435_v63 }
 0x176   :  { %v197_v54 = vunpack.c.l.bf16 %v62_v44  ;;  %v9427_v61 = vcombine.high %v9425_v50, %v9425_v50  ;;  %v13721_v0 = vsel %vm13367_vm0, %v9426_v51, 0.0  ;;  %v198_v24 = vunpack.c.h.bf16 %v62_v44  ;;  %v400_v51 = vld [vmem:[#allocation5 + $0xc8] sm:$0xff] }
 0x177   :  { %v13700_v58 = vadd.f32 %v13699_v48, %v13698_v53  ;;  %v13727_v25 = vsel %vm13367_vm0, %v9435_v63, 0.0  ;;  %v13729_v33 = vsel %vm13367_vm0, %v9443_v21, 0.0  ;;  %v1386_v35 = vrot.slane %v399_v56, %v15260_v14 }
 0x178   :  { %v13725_v22 = vsel %vm13367_vm0, %v9427_v61, 0.0  ;;  %v1390_v36 = vrot.slane %v399_v56, %v15262_v15  ;;  %v1394_v37 = vrot.slane %v399_v56, %v15264_v16  ;;  %v1402_v61 = vrot.slane %v400_v51, %v15248_v2 }
 0x179   :  { %v13702_v1 = vadd.f32 %v13701_v57, %v13700_v58  ;;  %v4981_v57 = vcombine.low %v4973_v46, %v4980_v47  ;;  %v4982_v58 = vcombine.low %v1354_v40, %v1358_v41  ;;  %v1398_v40 = vrot.slane %v399_v56, %v15266_v17 }
 0x17a   :  { %v1406_v62 = vrot.slane %v400_v51, %v15250_v4  ;;  %v1410_v63 = vrot.slane %v400_v51, %v15252_v5 }
 0x17b   :  { %v13704_v10 = vadd.f32 %v13703_v60, %v13702_v1  ;;  %v4990_v11 = vrot.slane %v4982_v58, %v15268_v20 }
 0x17d   :  { %v13706_v23 = vadd.f32 %v13705_v9, %v13704_v10  ;;  %v13723_v9 = vsel %vm13367_vm0, %v9425_v50, 0.0  ;;  %v1382_v10 = vrot.slane %v399_v56, %v15254_v6  ;;  %v4998_v26 = vcombine.low %v4990_v11, %v4997_v12 }
 0x17f   :  { %v13708_v28 = vadd.f32 %v13707_v18, %v13706_v23  ;;  %v8261_v18 = vmul.f32 %v4981_v57, %v197_v54  ;;  %v8262_v44 = vmul.f32 %v4998_v26, %v198_v24  ;;  %v5017_v54 = vcombine.low %v1394_v37, %v1398_v40 }
 0x181   :  { %v13710_v34 = vadd.f32 %v13709_v27, %v13708_v28  ;;  %v4999_v27 = vcombine.low %v1370_v3, %v1374_v7  ;;  %v5000_v28 = vcombine.low %v1378_v8, %v1382_v10  ;;  %v9445_v31 = vcombine.high %v8261_v18, %v8261_v18 }
 0x182   :  { %v9452_v32 = vrot.slane %v8261_v18, %v15268_v20  ;;  %v9462_v57 = vcombine.high %v8262_v44, %v8262_v44  ;;  %v9469_v58 = vrot.slane %v8262_v44, %v15268_v20  ;;  %v5031_v7 = vrot.slane %v5017_v54, %v15268_v20 }
 0x183   :  { %v13712_v39 = vadd.f32 %v13711_v30, %v13710_v34  ;;  %v9444_v30 = vcombine.high %v9442_v19, %v9442_v19  ;;  %v5007_v41 = vrot.slane %v4999_v27, %v15268_v20  ;;  %v5014_v42 = vrot.slane %v5000_v28, %v15268_v20 }
 0x184   :  { %v9459_v45 = vrot.slane %v9445_v31, %v15268_v20  ;;  %v9460_v46 = vcombine.high %v9452_v32, %v9452_v32  ;;  %v13735_v50 = vsel %vm13367_vm0, %v9452_v32, 0.0  ;;  %v9476_v10 = vrot.slane %v9462_v57, %v15268_v20 }
 0x185   :  { %v13714_v48 = vadd.f32 %v13713_v38, %v13712_v39  ;;  %v13731_v38 = vsel %vm13367_vm0, %v9442_v19, 0.0  ;;  %v63_v39 = vld [vmem:[#allocation3 + $0xc0] sm:$0xff]  ;;  %v13733_v47 = vsel %vm13367_vm0, %v9444_v30, 0.0  ;;  %v9477_v11 = vcombine.high %v9469_v58, %v9469_v58 }
 0x186   :  { %v199_v49 = vunpack.c.l.bf16 %v63_v39  ;;  %v9461_v56 = vcombine.high %v9459_v45, %v9459_v45  ;;  %v13737_v59 = vsel %vm13367_vm0, %v9460_v46, 0.0  ;;  %v200_v18 = vunpack.c.h.bf16 %v63_v39  ;;  %v401_v46 = vld [vmem:[#allocation5 + $0xd0] sm:$0xff] }
 0x187   :  { %v13716_v53 = vadd.f32 %v13715_v43, %v13714_v48  ;;  %v13743_v19 = vsel %vm13367_vm0, %v9469_v58, 0.0  ;;  %v13745_v28 = vsel %vm13367_vm0, %v9477_v11, 0.0  ;;  %v1418_v30 = vrot.slane %v400_v51, %v15260_v14 }
 0x188   :  { %v13741_v12 = vsel %vm13367_vm0, %v9461_v56, 0.0  ;;  %v1422_v31 = vrot.slane %v400_v51, %v15262_v15  ;;  %v1426_v32 = vrot.slane %v400_v51, %v15264_v16  ;;  %v1434_v56 = vrot.slane %v401_v46, %v15248_v2 }
 0x189   :  { %v13718_v60 = vadd.f32 %v13717_v52, %v13716_v53  ;;  %v5015_v52 = vcombine.low %v5007_v41, %v5014_v42  ;;  %v5016_v53 = vcombine.low %v1386_v35, %v1390_v36  ;;  %v1430_v35 = vrot.slane %v400_v51, %v15266_v17 }
 0x18a   :  { %v1438_v57 = vrot.slane %v401_v46, %v15250_v4  ;;  %v1442_v58 = vrot.slane %v401_v46, %v15252_v5 }
 0x18b   :  { %v13720_v1 = vadd.f32 %v13719_v55, %v13718_v60  ;;  %v5024_v3 = vrot.slane %v5016_v53, %v15268_v20 }
 0x18d   :  { %v13722_v13 = vadd.f32 %v13721_v0, %v13720_v1  ;;  %v13739_v0 = vsel %vm13367_vm0, %v9459_v45, 0.0  ;;  %v1414_v1 = vrot.slane %v400_v51, %v15254_v6  ;;  %v5032_v21 = vcombine.low %v5024_v3, %v5031_v7 }
 0x18f   :  { %v13724_v23 = vadd.f32 %v13723_v9, %v13722_v13  ;;  %v8263_v9 = vmul.f32 %v5015_v52, %v199_v49  ;;  %v8264_v39 = vmul.f32 %v5032_v21, %v200_v18  ;;  %v5051_v49 = vcombine.low %v1426_v32, %v1430_v35 }
 0x191   :  { %v13726_v29 = vadd.f32 %v13725_v22, %v13724_v23  ;;  %v5033_v22 = vcombine.low %v1402_v61, %v1406_v62  ;;  %v5034_v23 = vcombine.low %v1410_v63, %v1414_v1  ;;  %v9479_v26 = vcombine.high %v8263_v9, %v8263_v9 }
 0x192   :  { %v9486_v27 = vrot.slane %v8263_v9, %v15268_v20  ;;  %v9496_v52 = vcombine.high %v8264_v39, %v8264_v39  ;;  %v9503_v53 = vrot.slane %v8264_v39, %v15268_v20  ;;  %v5065_v62 = vrot.slane %v5051_v49, %v15268_v20 }
 0x193   :  { %v13728_v34 = vadd.f32 %v13727_v25, %v13726_v29  ;;  %v9478_v25 = vcombine.high %v9476_v10, %v9476_v10  ;;  %v5041_v36 = vrot.slane %v5033_v22, %v15268_v20  ;;  %v5048_v37 = vrot.slane %v5034_v23, %v15268_v20 }
 0x194   :  { %v9493_v40 = vrot.slane %v9479_v26, %v15268_v20  ;;  %v9494_v41 = vcombine.high %v9486_v27, %v9486_v27  ;;  %v13751_v45 = vsel %vm13367_vm0, %v9486_v27, 0.0  ;;  %v9510_v1 = vrot.slane %v9496_v52, %v15268_v20 }
 0x195   :  { %v13730_v43 = vadd.f32 %v13729_v33, %v13728_v34  ;;  %v13747_v33 = vsel %vm13367_vm0, %v9476_v10, 0.0  ;;  %v64_v34 = vld [vmem:[#allocation3 + $0xc8] sm:$0xff]  ;;  %v13749_v42 = vsel %vm13367_vm0, %v9478_v25, 0.0  ;;  %v9511_v3 = vcombine.high %v9503_v53, %v9503_v53 }
 0x196   :  { %v201_v44 = vunpack.c.l.bf16 %v64_v34  ;;  %v9495_v51 = vcombine.high %v9493_v40, %v9493_v40  ;;  %v13753_v54 = vsel %vm13367_vm0, %v9494_v41, 0.0  ;;  %v202_v9 = vunpack.c.h.bf16 %v64_v34  ;;  %v402_v41 = vld [vmem:[#allocation5 + $0xd8] sm:$0xff] }
 0x197   :  { %v13732_v48 = vadd.f32 %v13731_v38, %v13730_v43  ;;  %v13759_v10 = vsel %vm13367_vm0, %v9503_v53, 0.0  ;;  %v13761_v23 = vsel %vm13367_vm0, %v9511_v3, 0.0  ;;  %v1450_v25 = vrot.slane %v401_v46, %v15260_v14 }
 0x198   :  { %v13757_v7 = vsel %vm13367_vm0, %v9495_v51, 0.0  ;;  %v1454_v26 = vrot.slane %v401_v46, %v15262_v15  ;;  %v1458_v27 = vrot.slane %v401_v46, %v15264_v16  ;;  %v1466_v51 = vrot.slane %v402_v41, %v15248_v2 }
 0x199   :  { %v13734_v55 = vadd.f32 %v13733_v47, %v13732_v48  ;;  %v5049_v47 = vcombine.low %v5041_v36, %v5048_v37  ;;  %v5050_v48 = vcombine.low %v1418_v30, %v1422_v31  ;;  %v1462_v30 = vrot.slane %v401_v46, %v15266_v17 }
 0x19a   :  { %v1470_v52 = vrot.slane %v402_v41, %v15250_v4  ;;  %v1474_v53 = vrot.slane %v402_v41, %v15252_v5 }
 0x19b   :  { %v13736_v60 = vadd.f32 %v13735_v50, %v13734_v55  ;;  %v5058_v61 = vrot.slane %v5050_v48, %v15268_v20 }
 0x19d   :  { %v13738_v8 = vadd.f32 %v13737_v59, %v13736_v60  ;;  %v13755_v59 = vsel %vm13367_vm0, %v9493_v40, 0.0  ;;  %v1446_v60 = vrot.slane %v401_v46, %v15254_v6  ;;  %v5066_v11 = vcombine.low %v5058_v61, %v5065_v62 }
 0x19f   :  { %v13740_v13 = vadd.f32 %v13739_v0, %v13738_v8  ;;  %v8265_v0 = vmul.f32 %v5049_v47, %v201_v44  ;;  %v8266_v34 = vmul.f32 %v5066_v11, %v202_v9  ;;  %v5085_v44 = vcombine.low %v1458_v27, %v1462_v30 }
 0x1a1   :  { %v13742_v24 = vadd.f32 %v13741_v12, %v13740_v13  ;;  %v5067_v12 = vcombine.low %v1434_v56, %v1438_v57  ;;  %v5068_v13 = vcombine.low %v1442_v58, %v1446_v60  ;;  %v9513_v21 = vcombine.high %v8265_v0, %v8265_v0 }
 0x1a2   :  { %v9520_v22 = vrot.slane %v8265_v0, %v15268_v20  ;;  %v9530_v47 = vcombine.high %v8266_v34, %v8266_v34  ;;  %v9537_v48 = vrot.slane %v8266_v34, %v15268_v20  ;;  %v5099_v57 = vrot.slane %v5085_v44, %v15268_v20 }
 0x1a3   :  { %v13744_v29 = vadd.f32 %v13743_v19, %v13742_v24  ;;  %v9512_v19 = vcombine.high %v9510_v1, %v9510_v1  ;;  %v5075_v31 = vrot.slane %v5067_v12, %v15268_v20  ;;  %v5082_v32 = vrot.slane %v5068_v13, %v15268_v20 }
 0x1a4   :  { %v9527_v35 = vrot.slane %v9513_v21, %v15268_v20  ;;  %v9528_v36 = vcombine.high %v9520_v22, %v9520_v22  ;;  %v13767_v40 = vsel %vm13367_vm0, %v9520_v22, 0.0  ;;  %v9544_v60 = vrot.slane %v9530_v47, %v15268_v20 }
 0x1a5   :  { %v13746_v38 = vadd.f32 %v13745_v28, %v13744_v29  ;;  %v13763_v28 = vsel %vm13367_vm0, %v9510_v1, 0.0  ;;  %v65_v29 = vld [vmem:[#allocation3 + $0xd0] sm:$0xff]  ;;  %v13765_v37 = vsel %vm13367_vm0, %v9512_v19, 0.0  ;;  %v9545_v61 = vcombine.high %v9537_v48, %v9537_v48 }
 0x1a6   :  { %v203_v39 = vunpack.c.l.bf16 %v65_v29  ;;  %v9529_v46 = vcombine.high %v9527_v35, %v9527_v35  ;;  %v13769_v49 = vsel %vm13367_vm0, %v9528_v36, 0.0  ;;  %v204_v0 = vunpack.c.h.bf16 %v65_v29  ;;  %v403_v36 = vld [vmem:[#allocation5 + $0xe0] sm:$0xff] }
 0x1a7   :  { %v13748_v43 = vadd.f32 %v13747_v33, %v13746_v38  ;;  %v13775_v1 = vsel %vm13367_vm0, %v9537_v48, 0.0  ;;  %v13777_v13 = vsel %vm13367_vm0, %v9545_v61, 0.0  ;;  %v1482_v19 = vrot.slane %v402_v41, %v15260_v14 }
 0x1a8   :  { %v13773_v62 = vsel %vm13367_vm0, %v9529_v46, 0.0  ;;  %v1486_v21 = vrot.slane %v402_v41, %v15262_v15  ;;  %v1490_v22 = vrot.slane %v402_v41, %v15264_v16  ;;  %v1498_v46 = vrot.slane %v403_v36, %v15248_v2 }
 0x1a9   :  { %v13750_v50 = vadd.f32 %v13749_v42, %v13748_v43  ;;  %v5083_v42 = vcombine.low %v5075_v31, %v5082_v32  ;;  %v5084_v43 = vcombine.low %v1450_v25, %v1454_v26  ;;  %v1494_v25 = vrot.slane %v402_v41, %v15266_v17 }
 0x1aa   :  { %v1502_v47 = vrot.slane %v403_v36, %v15250_v4  ;;  %v1506_v48 = vrot.slane %v403_v36, %v15252_v5 }
 0x1ab   :  { %v13752_v55 = vadd.f32 %v13751_v45, %v13750_v50  ;;  %v5092_v56 = vrot.slane %v5084_v43, %v15268_v20 }
 0x1ad   :  { %v13754_v63 = vadd.f32 %v13753_v54, %v13752_v55  ;;  %v13771_v54 = vsel %vm13367_vm0, %v9527_v35, 0.0  ;;  %v1478_v55 = vrot.slane %v402_v41, %v15254_v6  ;;  %v5100_v3 = vcombine.low %v5092_v56, %v5099_v57 }
 0x1af   :  { %v13756_v8 = vadd.f32 %v13755_v59, %v13754_v63  ;;  %v8267_v59 = vmul.f32 %v5083_v42, %v203_v39  ;;  %v8268_v29 = vmul.f32 %v5100_v3, %v204_v0  ;;  %v5119_v39 = vcombine.low %v1490_v22, %v1494_v25 }
 0x1b1   :  { %v13758_v18 = vadd.f32 %v13757_v7, %v13756_v8  ;;  %v5101_v7 = vcombine.low %v1466_v51, %v1470_v52  ;;  %v5102_v8 = vcombine.low %v1474_v53, %v1478_v55  ;;  %v9547_v11 = vcombine.high %v8267_v59, %v8267_v59 }
 0x1b2   :  { %v9554_v12 = vrot.slane %v8267_v59, %v15268_v20  ;;  %v9564_v42 = vcombine.high %v8268_v29, %v8268_v29  ;;  %v9571_v43 = vrot.slane %v8268_v29, %v15268_v20  ;;  %v5133_v52 = vrot.slane %v5119_v39, %v15268_v20 }
 0x1b3   :  { %v13760_v24 = vadd.f32 %v13759_v10, %v13758_v18  ;;  %v9546_v10 = vcombine.high %v9544_v60, %v9544_v60  ;;  %v5109_v26 = vrot.slane %v5101_v7, %v15268_v20  ;;  %v5116_v27 = vrot.slane %v5102_v8, %v15268_v20 }
 0x1b4   :  { %v9561_v30 = vrot.slane %v9547_v11, %v15268_v20  ;;  %v9562_v31 = vcombine.high %v9554_v12, %v9554_v12  ;;  %v13783_v35 = vsel %vm13367_vm0, %v9554_v12, 0.0  ;;  %v9578_v55 = vrot.slane %v9564_v42, %v15268_v20 }
 0x1b5   :  { %v13762_v33 = vadd.f32 %v13761_v23, %v13760_v24  ;;  %v13779_v23 = vsel %vm13367_vm0, %v9544_v60, 0.0  ;;  %v66_v24 = vld [vmem:[#allocation3 + $0xd8] sm:$0xff]  ;;  %v13781_v32 = vsel %vm13367_vm0, %v9546_v10, 0.0  ;;  %v9579_v56 = vcombine.high %v9571_v43, %v9571_v43 }
 0x1b6   :  { %v205_v34 = vunpack.c.l.bf16 %v66_v24  ;;  %v9563_v41 = vcombine.high %v9561_v30, %v9561_v30  ;;  %v13785_v44 = vsel %vm13367_vm0, %v9562_v31, 0.0  ;;  %v206_v59 = vunpack.c.h.bf16 %v66_v24  ;;  %v404_v31 = vld [vmem:[#allocation5 + $0xe8] sm:$0xff] }
 0x1b7   :  { %v13764_v38 = vadd.f32 %v13763_v28, %v13762_v33  ;;  %v13791_v60 = vsel %vm13367_vm0, %v9571_v43, 0.0  ;;  %v13793_v8 = vsel %vm13367_vm0, %v9579_v56, 0.0  ;;  %v1514_v10 = vrot.slane %v403_v36, %v15260_v14 }
 0x1b8   :  { %v13789_v57 = vsel %vm13367_vm0, %v9563_v41, 0.0  ;;  %v1518_v11 = vrot.slane %v403_v36, %v15262_v15  ;;  %v1522_v12 = vrot.slane %v403_v36, %v15264_v16  ;;  %v1530_v41 = vrot.slane %v404_v31, %v15248_v2 }
 0x1b9   :  { %v13766_v45 = vadd.f32 %v13765_v37, %v13764_v38  ;;  %v5117_v37 = vcombine.low %v5109_v26, %v5116_v27  ;;  %v5118_v38 = vcombine.low %v1482_v19, %v1486_v21  ;;  %v1526_v19 = vrot.slane %v403_v36, %v15266_v17 }
 0x1ba   :  { %v1534_v42 = vrot.slane %v404_v31, %v15250_v4  ;;  %v1538_v43 = vrot.slane %v404_v31, %v15252_v5 }
 0x1bb   :  { %v13768_v50 = vadd.f32 %v13767_v40, %v13766_v45  ;;  %v5126_v51 = vrot.slane %v5118_v38, %v15268_v20 }
 0x1bd   :  { %v13770_v58 = vadd.f32 %v13769_v49, %v13768_v50  ;;  %v13787_v49 = vsel %vm13367_vm0, %v9561_v30, 0.0  ;;  %v1510_v50 = vrot.slane %v403_v36, %v15254_v6  ;;  %v5134_v61 = vcombine.low %v5126_v51, %v5133_v52 }
 0x1bf   :  { %v13772_v63 = vadd.f32 %v13771_v54, %v13770_v58  ;;  %v8269_v54 = vmul.f32 %v5117_v37, %v205_v34  ;;  %v8270_v24 = vmul.f32 %v5134_v61, %v206_v59  ;;  %v5153_v34 = vcombine.low %v1522_v12, %v1526_v19 }
 0x1c1   :  { %v13774_v9 = vadd.f32 %v13773_v62, %v13772_v63  ;;  %v5135_v62 = vcombine.low %v1498_v46, %v1502_v47  ;;  %v5136_v63 = vcombine.low %v1506_v48, %v1510_v50  ;;  %v9581_v3 = vcombine.high %v8269_v54, %v8269_v54 }
 0x1c2   :  { %v9588_v7 = vrot.slane %v8269_v54, %v15268_v20  ;;  %v9598_v37 = vcombine.high %v8270_v24, %v8270_v24  ;;  %v9605_v38 = vrot.slane %v8270_v24, %v15268_v20  ;;  %v5167_v47 = vrot.slane %v5153_v34, %v15268_v20 }
 0x1c3   :  { %v13776_v18 = vadd.f32 %v13775_v1, %v13774_v9  ;;  %v9580_v1 = vcombine.high %v9578_v55, %v9578_v55  ;;  %v5143_v21 = vrot.slane %v5135_v62, %v15268_v20  ;;  %v5150_v22 = vrot.slane %v5136_v63, %v15268_v20 }
 0x1c4   :  { %v9595_v25 = vrot.slane %v9581_v3, %v15268_v20  ;;  %v9596_v26 = vcombine.high %v9588_v7, %v9588_v7  ;;  %v13799_v30 = vsel %vm13367_vm0, %v9588_v7, 0.0  ;;  %v9612_v50 = vrot.slane %v9598_v37, %v15268_v20 }
 0x1c5   :  { %v13778_v28 = vadd.f32 %v13777_v13, %v13776_v18  ;;  %v13795_v13 = vsel %vm13367_vm0, %v9578_v55, 0.0  ;;  %v67_v18 = vld [vmem:[#allocation3 + $0xe0] sm:$0xff]  ;;  %v13797_v27 = vsel %vm13367_vm0, %v9580_v1, 0.0  ;;  %v9613_v51 = vcombine.high %v9605_v38, %v9605_v38 }
 0x1c6   :  { %v207_v29 = vunpack.c.l.bf16 %v67_v18  ;;  %v9597_v36 = vcombine.high %v9595_v25, %v9595_v25  ;;  %v13801_v39 = vsel %vm13367_vm0, %v9596_v26, 0.0  ;;  %v208_v54 = vunpack.c.h.bf16 %v67_v18  ;;  %v405_v26 = vld [vmem:[#allocation5 + $0xf0] sm:$0xff] }
 0x1c7   :  { %v13780_v33 = vadd.f32 %v13779_v23, %v13778_v28  ;;  %v13807_v55 = vsel %vm13367_vm0, %v9605_v38, 0.0  ;;  %v13809_v63 = vsel %vm13367_vm0, %v9613_v51, 0.0  ;;  %v1546_v1 = vrot.slane %v404_v31, %v15260_v14 }
 0x1c8   :  { %v13805_v52 = vsel %vm13367_vm0, %v9597_v36, 0.0  ;;  %v1550_v3 = vrot.slane %v404_v31, %v15262_v15  ;;  %v1554_v7 = vrot.slane %v404_v31, %v15264_v16  ;;  %v1562_v36 = vrot.slane %v405_v26, %v15248_v2 }
 0x1c9   :  { %v13782_v40 = vadd.f32 %v13781_v32, %v13780_v33  ;;  %v5151_v32 = vcombine.low %v5143_v21, %v5150_v22  ;;  %v5152_v33 = vcombine.low %v1514_v10, %v1518_v11  ;;  %v1558_v10 = vrot.slane %v404_v31, %v15266_v17 }
 0x1ca   :  { %v1566_v37 = vrot.slane %v405_v26, %v15250_v4  ;;  %v1570_v38 = vrot.slane %v405_v26, %v15252_v5 }
 0x1cb   :  { %v13784_v45 = vadd.f32 %v13783_v35, %v13782_v40  ;;  %v5160_v46 = vrot.slane %v5152_v33, %v15268_v20 }
 0x1cd   :  { %v13786_v53 = vadd.f32 %v13785_v44, %v13784_v45  ;;  %v13803_v44 = vsel %vm13367_vm0, %v9595_v25, 0.0  ;;  %v1542_v45 = vrot.slane %v404_v31, %v15254_v6  ;;  %v5168_v56 = vcombine.low %v5160_v46, %v5167_v47 }
 0x1cf   :  { %v13788_v58 = vadd.f32 %v13787_v49, %v13786_v53  ;;  %v8271_v49 = vmul.f32 %v5151_v32, %v207_v29  ;;  %v8272_v18 = vmul.f32 %v5168_v56, %v208_v54  ;;  %v5187_v29 = vcombine.low %v1554_v7, %v1558_v10 }
 0x1d1   :  { %v13790_v0 = vadd.f32 %v13789_v57, %v13788_v58  ;;  %v5169_v57 = vcombine.low %v1530_v41, %v1534_v42  ;;  %v5170_v58 = vcombine.low %v1538_v43, %v1542_v45  ;;  %v9615_v61 = vcombine.high %v8271_v49, %v8271_v49 }
 0x1d2   :  { %v9622_v62 = vrot.slane %v8271_v49, %v15268_v20  ;;  %v9632_v32 = vcombine.high %v8272_v18, %v8272_v18  ;;  %v9639_v33 = vrot.slane %v8272_v18, %v15268_v20  ;;  %v5201_v42 = vrot.slane %v5187_v29, %v15268_v20 }
 0x1d3   :  { %v13792_v9 = vadd.f32 %v13791_v60, %v13790_v0  ;;  %v9614_v60 = vcombine.high %v9612_v50, %v9612_v50  ;;  %v5177_v11 = vrot.slane %v5169_v57, %v15268_v20  ;;  %v5184_v12 = vrot.slane %v5170_v58, %v15268_v20 }
 0x1d4   :  { %v9629_v19 = vrot.slane %v9615_v61, %v15268_v20  ;;  %v9630_v21 = vcombine.high %v9622_v62, %v9622_v62  ;;  %v13815_v25 = vsel %vm13367_vm0, %v9622_v62, 0.0  ;;  %v9646_v45 = vrot.slane %v9632_v32, %v15268_v20 }
 0x1d5   :  { %v13794_v23 = vadd.f32 %v13793_v8, %v13792_v9  ;;  %v13811_v8 = vsel %vm13367_vm0, %v9612_v50, 0.0  ;;  %v68_v9 = vld [vmem:[#allocation3 + $0xe8] sm:$0xff]  ;;  %v13813_v22 = vsel %vm13367_vm0, %v9614_v60, 0.0  ;;  %v9647_v46 = vcombine.high %v9639_v33, %v9639_v33 }
 0x1d6   :  { %v209_v24 = vunpack.c.l.bf16 %v68_v9  ;;  %v9631_v31 = vcombine.high %v9629_v19, %v9629_v19  ;;  %v13817_v34 = vsel %vm13367_vm0, %v9630_v21, 0.0  ;;  %v210_v49 = vunpack.c.h.bf16 %v68_v9  ;;  %v406_v21 = vld [vmem:[#allocation5 + $0xf8] sm:$0xff] }
 0x1d7   :  { %v13796_v28 = vadd.f32 %v13795_v13, %v13794_v23  ;;  %v13823_v50 = vsel %vm13367_vm0, %v9639_v33, 0.0  ;;  %v13825_v58 = vsel %vm13367_vm0, %v9647_v46, 0.0  ;;  %v1578_v60 = vrot.slane %v405_v26, %v15260_v14 }
 0x1d8   :  { %v13821_v47 = vsel %vm13367_vm0, %v9631_v31, 0.0  ;;  %v1582_v61 = vrot.slane %v405_v26, %v15262_v15  ;;  %v1586_v62 = vrot.slane %v405_v26, %v15264_v16  ;;  %v1594_v31 = vrot.slane %v406_v21, %v15248_v2 }
 0x1d9   :  { %v13798_v35 = vadd.f32 %v13797_v27, %v13796_v28  ;;  %v5185_v27 = vcombine.low %v5177_v11, %v5184_v12  ;;  %v5186_v28 = vcombine.low %v1546_v1, %v1550_v3  ;;  %v1590_v1 = vrot.slane %v405_v26, %v15266_v17 }
 0x1da   :  { %v1598_v32 = vrot.slane %v406_v21, %v15250_v4  ;;  %v1602_v33 = vrot.slane %v406_v21, %v15252_v5 }
 0x1db   :  { %v13800_v40 = vadd.f32 %v13799_v30, %v13798_v35  ;;  %v5194_v41 = vrot.slane %v5186_v28, %v15268_v20 }
 0x1dd   :  { %v13802_v48 = vadd.f32 %v13801_v39, %v13800_v40  ;;  %v13819_v39 = vsel %vm13367_vm0, %v9629_v19, 0.0  ;;  %v1574_v40 = vrot.slane %v405_v26, %v15254_v6  ;;  %v5202_v51 = vcombine.low %v5194_v41, %v5201_v42 }
 0x1df   :  { %v13804_v53 = vadd.f32 %v13803_v44, %v13802_v48  ;;  %v8273_v44 = vmul.f32 %v5185_v27, %v209_v24  ;;  %v8274_v9 = vmul.f32 %v5202_v51, %v210_v49  ;;  %v5221_v24 = vcombine.low %v1586_v62, %v1590_v1 }
 0x1e1   :  { %v13806_v59 = vadd.f32 %v13805_v52, %v13804_v53  ;;  %v5203_v52 = vcombine.low %v1562_v36, %v1566_v37  ;;  %v5204_v53 = vcombine.low %v1570_v38, %v1574_v40  ;;  %v9649_v56 = vcombine.high %v8273_v44, %v8273_v44 }
 0x1e2   :  { %v9656_v57 = vrot.slane %v8273_v44, %v15268_v20  ;;  %v9666_v27 = vcombine.high %v8274_v9, %v8274_v9  ;;  %v9673_v28 = vrot.slane %v8274_v9, %v15268_v20  ;;  %v5235_v37 = vrot.slane %v5221_v24, %v15268_v20 }
 0x1e3   :  { %v13808_v0 = vadd.f32 %v13807_v55, %v13806_v59  ;;  %v9648_v55 = vcombine.high %v9646_v45, %v9646_v45  ;;  %v5211_v3 = vrot.slane %v5203_v52, %v15268_v20  ;;  %v5218_v7 = vrot.slane %v5204_v53, %v15268_v20 }
 0x1e4   :  { %v9663_v10 = vrot.slane %v9649_v56, %v15268_v20  ;;  %v9664_v11 = vcombine.high %v9656_v57, %v9656_v57  ;;  %v13831_v19 = vsel %vm13367_vm0, %v9656_v57, 0.0  ;;  %v9680_v40 = vrot.slane %v9666_v27, %v15268_v20 }
 0x1e5   :  { %v13810_v13 = vadd.f32 %v13809_v63, %v13808_v0  ;;  %v13827_v63 = vsel %vm13367_vm0, %v9646_v45, 0.0  ;;  %v69_v0 = vld [vmem:[#allocation3 + $0xf0] sm:$0xff]  ;;  %v13829_v12 = vsel %vm13367_vm0, %v9648_v55, 0.0  ;;  %v9681_v41 = vcombine.high %v9673_v28, %v9673_v28 }
 0x1e6   :  { %v211_v18 = vunpack.c.l.bf16 %v69_v0  ;;  %v9665_v26 = vcombine.high %v9663_v10, %v9663_v10  ;;  %v13833_v29 = vsel %vm13367_vm0, %v9664_v11, 0.0  ;;  %v212_v44 = vunpack.c.h.bf16 %v69_v0  ;;  %v407_v11 = vld [vmem:[#allocation5 + $0x100] sm:$0xff] }
 0x1e7   :  { %v13812_v23 = vadd.f32 %v13811_v8, %v13810_v13  ;;  %v13839_v45 = vsel %vm13367_vm0, %v9673_v28, 0.0  ;;  %v13841_v53 = vsel %vm13367_vm0, %v9681_v41, 0.0  ;;  %v1610_v55 = vrot.slane %v406_v21, %v15260_v14 }
 0x1e8   :  { %v13837_v42 = vsel %vm13367_vm0, %v9665_v26, 0.0  ;;  %v1614_v56 = vrot.slane %v406_v21, %v15262_v15  ;;  %v1618_v57 = vrot.slane %v406_v21, %v15264_v16  ;;  %v1626_v26 = vrot.slane %v407_v11, %v15248_v2 }
 0x1e9   :  { %v13814_v30 = vadd.f32 %v13813_v22, %v13812_v23  ;;  %v5219_v22 = vcombine.low %v5211_v3, %v5218_v7  ;;  %v5220_v23 = vcombine.low %v1578_v60, %v1582_v61  ;;  %v1622_v60 = vrot.slane %v406_v21, %v15266_v17 }
 0x1ea   :  { %v1630_v27 = vrot.slane %v407_v11, %v15250_v4  ;;  %v1634_v28 = vrot.slane %v407_v11, %v15252_v5 }
 0x1eb   :  { %v13816_v35 = vadd.f32 %v13815_v25, %v13814_v30  ;;  %v5228_v36 = vrot.slane %v5220_v23, %v15268_v20 }
 0x1ed   :  { %v13818_v43 = vadd.f32 %v13817_v34, %v13816_v35  ;;  %v13835_v34 = vsel %vm13367_vm0, %v9663_v10, 0.0  ;;  %v1606_v35 = vrot.slane %v406_v21, %v15254_v6  ;;  %v5236_v46 = vcombine.low %v5228_v36, %v5235_v37 }
 0x1ef   :  { %v13820_v48 = vadd.f32 %v13819_v39, %v13818_v43  ;;  %v8275_v39 = vmul.f32 %v5219_v22, %v211_v18  ;;  %v8276_v0 = vmul.f32 %v5236_v46, %v212_v44  ;;  %v5255_v18 = vcombine.low %v1618_v57, %v1622_v60 }
 0x1f1   :  { %v13822_v54 = vadd.f32 %v13821_v47, %v13820_v48  ;;  %v5237_v47 = vcombine.low %v1594_v31, %v1598_v32  ;;  %v5238_v48 = vcombine.low %v1602_v33, %v1606_v35  ;;  %v9683_v51 = vcombine.high %v8275_v39, %v8275_v39 }
 0x1f2   :  { %v9690_v52 = vrot.slane %v8275_v39, %v15268_v20  ;;  %v9700_v22 = vcombine.high %v8276_v0, %v8276_v0  ;;  %v9707_v23 = vrot.slane %v8276_v0, %v15268_v20  ;;  %v5269_v32 = vrot.slane %v5255_v18, %v15268_v20 }
 0x1f3   :  { %v13824_v59 = vadd.f32 %v13823_v50, %v13822_v54  ;;  %v9682_v50 = vcombine.high %v9680_v40, %v9680_v40  ;;  %v5245_v61 = vrot.slane %v5237_v47, %v15268_v20  ;;  %v5252_v62 = vrot.slane %v5238_v48, %v15268_v20 }
 0x1f4   :  { %v9697_v1 = vrot.slane %v9683_v51, %v15268_v20  ;;  %v9698_v3 = vcombine.high %v9690_v52, %v9690_v52  ;;  %v13847_v10 = vsel %vm13367_vm0, %v9690_v52, 0.0  ;;  %v9714_v35 = vrot.slane %v9700_v22, %v15268_v20 }
 0x1f5   :  { %v13826_v8 = vadd.f32 %v13825_v58, %v13824_v59  ;;  %v13843_v58 = vsel %vm13367_vm0, %v9680_v40, 0.0  ;;  %v70_v59 = vld [vmem:[#allocation3 + $0xf8] sm:$0xff]  ;;  %v13845_v7 = vsel %vm13367_vm0, %v9682_v50, 0.0  ;;  %v9715_v36 = vcombine.high %v9707_v23, %v9707_v23 }
 0x1f6   :  { %v213_v9 = vunpack.c.l.bf16 %v70_v59  ;;  %v9699_v21 = vcombine.high %v9697_v1, %v9697_v1  ;;  %v13849_v24 = vsel %vm13367_vm0, %v9698_v3, 0.0  ;;  %v214_v39 = vunpack.c.h.bf16 %v70_v59  ;;  %v408_v3 = vld [vmem:[#allocation5 + $0x108] sm:$0xff] }
 0x1f7   :  { %v13828_v13 = vadd.f32 %v13827_v63, %v13826_v8  ;;  %v13855_v40 = vsel %vm13367_vm0, %v9707_v23, 0.0  ;;  %v13857_v48 = vsel %vm13367_vm0, %v9715_v36, 0.0  ;;  %v1642_v50 = vrot.slane %v407_v11, %v15260_v14 }
 0x1f8   :  { %v13853_v37 = vsel %vm13367_vm0, %v9699_v21, 0.0  ;;  %v1646_v51 = vrot.slane %v407_v11, %v15262_v15  ;;  %v1650_v52 = vrot.slane %v407_v11, %v15264_v16  ;;  %v1658_v21 = vrot.slane %v408_v3, %v15248_v2 }
 0x1f9   :  { %v13830_v25 = vadd.f32 %v13829_v12, %v13828_v13  ;;  %v5253_v12 = vcombine.low %v5245_v61, %v5252_v62  ;;  %v5254_v13 = vcombine.low %v1610_v55, %v1614_v56  ;;  %v1654_v55 = vrot.slane %v407_v11, %v15266_v17 }
 0x1fa   :  { %v1662_v22 = vrot.slane %v408_v3, %v15250_v4  ;;  %v1666_v23 = vrot.slane %v408_v3, %v15252_v5 }
 0x1fb   :  { %v13832_v30 = vadd.f32 %v13831_v19, %v13830_v25  ;;  %v5262_v31 = vrot.slane %v5254_v13, %v15268_v20 }
 0x1fd   :  { %v13834_v38 = vadd.f32 %v13833_v29, %v13832_v30  ;;  %v13851_v29 = vsel %vm13367_vm0, %v9697_v1, 0.0  ;;  %v1638_v30 = vrot.slane %v407_v11, %v15254_v6  ;;  %v5270_v41 = vcombine.low %v5262_v31, %v5269_v32 }
 0x1ff   :  { %v13836_v43 = vadd.f32 %v13835_v34, %v13834_v38  ;;  %v8277_v34 = vmul.f32 %v5253_v12, %v213_v9  ;;  %v8278_v59 = vmul.f32 %v5270_v41, %v214_v39  ;;  %v5289_v9 = vcombine.low %v1650_v52, %v1654_v55 }
 0x201   :  { %v13838_v49 = vadd.f32 %v13837_v42, %v13836_v43  ;;  %v5271_v42 = vcombine.low %v1626_v26, %v1630_v27  ;;  %v5272_v43 = vcombine.low %v1634_v28, %v1638_v30  ;;  %v9717_v46 = vcombine.high %v8277_v34, %v8277_v34 }
 0x202   :  { %v9724_v47 = vrot.slane %v8277_v34, %v15268_v20  ;;  %v9734_v12 = vcombine.high %v8278_v59, %v8278_v59  ;;  %v9741_v13 = vrot.slane %v8278_v59, %v15268_v20  ;;  %v5303_v27 = vrot.slane %v5289_v9, %v15268_v20 }
 0x203   :  { %v13840_v54 = vadd.f32 %v13839_v45, %v13838_v49  ;;  %v9716_v45 = vcombine.high %v9714_v35, %v9714_v35  ;;  %v5279_v56 = vrot.slane %v5271_v42, %v15268_v20  ;;  %v5286_v57 = vrot.slane %v5272_v43, %v15268_v20 }
 0x204   :  { %v9731_v60 = vrot.slane %v9717_v46, %v15268_v20  ;;  %v9732_v61 = vcombine.high %v9724_v47, %v9724_v47  ;;  %v13863_v1 = vsel %vm13367_vm0, %v9724_v47, 0.0  ;;  %v9748_v30 = vrot.slane %v9734_v12, %v15268_v20 }
 0x205   :  { %v13842_v63 = vadd.f32 %v13841_v53, %v13840_v54  ;;  %v13859_v53 = vsel %vm13367_vm0, %v9714_v35, 0.0  ;;  %v71_v54 = vld [vmem:[#allocation3 + $0x100] sm:$0xff]  ;;  %v13861_v62 = vsel %vm13367_vm0, %v9716_v45, 0.0  ;;  %v9749_v31 = vcombine.high %v9741_v13, %v9741_v13 }
 0x206   :  { %v215_v0 = vunpack.c.l.bf16 %v71_v54  ;;  %v9733_v11 = vcombine.high %v9731_v60, %v9731_v60  ;;  %v13865_v18 = vsel %vm13367_vm0, %v9732_v61, 0.0  ;;  %v216_v34 = vunpack.c.h.bf16 %v71_v54  ;;  %v409_v61 = vld [vmem:[#allocation5 + $0x110] sm:$0xff] }
 0x207   :  { %v13844_v8 = vadd.f32 %v13843_v58, %v13842_v63  ;;  %v13871_v35 = vsel %vm13367_vm0, %v9741_v13, 0.0  ;;  %v13873_v43 = vsel %vm13367_vm0, %v9749_v31, 0.0  ;;  %v1674_v45 = vrot.slane %v408_v3, %v15260_v14 }
 0x208   :  { %v13869_v32 = vsel %vm13367_vm0, %v9733_v11, 0.0  ;;  %v1678_v46 = vrot.slane %v408_v3, %v15262_v15  ;;  %v1682_v47 = vrot.slane %v408_v3, %v15264_v16  ;;  %v1690_v11 = vrot.slane %v409_v61, %v15248_v2 }
 0x209   :  { %v13846_v19 = vadd.f32 %v13845_v7, %v13844_v8  ;;  %v5287_v7 = vcombine.low %v5279_v56, %v5286_v57  ;;  %v5288_v8 = vcombine.low %v1642_v50, %v1646_v51  ;;  %v1686_v50 = vrot.slane %v408_v3, %v15266_v17 }
 0x20a   :  { %v1694_v12 = vrot.slane %v409_v61, %v15250_v4  ;;  %v1698_v13 = vrot.slane %v409_v61, %v15252_v5 }
 0x20b   :  { %v13848_v25 = vadd.f32 %v13847_v10, %v13846_v19  ;;  %v5296_v26 = vrot.slane %v5288_v8, %v15268_v20 }
 0x20d   :  { %v13850_v33 = vadd.f32 %v13849_v24, %v13848_v25  ;;  %v13867_v24 = vsel %vm13367_vm0, %v9731_v60, 0.0  ;;  %v1670_v25 = vrot.slane %v408_v3, %v15254_v6  ;;  %v5304_v36 = vcombine.low %v5296_v26, %v5303_v27 }
 0x20f   :  { %v13852_v38 = vadd.f32 %v13851_v29, %v13850_v33  ;;  %v8279_v29 = vmul.f32 %v5287_v7, %v215_v0  ;;  %v8280_v54 = vmul.f32 %v5304_v36, %v216_v34  ;;  %v5323_v0 = vcombine.low %v1682_v47, %v1686_v50 }
 0x211   :  { %v13854_v44 = vadd.f32 %v13853_v37, %v13852_v38  ;;  %v5305_v37 = vcombine.low %v1658_v21, %v1662_v22  ;;  %v5306_v38 = vcombine.low %v1666_v23, %v1670_v25  ;;  %v9751_v41 = vcombine.high %v8279_v29, %v8279_v29 }
 0x212   :  { %v9758_v42 = vrot.slane %v8279_v29, %v15268_v20  ;;  %v9768_v7 = vcombine.high %v8280_v54, %v8280_v54  ;;  %v9775_v8 = vrot.slane %v8280_v54, %v15268_v20  ;;  %v5337_v22 = vrot.slane %v5323_v0, %v15268_v20 }
 0x213   :  { %v13856_v49 = vadd.f32 %v13855_v40, %v13854_v44  ;;  %v9750_v40 = vcombine.high %v9748_v30, %v9748_v30  ;;  %v5313_v51 = vrot.slane %v5305_v37, %v15268_v20  ;;  %v5320_v52 = vrot.slane %v5306_v38, %v15268_v20 }
 0x214   :  { %v9765_v55 = vrot.slane %v9751_v41, %v15268_v20  ;;  %v9766_v56 = vcombine.high %v9758_v42, %v9758_v42  ;;  %v13879_v60 = vsel %vm13367_vm0, %v9758_v42, 0.0  ;;  %v9782_v25 = vrot.slane %v9768_v7, %v15268_v20 }
 0x215   :  { %v13858_v58 = vadd.f32 %v13857_v48, %v13856_v49  ;;  %v13875_v48 = vsel %vm13367_vm0, %v9748_v30, 0.0  ;;  %v72_v49 = vld [vmem:[#allocation3 + $0x108] sm:$0xff]  ;;  %v13877_v57 = vsel %vm13367_vm0, %v9750_v40, 0.0  ;;  %v9783_v26 = vcombine.high %v9775_v8, %v9775_v8 }
 0x216   :  { %v217_v59 = vunpack.c.l.bf16 %v72_v49  ;;  %v9767_v3 = vcombine.high %v9765_v55, %v9765_v55  ;;  %v13881_v9 = vsel %vm13367_vm0, %v9766_v56, 0.0  ;;  %v218_v29 = vunpack.c.h.bf16 %v72_v49  ;;  %v410_v56 = vld [vmem:[#allocation5 + $0x118] sm:$0xff] }
 0x217   :  { %v13860_v63 = vadd.f32 %v13859_v53, %v13858_v58  ;;  %v13887_v30 = vsel %vm13367_vm0, %v9775_v8, 0.0  ;;  %v13889_v38 = vsel %vm13367_vm0, %v9783_v26, 0.0  ;;  %v1706_v40 = vrot.slane %v409_v61, %v15260_v14 }
 0x218   :  { %v13885_v27 = vsel %vm13367_vm0, %v9767_v3, 0.0  ;;  %v1710_v41 = vrot.slane %v409_v61, %v15262_v15  ;;  %v1714_v42 = vrot.slane %v409_v61, %v15264_v16  ;;  %v1722_v3 = vrot.slane %v410_v56, %v15248_v2 }
 0x219   :  { %v13862_v10 = vadd.f32 %v13861_v62, %v13860_v63  ;;  %v5321_v62 = vcombine.low %v5313_v51, %v5320_v52  ;;  %v5322_v63 = vcombine.low %v1674_v45, %v1678_v46  ;;  %v1718_v45 = vrot.slane %v409_v61, %v15266_v17 }
 0x21a   :  { %v1726_v7 = vrot.slane %v410_v56, %v15250_v4  ;;  %v1730_v8 = vrot.slane %v410_v56, %v15252_v5 }
 0x21b   :  { %v13864_v19 = vadd.f32 %v13863_v1, %v13862_v10  ;;  %v5330_v21 = vrot.slane %v5322_v63, %v15268_v20 }
 0x21d   :  { %v13866_v28 = vadd.f32 %v13865_v18, %v13864_v19  ;;  %v13883_v18 = vsel %vm13367_vm0, %v9765_v55, 0.0  ;;  %v1702_v19 = vrot.slane %v409_v61, %v15254_v6  ;;  %v5338_v31 = vcombine.low %v5330_v21, %v5337_v22 }
 0x21f   :  { %v13868_v33 = vadd.f32 %v13867_v24, %v13866_v28  ;;  %v8281_v24 = vmul.f32 %v5321_v62, %v217_v59  ;;  %v8282_v49 = vmul.f32 %v5338_v31, %v218_v29  ;;  %v5357_v59 = vcombine.low %v1714_v42, %v1718_v45 }
 0x221   :  { %v13870_v39 = vadd.f32 %v13869_v32, %v13868_v33  ;;  %v5339_v32 = vcombine.low %v1690_v11, %v1694_v12  ;;  %v5340_v33 = vcombine.low %v1698_v13, %v1702_v19  ;;  %v9785_v36 = vcombine.high %v8281_v24, %v8281_v24 }
 0x222   :  { %v9792_v37 = vrot.slane %v8281_v24, %v15268_v20  ;;  %v9802_v62 = vcombine.high %v8282_v49, %v8282_v49  ;;  %v9809_v63 = vrot.slane %v8282_v49, %v15268_v20  ;;  %v5371_v12 = vrot.slane %v5357_v59, %v15268_v20 }
 0x223   :  { %v13872_v44 = vadd.f32 %v13871_v35, %v13870_v39  ;;  %v9784_v35 = vcombine.high %v9782_v25, %v9782_v25  ;;  %v5347_v46 = vrot.slane %v5339_v32, %v15268_v20  ;;  %v5354_v47 = vrot.slane %v5340_v33, %v15268_v20 }
 0x224   :  { %v9799_v50 = vrot.slane %v9785_v36, %v15268_v20  ;;  %v9800_v51 = vcombine.high %v9792_v37, %v9792_v37  ;;  %v13895_v55 = vsel %vm13367_vm0, %v9792_v37, 0.0  ;;  %v9816_v19 = vrot.slane %v9802_v62, %v15268_v20 }
 0x225   :  { %v13874_v53 = vadd.f32 %v13873_v43, %v13872_v44  ;;  %v13891_v43 = vsel %vm13367_vm0, %v9782_v25, 0.0  ;;  %v73_v44 = vld [vmem:[#allocation3 + $0x110] sm:$0xff]  ;;  %v13893_v52 = vsel %vm13367_vm0, %v9784_v35, 0.0  ;;  %v9817_v21 = vcombine.high %v9809_v63, %v9809_v63 }
 0x226   :  { %v219_v54 = vunpack.c.l.bf16 %v73_v44  ;;  %v9801_v61 = vcombine.high %v9799_v50, %v9799_v50  ;;  %v13897_v0 = vsel %vm13367_vm0, %v9800_v51, 0.0  ;;  %v220_v24 = vunpack.c.h.bf16 %v73_v44  ;;  %v411_v51 = vld [vmem:[#allocation5 + $0x120] sm:$0xff] }
 0x227   :  { %v13876_v58 = vadd.f32 %v13875_v48, %v13874_v53  ;;  %v13903_v25 = vsel %vm13367_vm0, %v9809_v63, 0.0  ;;  %v13905_v33 = vsel %vm13367_vm0, %v9817_v21, 0.0  ;;  %v1738_v35 = vrot.slane %v410_v56, %v15260_v14 }
 0x228   :  { %v13901_v22 = vsel %vm13367_vm0, %v9801_v61, 0.0  ;;  %v1742_v36 = vrot.slane %v410_v56, %v15262_v15  ;;  %v1746_v37 = vrot.slane %v410_v56, %v15264_v16  ;;  %v1754_v61 = vrot.slane %v411_v51, %v15248_v2 }
 0x229   :  { %v13878_v1 = vadd.f32 %v13877_v57, %v13876_v58  ;;  %v5355_v57 = vcombine.low %v5347_v46, %v5354_v47  ;;  %v5356_v58 = vcombine.low %v1706_v40, %v1710_v41  ;;  %v1750_v40 = vrot.slane %v410_v56, %v15266_v17 }
 0x22a   :  { %v1758_v62 = vrot.slane %v411_v51, %v15250_v4  ;;  %v1762_v63 = vrot.slane %v411_v51, %v15252_v5 }
 0x22b   :  { %v13880_v10 = vadd.f32 %v13879_v60, %v13878_v1  ;;  %v5364_v11 = vrot.slane %v5356_v58, %v15268_v20 }
 0x22d   :  { %v13882_v23 = vadd.f32 %v13881_v9, %v13880_v10  ;;  %v13899_v9 = vsel %vm13367_vm0, %v9799_v50, 0.0  ;;  %v1734_v10 = vrot.slane %v410_v56, %v15254_v6  ;;  %v5372_v26 = vcombine.low %v5364_v11, %v5371_v12 }
 0x22f   :  { %v13884_v28 = vadd.f32 %v13883_v18, %v13882_v23  ;;  %v8283_v18 = vmul.f32 %v5355_v57, %v219_v54  ;;  %v8284_v44 = vmul.f32 %v5372_v26, %v220_v24  ;;  %v5391_v54 = vcombine.low %v1746_v37, %v1750_v40 }
 0x231   :  { %v13886_v34 = vadd.f32 %v13885_v27, %v13884_v28  ;;  %v5373_v27 = vcombine.low %v1722_v3, %v1726_v7  ;;  %v5374_v28 = vcombine.low %v1730_v8, %v1734_v10  ;;  %v9819_v31 = vcombine.high %v8283_v18, %v8283_v18 }
 0x232   :  { %v9826_v32 = vrot.slane %v8283_v18, %v15268_v20  ;;  %v9836_v57 = vcombine.high %v8284_v44, %v8284_v44  ;;  %v9843_v58 = vrot.slane %v8284_v44, %v15268_v20  ;;  %v5405_v7 = vrot.slane %v5391_v54, %v15268_v20 }
 0x233   :  { %v13888_v39 = vadd.f32 %v13887_v30, %v13886_v34  ;;  %v9818_v30 = vcombine.high %v9816_v19, %v9816_v19  ;;  %v5381_v41 = vrot.slane %v5373_v27, %v15268_v20  ;;  %v5388_v42 = vrot.slane %v5374_v28, %v15268_v20 }
 0x234   :  { %v9833_v45 = vrot.slane %v9819_v31, %v15268_v20  ;;  %v9834_v46 = vcombine.high %v9826_v32, %v9826_v32  ;;  %v13911_v50 = vsel %vm13367_vm0, %v9826_v32, 0.0  ;;  %v9850_v10 = vrot.slane %v9836_v57, %v15268_v20 }
 0x235   :  { %v13890_v48 = vadd.f32 %v13889_v38, %v13888_v39  ;;  %v13907_v38 = vsel %vm13367_vm0, %v9816_v19, 0.0  ;;  %v74_v39 = vld [vmem:[#allocation3 + $0x118] sm:$0xff]  ;;  %v13909_v47 = vsel %vm13367_vm0, %v9818_v30, 0.0  ;;  %v9851_v11 = vcombine.high %v9843_v58, %v9843_v58 }
 0x236   :  { %v221_v49 = vunpack.c.l.bf16 %v74_v39  ;;  %v9835_v56 = vcombine.high %v9833_v45, %v9833_v45  ;;  %v13913_v59 = vsel %vm13367_vm0, %v9834_v46, 0.0  ;;  %v222_v18 = vunpack.c.h.bf16 %v74_v39  ;;  %v412_v46 = vld [vmem:[#allocation5 + $0x128] sm:$0xff] }
 0x237   :  { %v13892_v53 = vadd.f32 %v13891_v43, %v13890_v48  ;;  %v13919_v19 = vsel %vm13367_vm0, %v9843_v58, 0.0  ;;  %v13921_v28 = vsel %vm13367_vm0, %v9851_v11, 0.0  ;;  %v1770_v30 = vrot.slane %v411_v51, %v15260_v14 }
 0x238   :  { %v13917_v12 = vsel %vm13367_vm0, %v9835_v56, 0.0  ;;  %v1774_v31 = vrot.slane %v411_v51, %v15262_v15  ;;  %v1778_v32 = vrot.slane %v411_v51, %v15264_v16  ;;  %v1786_v56 = vrot.slane %v412_v46, %v15248_v2 }
 0x239   :  { %v13894_v60 = vadd.f32 %v13893_v52, %v13892_v53  ;;  %v5389_v52 = vcombine.low %v5381_v41, %v5388_v42  ;;  %v5390_v53 = vcombine.low %v1738_v35, %v1742_v36  ;;  %v1782_v35 = vrot.slane %v411_v51, %v15266_v17 }
 0x23a   :  { %v1790_v57 = vrot.slane %v412_v46, %v15250_v4  ;;  %v1794_v58 = vrot.slane %v412_v46, %v15252_v5 }
 0x23b   :  { %v13896_v1 = vadd.f32 %v13895_v55, %v13894_v60  ;;  %v5398_v3 = vrot.slane %v5390_v53, %v15268_v20 }
 0x23d   :  { %v13898_v13 = vadd.f32 %v13897_v0, %v13896_v1  ;;  %v13915_v0 = vsel %vm13367_vm0, %v9833_v45, 0.0  ;;  %v1766_v1 = vrot.slane %v411_v51, %v15254_v6  ;;  %v5406_v21 = vcombine.low %v5398_v3, %v5405_v7 }
 0x23f   :  { %v13900_v23 = vadd.f32 %v13899_v9, %v13898_v13  ;;  %v8285_v9 = vmul.f32 %v5389_v52, %v221_v49  ;;  %v8286_v39 = vmul.f32 %v5406_v21, %v222_v18  ;;  %v5425_v49 = vcombine.low %v1778_v32, %v1782_v35 }
 0x241   :  { %v13902_v29 = vadd.f32 %v13901_v22, %v13900_v23  ;;  %v5407_v22 = vcombine.low %v1754_v61, %v1758_v62  ;;  %v5408_v23 = vcombine.low %v1762_v63, %v1766_v1  ;;  %v9853_v26 = vcombine.high %v8285_v9, %v8285_v9 }
 0x242   :  { %v9860_v27 = vrot.slane %v8285_v9, %v15268_v20  ;;  %v9870_v52 = vcombine.high %v8286_v39, %v8286_v39  ;;  %v9877_v53 = vrot.slane %v8286_v39, %v15268_v20  ;;  %v5439_v62 = vrot.slane %v5425_v49, %v15268_v20 }
 0x243   :  { %v13904_v34 = vadd.f32 %v13903_v25, %v13902_v29  ;;  %v9852_v25 = vcombine.high %v9850_v10, %v9850_v10  ;;  %v5415_v36 = vrot.slane %v5407_v22, %v15268_v20  ;;  %v5422_v37 = vrot.slane %v5408_v23, %v15268_v20 }
 0x244   :  { %v9867_v40 = vrot.slane %v9853_v26, %v15268_v20  ;;  %v9868_v41 = vcombine.high %v9860_v27, %v9860_v27  ;;  %v13927_v45 = vsel %vm13367_vm0, %v9860_v27, 0.0  ;;  %v9884_v1 = vrot.slane %v9870_v52, %v15268_v20 }
 0x245   :  { %v13906_v43 = vadd.f32 %v13905_v33, %v13904_v34  ;;  %v13923_v33 = vsel %vm13367_vm0, %v9850_v10, 0.0  ;;  %v75_v34 = vld [vmem:[#allocation3 + $0x120] sm:$0xff]  ;;  %v13925_v42 = vsel %vm13367_vm0, %v9852_v25, 0.0  ;;  %v9885_v3 = vcombine.high %v9877_v53, %v9877_v53 }
 0x246   :  { %v223_v44 = vunpack.c.l.bf16 %v75_v34  ;;  %v9869_v51 = vcombine.high %v9867_v40, %v9867_v40  ;;  %v13929_v54 = vsel %vm13367_vm0, %v9868_v41, 0.0  ;;  %v224_v9 = vunpack.c.h.bf16 %v75_v34  ;;  %v413_v41 = vld [vmem:[#allocation5 + $0x130] sm:$0xff] }
 0x247   :  { %v13908_v48 = vadd.f32 %v13907_v38, %v13906_v43  ;;  %v13935_v10 = vsel %vm13367_vm0, %v9877_v53, 0.0  ;;  %v13937_v23 = vsel %vm13367_vm0, %v9885_v3, 0.0  ;;  %v1802_v25 = vrot.slane %v412_v46, %v15260_v14 }
 0x248   :  { %v13933_v7 = vsel %vm13367_vm0, %v9869_v51, 0.0  ;;  %v1806_v26 = vrot.slane %v412_v46, %v15262_v15  ;;  %v1810_v27 = vrot.slane %v412_v46, %v15264_v16  ;;  %v1818_v51 = vrot.slane %v413_v41, %v15248_v2 }
 0x249   :  { %v13910_v55 = vadd.f32 %v13909_v47, %v13908_v48  ;;  %v5423_v47 = vcombine.low %v5415_v36, %v5422_v37  ;;  %v5424_v48 = vcombine.low %v1770_v30, %v1774_v31  ;;  %v1814_v30 = vrot.slane %v412_v46, %v15266_v17 }
 0x24a   :  { %v1822_v52 = vrot.slane %v413_v41, %v15250_v4  ;;  %v1826_v53 = vrot.slane %v413_v41, %v15252_v5 }
 0x24b   :  { %v13912_v60 = vadd.f32 %v13911_v50, %v13910_v55  ;;  %v5432_v61 = vrot.slane %v5424_v48, %v15268_v20 }
 0x24d   :  { %v13914_v8 = vadd.f32 %v13913_v59, %v13912_v60  ;;  %v13931_v59 = vsel %vm13367_vm0, %v9867_v40, 0.0  ;;  %v1798_v60 = vrot.slane %v412_v46, %v15254_v6  ;;  %v5440_v11 = vcombine.low %v5432_v61, %v5439_v62 }
 0x24f   :  { %v13916_v13 = vadd.f32 %v13915_v0, %v13914_v8  ;;  %v8287_v0 = vmul.f32 %v5423_v47, %v223_v44  ;;  %v8288_v34 = vmul.f32 %v5440_v11, %v224_v9  ;;  %v5459_v44 = vcombine.low %v1810_v27, %v1814_v30 }
 0x251   :  { %v13918_v24 = vadd.f32 %v13917_v12, %v13916_v13  ;;  %v5441_v12 = vcombine.low %v1786_v56, %v1790_v57  ;;  %v5442_v13 = vcombine.low %v1794_v58, %v1798_v60  ;;  %v9887_v21 = vcombine.high %v8287_v0, %v8287_v0 }
 0x252   :  { %v9894_v22 = vrot.slane %v8287_v0, %v15268_v20  ;;  %v9904_v47 = vcombine.high %v8288_v34, %v8288_v34  ;;  %v9911_v48 = vrot.slane %v8288_v34, %v15268_v20  ;;  %v5473_v57 = vrot.slane %v5459_v44, %v15268_v20 }
 0x253   :  { %v13920_v29 = vadd.f32 %v13919_v19, %v13918_v24  ;;  %v9886_v19 = vcombine.high %v9884_v1, %v9884_v1  ;;  %v5449_v31 = vrot.slane %v5441_v12, %v15268_v20  ;;  %v5456_v32 = vrot.slane %v5442_v13, %v15268_v20 }
 0x254   :  { %v9901_v35 = vrot.slane %v9887_v21, %v15268_v20  ;;  %v9902_v36 = vcombine.high %v9894_v22, %v9894_v22  ;;  %v13943_v40 = vsel %vm13367_vm0, %v9894_v22, 0.0  ;;  %v9918_v60 = vrot.slane %v9904_v47, %v15268_v20 }
 0x255   :  { %v13922_v38 = vadd.f32 %v13921_v28, %v13920_v29  ;;  %v13939_v28 = vsel %vm13367_vm0, %v9884_v1, 0.0  ;;  %v76_v29 = vld [vmem:[#allocation3 + $0x128] sm:$0xff]  ;;  %v13941_v37 = vsel %vm13367_vm0, %v9886_v19, 0.0  ;;  %v9919_v61 = vcombine.high %v9911_v48, %v9911_v48 }
 0x256   :  { %v225_v39 = vunpack.c.l.bf16 %v76_v29  ;;  %v9903_v46 = vcombine.high %v9901_v35, %v9901_v35  ;;  %v13945_v49 = vsel %vm13367_vm0, %v9902_v36, 0.0  ;;  %v226_v0 = vunpack.c.h.bf16 %v76_v29  ;;  %v414_v36 = vld [vmem:[#allocation5 + $0x138] sm:$0xff] }
 0x257   :  { %v13924_v43 = vadd.f32 %v13923_v33, %v13922_v38  ;;  %v13951_v1 = vsel %vm13367_vm0, %v9911_v48, 0.0  ;;  %v13953_v13 = vsel %vm13367_vm0, %v9919_v61, 0.0  ;;  %v1834_v19 = vrot.slane %v413_v41, %v15260_v14 }
 0x258   :  { %v13949_v62 = vsel %vm13367_vm0, %v9903_v46, 0.0  ;;  %v1838_v21 = vrot.slane %v413_v41, %v15262_v15  ;;  %v1842_v22 = vrot.slane %v413_v41, %v15264_v16  ;;  %v1850_v46 = vrot.slane %v414_v36, %v15248_v2 }
 0x259   :  { %v13926_v50 = vadd.f32 %v13925_v42, %v13924_v43  ;;  %v5457_v42 = vcombine.low %v5449_v31, %v5456_v32  ;;  %v5458_v43 = vcombine.low %v1802_v25, %v1806_v26  ;;  %v1846_v25 = vrot.slane %v413_v41, %v15266_v17 }
 0x25a   :  { %v1854_v47 = vrot.slane %v414_v36, %v15250_v4  ;;  %v1858_v48 = vrot.slane %v414_v36, %v15252_v5 }
 0x25b   :  { %v13928_v55 = vadd.f32 %v13927_v45, %v13926_v50  ;;  %v5466_v56 = vrot.slane %v5458_v43, %v15268_v20 }
 0x25d   :  { %v13930_v63 = vadd.f32 %v13929_v54, %v13928_v55  ;;  %v13947_v54 = vsel %vm13367_vm0, %v9901_v35, 0.0  ;;  %v1830_v55 = vrot.slane %v413_v41, %v15254_v6  ;;  %v5474_v3 = vcombine.low %v5466_v56, %v5473_v57 }
 0x25f   :  { %v13932_v8 = vadd.f32 %v13931_v59, %v13930_v63  ;;  %v8289_v59 = vmul.f32 %v5457_v42, %v225_v39  ;;  %v8290_v29 = vmul.f32 %v5474_v3, %v226_v0  ;;  %v5493_v39 = vcombine.low %v1842_v22, %v1846_v25 }
 0x261   :  { %v13934_v18 = vadd.f32 %v13933_v7, %v13932_v8  ;;  %v5475_v7 = vcombine.low %v1818_v51, %v1822_v52  ;;  %v5476_v8 = vcombine.low %v1826_v53, %v1830_v55  ;;  %v9921_v11 = vcombine.high %v8289_v59, %v8289_v59 }
 0x262   :  { %v9928_v12 = vrot.slane %v8289_v59, %v15268_v20  ;;  %v9938_v42 = vcombine.high %v8290_v29, %v8290_v29  ;;  %v9945_v43 = vrot.slane %v8290_v29, %v15268_v20  ;;  %v5507_v52 = vrot.slane %v5493_v39, %v15268_v20 }
 0x263   :  { %v13936_v24 = vadd.f32 %v13935_v10, %v13934_v18  ;;  %v9920_v10 = vcombine.high %v9918_v60, %v9918_v60  ;;  %v5483_v26 = vrot.slane %v5475_v7, %v15268_v20  ;;  %v5490_v27 = vrot.slane %v5476_v8, %v15268_v20 }
 0x264   :  { %v9935_v30 = vrot.slane %v9921_v11, %v15268_v20  ;;  %v9936_v31 = vcombine.high %v9928_v12, %v9928_v12  ;;  %v13959_v35 = vsel %vm13367_vm0, %v9928_v12, 0.0  ;;  %v9952_v55 = vrot.slane %v9938_v42, %v15268_v20 }
 0x265   :  { %v13938_v33 = vadd.f32 %v13937_v23, %v13936_v24  ;;  %v13955_v23 = vsel %vm13367_vm0, %v9918_v60, 0.0  ;;  %v77_v24 = vld [vmem:[#allocation3 + $0x130] sm:$0xff]  ;;  %v13957_v32 = vsel %vm13367_vm0, %v9920_v10, 0.0  ;;  %v9953_v56 = vcombine.high %v9945_v43, %v9945_v43 }
 0x266   :  { %v227_v34 = vunpack.c.l.bf16 %v77_v24  ;;  %v9937_v41 = vcombine.high %v9935_v30, %v9935_v30  ;;  %v13961_v44 = vsel %vm13367_vm0, %v9936_v31, 0.0  ;;  %v228_v59 = vunpack.c.h.bf16 %v77_v24  ;;  %v415_v31 = vld [vmem:[#allocation5 + $0x140] sm:$0xff] }
 0x267   :  { %v13940_v38 = vadd.f32 %v13939_v28, %v13938_v33  ;;  %v13967_v60 = vsel %vm13367_vm0, %v9945_v43, 0.0  ;;  %v13969_v8 = vsel %vm13367_vm0, %v9953_v56, 0.0  ;;  %v1866_v10 = vrot.slane %v414_v36, %v15260_v14 }
 0x268   :  { %v13965_v57 = vsel %vm13367_vm0, %v9937_v41, 0.0  ;;  %v1870_v11 = vrot.slane %v414_v36, %v15262_v15  ;;  %v1874_v12 = vrot.slane %v414_v36, %v15264_v16  ;;  %v1882_v41 = vrot.slane %v415_v31, %v15248_v2 }
 0x269   :  { %v13942_v45 = vadd.f32 %v13941_v37, %v13940_v38  ;;  %v5491_v37 = vcombine.low %v5483_v26, %v5490_v27  ;;  %v5492_v38 = vcombine.low %v1834_v19, %v1838_v21  ;;  %v1878_v19 = vrot.slane %v414_v36, %v15266_v17 }
 0x26a   :  { %v1886_v42 = vrot.slane %v415_v31, %v15250_v4  ;;  %v1890_v43 = vrot.slane %v415_v31, %v15252_v5 }
 0x26b   :  { %v13944_v50 = vadd.f32 %v13943_v40, %v13942_v45  ;;  %v5500_v51 = vrot.slane %v5492_v38, %v15268_v20 }
 0x26d   :  { %v13946_v58 = vadd.f32 %v13945_v49, %v13944_v50  ;;  %v13963_v49 = vsel %vm13367_vm0, %v9935_v30, 0.0  ;;  %v1862_v50 = vrot.slane %v414_v36, %v15254_v6  ;;  %v5508_v61 = vcombine.low %v5500_v51, %v5507_v52 }
 0x26f   :  { %v13948_v63 = vadd.f32 %v13947_v54, %v13946_v58  ;;  %v8291_v54 = vmul.f32 %v5491_v37, %v227_v34  ;;  %v8292_v24 = vmul.f32 %v5508_v61, %v228_v59  ;;  %v5527_v34 = vcombine.low %v1874_v12, %v1878_v19 }
 0x271   :  { %v13950_v9 = vadd.f32 %v13949_v62, %v13948_v63  ;;  %v5509_v62 = vcombine.low %v1850_v46, %v1854_v47  ;;  %v5510_v63 = vcombine.low %v1858_v48, %v1862_v50  ;;  %v9955_v3 = vcombine.high %v8291_v54, %v8291_v54 }
 0x272   :  { %v9962_v7 = vrot.slane %v8291_v54, %v15268_v20  ;;  %v9972_v37 = vcombine.high %v8292_v24, %v8292_v24  ;;  %v9979_v38 = vrot.slane %v8292_v24, %v15268_v20  ;;  %v5541_v47 = vrot.slane %v5527_v34, %v15268_v20 }
 0x273   :  { %v13952_v18 = vadd.f32 %v13951_v1, %v13950_v9  ;;  %v9954_v1 = vcombine.high %v9952_v55, %v9952_v55  ;;  %v5517_v21 = vrot.slane %v5509_v62, %v15268_v20  ;;  %v5524_v22 = vrot.slane %v5510_v63, %v15268_v20 }
 0x274   :  { %v9969_v25 = vrot.slane %v9955_v3, %v15268_v20  ;;  %v9970_v26 = vcombine.high %v9962_v7, %v9962_v7  ;;  %v13975_v30 = vsel %vm13367_vm0, %v9962_v7, 0.0  ;;  %v9986_v50 = vrot.slane %v9972_v37, %v15268_v20 }
 0x275   :  { %v13954_v28 = vadd.f32 %v13953_v13, %v13952_v18  ;;  %v13971_v13 = vsel %vm13367_vm0, %v9952_v55, 0.0  ;;  %v78_v18 = vld [vmem:[#allocation3 + $0x138] sm:$0xff]  ;;  %v13973_v27 = vsel %vm13367_vm0, %v9954_v1, 0.0  ;;  %v9987_v51 = vcombine.high %v9979_v38, %v9979_v38 }
 0x276   :  { %v229_v29 = vunpack.c.l.bf16 %v78_v18  ;;  %v9971_v36 = vcombine.high %v9969_v25, %v9969_v25  ;;  %v13977_v39 = vsel %vm13367_vm0, %v9970_v26, 0.0  ;;  %v230_v54 = vunpack.c.h.bf16 %v78_v18  ;;  %v416_v26 = vld [vmem:[#allocation5 + $0x148] sm:$0xff] }
 0x277   :  { %v13956_v33 = vadd.f32 %v13955_v23, %v13954_v28  ;;  %v13983_v55 = vsel %vm13367_vm0, %v9979_v38, 0.0  ;;  %v13985_v63 = vsel %vm13367_vm0, %v9987_v51, 0.0  ;;  %v1898_v1 = vrot.slane %v415_v31, %v15260_v14 }
 0x278   :  { %v13981_v52 = vsel %vm13367_vm0, %v9971_v36, 0.0  ;;  %v1902_v3 = vrot.slane %v415_v31, %v15262_v15  ;;  %v1906_v7 = vrot.slane %v415_v31, %v15264_v16  ;;  %v1914_v36 = vrot.slane %v416_v26, %v15248_v2 }
 0x279   :  { %v13958_v40 = vadd.f32 %v13957_v32, %v13956_v33  ;;  %v5525_v32 = vcombine.low %v5517_v21, %v5524_v22  ;;  %v5526_v33 = vcombine.low %v1866_v10, %v1870_v11  ;;  %v1910_v10 = vrot.slane %v415_v31, %v15266_v17 }
 0x27a   :  { %v1918_v37 = vrot.slane %v416_v26, %v15250_v4  ;;  %v1922_v38 = vrot.slane %v416_v26, %v15252_v5 }
 0x27b   :  { %v13960_v45 = vadd.f32 %v13959_v35, %v13958_v40  ;;  %v5534_v46 = vrot.slane %v5526_v33, %v15268_v20 }
 0x27d   :  { %v13962_v53 = vadd.f32 %v13961_v44, %v13960_v45  ;;  %v13979_v44 = vsel %vm13367_vm0, %v9969_v25, 0.0  ;;  %v1894_v45 = vrot.slane %v415_v31, %v15254_v6  ;;  %v5542_v56 = vcombine.low %v5534_v46, %v5541_v47 }
 0x27f   :  { %v13964_v58 = vadd.f32 %v13963_v49, %v13962_v53  ;;  %v8293_v49 = vmul.f32 %v5525_v32, %v229_v29  ;;  %v8294_v18 = vmul.f32 %v5542_v56, %v230_v54  ;;  %v5561_v29 = vcombine.low %v1906_v7, %v1910_v10 }
 0x281   :  { %v13966_v0 = vadd.f32 %v13965_v57, %v13964_v58  ;;  %v5543_v57 = vcombine.low %v1882_v41, %v1886_v42  ;;  %v5544_v58 = vcombine.low %v1890_v43, %v1894_v45  ;;  %v9989_v61 = vcombine.high %v8293_v49, %v8293_v49 }
 0x282   :  { %v9996_v62 = vrot.slane %v8293_v49, %v15268_v20  ;;  %v10006_v32 = vcombine.high %v8294_v18, %v8294_v18  ;;  %v10013_v33 = vrot.slane %v8294_v18, %v15268_v20  ;;  %v5575_v42 = vrot.slane %v5561_v29, %v15268_v20 }
 0x283   :  { %v13968_v9 = vadd.f32 %v13967_v60, %v13966_v0  ;;  %v9988_v60 = vcombine.high %v9986_v50, %v9986_v50  ;;  %v5551_v11 = vrot.slane %v5543_v57, %v15268_v20  ;;  %v5558_v12 = vrot.slane %v5544_v58, %v15268_v20 }
 0x284   :  { %v10003_v19 = vrot.slane %v9989_v61, %v15268_v20  ;;  %v10004_v21 = vcombine.high %v9996_v62, %v9996_v62  ;;  %v13991_v25 = vsel %vm13367_vm0, %v9996_v62, 0.0  ;;  %v10020_v45 = vrot.slane %v10006_v32, %v15268_v20 }
 0x285   :  { %v13970_v23 = vadd.f32 %v13969_v8, %v13968_v9  ;;  %v13987_v8 = vsel %vm13367_vm0, %v9986_v50, 0.0  ;;  %v79_v9 = vld [vmem:[#allocation3 + $0x140] sm:$0xff]  ;;  %v13989_v22 = vsel %vm13367_vm0, %v9988_v60, 0.0  ;;  %v10021_v46 = vcombine.high %v10013_v33, %v10013_v33 }
 0x286   :  { %v231_v24 = vunpack.c.l.bf16 %v79_v9  ;;  %v10005_v31 = vcombine.high %v10003_v19, %v10003_v19  ;;  %v13993_v34 = vsel %vm13367_vm0, %v10004_v21, 0.0  ;;  %v232_v49 = vunpack.c.h.bf16 %v79_v9  ;;  %v417_v21 = vld [vmem:[#allocation5 + $0x150] sm:$0xff] }
 0x287   :  { %v13972_v28 = vadd.f32 %v13971_v13, %v13970_v23  ;;  %v13999_v50 = vsel %vm13367_vm0, %v10013_v33, 0.0  ;;  %v14001_v58 = vsel %vm13367_vm0, %v10021_v46, 0.0  ;;  %v1930_v60 = vrot.slane %v416_v26, %v15260_v14 }
 0x288   :  { %v13997_v47 = vsel %vm13367_vm0, %v10005_v31, 0.0  ;;  %v1934_v61 = vrot.slane %v416_v26, %v15262_v15  ;;  %v1938_v62 = vrot.slane %v416_v26, %v15264_v16  ;;  %v1946_v31 = vrot.slane %v417_v21, %v15248_v2 }
 0x289   :  { %v13974_v35 = vadd.f32 %v13973_v27, %v13972_v28  ;;  %v5559_v27 = vcombine.low %v5551_v11, %v5558_v12  ;;  %v5560_v28 = vcombine.low %v1898_v1, %v1902_v3  ;;  %v1942_v1 = vrot.slane %v416_v26, %v15266_v17 }
 0x28a   :  { %v1950_v32 = vrot.slane %v417_v21, %v15250_v4  ;;  %v1954_v33 = vrot.slane %v417_v21, %v15252_v5 }
 0x28b   :  { %v13976_v40 = vadd.f32 %v13975_v30, %v13974_v35  ;;  %v5568_v41 = vrot.slane %v5560_v28, %v15268_v20 }
 0x28d   :  { %v13978_v48 = vadd.f32 %v13977_v39, %v13976_v40  ;;  %v13995_v39 = vsel %vm13367_vm0, %v10003_v19, 0.0  ;;  %v1926_v40 = vrot.slane %v416_v26, %v15254_v6  ;;  %v5576_v51 = vcombine.low %v5568_v41, %v5575_v42 }
 0x28f   :  { %v13980_v53 = vadd.f32 %v13979_v44, %v13978_v48  ;;  %v8295_v44 = vmul.f32 %v5559_v27, %v231_v24  ;;  %v8296_v9 = vmul.f32 %v5576_v51, %v232_v49  ;;  %v5595_v24 = vcombine.low %v1938_v62, %v1942_v1 }
 0x291   :  { %v13982_v59 = vadd.f32 %v13981_v52, %v13980_v53  ;;  %v5577_v52 = vcombine.low %v1914_v36, %v1918_v37  ;;  %v5578_v53 = vcombine.low %v1922_v38, %v1926_v40  ;;  %v10023_v56 = vcombine.high %v8295_v44, %v8295_v44 }
 0x292   :  { %v10030_v57 = vrot.slane %v8295_v44, %v15268_v20  ;;  %v10040_v27 = vcombine.high %v8296_v9, %v8296_v9  ;;  %v10047_v28 = vrot.slane %v8296_v9, %v15268_v20  ;;  %v5609_v37 = vrot.slane %v5595_v24, %v15268_v20 }
 0x293   :  { %v13984_v0 = vadd.f32 %v13983_v55, %v13982_v59  ;;  %v10022_v55 = vcombine.high %v10020_v45, %v10020_v45  ;;  %v5585_v3 = vrot.slane %v5577_v52, %v15268_v20  ;;  %v5592_v7 = vrot.slane %v5578_v53, %v15268_v20 }
 0x294   :  { %v10037_v10 = vrot.slane %v10023_v56, %v15268_v20  ;;  %v10038_v11 = vcombine.high %v10030_v57, %v10030_v57  ;;  %v14007_v19 = vsel %vm13367_vm0, %v10030_v57, 0.0  ;;  %v10054_v40 = vrot.slane %v10040_v27, %v15268_v20 }
 0x295   :  { %v13986_v13 = vadd.f32 %v13985_v63, %v13984_v0  ;;  %v14003_v63 = vsel %vm13367_vm0, %v10020_v45, 0.0  ;;  %v80_v0 = vld [vmem:[#allocation3 + $0x148] sm:$0xff]  ;;  %v14005_v12 = vsel %vm13367_vm0, %v10022_v55, 0.0  ;;  %v10055_v41 = vcombine.high %v10047_v28, %v10047_v28 }
 0x296   :  { %v233_v18 = vunpack.c.l.bf16 %v80_v0  ;;  %v10039_v26 = vcombine.high %v10037_v10, %v10037_v10  ;;  %v14009_v29 = vsel %vm13367_vm0, %v10038_v11, 0.0  ;;  %v234_v44 = vunpack.c.h.bf16 %v80_v0  ;;  %v418_v11 = vld [vmem:[#allocation5 + $0x158] sm:$0xff] }
 0x297   :  { %v13988_v23 = vadd.f32 %v13987_v8, %v13986_v13  ;;  %v14015_v45 = vsel %vm13367_vm0, %v10047_v28, 0.0  ;;  %v14017_v53 = vsel %vm13367_vm0, %v10055_v41, 0.0  ;;  %v1962_v55 = vrot.slane %v417_v21, %v15260_v14 }
 0x298   :  { %v14013_v42 = vsel %vm13367_vm0, %v10039_v26, 0.0  ;;  %v1966_v56 = vrot.slane %v417_v21, %v15262_v15  ;;  %v1970_v57 = vrot.slane %v417_v21, %v15264_v16  ;;  %v1978_v26 = vrot.slane %v418_v11, %v15248_v2 }
 0x299   :  { %v13990_v30 = vadd.f32 %v13989_v22, %v13988_v23  ;;  %v5593_v22 = vcombine.low %v5585_v3, %v5592_v7  ;;  %v5594_v23 = vcombine.low %v1930_v60, %v1934_v61  ;;  %v1974_v60 = vrot.slane %v417_v21, %v15266_v17 }
 0x29a   :  { %v1982_v27 = vrot.slane %v418_v11, %v15250_v4  ;;  %v1986_v28 = vrot.slane %v418_v11, %v15252_v5 }
 0x29b   :  { %v13992_v35 = vadd.f32 %v13991_v25, %v13990_v30  ;;  %v5602_v36 = vrot.slane %v5594_v23, %v15268_v20 }
 0x29d   :  { %v13994_v43 = vadd.f32 %v13993_v34, %v13992_v35  ;;  %v14011_v34 = vsel %vm13367_vm0, %v10037_v10, 0.0  ;;  %v1958_v35 = vrot.slane %v417_v21, %v15254_v6  ;;  %v5610_v46 = vcombine.low %v5602_v36, %v5609_v37 }
 0x29f   :  { %v13996_v48 = vadd.f32 %v13995_v39, %v13994_v43  ;;  %v8297_v39 = vmul.f32 %v5593_v22, %v233_v18  ;;  %v8298_v0 = vmul.f32 %v5610_v46, %v234_v44  ;;  %v5629_v18 = vcombine.low %v1970_v57, %v1974_v60 }
 0x2a1   :  { %v13998_v54 = vadd.f32 %v13997_v47, %v13996_v48  ;;  %v5611_v47 = vcombine.low %v1946_v31, %v1950_v32  ;;  %v5612_v48 = vcombine.low %v1954_v33, %v1958_v35  ;;  %v10057_v51 = vcombine.high %v8297_v39, %v8297_v39 }
 0x2a2   :  { %v10064_v52 = vrot.slane %v8297_v39, %v15268_v20  ;;  %v10074_v22 = vcombine.high %v8298_v0, %v8298_v0  ;;  %v10081_v23 = vrot.slane %v8298_v0, %v15268_v20  ;;  %v5643_v32 = vrot.slane %v5629_v18, %v15268_v20 }
 0x2a3   :  { %v14000_v59 = vadd.f32 %v13999_v50, %v13998_v54  ;;  %v10056_v50 = vcombine.high %v10054_v40, %v10054_v40  ;;  %v5619_v61 = vrot.slane %v5611_v47, %v15268_v20  ;;  %v5626_v62 = vrot.slane %v5612_v48, %v15268_v20 }
 0x2a4   :  { %v10071_v1 = vrot.slane %v10057_v51, %v15268_v20  ;;  %v10072_v3 = vcombine.high %v10064_v52, %v10064_v52  ;;  %v14023_v10 = vsel %vm13367_vm0, %v10064_v52, 0.0  ;;  %v10088_v35 = vrot.slane %v10074_v22, %v15268_v20 }
 0x2a5   :  { %v14002_v8 = vadd.f32 %v14001_v58, %v14000_v59  ;;  %v14019_v58 = vsel %vm13367_vm0, %v10054_v40, 0.0  ;;  %v81_v59 = vld [vmem:[#allocation3 + $0x150] sm:$0xff]  ;;  %v14021_v7 = vsel %vm13367_vm0, %v10056_v50, 0.0  ;;  %v10089_v36 = vcombine.high %v10081_v23, %v10081_v23 }
 0x2a6   :  { %v235_v9 = vunpack.c.l.bf16 %v81_v59  ;;  %v10073_v21 = vcombine.high %v10071_v1, %v10071_v1  ;;  %v14025_v24 = vsel %vm13367_vm0, %v10072_v3, 0.0  ;;  %v236_v39 = vunpack.c.h.bf16 %v81_v59  ;;  %v419_v3 = vld [vmem:[#allocation5 + $0x160] sm:$0xff] }
 0x2a7   :  { %v14004_v13 = vadd.f32 %v14003_v63, %v14002_v8  ;;  %v14031_v40 = vsel %vm13367_vm0, %v10081_v23, 0.0  ;;  %v14033_v48 = vsel %vm13367_vm0, %v10089_v36, 0.0  ;;  %v1994_v50 = vrot.slane %v418_v11, %v15260_v14 }
 0x2a8   :  { %v14029_v37 = vsel %vm13367_vm0, %v10073_v21, 0.0  ;;  %v1998_v51 = vrot.slane %v418_v11, %v15262_v15  ;;  %v2002_v52 = vrot.slane %v418_v11, %v15264_v16  ;;  %v2010_v21 = vrot.slane %v419_v3, %v15248_v2 }
 0x2a9   :  { %v14006_v25 = vadd.f32 %v14005_v12, %v14004_v13  ;;  %v5627_v12 = vcombine.low %v5619_v61, %v5626_v62  ;;  %v5628_v13 = vcombine.low %v1962_v55, %v1966_v56  ;;  %v2006_v55 = vrot.slane %v418_v11, %v15266_v17 }
 0x2aa   :  { %v2014_v22 = vrot.slane %v419_v3, %v15250_v4  ;;  %v2018_v23 = vrot.slane %v419_v3, %v15252_v5 }
 0x2ab   :  { %v14008_v30 = vadd.f32 %v14007_v19, %v14006_v25  ;;  %v5636_v31 = vrot.slane %v5628_v13, %v15268_v20 }
 0x2ad   :  { %v14010_v38 = vadd.f32 %v14009_v29, %v14008_v30  ;;  %v14027_v29 = vsel %vm13367_vm0, %v10071_v1, 0.0  ;;  %v1990_v30 = vrot.slane %v418_v11, %v15254_v6  ;;  %v5644_v41 = vcombine.low %v5636_v31, %v5643_v32 }
 0x2af   :  { %v14012_v43 = vadd.f32 %v14011_v34, %v14010_v38  ;;  %v8299_v34 = vmul.f32 %v5627_v12, %v235_v9  ;;  %v8300_v59 = vmul.f32 %v5644_v41, %v236_v39  ;;  %v5663_v9 = vcombine.low %v2002_v52, %v2006_v55 }
 0x2b1   :  { %v14014_v49 = vadd.f32 %v14013_v42, %v14012_v43  ;;  %v5645_v42 = vcombine.low %v1978_v26, %v1982_v27  ;;  %v5646_v43 = vcombine.low %v1986_v28, %v1990_v30  ;;  %v10091_v46 = vcombine.high %v8299_v34, %v8299_v34 }
 0x2b2   :  { %v10098_v47 = vrot.slane %v8299_v34, %v15268_v20  ;;  %v10108_v12 = vcombine.high %v8300_v59, %v8300_v59  ;;  %v10115_v13 = vrot.slane %v8300_v59, %v15268_v20  ;;  %v5677_v27 = vrot.slane %v5663_v9, %v15268_v20 }
 0x2b3   :  { %v14016_v54 = vadd.f32 %v14015_v45, %v14014_v49  ;;  %v10090_v45 = vcombine.high %v10088_v35, %v10088_v35  ;;  %v5653_v56 = vrot.slane %v5645_v42, %v15268_v20  ;;  %v5660_v57 = vrot.slane %v5646_v43, %v15268_v20 }
 0x2b4   :  { %v10105_v60 = vrot.slane %v10091_v46, %v15268_v20  ;;  %v10106_v61 = vcombine.high %v10098_v47, %v10098_v47  ;;  %v14039_v1 = vsel %vm13367_vm0, %v10098_v47, 0.0  ;;  %v10122_v30 = vrot.slane %v10108_v12, %v15268_v20 }
 0x2b5   :  { %v14018_v63 = vadd.f32 %v14017_v53, %v14016_v54  ;;  %v14035_v53 = vsel %vm13367_vm0, %v10088_v35, 0.0  ;;  %v82_v54 = vld [vmem:[#allocation3 + $0x158] sm:$0xff]  ;;  %v14037_v62 = vsel %vm13367_vm0, %v10090_v45, 0.0  ;;  %v10123_v31 = vcombine.high %v10115_v13, %v10115_v13 }
 0x2b6   :  { %v237_v0 = vunpack.c.l.bf16 %v82_v54  ;;  %v10107_v11 = vcombine.high %v10105_v60, %v10105_v60  ;;  %v14041_v18 = vsel %vm13367_vm0, %v10106_v61, 0.0  ;;  %v238_v34 = vunpack.c.h.bf16 %v82_v54  ;;  %v420_v61 = vld [vmem:[#allocation5 + $0x168] sm:$0xff] }
 0x2b7   :  { %v14020_v8 = vadd.f32 %v14019_v58, %v14018_v63  ;;  %v14047_v35 = vsel %vm13367_vm0, %v10115_v13, 0.0  ;;  %v14049_v43 = vsel %vm13367_vm0, %v10123_v31, 0.0  ;;  %v2026_v45 = vrot.slane %v419_v3, %v15260_v14 }
 0x2b8   :  { %v14045_v32 = vsel %vm13367_vm0, %v10107_v11, 0.0  ;;  %v2030_v46 = vrot.slane %v419_v3, %v15262_v15  ;;  %v2034_v47 = vrot.slane %v419_v3, %v15264_v16  ;;  %v2042_v11 = vrot.slane %v420_v61, %v15248_v2 }
 0x2b9   :  { %v14022_v19 = vadd.f32 %v14021_v7, %v14020_v8  ;;  %v5661_v7 = vcombine.low %v5653_v56, %v5660_v57  ;;  %v5662_v8 = vcombine.low %v1994_v50, %v1998_v51  ;;  %v2038_v50 = vrot.slane %v419_v3, %v15266_v17 }
 0x2ba   :  { %v2046_v12 = vrot.slane %v420_v61, %v15250_v4  ;;  %v2050_v13 = vrot.slane %v420_v61, %v15252_v5 }
 0x2bb   :  { %v14024_v25 = vadd.f32 %v14023_v10, %v14022_v19  ;;  %v5670_v26 = vrot.slane %v5662_v8, %v15268_v20 }
 0x2bd   :  { %v14026_v33 = vadd.f32 %v14025_v24, %v14024_v25  ;;  %v14043_v24 = vsel %vm13367_vm0, %v10105_v60, 0.0  ;;  %v2022_v25 = vrot.slane %v419_v3, %v15254_v6  ;;  %v5678_v36 = vcombine.low %v5670_v26, %v5677_v27 }
 0x2bf   :  { %v14028_v38 = vadd.f32 %v14027_v29, %v14026_v33  ;;  %v8301_v29 = vmul.f32 %v5661_v7, %v237_v0  ;;  %v8302_v54 = vmul.f32 %v5678_v36, %v238_v34  ;;  %v5697_v0 = vcombine.low %v2034_v47, %v2038_v50 }
 0x2c1   :  { %v14030_v44 = vadd.f32 %v14029_v37, %v14028_v38  ;;  %v5679_v37 = vcombine.low %v2010_v21, %v2014_v22  ;;  %v5680_v38 = vcombine.low %v2018_v23, %v2022_v25  ;;  %v10125_v41 = vcombine.high %v8301_v29, %v8301_v29 }
 0x2c2   :  { %v10132_v42 = vrot.slane %v8301_v29, %v15268_v20  ;;  %v10142_v7 = vcombine.high %v8302_v54, %v8302_v54  ;;  %v10149_v8 = vrot.slane %v8302_v54, %v15268_v20  ;;  %v5711_v22 = vrot.slane %v5697_v0, %v15268_v20 }
 0x2c3   :  { %v14032_v49 = vadd.f32 %v14031_v40, %v14030_v44  ;;  %v10124_v40 = vcombine.high %v10122_v30, %v10122_v30  ;;  %v5687_v51 = vrot.slane %v5679_v37, %v15268_v20  ;;  %v5694_v52 = vrot.slane %v5680_v38, %v15268_v20 }
 0x2c4   :  { %v10139_v55 = vrot.slane %v10125_v41, %v15268_v20  ;;  %v10140_v56 = vcombine.high %v10132_v42, %v10132_v42  ;;  %v14055_v60 = vsel %vm13367_vm0, %v10132_v42, 0.0  ;;  %v10156_v25 = vrot.slane %v10142_v7, %v15268_v20 }
 0x2c5   :  { %v14034_v58 = vadd.f32 %v14033_v48, %v14032_v49  ;;  %v14051_v48 = vsel %vm13367_vm0, %v10122_v30, 0.0  ;;  %v83_v49 = vld [vmem:[#allocation3 + $0x160] sm:$0xff]  ;;  %v14053_v57 = vsel %vm13367_vm0, %v10124_v40, 0.0  ;;  %v10157_v26 = vcombine.high %v10149_v8, %v10149_v8 }
 0x2c6   :  { %v239_v59 = vunpack.c.l.bf16 %v83_v49  ;;  %v10141_v3 = vcombine.high %v10139_v55, %v10139_v55  ;;  %v14057_v9 = vsel %vm13367_vm0, %v10140_v56, 0.0  ;;  %v240_v29 = vunpack.c.h.bf16 %v83_v49  ;;  %v421_v56 = vld [vmem:[#allocation5 + $0x170] sm:$0xff] }
 0x2c7   :  { %v14036_v63 = vadd.f32 %v14035_v53, %v14034_v58  ;;  %v14063_v30 = vsel %vm13367_vm0, %v10149_v8, 0.0  ;;  %v14065_v38 = vsel %vm13367_vm0, %v10157_v26, 0.0  ;;  %v2058_v40 = vrot.slane %v420_v61, %v15260_v14 }
 0x2c8   :  { %v14061_v27 = vsel %vm13367_vm0, %v10141_v3, 0.0  ;;  %v2062_v41 = vrot.slane %v420_v61, %v15262_v15  ;;  %v2066_v42 = vrot.slane %v420_v61, %v15264_v16  ;;  %v2074_v3 = vrot.slane %v421_v56, %v15248_v2 }
 0x2c9   :  { %v14038_v10 = vadd.f32 %v14037_v62, %v14036_v63  ;;  %v5695_v62 = vcombine.low %v5687_v51, %v5694_v52  ;;  %v5696_v63 = vcombine.low %v2026_v45, %v2030_v46  ;;  %v2070_v45 = vrot.slane %v420_v61, %v15266_v17 }
 0x2ca   :  { %v2078_v7 = vrot.slane %v421_v56, %v15250_v4  ;;  %v2082_v8 = vrot.slane %v421_v56, %v15252_v5 }
 0x2cb   :  { %v14040_v19 = vadd.f32 %v14039_v1, %v14038_v10  ;;  %v5704_v21 = vrot.slane %v5696_v63, %v15268_v20 }
 0x2cd   :  { %v14042_v28 = vadd.f32 %v14041_v18, %v14040_v19  ;;  %v14059_v18 = vsel %vm13367_vm0, %v10139_v55, 0.0  ;;  %v2054_v19 = vrot.slane %v420_v61, %v15254_v6  ;;  %v5712_v31 = vcombine.low %v5704_v21, %v5711_v22 }
 0x2cf   :  { %v14044_v33 = vadd.f32 %v14043_v24, %v14042_v28  ;;  %v8303_v24 = vmul.f32 %v5695_v62, %v239_v59  ;;  %v8304_v49 = vmul.f32 %v5712_v31, %v240_v29  ;;  %v5731_v59 = vcombine.low %v2066_v42, %v2070_v45 }
 0x2d1   :  { %v14046_v39 = vadd.f32 %v14045_v32, %v14044_v33  ;;  %v5713_v32 = vcombine.low %v2042_v11, %v2046_v12  ;;  %v5714_v33 = vcombine.low %v2050_v13, %v2054_v19  ;;  %v10159_v36 = vcombine.high %v8303_v24, %v8303_v24 }
 0x2d2   :  { %v10166_v37 = vrot.slane %v8303_v24, %v15268_v20  ;;  %v10176_v62 = vcombine.high %v8304_v49, %v8304_v49  ;;  %v10183_v63 = vrot.slane %v8304_v49, %v15268_v20  ;;  %v5745_v12 = vrot.slane %v5731_v59, %v15268_v20 }
 0x2d3   :  { %v14048_v44 = vadd.f32 %v14047_v35, %v14046_v39  ;;  %v10158_v35 = vcombine.high %v10156_v25, %v10156_v25  ;;  %v5721_v46 = vrot.slane %v5713_v32, %v15268_v20  ;;  %v5728_v47 = vrot.slane %v5714_v33, %v15268_v20 }
 0x2d4   :  { %v10173_v50 = vrot.slane %v10159_v36, %v15268_v20  ;;  %v10174_v51 = vcombine.high %v10166_v37, %v10166_v37  ;;  %v14071_v55 = vsel %vm13367_vm0, %v10166_v37, 0.0  ;;  %v10190_v19 = vrot.slane %v10176_v62, %v15268_v20 }
 0x2d5   :  { %v14050_v53 = vadd.f32 %v14049_v43, %v14048_v44  ;;  %v14067_v43 = vsel %vm13367_vm0, %v10156_v25, 0.0  ;;  %v84_v44 = vld [vmem:[#allocation3 + $0x168] sm:$0xff]  ;;  %v14069_v52 = vsel %vm13367_vm0, %v10158_v35, 0.0  ;;  %v10191_v21 = vcombine.high %v10183_v63, %v10183_v63 }
 0x2d6   :  { %v241_v54 = vunpack.c.l.bf16 %v84_v44  ;;  %v10175_v61 = vcombine.high %v10173_v50, %v10173_v50  ;;  %v14073_v0 = vsel %vm13367_vm0, %v10174_v51, 0.0  ;;  %v242_v24 = vunpack.c.h.bf16 %v84_v44  ;;  %v422_v51 = vld [vmem:[#allocation5 + $0x178] sm:$0xff] }
 0x2d7   :  { %v14052_v58 = vadd.f32 %v14051_v48, %v14050_v53  ;;  %v14079_v25 = vsel %vm13367_vm0, %v10183_v63, 0.0  ;;  %v14081_v33 = vsel %vm13367_vm0, %v10191_v21, 0.0  ;;  %v2090_v35 = vrot.slane %v421_v56, %v15260_v14 }
 0x2d8   :  { %v14077_v22 = vsel %vm13367_vm0, %v10175_v61, 0.0  ;;  %v2094_v36 = vrot.slane %v421_v56, %v15262_v15  ;;  %v2098_v37 = vrot.slane %v421_v56, %v15264_v16  ;;  %v2106_v61 = vrot.slane %v422_v51, %v15248_v2 }
 0x2d9   :  { %v14054_v1 = vadd.f32 %v14053_v57, %v14052_v58  ;;  %v5729_v57 = vcombine.low %v5721_v46, %v5728_v47  ;;  %v5730_v58 = vcombine.low %v2058_v40, %v2062_v41  ;;  %v2102_v40 = vrot.slane %v421_v56, %v15266_v17 }
 0x2da   :  { %v2110_v62 = vrot.slane %v422_v51, %v15250_v4  ;;  %v2114_v63 = vrot.slane %v422_v51, %v15252_v5 }
 0x2db   :  { %v14056_v10 = vadd.f32 %v14055_v60, %v14054_v1  ;;  %v5738_v11 = vrot.slane %v5730_v58, %v15268_v20 }
 0x2dd   :  { %v14058_v23 = vadd.f32 %v14057_v9, %v14056_v10  ;;  %v14075_v9 = vsel %vm13367_vm0, %v10173_v50, 0.0  ;;  %v2086_v10 = vrot.slane %v421_v56, %v15254_v6  ;;  %v5746_v26 = vcombine.low %v5738_v11, %v5745_v12 }
 0x2df   :  { %v14060_v28 = vadd.f32 %v14059_v18, %v14058_v23  ;;  %v8305_v18 = vmul.f32 %v5729_v57, %v241_v54  ;;  %v8306_v44 = vmul.f32 %v5746_v26, %v242_v24  ;;  %v5765_v54 = vcombine.low %v2098_v37, %v2102_v40 }
 0x2e1   :  { %v14062_v34 = vadd.f32 %v14061_v27, %v14060_v28  ;;  %v5747_v27 = vcombine.low %v2074_v3, %v2078_v7  ;;  %v5748_v28 = vcombine.low %v2082_v8, %v2086_v10  ;;  %v10193_v31 = vcombine.high %v8305_v18, %v8305_v18 }
 0x2e2   :  { %v10200_v32 = vrot.slane %v8305_v18, %v15268_v20  ;;  %v10210_v57 = vcombine.high %v8306_v44, %v8306_v44  ;;  %v10217_v58 = vrot.slane %v8306_v44, %v15268_v20  ;;  %v5779_v7 = vrot.slane %v5765_v54, %v15268_v20 }
 0x2e3   :  { %v14064_v39 = vadd.f32 %v14063_v30, %v14062_v34  ;;  %v10192_v30 = vcombine.high %v10190_v19, %v10190_v19  ;;  %v5755_v41 = vrot.slane %v5747_v27, %v15268_v20  ;;  %v5762_v42 = vrot.slane %v5748_v28, %v15268_v20 }
 0x2e4   :  { %v10207_v45 = vrot.slane %v10193_v31, %v15268_v20  ;;  %v10208_v46 = vcombine.high %v10200_v32, %v10200_v32  ;;  %v14087_v50 = vsel %vm13367_vm0, %v10200_v32, 0.0  ;;  %v10224_v10 = vrot.slane %v10210_v57, %v15268_v20 }
 0x2e5   :  { %v14066_v48 = vadd.f32 %v14065_v38, %v14064_v39  ;;  %v14083_v38 = vsel %vm13367_vm0, %v10190_v19, 0.0  ;;  %v85_v39 = vld [vmem:[#allocation3 + $0x170] sm:$0xff]  ;;  %v14085_v47 = vsel %vm13367_vm0, %v10192_v30, 0.0  ;;  %v10225_v11 = vcombine.high %v10217_v58, %v10217_v58 }
 0x2e6   :  { %v243_v49 = vunpack.c.l.bf16 %v85_v39  ;;  %v10209_v56 = vcombine.high %v10207_v45, %v10207_v45  ;;  %v14089_v59 = vsel %vm13367_vm0, %v10208_v46, 0.0  ;;  %v244_v18 = vunpack.c.h.bf16 %v85_v39  ;;  %v423_v46 = vld [vmem:[#allocation5 + $0x180] sm:$0xff] }
 0x2e7   :  { %v14068_v53 = vadd.f32 %v14067_v43, %v14066_v48  ;;  %v14095_v19 = vsel %vm13367_vm0, %v10217_v58, 0.0  ;;  %v14097_v28 = vsel %vm13367_vm0, %v10225_v11, 0.0  ;;  %v2122_v30 = vrot.slane %v422_v51, %v15260_v14 }
 0x2e8   :  { %v14093_v12 = vsel %vm13367_vm0, %v10209_v56, 0.0  ;;  %v2126_v31 = vrot.slane %v422_v51, %v15262_v15  ;;  %v2130_v32 = vrot.slane %v422_v51, %v15264_v16  ;;  %v2138_v56 = vrot.slane %v423_v46, %v15248_v2 }
 0x2e9   :  { %v14070_v60 = vadd.f32 %v14069_v52, %v14068_v53  ;;  %v5763_v52 = vcombine.low %v5755_v41, %v5762_v42  ;;  %v5764_v53 = vcombine.low %v2090_v35, %v2094_v36  ;;  %v2134_v35 = vrot.slane %v422_v51, %v15266_v17 }
 0x2ea   :  { %v2142_v57 = vrot.slane %v423_v46, %v15250_v4  ;;  %v2146_v58 = vrot.slane %v423_v46, %v15252_v5 }
 0x2eb   :  { %v14072_v1 = vadd.f32 %v14071_v55, %v14070_v60  ;;  %v5772_v3 = vrot.slane %v5764_v53, %v15268_v20 }
 0x2ed   :  { %v14074_v13 = vadd.f32 %v14073_v0, %v14072_v1  ;;  %v14091_v0 = vsel %vm13367_vm0, %v10207_v45, 0.0  ;;  %v2118_v1 = vrot.slane %v422_v51, %v15254_v6  ;;  %v5780_v21 = vcombine.low %v5772_v3, %v5779_v7 }
 0x2ef   :  { %v14076_v23 = vadd.f32 %v14075_v9, %v14074_v13  ;;  %v8307_v9 = vmul.f32 %v5763_v52, %v243_v49  ;;  %v8308_v39 = vmul.f32 %v5780_v21, %v244_v18  ;;  %v5799_v49 = vcombine.low %v2130_v32, %v2134_v35 }
 0x2f1   :  { %v14078_v29 = vadd.f32 %v14077_v22, %v14076_v23  ;;  %v5781_v22 = vcombine.low %v2106_v61, %v2110_v62  ;;  %v5782_v23 = vcombine.low %v2114_v63, %v2118_v1  ;;  %v10227_v26 = vcombine.high %v8307_v9, %v8307_v9 }
 0x2f2   :  { %v10234_v27 = vrot.slane %v8307_v9, %v15268_v20  ;;  %v10244_v52 = vcombine.high %v8308_v39, %v8308_v39  ;;  %v10251_v53 = vrot.slane %v8308_v39, %v15268_v20  ;;  %v5813_v62 = vrot.slane %v5799_v49, %v15268_v20 }
 0x2f3   :  { %v14080_v34 = vadd.f32 %v14079_v25, %v14078_v29  ;;  %v10226_v25 = vcombine.high %v10224_v10, %v10224_v10  ;;  %v5789_v36 = vrot.slane %v5781_v22, %v15268_v20  ;;  %v5796_v37 = vrot.slane %v5782_v23, %v15268_v20 }
 0x2f4   :  { %v10241_v40 = vrot.slane %v10227_v26, %v15268_v20  ;;  %v10242_v41 = vcombine.high %v10234_v27, %v10234_v27  ;;  %v14103_v45 = vsel %vm13367_vm0, %v10234_v27, 0.0  ;;  %v10258_v1 = vrot.slane %v10244_v52, %v15268_v20 }
 0x2f5   :  { %v14082_v43 = vadd.f32 %v14081_v33, %v14080_v34  ;;  %v14099_v33 = vsel %vm13367_vm0, %v10224_v10, 0.0  ;;  %v86_v34 = vld [vmem:[#allocation3 + $0x178] sm:$0xff]  ;;  %v14101_v42 = vsel %vm13367_vm0, %v10226_v25, 0.0  ;;  %v10259_v3 = vcombine.high %v10251_v53, %v10251_v53 }
 0x2f6   :  { %v245_v44 = vunpack.c.l.bf16 %v86_v34  ;;  %v10243_v51 = vcombine.high %v10241_v40, %v10241_v40  ;;  %v14105_v54 = vsel %vm13367_vm0, %v10242_v41, 0.0  ;;  %v246_v9 = vunpack.c.h.bf16 %v86_v34  ;;  %v424_v41 = vld [vmem:[#allocation5 + $0x188] sm:$0xff] }
 0x2f7   :  { %v14084_v48 = vadd.f32 %v14083_v38, %v14082_v43  ;;  %v14111_v10 = vsel %vm13367_vm0, %v10251_v53, 0.0  ;;  %v14113_v23 = vsel %vm13367_vm0, %v10259_v3, 0.0  ;;  %v2154_v25 = vrot.slane %v423_v46, %v15260_v14 }
 0x2f8   :  { %v14109_v7 = vsel %vm13367_vm0, %v10243_v51, 0.0  ;;  %v2158_v26 = vrot.slane %v423_v46, %v15262_v15  ;;  %v2162_v27 = vrot.slane %v423_v46, %v15264_v16  ;;  %v2170_v51 = vrot.slane %v424_v41, %v15248_v2 }
 0x2f9   :  { %v14086_v55 = vadd.f32 %v14085_v47, %v14084_v48  ;;  %v5797_v47 = vcombine.low %v5789_v36, %v5796_v37  ;;  %v5798_v48 = vcombine.low %v2122_v30, %v2126_v31  ;;  %v2166_v30 = vrot.slane %v423_v46, %v15266_v17 }
 0x2fa   :  { %v2174_v52 = vrot.slane %v424_v41, %v15250_v4  ;;  %v2178_v53 = vrot.slane %v424_v41, %v15252_v5 }
 0x2fb   :  { %v14088_v60 = vadd.f32 %v14087_v50, %v14086_v55  ;;  %v5806_v61 = vrot.slane %v5798_v48, %v15268_v20 }
 0x2fd   :  { %v14090_v8 = vadd.f32 %v14089_v59, %v14088_v60  ;;  %v14107_v59 = vsel %vm13367_vm0, %v10241_v40, 0.0  ;;  %v2150_v60 = vrot.slane %v423_v46, %v15254_v6  ;;  %v5814_v11 = vcombine.low %v5806_v61, %v5813_v62 }
 0x2ff   :  { %v14092_v13 = vadd.f32 %v14091_v0, %v14090_v8  ;;  %v8309_v0 = vmul.f32 %v5797_v47, %v245_v44  ;;  %v8310_v34 = vmul.f32 %v5814_v11, %v246_v9  ;;  %v5833_v44 = vcombine.low %v2162_v27, %v2166_v30 }
 0x301   :  { %v14094_v24 = vadd.f32 %v14093_v12, %v14092_v13  ;;  %v5815_v12 = vcombine.low %v2138_v56, %v2142_v57  ;;  %v5816_v13 = vcombine.low %v2146_v58, %v2150_v60  ;;  %v10261_v21 = vcombine.high %v8309_v0, %v8309_v0 }
 0x302   :  { %v10268_v22 = vrot.slane %v8309_v0, %v15268_v20  ;;  %v10278_v47 = vcombine.high %v8310_v34, %v8310_v34  ;;  %v10285_v48 = vrot.slane %v8310_v34, %v15268_v20  ;;  %v5847_v57 = vrot.slane %v5833_v44, %v15268_v20 }
 0x303   :  { %v14096_v29 = vadd.f32 %v14095_v19, %v14094_v24  ;;  %v10260_v19 = vcombine.high %v10258_v1, %v10258_v1  ;;  %v5823_v31 = vrot.slane %v5815_v12, %v15268_v20  ;;  %v5830_v32 = vrot.slane %v5816_v13, %v15268_v20 }
 0x304   :  { %v10275_v35 = vrot.slane %v10261_v21, %v15268_v20  ;;  %v10276_v36 = vcombine.high %v10268_v22, %v10268_v22  ;;  %v14119_v40 = vsel %vm13367_vm0, %v10268_v22, 0.0  ;;  %v10292_v60 = vrot.slane %v10278_v47, %v15268_v20 }
 0x305   :  { %v14098_v38 = vadd.f32 %v14097_v28, %v14096_v29  ;;  %v14115_v28 = vsel %vm13367_vm0, %v10258_v1, 0.0  ;;  %v87_v29 = vld [vmem:[#allocation3 + $0x180] sm:$0xff]  ;;  %v14117_v37 = vsel %vm13367_vm0, %v10260_v19, 0.0  ;;  %v10293_v61 = vcombine.high %v10285_v48, %v10285_v48 }
 0x306   :  { %v247_v39 = vunpack.c.l.bf16 %v87_v29  ;;  %v10277_v46 = vcombine.high %v10275_v35, %v10275_v35  ;;  %v14121_v49 = vsel %vm13367_vm0, %v10276_v36, 0.0  ;;  %v248_v0 = vunpack.c.h.bf16 %v87_v29  ;;  %v425_v36 = vld [vmem:[#allocation5 + $0x190] sm:$0xff] }
 0x307   :  { %v14100_v43 = vadd.f32 %v14099_v33, %v14098_v38  ;;  %v14127_v1 = vsel %vm13367_vm0, %v10285_v48, 0.0  ;;  %v14129_v13 = vsel %vm13367_vm0, %v10293_v61, 0.0  ;;  %v2186_v19 = vrot.slane %v424_v41, %v15260_v14 }
 0x308   :  { %v14125_v62 = vsel %vm13367_vm0, %v10277_v46, 0.0  ;;  %v2190_v21 = vrot.slane %v424_v41, %v15262_v15  ;;  %v2194_v22 = vrot.slane %v424_v41, %v15264_v16  ;;  %v2202_v46 = vrot.slane %v425_v36, %v15248_v2 }
 0x309   :  { %v14102_v50 = vadd.f32 %v14101_v42, %v14100_v43  ;;  %v5831_v42 = vcombine.low %v5823_v31, %v5830_v32  ;;  %v5832_v43 = vcombine.low %v2154_v25, %v2158_v26  ;;  %v2198_v25 = vrot.slane %v424_v41, %v15266_v17 }
 0x30a   :  { %v2206_v47 = vrot.slane %v425_v36, %v15250_v4  ;;  %v2210_v48 = vrot.slane %v425_v36, %v15252_v5 }
 0x30b   :  { %v14104_v55 = vadd.f32 %v14103_v45, %v14102_v50  ;;  %v5840_v56 = vrot.slane %v5832_v43, %v15268_v20 }
 0x30d   :  { %v14106_v63 = vadd.f32 %v14105_v54, %v14104_v55  ;;  %v14123_v54 = vsel %vm13367_vm0, %v10275_v35, 0.0  ;;  %v2182_v55 = vrot.slane %v424_v41, %v15254_v6  ;;  %v5848_v3 = vcombine.low %v5840_v56, %v5847_v57 }
 0x30f   :  { %v14108_v8 = vadd.f32 %v14107_v59, %v14106_v63  ;;  %v8311_v59 = vmul.f32 %v5831_v42, %v247_v39  ;;  %v8312_v29 = vmul.f32 %v5848_v3, %v248_v0  ;;  %v5867_v39 = vcombine.low %v2194_v22, %v2198_v25 }
 0x311   :  { %v14110_v18 = vadd.f32 %v14109_v7, %v14108_v8  ;;  %v5849_v7 = vcombine.low %v2170_v51, %v2174_v52  ;;  %v5850_v8 = vcombine.low %v2178_v53, %v2182_v55  ;;  %v10295_v11 = vcombine.high %v8311_v59, %v8311_v59 }
 0x312   :  { %v10302_v12 = vrot.slane %v8311_v59, %v15268_v20  ;;  %v10312_v42 = vcombine.high %v8312_v29, %v8312_v29  ;;  %v10319_v43 = vrot.slane %v8312_v29, %v15268_v20  ;;  %v5881_v52 = vrot.slane %v5867_v39, %v15268_v20 }
 0x313   :  { %v14112_v24 = vadd.f32 %v14111_v10, %v14110_v18  ;;  %v10294_v10 = vcombine.high %v10292_v60, %v10292_v60  ;;  %v5857_v26 = vrot.slane %v5849_v7, %v15268_v20  ;;  %v5864_v27 = vrot.slane %v5850_v8, %v15268_v20 }
 0x314   :  { %v10309_v30 = vrot.slane %v10295_v11, %v15268_v20  ;;  %v10310_v31 = vcombine.high %v10302_v12, %v10302_v12  ;;  %v14135_v35 = vsel %vm13367_vm0, %v10302_v12, 0.0  ;;  %v10326_v55 = vrot.slane %v10312_v42, %v15268_v20 }
 0x315   :  { %v14114_v33 = vadd.f32 %v14113_v23, %v14112_v24  ;;  %v14131_v23 = vsel %vm13367_vm0, %v10292_v60, 0.0  ;;  %v88_v24 = vld [vmem:[#allocation3 + $0x188] sm:$0xff]  ;;  %v14133_v32 = vsel %vm13367_vm0, %v10294_v10, 0.0  ;;  %v10327_v56 = vcombine.high %v10319_v43, %v10319_v43 }
 0x316   :  { %v249_v34 = vunpack.c.l.bf16 %v88_v24  ;;  %v10311_v41 = vcombine.high %v10309_v30, %v10309_v30  ;;  %v14137_v44 = vsel %vm13367_vm0, %v10310_v31, 0.0  ;;  %v250_v59 = vunpack.c.h.bf16 %v88_v24  ;;  %v426_v31 = vld [vmem:[#allocation5 + $0x198] sm:$0xff] }
 0x317   :  { %v14116_v38 = vadd.f32 %v14115_v28, %v14114_v33  ;;  %v14143_v60 = vsel %vm13367_vm0, %v10319_v43, 0.0  ;;  %v14145_v8 = vsel %vm13367_vm0, %v10327_v56, 0.0  ;;  %v2218_v10 = vrot.slane %v425_v36, %v15260_v14 }
 0x318   :  { %v14141_v57 = vsel %vm13367_vm0, %v10311_v41, 0.0  ;;  %v2222_v11 = vrot.slane %v425_v36, %v15262_v15  ;;  %v2226_v12 = vrot.slane %v425_v36, %v15264_v16  ;;  %v2234_v41 = vrot.slane %v426_v31, %v15248_v2 }
 0x319   :  { %v14118_v45 = vadd.f32 %v14117_v37, %v14116_v38  ;;  %v5865_v37 = vcombine.low %v5857_v26, %v5864_v27  ;;  %v5866_v38 = vcombine.low %v2186_v19, %v2190_v21  ;;  %v2230_v19 = vrot.slane %v425_v36, %v15266_v17 }
 0x31a   :  { %v2238_v42 = vrot.slane %v426_v31, %v15250_v4  ;;  %v2242_v43 = vrot.slane %v426_v31, %v15252_v5 }
 0x31b   :  { %v14120_v50 = vadd.f32 %v14119_v40, %v14118_v45  ;;  %v5874_v51 = vrot.slane %v5866_v38, %v15268_v20 }
 0x31d   :  { %v14122_v58 = vadd.f32 %v14121_v49, %v14120_v50  ;;  %v14139_v49 = vsel %vm13367_vm0, %v10309_v30, 0.0  ;;  %v2214_v50 = vrot.slane %v425_v36, %v15254_v6  ;;  %v5882_v61 = vcombine.low %v5874_v51, %v5881_v52 }
 0x31f   :  { %v14124_v63 = vadd.f32 %v14123_v54, %v14122_v58  ;;  %v8313_v54 = vmul.f32 %v5865_v37, %v249_v34  ;;  %v8314_v24 = vmul.f32 %v5882_v61, %v250_v59  ;;  %v5901_v34 = vcombine.low %v2226_v12, %v2230_v19 }
 0x321   :  { %v14126_v9 = vadd.f32 %v14125_v62, %v14124_v63  ;;  %v5883_v62 = vcombine.low %v2202_v46, %v2206_v47  ;;  %v5884_v63 = vcombine.low %v2210_v48, %v2214_v50  ;;  %v10329_v3 = vcombine.high %v8313_v54, %v8313_v54 }
 0x322   :  { %v10336_v7 = vrot.slane %v8313_v54, %v15268_v20  ;;  %v10346_v37 = vcombine.high %v8314_v24, %v8314_v24  ;;  %v10353_v38 = vrot.slane %v8314_v24, %v15268_v20  ;;  %v5915_v47 = vrot.slane %v5901_v34, %v15268_v20 }
 0x323   :  { %v14128_v18 = vadd.f32 %v14127_v1, %v14126_v9  ;;  %v10328_v1 = vcombine.high %v10326_v55, %v10326_v55  ;;  %v5891_v21 = vrot.slane %v5883_v62, %v15268_v20  ;;  %v5898_v22 = vrot.slane %v5884_v63, %v15268_v20 }
 0x324   :  { %v10343_v25 = vrot.slane %v10329_v3, %v15268_v20  ;;  %v10344_v26 = vcombine.high %v10336_v7, %v10336_v7  ;;  %v14151_v30 = vsel %vm13367_vm0, %v10336_v7, 0.0  ;;  %v10360_v50 = vrot.slane %v10346_v37, %v15268_v20 }
 0x325   :  { %v14130_v28 = vadd.f32 %v14129_v13, %v14128_v18  ;;  %v14147_v13 = vsel %vm13367_vm0, %v10326_v55, 0.0  ;;  %v89_v18 = vld [vmem:[#allocation3 + $0x190] sm:$0xff]  ;;  %v14149_v27 = vsel %vm13367_vm0, %v10328_v1, 0.0  ;;  %v10361_v51 = vcombine.high %v10353_v38, %v10353_v38 }
 0x326   :  { %v251_v29 = vunpack.c.l.bf16 %v89_v18  ;;  %v10345_v36 = vcombine.high %v10343_v25, %v10343_v25  ;;  %v14153_v39 = vsel %vm13367_vm0, %v10344_v26, 0.0  ;;  %v252_v54 = vunpack.c.h.bf16 %v89_v18  ;;  %v427_v26 = vld [vmem:[#allocation5 + $0x1a0] sm:$0xff] }
 0x327   :  { %v14132_v33 = vadd.f32 %v14131_v23, %v14130_v28  ;;  %v14159_v55 = vsel %vm13367_vm0, %v10353_v38, 0.0  ;;  %v14161_v63 = vsel %vm13367_vm0, %v10361_v51, 0.0  ;;  %v2250_v1 = vrot.slane %v426_v31, %v15260_v14 }
 0x328   :  { %v14157_v52 = vsel %vm13367_vm0, %v10345_v36, 0.0  ;;  %v2254_v3 = vrot.slane %v426_v31, %v15262_v15  ;;  %v2258_v7 = vrot.slane %v426_v31, %v15264_v16  ;;  %v2266_v36 = vrot.slane %v427_v26, %v15248_v2 }
 0x329   :  { %v14134_v40 = vadd.f32 %v14133_v32, %v14132_v33  ;;  %v5899_v32 = vcombine.low %v5891_v21, %v5898_v22  ;;  %v5900_v33 = vcombine.low %v2218_v10, %v2222_v11  ;;  %v2262_v10 = vrot.slane %v426_v31, %v15266_v17 }
 0x32a   :  { %v2270_v37 = vrot.slane %v427_v26, %v15250_v4  ;;  %v2274_v38 = vrot.slane %v427_v26, %v15252_v5 }
 0x32b   :  { %v14136_v45 = vadd.f32 %v14135_v35, %v14134_v40  ;;  %v5908_v46 = vrot.slane %v5900_v33, %v15268_v20 }
 0x32d   :  { %v14138_v53 = vadd.f32 %v14137_v44, %v14136_v45  ;;  %v14155_v44 = vsel %vm13367_vm0, %v10343_v25, 0.0  ;;  %v2246_v45 = vrot.slane %v426_v31, %v15254_v6  ;;  %v5916_v56 = vcombine.low %v5908_v46, %v5915_v47 }
 0x32f   :  { %v14140_v58 = vadd.f32 %v14139_v49, %v14138_v53  ;;  %v8315_v49 = vmul.f32 %v5899_v32, %v251_v29  ;;  %v8316_v18 = vmul.f32 %v5916_v56, %v252_v54  ;;  %v5935_v29 = vcombine.low %v2258_v7, %v2262_v10 }
 0x331   :  { %v14142_v0 = vadd.f32 %v14141_v57, %v14140_v58  ;;  %v5917_v57 = vcombine.low %v2234_v41, %v2238_v42  ;;  %v5918_v58 = vcombine.low %v2242_v43, %v2246_v45  ;;  %v10363_v61 = vcombine.high %v8315_v49, %v8315_v49 }
 0x332   :  { %v10370_v62 = vrot.slane %v8315_v49, %v15268_v20  ;;  %v10380_v32 = vcombine.high %v8316_v18, %v8316_v18  ;;  %v10387_v33 = vrot.slane %v8316_v18, %v15268_v20  ;;  %v5949_v42 = vrot.slane %v5935_v29, %v15268_v20 }
 0x333   :  { %v14144_v9 = vadd.f32 %v14143_v60, %v14142_v0  ;;  %v10362_v60 = vcombine.high %v10360_v50, %v10360_v50  ;;  %v5925_v11 = vrot.slane %v5917_v57, %v15268_v20  ;;  %v5932_v12 = vrot.slane %v5918_v58, %v15268_v20 }
 0x334   :  { %v10377_v19 = vrot.slane %v10363_v61, %v15268_v20  ;;  %v10378_v21 = vcombine.high %v10370_v62, %v10370_v62  ;;  %v14167_v25 = vsel %vm13367_vm0, %v10370_v62, 0.0  ;;  %v10394_v45 = vrot.slane %v10380_v32, %v15268_v20 }
 0x335   :  { %v14146_v23 = vadd.f32 %v14145_v8, %v14144_v9  ;;  %v14163_v8 = vsel %vm13367_vm0, %v10360_v50, 0.0  ;;  %v90_v9 = vld [vmem:[#allocation3 + $0x198] sm:$0xff]  ;;  %v14165_v22 = vsel %vm13367_vm0, %v10362_v60, 0.0  ;;  %v10395_v46 = vcombine.high %v10387_v33, %v10387_v33 }
 0x336   :  { %v253_v24 = vunpack.c.l.bf16 %v90_v9  ;;  %v10379_v31 = vcombine.high %v10377_v19, %v10377_v19  ;;  %v14169_v34 = vsel %vm13367_vm0, %v10378_v21, 0.0  ;;  %v254_v49 = vunpack.c.h.bf16 %v90_v9  ;;  %v428_v21 = vld [vmem:[#allocation5 + $0x1a8] sm:$0xff] }
 0x337   :  { %v14148_v28 = vadd.f32 %v14147_v13, %v14146_v23  ;;  %v14175_v50 = vsel %vm13367_vm0, %v10387_v33, 0.0  ;;  %v14177_v58 = vsel %vm13367_vm0, %v10395_v46, 0.0  ;;  %v2282_v60 = vrot.slane %v427_v26, %v15260_v14 }
 0x338   :  { %v14173_v47 = vsel %vm13367_vm0, %v10379_v31, 0.0  ;;  %v2286_v61 = vrot.slane %v427_v26, %v15262_v15  ;;  %v2290_v62 = vrot.slane %v427_v26, %v15264_v16  ;;  %v2298_v31 = vrot.slane %v428_v21, %v15248_v2 }
 0x339   :  { %v14150_v35 = vadd.f32 %v14149_v27, %v14148_v28  ;;  %v5933_v27 = vcombine.low %v5925_v11, %v5932_v12  ;;  %v5934_v28 = vcombine.low %v2250_v1, %v2254_v3  ;;  %v2294_v1 = vrot.slane %v427_v26, %v15266_v17 }
 0x33a   :  { %v2302_v32 = vrot.slane %v428_v21, %v15250_v4  ;;  %v2306_v33 = vrot.slane %v428_v21, %v15252_v5 }
 0x33b   :  { %v14152_v40 = vadd.f32 %v14151_v30, %v14150_v35  ;;  %v5942_v41 = vrot.slane %v5934_v28, %v15268_v20 }
 0x33d   :  { %v14154_v48 = vadd.f32 %v14153_v39, %v14152_v40  ;;  %v14171_v39 = vsel %vm13367_vm0, %v10377_v19, 0.0  ;;  %v2278_v40 = vrot.slane %v427_v26, %v15254_v6  ;;  %v5950_v51 = vcombine.low %v5942_v41, %v5949_v42 }
 0x33f   :  { %v14156_v53 = vadd.f32 %v14155_v44, %v14154_v48  ;;  %v8317_v44 = vmul.f32 %v5933_v27, %v253_v24  ;;  %v8318_v9 = vmul.f32 %v5950_v51, %v254_v49  ;;  %v5969_v24 = vcombine.low %v2290_v62, %v2294_v1 }
 0x341   :  { %v14158_v59 = vadd.f32 %v14157_v52, %v14156_v53  ;;  %v5951_v52 = vcombine.low %v2266_v36, %v2270_v37  ;;  %v5952_v53 = vcombine.low %v2274_v38, %v2278_v40  ;;  %v10397_v56 = vcombine.high %v8317_v44, %v8317_v44 }
 0x342   :  { %v10404_v57 = vrot.slane %v8317_v44, %v15268_v20  ;;  %v10414_v27 = vcombine.high %v8318_v9, %v8318_v9  ;;  %v10421_v28 = vrot.slane %v8318_v9, %v15268_v20  ;;  %v5983_v37 = vrot.slane %v5969_v24, %v15268_v20 }
 0x343   :  { %v14160_v0 = vadd.f32 %v14159_v55, %v14158_v59  ;;  %v10396_v55 = vcombine.high %v10394_v45, %v10394_v45  ;;  %v5959_v3 = vrot.slane %v5951_v52, %v15268_v20  ;;  %v5966_v7 = vrot.slane %v5952_v53, %v15268_v20 }
 0x344   :  { %v10411_v10 = vrot.slane %v10397_v56, %v15268_v20  ;;  %v10412_v11 = vcombine.high %v10404_v57, %v10404_v57  ;;  %v14183_v19 = vsel %vm13367_vm0, %v10404_v57, 0.0  ;;  %v10428_v40 = vrot.slane %v10414_v27, %v15268_v20 }
 0x345   :  { %v14162_v13 = vadd.f32 %v14161_v63, %v14160_v0  ;;  %v14179_v63 = vsel %vm13367_vm0, %v10394_v45, 0.0  ;;  %v91_v0 = vld [vmem:[#allocation3 + $0x1a0] sm:$0xff]  ;;  %v14181_v12 = vsel %vm13367_vm0, %v10396_v55, 0.0  ;;  %v10429_v41 = vcombine.high %v10421_v28, %v10421_v28 }
 0x346   :  { %v255_v18 = vunpack.c.l.bf16 %v91_v0  ;;  %v10413_v26 = vcombine.high %v10411_v10, %v10411_v10  ;;  %v14185_v29 = vsel %vm13367_vm0, %v10412_v11, 0.0  ;;  %v256_v44 = vunpack.c.h.bf16 %v91_v0  ;;  %v429_v11 = vld [vmem:[#allocation5 + $0x1b0] sm:$0xff] }
 0x347   :  { %v14164_v23 = vadd.f32 %v14163_v8, %v14162_v13  ;;  %v14191_v45 = vsel %vm13367_vm0, %v10421_v28, 0.0  ;;  %v14193_v53 = vsel %vm13367_vm0, %v10429_v41, 0.0  ;;  %v2314_v55 = vrot.slane %v428_v21, %v15260_v14 }
 0x348   :  { %v14189_v42 = vsel %vm13367_vm0, %v10413_v26, 0.0  ;;  %v2318_v56 = vrot.slane %v428_v21, %v15262_v15  ;;  %v2322_v57 = vrot.slane %v428_v21, %v15264_v16  ;;  %v2330_v26 = vrot.slane %v429_v11, %v15248_v2 }
 0x349   :  { %v14166_v30 = vadd.f32 %v14165_v22, %v14164_v23  ;;  %v5967_v22 = vcombine.low %v5959_v3, %v5966_v7  ;;  %v5968_v23 = vcombine.low %v2282_v60, %v2286_v61  ;;  %v2326_v60 = vrot.slane %v428_v21, %v15266_v17 }
 0x34a   :  { %v2334_v27 = vrot.slane %v429_v11, %v15250_v4  ;;  %v2338_v28 = vrot.slane %v429_v11, %v15252_v5 }
 0x34b   :  { %v14168_v35 = vadd.f32 %v14167_v25, %v14166_v30  ;;  %v5976_v36 = vrot.slane %v5968_v23, %v15268_v20 }
 0x34d   :  { %v14170_v43 = vadd.f32 %v14169_v34, %v14168_v35  ;;  %v14187_v34 = vsel %vm13367_vm0, %v10411_v10, 0.0  ;;  %v2310_v35 = vrot.slane %v428_v21, %v15254_v6  ;;  %v5984_v46 = vcombine.low %v5976_v36, %v5983_v37 }
 0x34f   :  { %v14172_v48 = vadd.f32 %v14171_v39, %v14170_v43  ;;  %v8319_v39 = vmul.f32 %v5967_v22, %v255_v18  ;;  %v8320_v0 = vmul.f32 %v5984_v46, %v256_v44  ;;  %v6003_v18 = vcombine.low %v2322_v57, %v2326_v60 }
 0x351   :  { %v14174_v54 = vadd.f32 %v14173_v47, %v14172_v48  ;;  %v5985_v47 = vcombine.low %v2298_v31, %v2302_v32  ;;  %v5986_v48 = vcombine.low %v2306_v33, %v2310_v35  ;;  %v10431_v51 = vcombine.high %v8319_v39, %v8319_v39 }
 0x352   :  { %v10438_v52 = vrot.slane %v8319_v39, %v15268_v20  ;;  %v10448_v22 = vcombine.high %v8320_v0, %v8320_v0  ;;  %v10455_v23 = vrot.slane %v8320_v0, %v15268_v20  ;;  %v6017_v32 = vrot.slane %v6003_v18, %v15268_v20 }
 0x353   :  { %v14176_v59 = vadd.f32 %v14175_v50, %v14174_v54  ;;  %v10430_v50 = vcombine.high %v10428_v40, %v10428_v40  ;;  %v5993_v61 = vrot.slane %v5985_v47, %v15268_v20  ;;  %v6000_v62 = vrot.slane %v5986_v48, %v15268_v20 }
 0x354   :  { %v10445_v1 = vrot.slane %v10431_v51, %v15268_v20  ;;  %v10446_v3 = vcombine.high %v10438_v52, %v10438_v52  ;;  %v14199_v10 = vsel %vm13367_vm0, %v10438_v52, 0.0  ;;  %v10462_v35 = vrot.slane %v10448_v22, %v15268_v20 }
 0x355   :  { %v14178_v8 = vadd.f32 %v14177_v58, %v14176_v59  ;;  %v14195_v58 = vsel %vm13367_vm0, %v10428_v40, 0.0  ;;  %v92_v59 = vld [vmem:[#allocation3 + $0x1a8] sm:$0xff]  ;;  %v14197_v7 = vsel %vm13367_vm0, %v10430_v50, 0.0  ;;  %v10463_v36 = vcombine.high %v10455_v23, %v10455_v23 }
 0x356   :  { %v257_v9 = vunpack.c.l.bf16 %v92_v59  ;;  %v10447_v21 = vcombine.high %v10445_v1, %v10445_v1  ;;  %v14201_v24 = vsel %vm13367_vm0, %v10446_v3, 0.0  ;;  %v258_v39 = vunpack.c.h.bf16 %v92_v59  ;;  %v430_v3 = vld [vmem:[#allocation5 + $0x1b8] sm:$0xff] }
 0x357   :  { %v14180_v13 = vadd.f32 %v14179_v63, %v14178_v8  ;;  %v14207_v40 = vsel %vm13367_vm0, %v10455_v23, 0.0  ;;  %v14209_v48 = vsel %vm13367_vm0, %v10463_v36, 0.0  ;;  %v2346_v50 = vrot.slane %v429_v11, %v15260_v14 }
 0x358   :  { %v14205_v37 = vsel %vm13367_vm0, %v10447_v21, 0.0  ;;  %v2350_v51 = vrot.slane %v429_v11, %v15262_v15  ;;  %v2354_v52 = vrot.slane %v429_v11, %v15264_v16  ;;  %v2362_v21 = vrot.slane %v430_v3, %v15248_v2 }
 0x359   :  { %v14182_v25 = vadd.f32 %v14181_v12, %v14180_v13  ;;  %v6001_v12 = vcombine.low %v5993_v61, %v6000_v62  ;;  %v6002_v13 = vcombine.low %v2314_v55, %v2318_v56  ;;  %v2358_v55 = vrot.slane %v429_v11, %v15266_v17 }
 0x35a   :  { %v2366_v22 = vrot.slane %v430_v3, %v15250_v4  ;;  %v2370_v23 = vrot.slane %v430_v3, %v15252_v5 }
 0x35b   :  { %v14184_v30 = vadd.f32 %v14183_v19, %v14182_v25  ;;  %v6010_v31 = vrot.slane %v6002_v13, %v15268_v20 }
 0x35d   :  { %v14186_v38 = vadd.f32 %v14185_v29, %v14184_v30  ;;  %v14203_v29 = vsel %vm13367_vm0, %v10445_v1, 0.0  ;;  %v2342_v30 = vrot.slane %v429_v11, %v15254_v6  ;;  %v6018_v41 = vcombine.low %v6010_v31, %v6017_v32 }
 0x35f   :  { %v14188_v43 = vadd.f32 %v14187_v34, %v14186_v38  ;;  %v8321_v34 = vmul.f32 %v6001_v12, %v257_v9  ;;  %v8322_v59 = vmul.f32 %v6018_v41, %v258_v39  ;;  %v6037_v9 = vcombine.low %v2354_v52, %v2358_v55 }
 0x361   :  { %v14190_v49 = vadd.f32 %v14189_v42, %v14188_v43  ;;  %v6019_v42 = vcombine.low %v2330_v26, %v2334_v27  ;;  %v6020_v43 = vcombine.low %v2338_v28, %v2342_v30  ;;  %v10465_v46 = vcombine.high %v8321_v34, %v8321_v34 }
 0x362   :  { %v10472_v47 = vrot.slane %v8321_v34, %v15268_v20  ;;  %v10482_v12 = vcombine.high %v8322_v59, %v8322_v59  ;;  %v10489_v13 = vrot.slane %v8322_v59, %v15268_v20  ;;  %v6051_v27 = vrot.slane %v6037_v9, %v15268_v20 }
 0x363   :  { %v14192_v54 = vadd.f32 %v14191_v45, %v14190_v49  ;;  %v10464_v45 = vcombine.high %v10462_v35, %v10462_v35  ;;  %v6027_v56 = vrot.slane %v6019_v42, %v15268_v20  ;;  %v6034_v57 = vrot.slane %v6020_v43, %v15268_v20 }
 0x364   :  { %v10479_v60 = vrot.slane %v10465_v46, %v15268_v20  ;;  %v10480_v61 = vcombine.high %v10472_v47, %v10472_v47  ;;  %v14215_v1 = vsel %vm13367_vm0, %v10472_v47, 0.0  ;;  %v10496_v30 = vrot.slane %v10482_v12, %v15268_v20 }
 0x365   :  { %v14194_v63 = vadd.f32 %v14193_v53, %v14192_v54  ;;  %v14211_v53 = vsel %vm13367_vm0, %v10462_v35, 0.0  ;;  %v93_v54 = vld [vmem:[#allocation3 + $0x1b0] sm:$0xff]  ;;  %v14213_v62 = vsel %vm13367_vm0, %v10464_v45, 0.0  ;;  %v10497_v31 = vcombine.high %v10489_v13, %v10489_v13 }
 0x366   :  { %v259_v0 = vunpack.c.l.bf16 %v93_v54  ;;  %v10481_v11 = vcombine.high %v10479_v60, %v10479_v60  ;;  %v14217_v18 = vsel %vm13367_vm0, %v10480_v61, 0.0  ;;  %v260_v34 = vunpack.c.h.bf16 %v93_v54  ;;  %v431_v61 = vld [vmem:[#allocation5 + $0x1c0] sm:$0xff] }
 0x367   :  { %v14196_v8 = vadd.f32 %v14195_v58, %v14194_v63  ;;  %v14223_v35 = vsel %vm13367_vm0, %v10489_v13, 0.0  ;;  %v14225_v43 = vsel %vm13367_vm0, %v10497_v31, 0.0  ;;  %v2378_v45 = vrot.slane %v430_v3, %v15260_v14 }
 0x368   :  { %v14221_v32 = vsel %vm13367_vm0, %v10481_v11, 0.0  ;;  %v2382_v46 = vrot.slane %v430_v3, %v15262_v15  ;;  %v2386_v47 = vrot.slane %v430_v3, %v15264_v16  ;;  %v2394_v11 = vrot.slane %v431_v61, %v15248_v2 }
 0x369   :  { %v14198_v19 = vadd.f32 %v14197_v7, %v14196_v8  ;;  %v6035_v7 = vcombine.low %v6027_v56, %v6034_v57  ;;  %v6036_v8 = vcombine.low %v2346_v50, %v2350_v51  ;;  %v2390_v50 = vrot.slane %v430_v3, %v15266_v17 }
 0x36a   :  { %v2398_v12 = vrot.slane %v431_v61, %v15250_v4  ;;  %v2402_v13 = vrot.slane %v431_v61, %v15252_v5 }
 0x36b   :  { %v14200_v25 = vadd.f32 %v14199_v10, %v14198_v19  ;;  %v6044_v26 = vrot.slane %v6036_v8, %v15268_v20 }
 0x36d   :  { %v14202_v33 = vadd.f32 %v14201_v24, %v14200_v25  ;;  %v14219_v24 = vsel %vm13367_vm0, %v10479_v60, 0.0  ;;  %v2374_v25 = vrot.slane %v430_v3, %v15254_v6  ;;  %v6052_v36 = vcombine.low %v6044_v26, %v6051_v27 }
 0x36f   :  { %v14204_v38 = vadd.f32 %v14203_v29, %v14202_v33  ;;  %v8323_v29 = vmul.f32 %v6035_v7, %v259_v0  ;;  %v8324_v54 = vmul.f32 %v6052_v36, %v260_v34  ;;  %v6071_v0 = vcombine.low %v2386_v47, %v2390_v50 }
 0x371   :  { %v14206_v44 = vadd.f32 %v14205_v37, %v14204_v38  ;;  %v6053_v37 = vcombine.low %v2362_v21, %v2366_v22  ;;  %v6054_v38 = vcombine.low %v2370_v23, %v2374_v25  ;;  %v10499_v41 = vcombine.high %v8323_v29, %v8323_v29 }
 0x372   :  { %v10506_v42 = vrot.slane %v8323_v29, %v15268_v20  ;;  %v10516_v7 = vcombine.high %v8324_v54, %v8324_v54  ;;  %v10523_v8 = vrot.slane %v8324_v54, %v15268_v20  ;;  %v6085_v22 = vrot.slane %v6071_v0, %v15268_v20 }
 0x373   :  { %v14208_v49 = vadd.f32 %v14207_v40, %v14206_v44  ;;  %v10498_v40 = vcombine.high %v10496_v30, %v10496_v30  ;;  %v6061_v51 = vrot.slane %v6053_v37, %v15268_v20  ;;  %v6068_v52 = vrot.slane %v6054_v38, %v15268_v20 }
 0x374   :  { %v10513_v55 = vrot.slane %v10499_v41, %v15268_v20  ;;  %v10514_v56 = vcombine.high %v10506_v42, %v10506_v42  ;;  %v14231_v60 = vsel %vm13367_vm0, %v10506_v42, 0.0  ;;  %v10530_v25 = vrot.slane %v10516_v7, %v15268_v20 }
 0x375   :  { %v14210_v58 = vadd.f32 %v14209_v48, %v14208_v49  ;;  %v14227_v48 = vsel %vm13367_vm0, %v10496_v30, 0.0  ;;  %v94_v49 = vld [vmem:[#allocation3 + $0x1b8] sm:$0xff]  ;;  %v14229_v57 = vsel %vm13367_vm0, %v10498_v40, 0.0  ;;  %v10531_v26 = vcombine.high %v10523_v8, %v10523_v8 }
 0x376   :  { %v261_v59 = vunpack.c.l.bf16 %v94_v49  ;;  %v10515_v3 = vcombine.high %v10513_v55, %v10513_v55  ;;  %v14233_v9 = vsel %vm13367_vm0, %v10514_v56, 0.0  ;;  %v262_v29 = vunpack.c.h.bf16 %v94_v49  ;;  %v432_v56 = vld [vmem:[#allocation5 + $0x1c8] sm:$0xff] }
 0x377   :  { %v14212_v63 = vadd.f32 %v14211_v53, %v14210_v58  ;;  %v14239_v30 = vsel %vm13367_vm0, %v10523_v8, 0.0  ;;  %v14241_v38 = vsel %vm13367_vm0, %v10531_v26, 0.0  ;;  %v2410_v40 = vrot.slane %v431_v61, %v15260_v14 }
 0x378   :  { %v14237_v27 = vsel %vm13367_vm0, %v10515_v3, 0.0  ;;  %v2414_v41 = vrot.slane %v431_v61, %v15262_v15  ;;  %v2418_v42 = vrot.slane %v431_v61, %v15264_v16  ;;  %v2426_v3 = vrot.slane %v432_v56, %v15248_v2 }
 0x379   :  { %v14214_v10 = vadd.f32 %v14213_v62, %v14212_v63  ;;  %v6069_v62 = vcombine.low %v6061_v51, %v6068_v52  ;;  %v6070_v63 = vcombine.low %v2378_v45, %v2382_v46  ;;  %v2422_v45 = vrot.slane %v431_v61, %v15266_v17 }
 0x37a   :  { %v2430_v7 = vrot.slane %v432_v56, %v15250_v4  ;;  %v2434_v8 = vrot.slane %v432_v56, %v15252_v5 }
 0x37b   :  { %v14216_v19 = vadd.f32 %v14215_v1, %v14214_v10  ;;  %v6078_v21 = vrot.slane %v6070_v63, %v15268_v20 }
 0x37d   :  { %v14218_v28 = vadd.f32 %v14217_v18, %v14216_v19  ;;  %v14235_v18 = vsel %vm13367_vm0, %v10513_v55, 0.0  ;;  %v2406_v19 = vrot.slane %v431_v61, %v15254_v6  ;;  %v6086_v31 = vcombine.low %v6078_v21, %v6085_v22 }
 0x37f   :  { %v14220_v33 = vadd.f32 %v14219_v24, %v14218_v28  ;;  %v8325_v24 = vmul.f32 %v6069_v62, %v261_v59  ;;  %v8326_v49 = vmul.f32 %v6086_v31, %v262_v29  ;;  %v6105_v59 = vcombine.low %v2418_v42, %v2422_v45 }
 0x381   :  { %v14222_v39 = vadd.f32 %v14221_v32, %v14220_v33  ;;  %v6087_v32 = vcombine.low %v2394_v11, %v2398_v12  ;;  %v6088_v33 = vcombine.low %v2402_v13, %v2406_v19  ;;  %v10533_v36 = vcombine.high %v8325_v24, %v8325_v24 }
 0x382   :  { %v10540_v37 = vrot.slane %v8325_v24, %v15268_v20  ;;  %v10550_v62 = vcombine.high %v8326_v49, %v8326_v49  ;;  %v10557_v63 = vrot.slane %v8326_v49, %v15268_v20  ;;  %v6119_v12 = vrot.slane %v6105_v59, %v15268_v20 }
 0x383   :  { %v14224_v44 = vadd.f32 %v14223_v35, %v14222_v39  ;;  %v10532_v35 = vcombine.high %v10530_v25, %v10530_v25  ;;  %v6095_v46 = vrot.slane %v6087_v32, %v15268_v20  ;;  %v6102_v47 = vrot.slane %v6088_v33, %v15268_v20 }
 0x384   :  { %v10547_v50 = vrot.slane %v10533_v36, %v15268_v20  ;;  %v10548_v51 = vcombine.high %v10540_v37, %v10540_v37  ;;  %v14247_v55 = vsel %vm13367_vm0, %v10540_v37, 0.0  ;;  %v10564_v19 = vrot.slane %v10550_v62, %v15268_v20 }
 0x385   :  { %v14226_v53 = vadd.f32 %v14225_v43, %v14224_v44  ;;  %v14243_v43 = vsel %vm13367_vm0, %v10530_v25, 0.0  ;;  %v95_v44 = vld [vmem:[#allocation3 + $0x1c0] sm:$0xff]  ;;  %v14245_v52 = vsel %vm13367_vm0, %v10532_v35, 0.0  ;;  %v10565_v21 = vcombine.high %v10557_v63, %v10557_v63 }
 0x386   :  { %v263_v54 = vunpack.c.l.bf16 %v95_v44  ;;  %v10549_v61 = vcombine.high %v10547_v50, %v10547_v50  ;;  %v14249_v0 = vsel %vm13367_vm0, %v10548_v51, 0.0  ;;  %v264_v24 = vunpack.c.h.bf16 %v95_v44  ;;  %v433_v51 = vld [vmem:[#allocation5 + $0x1d0] sm:$0xff] }
 0x387   :  { %v14228_v58 = vadd.f32 %v14227_v48, %v14226_v53  ;;  %v14255_v25 = vsel %vm13367_vm0, %v10557_v63, 0.0  ;;  %v14257_v33 = vsel %vm13367_vm0, %v10565_v21, 0.0  ;;  %v2442_v35 = vrot.slane %v432_v56, %v15260_v14 }
 0x388   :  { %v14253_v22 = vsel %vm13367_vm0, %v10549_v61, 0.0  ;;  %v2446_v36 = vrot.slane %v432_v56, %v15262_v15  ;;  %v2450_v37 = vrot.slane %v432_v56, %v15264_v16  ;;  %v2458_v61 = vrot.slane %v433_v51, %v15248_v2 }
 0x389   :  { %v14230_v1 = vadd.f32 %v14229_v57, %v14228_v58  ;;  %v6103_v57 = vcombine.low %v6095_v46, %v6102_v47  ;;  %v6104_v58 = vcombine.low %v2410_v40, %v2414_v41  ;;  %v2454_v40 = vrot.slane %v432_v56, %v15266_v17 }
 0x38a   :  { %v2462_v62 = vrot.slane %v433_v51, %v15250_v4  ;;  %v2466_v63 = vrot.slane %v433_v51, %v15252_v5 }
 0x38b   :  { %v14232_v10 = vadd.f32 %v14231_v60, %v14230_v1  ;;  %v6112_v11 = vrot.slane %v6104_v58, %v15268_v20 }
 0x38d   :  { %v14234_v23 = vadd.f32 %v14233_v9, %v14232_v10  ;;  %v14251_v9 = vsel %vm13367_vm0, %v10547_v50, 0.0  ;;  %v2438_v10 = vrot.slane %v432_v56, %v15254_v6  ;;  %v6120_v26 = vcombine.low %v6112_v11, %v6119_v12 }
 0x38f   :  { %v14236_v28 = vadd.f32 %v14235_v18, %v14234_v23  ;;  %v8327_v18 = vmul.f32 %v6103_v57, %v263_v54  ;;  %v8328_v44 = vmul.f32 %v6120_v26, %v264_v24  ;;  %v6139_v54 = vcombine.low %v2450_v37, %v2454_v40 }
 0x391   :  { %v14238_v34 = vadd.f32 %v14237_v27, %v14236_v28  ;;  %v6121_v27 = vcombine.low %v2426_v3, %v2430_v7  ;;  %v6122_v28 = vcombine.low %v2434_v8, %v2438_v10  ;;  %v10567_v31 = vcombine.high %v8327_v18, %v8327_v18 }
 0x392   :  { %v10574_v32 = vrot.slane %v8327_v18, %v15268_v20  ;;  %v10584_v57 = vcombine.high %v8328_v44, %v8328_v44  ;;  %v10591_v58 = vrot.slane %v8328_v44, %v15268_v20  ;;  %v6153_v7 = vrot.slane %v6139_v54, %v15268_v20 }
 0x393   :  { %v14240_v39 = vadd.f32 %v14239_v30, %v14238_v34  ;;  %v10566_v30 = vcombine.high %v10564_v19, %v10564_v19  ;;  %v6129_v41 = vrot.slane %v6121_v27, %v15268_v20  ;;  %v6136_v42 = vrot.slane %v6122_v28, %v15268_v20 }
 0x394   :  { %v10581_v45 = vrot.slane %v10567_v31, %v15268_v20  ;;  %v10582_v46 = vcombine.high %v10574_v32, %v10574_v32  ;;  %v14263_v50 = vsel %vm13367_vm0, %v10574_v32, 0.0  ;;  %v10598_v10 = vrot.slane %v10584_v57, %v15268_v20 }
 0x395   :  { %v14242_v48 = vadd.f32 %v14241_v38, %v14240_v39  ;;  %v14259_v38 = vsel %vm13367_vm0, %v10564_v19, 0.0  ;;  %v96_v39 = vld [vmem:[#allocation3 + $0x1c8] sm:$0xff]  ;;  %v14261_v47 = vsel %vm13367_vm0, %v10566_v30, 0.0  ;;  %v10599_v11 = vcombine.high %v10591_v58, %v10591_v58 }
 0x396   :  { %v265_v49 = vunpack.c.l.bf16 %v96_v39  ;;  %v10583_v56 = vcombine.high %v10581_v45, %v10581_v45  ;;  %v14265_v59 = vsel %vm13367_vm0, %v10582_v46, 0.0  ;;  %v266_v18 = vunpack.c.h.bf16 %v96_v39  ;;  %v434_v46 = vld [vmem:[#allocation5 + $0x1d8] sm:$0xff] }
 0x397   :  { %v14244_v53 = vadd.f32 %v14243_v43, %v14242_v48  ;;  %v14271_v19 = vsel %vm13367_vm0, %v10591_v58, 0.0  ;;  %v14273_v28 = vsel %vm13367_vm0, %v10599_v11, 0.0  ;;  %v2474_v30 = vrot.slane %v433_v51, %v15260_v14 }
 0x398   :  { %v14269_v12 = vsel %vm13367_vm0, %v10583_v56, 0.0  ;;  %v2478_v31 = vrot.slane %v433_v51, %v15262_v15  ;;  %v2482_v32 = vrot.slane %v433_v51, %v15264_v16  ;;  %v2490_v56 = vrot.slane %v434_v46, %v15248_v2 }
 0x399   :  { %v14246_v60 = vadd.f32 %v14245_v52, %v14244_v53  ;;  %v6137_v52 = vcombine.low %v6129_v41, %v6136_v42  ;;  %v6138_v53 = vcombine.low %v2442_v35, %v2446_v36  ;;  %v2486_v35 = vrot.slane %v433_v51, %v15266_v17 }
 0x39a   :  { %v2494_v57 = vrot.slane %v434_v46, %v15250_v4  ;;  %v2498_v58 = vrot.slane %v434_v46, %v15252_v5 }
 0x39b   :  { %v14248_v1 = vadd.f32 %v14247_v55, %v14246_v60  ;;  %v6146_v3 = vrot.slane %v6138_v53, %v15268_v20 }
 0x39d   :  { %v14250_v13 = vadd.f32 %v14249_v0, %v14248_v1  ;;  %v14267_v0 = vsel %vm13367_vm0, %v10581_v45, 0.0  ;;  %v2470_v1 = vrot.slane %v433_v51, %v15254_v6  ;;  %v6154_v21 = vcombine.low %v6146_v3, %v6153_v7 }
 0x39f   :  { %v14252_v23 = vadd.f32 %v14251_v9, %v14250_v13  ;;  %v8329_v9 = vmul.f32 %v6137_v52, %v265_v49  ;;  %v8330_v39 = vmul.f32 %v6154_v21, %v266_v18  ;;  %v6173_v49 = vcombine.low %v2482_v32, %v2486_v35 }
 0x3a1   :  { %v14254_v29 = vadd.f32 %v14253_v22, %v14252_v23  ;;  %v6155_v22 = vcombine.low %v2458_v61, %v2462_v62  ;;  %v6156_v23 = vcombine.low %v2466_v63, %v2470_v1  ;;  %v10601_v26 = vcombine.high %v8329_v9, %v8329_v9 }
 0x3a2   :  { %v10608_v27 = vrot.slane %v8329_v9, %v15268_v20  ;;  %v10618_v52 = vcombine.high %v8330_v39, %v8330_v39  ;;  %v10625_v53 = vrot.slane %v8330_v39, %v15268_v20  ;;  %v6187_v62 = vrot.slane %v6173_v49, %v15268_v20 }
 0x3a3   :  { %v14256_v34 = vadd.f32 %v14255_v25, %v14254_v29  ;;  %v10600_v25 = vcombine.high %v10598_v10, %v10598_v10  ;;  %v6163_v36 = vrot.slane %v6155_v22, %v15268_v20  ;;  %v6170_v37 = vrot.slane %v6156_v23, %v15268_v20 }
 0x3a4   :  { %v10615_v40 = vrot.slane %v10601_v26, %v15268_v20  ;;  %v10616_v41 = vcombine.high %v10608_v27, %v10608_v27  ;;  %v14279_v45 = vsel %vm13367_vm0, %v10608_v27, 0.0  ;;  %v10632_v1 = vrot.slane %v10618_v52, %v15268_v20 }
 0x3a5   :  { %v14258_v43 = vadd.f32 %v14257_v33, %v14256_v34  ;;  %v14275_v33 = vsel %vm13367_vm0, %v10598_v10, 0.0  ;;  %v97_v34 = vld [vmem:[#allocation3 + $0x1d0] sm:$0xff]  ;;  %v14277_v42 = vsel %vm13367_vm0, %v10600_v25, 0.0  ;;  %v10633_v3 = vcombine.high %v10625_v53, %v10625_v53 }
 0x3a6   :  { %v267_v44 = vunpack.c.l.bf16 %v97_v34  ;;  %v10617_v51 = vcombine.high %v10615_v40, %v10615_v40  ;;  %v14281_v54 = vsel %vm13367_vm0, %v10616_v41, 0.0  ;;  %v268_v9 = vunpack.c.h.bf16 %v97_v34  ;;  %v435_v41 = vld [vmem:[#allocation5 + $0x1e0] sm:$0xff] }
 0x3a7   :  { %v14260_v48 = vadd.f32 %v14259_v38, %v14258_v43  ;;  %v14287_v10 = vsel %vm13367_vm0, %v10625_v53, 0.0  ;;  %v14289_v23 = vsel %vm13367_vm0, %v10633_v3, 0.0  ;;  %v2506_v25 = vrot.slane %v434_v46, %v15260_v14 }
 0x3a8   :  { %v14285_v7 = vsel %vm13367_vm0, %v10617_v51, 0.0  ;;  %v2510_v26 = vrot.slane %v434_v46, %v15262_v15  ;;  %v2514_v27 = vrot.slane %v434_v46, %v15264_v16  ;;  %v2522_v51 = vrot.slane %v435_v41, %v15248_v2 }
 0x3a9   :  { %v14262_v55 = vadd.f32 %v14261_v47, %v14260_v48  ;;  %v6171_v47 = vcombine.low %v6163_v36, %v6170_v37  ;;  %v6172_v48 = vcombine.low %v2474_v30, %v2478_v31  ;;  %v2518_v30 = vrot.slane %v434_v46, %v15266_v17 }
 0x3aa   :  { %v2526_v52 = vrot.slane %v435_v41, %v15250_v4  ;;  %v2530_v53 = vrot.slane %v435_v41, %v15252_v5 }
 0x3ab   :  { %v14264_v60 = vadd.f32 %v14263_v50, %v14262_v55  ;;  %v6180_v61 = vrot.slane %v6172_v48, %v15268_v20 }
 0x3ad   :  { %v14266_v8 = vadd.f32 %v14265_v59, %v14264_v60  ;;  %v14283_v59 = vsel %vm13367_vm0, %v10615_v40, 0.0  ;;  %v2502_v60 = vrot.slane %v434_v46, %v15254_v6  ;;  %v6188_v11 = vcombine.low %v6180_v61, %v6187_v62 }
 0x3af   :  { %v14268_v13 = vadd.f32 %v14267_v0, %v14266_v8  ;;  %v8331_v0 = vmul.f32 %v6171_v47, %v267_v44  ;;  %v8332_v34 = vmul.f32 %v6188_v11, %v268_v9  ;;  %v6207_v44 = vcombine.low %v2514_v27, %v2518_v30 }
 0x3b1   :  { %v14270_v24 = vadd.f32 %v14269_v12, %v14268_v13  ;;  %v6189_v12 = vcombine.low %v2490_v56, %v2494_v57  ;;  %v6190_v13 = vcombine.low %v2498_v58, %v2502_v60  ;;  %v10635_v21 = vcombine.high %v8331_v0, %v8331_v0 }
 0x3b2   :  { %v10642_v22 = vrot.slane %v8331_v0, %v15268_v20  ;;  %v10652_v47 = vcombine.high %v8332_v34, %v8332_v34  ;;  %v10659_v48 = vrot.slane %v8332_v34, %v15268_v20  ;;  %v6221_v57 = vrot.slane %v6207_v44, %v15268_v20 }
 0x3b3   :  { %v14272_v29 = vadd.f32 %v14271_v19, %v14270_v24  ;;  %v10634_v19 = vcombine.high %v10632_v1, %v10632_v1  ;;  %v6197_v31 = vrot.slane %v6189_v12, %v15268_v20  ;;  %v6204_v32 = vrot.slane %v6190_v13, %v15268_v20 }
 0x3b4   :  { %v10649_v35 = vrot.slane %v10635_v21, %v15268_v20  ;;  %v10650_v36 = vcombine.high %v10642_v22, %v10642_v22  ;;  %v14295_v40 = vsel %vm13367_vm0, %v10642_v22, 0.0  ;;  %v10666_v60 = vrot.slane %v10652_v47, %v15268_v20 }
 0x3b5   :  { %v14274_v38 = vadd.f32 %v14273_v28, %v14272_v29  ;;  %v14291_v28 = vsel %vm13367_vm0, %v10632_v1, 0.0  ;;  %v98_v29 = vld [vmem:[#allocation3 + $0x1d8] sm:$0xff]  ;;  %v14293_v37 = vsel %vm13367_vm0, %v10634_v19, 0.0  ;;  %v10667_v61 = vcombine.high %v10659_v48, %v10659_v48 }
 0x3b6   :  { %v269_v39 = vunpack.c.l.bf16 %v98_v29  ;;  %v10651_v46 = vcombine.high %v10649_v35, %v10649_v35  ;;  %v14297_v49 = vsel %vm13367_vm0, %v10650_v36, 0.0  ;;  %v270_v0 = vunpack.c.h.bf16 %v98_v29  ;;  %v436_v36 = vld [vmem:[#allocation5 + $0x1e8] sm:$0xff] }
 0x3b7   :  { %v14276_v43 = vadd.f32 %v14275_v33, %v14274_v38  ;;  %v14303_v1 = vsel %vm13367_vm0, %v10659_v48, 0.0  ;;  %v14305_v13 = vsel %vm13367_vm0, %v10667_v61, 0.0  ;;  %v2538_v19 = vrot.slane %v435_v41, %v15260_v14 }
 0x3b8   :  { %v14301_v62 = vsel %vm13367_vm0, %v10651_v46, 0.0  ;;  %v2542_v21 = vrot.slane %v435_v41, %v15262_v15  ;;  %v2546_v22 = vrot.slane %v435_v41, %v15264_v16  ;;  %v2554_v46 = vrot.slane %v436_v36, %v15248_v2 }
 0x3b9   :  { %v14278_v50 = vadd.f32 %v14277_v42, %v14276_v43  ;;  %v6205_v42 = vcombine.low %v6197_v31, %v6204_v32  ;;  %v6206_v43 = vcombine.low %v2506_v25, %v2510_v26  ;;  %v2550_v25 = vrot.slane %v435_v41, %v15266_v17 }
 0x3ba   :  { %v2558_v47 = vrot.slane %v436_v36, %v15250_v4  ;;  %v2562_v48 = vrot.slane %v436_v36, %v15252_v5 }
 0x3bb   :  { %v14280_v55 = vadd.f32 %v14279_v45, %v14278_v50  ;;  %v6214_v56 = vrot.slane %v6206_v43, %v15268_v20 }
 0x3bd   :  { %v14282_v63 = vadd.f32 %v14281_v54, %v14280_v55  ;;  %v14299_v54 = vsel %vm13367_vm0, %v10649_v35, 0.0  ;;  %v2534_v55 = vrot.slane %v435_v41, %v15254_v6  ;;  %v6222_v3 = vcombine.low %v6214_v56, %v6221_v57 }
 0x3bf   :  { %v14284_v8 = vadd.f32 %v14283_v59, %v14282_v63  ;;  %v8333_v59 = vmul.f32 %v6205_v42, %v269_v39  ;;  %v8334_v29 = vmul.f32 %v6222_v3, %v270_v0  ;;  %v6241_v39 = vcombine.low %v2546_v22, %v2550_v25 }
 0x3c1   :  { %v14286_v18 = vadd.f32 %v14285_v7, %v14284_v8  ;;  %v6223_v7 = vcombine.low %v2522_v51, %v2526_v52  ;;  %v6224_v8 = vcombine.low %v2530_v53, %v2534_v55  ;;  %v10669_v11 = vcombine.high %v8333_v59, %v8333_v59 }
 0x3c2   :  { %v10676_v12 = vrot.slane %v8333_v59, %v15268_v20  ;;  %v10686_v42 = vcombine.high %v8334_v29, %v8334_v29  ;;  %v10693_v43 = vrot.slane %v8334_v29, %v15268_v20  ;;  %v6255_v52 = vrot.slane %v6241_v39, %v15268_v20 }
 0x3c3   :  { %v14288_v24 = vadd.f32 %v14287_v10, %v14286_v18  ;;  %v10668_v10 = vcombine.high %v10666_v60, %v10666_v60  ;;  %v6231_v26 = vrot.slane %v6223_v7, %v15268_v20  ;;  %v6238_v27 = vrot.slane %v6224_v8, %v15268_v20 }
 0x3c4   :  { %v10683_v30 = vrot.slane %v10669_v11, %v15268_v20  ;;  %v10684_v31 = vcombine.high %v10676_v12, %v10676_v12  ;;  %v14311_v35 = vsel %vm13367_vm0, %v10676_v12, 0.0  ;;  %v10700_v55 = vrot.slane %v10686_v42, %v15268_v20 }
 0x3c5   :  { %v14290_v33 = vadd.f32 %v14289_v23, %v14288_v24  ;;  %v14307_v23 = vsel %vm13367_vm0, %v10666_v60, 0.0  ;;  %v99_v24 = vld [vmem:[#allocation3 + $0x1e0] sm:$0xff]  ;;  %v14309_v32 = vsel %vm13367_vm0, %v10668_v10, 0.0  ;;  %v10701_v56 = vcombine.high %v10693_v43, %v10693_v43 }
 0x3c6   :  { %v271_v34 = vunpack.c.l.bf16 %v99_v24  ;;  %v10685_v41 = vcombine.high %v10683_v30, %v10683_v30  ;;  %v14313_v44 = vsel %vm13367_vm0, %v10684_v31, 0.0  ;;  %v272_v59 = vunpack.c.h.bf16 %v99_v24  ;;  %v437_v31 = vld [vmem:[#allocation5 + $0x1f0] sm:$0xff] }
 0x3c7   :  { %v14292_v38 = vadd.f32 %v14291_v28, %v14290_v33  ;;  %v14319_v60 = vsel %vm13367_vm0, %v10693_v43, 0.0  ;;  %v14321_v8 = vsel %vm13367_vm0, %v10701_v56, 0.0  ;;  %v2570_v10 = vrot.slane %v436_v36, %v15260_v14 }
 0x3c8   :  { %v14317_v57 = vsel %vm13367_vm0, %v10685_v41, 0.0  ;;  %v2574_v11 = vrot.slane %v436_v36, %v15262_v15  ;;  %v2578_v12 = vrot.slane %v436_v36, %v15264_v16  ;;  %v2586_v41 = vrot.slane %v437_v31, %v15248_v2 }
 0x3c9   :  { %v14294_v45 = vadd.f32 %v14293_v37, %v14292_v38  ;;  %v6239_v37 = vcombine.low %v6231_v26, %v6238_v27  ;;  %v6240_v38 = vcombine.low %v2538_v19, %v2542_v21  ;;  %v2582_v19 = vrot.slane %v436_v36, %v15266_v17 }
 0x3ca   :  { %v2590_v42 = vrot.slane %v437_v31, %v15250_v4  ;;  %v2594_v43 = vrot.slane %v437_v31, %v15252_v5 }
 0x3cb   :  { %v14296_v50 = vadd.f32 %v14295_v40, %v14294_v45  ;;  %v6248_v51 = vrot.slane %v6240_v38, %v15268_v20 }
 0x3cd   :  { %v14298_v58 = vadd.f32 %v14297_v49, %v14296_v50  ;;  %v14315_v49 = vsel %vm13367_vm0, %v10683_v30, 0.0  ;;  %v2566_v50 = vrot.slane %v436_v36, %v15254_v6  ;;  %v6256_v61 = vcombine.low %v6248_v51, %v6255_v52 }
 0x3cf   :  { %v14300_v63 = vadd.f32 %v14299_v54, %v14298_v58  ;;  %v8335_v54 = vmul.f32 %v6239_v37, %v271_v34  ;;  %v8336_v24 = vmul.f32 %v6256_v61, %v272_v59  ;;  %v6275_v34 = vcombine.low %v2578_v12, %v2582_v19 }
 0x3d1   :  { %v14302_v9 = vadd.f32 %v14301_v62, %v14300_v63  ;;  %v6257_v62 = vcombine.low %v2554_v46, %v2558_v47  ;;  %v6258_v63 = vcombine.low %v2562_v48, %v2566_v50  ;;  %v10703_v3 = vcombine.high %v8335_v54, %v8335_v54 }
 0x3d2   :  { %v10710_v7 = vrot.slane %v8335_v54, %v15268_v20  ;;  %v10720_v37 = vcombine.high %v8336_v24, %v8336_v24  ;;  %v10727_v38 = vrot.slane %v8336_v24, %v15268_v20  ;;  %v6289_v47 = vrot.slane %v6275_v34, %v15268_v20 }
 0x3d3   :  { %v14304_v18 = vadd.f32 %v14303_v1, %v14302_v9  ;;  %v10702_v1 = vcombine.high %v10700_v55, %v10700_v55  ;;  %v6265_v21 = vrot.slane %v6257_v62, %v15268_v20  ;;  %v6272_v22 = vrot.slane %v6258_v63, %v15268_v20 }
 0x3d4   :  { %v10717_v25 = vrot.slane %v10703_v3, %v15268_v20  ;;  %v10718_v26 = vcombine.high %v10710_v7, %v10710_v7  ;;  %v14327_v30 = vsel %vm13367_vm0, %v10710_v7, 0.0  ;;  %v10734_v50 = vrot.slane %v10720_v37, %v15268_v20 }
 0x3d5   :  { %v14306_v28 = vadd.f32 %v14305_v13, %v14304_v18  ;;  %v14323_v13 = vsel %vm13367_vm0, %v10700_v55, 0.0  ;;  %v100_v18 = vld [vmem:[#allocation3 + $0x1e8] sm:$0xff]  ;;  %v14325_v27 = vsel %vm13367_vm0, %v10702_v1, 0.0  ;;  %v10735_v51 = vcombine.high %v10727_v38, %v10727_v38 }
 0x3d6   :  { %v273_v29 = vunpack.c.l.bf16 %v100_v18  ;;  %v10719_v36 = vcombine.high %v10717_v25, %v10717_v25  ;;  %v14329_v39 = vsel %vm13367_vm0, %v10718_v26, 0.0  ;;  %v274_v54 = vunpack.c.h.bf16 %v100_v18  ;;  %v438_v26 = vld [vmem:[#allocation5 + $0x1f8] sm:$0xff] }
 0x3d7   :  { %v14308_v33 = vadd.f32 %v14307_v23, %v14306_v28  ;;  %v14335_v55 = vsel %vm13367_vm0, %v10727_v38, 0.0  ;;  %v14337_v63 = vsel %vm13367_vm0, %v10735_v51, 0.0  ;;  %v2602_v1 = vrot.slane %v437_v31, %v15260_v14 }
 0x3d8   :  { %v14333_v52 = vsel %vm13367_vm0, %v10719_v36, 0.0  ;;  %v2606_v3 = vrot.slane %v437_v31, %v15262_v15  ;;  %v2610_v7 = vrot.slane %v437_v31, %v15264_v16  ;;  %v2618_v36 = vrot.slane %v438_v26, %v15248_v2 }
 0x3d9   :  { %v14310_v40 = vadd.f32 %v14309_v32, %v14308_v33  ;;  %v6273_v32 = vcombine.low %v6265_v21, %v6272_v22  ;;  %v6274_v33 = vcombine.low %v2570_v10, %v2574_v11  ;;  %v2614_v10 = vrot.slane %v437_v31, %v15266_v17 }
 0x3da   :  { %v2622_v37 = vrot.slane %v438_v26, %v15250_v4  ;;  %v2626_v38 = vrot.slane %v438_v26, %v15252_v5 }
 0x3db   :  { %v14312_v45 = vadd.f32 %v14311_v35, %v14310_v40  ;;  %v6282_v46 = vrot.slane %v6274_v33, %v15268_v20 }
 0x3dd   :  { %v14314_v53 = vadd.f32 %v14313_v44, %v14312_v45  ;;  %v14331_v44 = vsel %vm13367_vm0, %v10717_v25, 0.0  ;;  %v2598_v45 = vrot.slane %v437_v31, %v15254_v6  ;;  %v6290_v56 = vcombine.low %v6282_v46, %v6289_v47 }
 0x3df   :  { %v14316_v58 = vadd.f32 %v14315_v49, %v14314_v53  ;;  %v8337_v49 = vmul.f32 %v6273_v32, %v273_v29  ;;  %v8338_v18 = vmul.f32 %v6290_v56, %v274_v54  ;;  %v6309_v29 = vcombine.low %v2610_v7, %v2614_v10 }
 0x3e1   :  { %v14318_v0 = vadd.f32 %v14317_v57, %v14316_v58  ;;  %v6291_v57 = vcombine.low %v2586_v41, %v2590_v42  ;;  %v6292_v58 = vcombine.low %v2594_v43, %v2598_v45  ;;  %v10737_v61 = vcombine.high %v8337_v49, %v8337_v49 }
 0x3e2   :  { %v10744_v62 = vrot.slane %v8337_v49, %v15268_v20  ;;  %v10754_v32 = vcombine.high %v8338_v18, %v8338_v18  ;;  %v10761_v33 = vrot.slane %v8338_v18, %v15268_v20  ;;  %v6323_v42 = vrot.slane %v6309_v29, %v15268_v20 }
 0x3e3   :  { %v14320_v9 = vadd.f32 %v14319_v60, %v14318_v0  ;;  %v10736_v60 = vcombine.high %v10734_v50, %v10734_v50  ;;  %v6299_v11 = vrot.slane %v6291_v57, %v15268_v20  ;;  %v6306_v12 = vrot.slane %v6292_v58, %v15268_v20 }
 0x3e4   :  { %v10751_v19 = vrot.slane %v10737_v61, %v15268_v20  ;;  %v10752_v21 = vcombine.high %v10744_v62, %v10744_v62  ;;  %v14343_v25 = vsel %vm13367_vm0, %v10744_v62, 0.0  ;;  %v10768_v45 = vrot.slane %v10754_v32, %v15268_v20 }
 0x3e5   :  { %v14322_v23 = vadd.f32 %v14321_v8, %v14320_v9  ;;  %v14339_v8 = vsel %vm13367_vm0, %v10734_v50, 0.0  ;;  %v101_v9 = vld [vmem:[#allocation3 + $0x1f0] sm:$0xff]  ;;  %v14341_v22 = vsel %vm13367_vm0, %v10736_v60, 0.0  ;;  %v10769_v46 = vcombine.high %v10761_v33, %v10761_v33 }
 0x3e6   :  { %v275_v24 = vunpack.c.l.bf16 %v101_v9  ;;  %v10753_v31 = vcombine.high %v10751_v19, %v10751_v19  ;;  %v14345_v34 = vsel %vm13367_vm0, %v10752_v21, 0.0  ;;  %v276_v49 = vunpack.c.h.bf16 %v101_v9  ;;  %v439_v21 = vld [vmem:[#allocation5 + $0x200] sm:$0xff] }
 0x3e7   :  { %v14324_v28 = vadd.f32 %v14323_v13, %v14322_v23  ;;  %v14351_v50 = vsel %vm13367_vm0, %v10761_v33, 0.0  ;;  %v14353_v58 = vsel %vm13367_vm0, %v10769_v46, 0.0  ;;  %v2634_v60 = vrot.slane %v438_v26, %v15260_v14 }
 0x3e8   :  { %v14349_v47 = vsel %vm13367_vm0, %v10753_v31, 0.0  ;;  %v2638_v61 = vrot.slane %v438_v26, %v15262_v15  ;;  %v2642_v62 = vrot.slane %v438_v26, %v15264_v16  ;;  %v2650_v31 = vrot.slane %v439_v21, %v15248_v2 }
 0x3e9   :  { %v14326_v35 = vadd.f32 %v14325_v27, %v14324_v28  ;;  %v6307_v27 = vcombine.low %v6299_v11, %v6306_v12  ;;  %v6308_v28 = vcombine.low %v2602_v1, %v2606_v3  ;;  %v2646_v1 = vrot.slane %v438_v26, %v15266_v17 }
 0x3ea   :  { %v2654_v32 = vrot.slane %v439_v21, %v15250_v4  ;;  %v2658_v33 = vrot.slane %v439_v21, %v15252_v5 }
 0x3eb   :  { %v14328_v40 = vadd.f32 %v14327_v30, %v14326_v35  ;;  %v6316_v41 = vrot.slane %v6308_v28, %v15268_v20 }
 0x3ed   :  { %v14330_v48 = vadd.f32 %v14329_v39, %v14328_v40  ;;  %v14347_v39 = vsel %vm13367_vm0, %v10751_v19, 0.0  ;;  %v2630_v40 = vrot.slane %v438_v26, %v15254_v6  ;;  %v6324_v51 = vcombine.low %v6316_v41, %v6323_v42 }
 0x3ef   :  { %v14332_v53 = vadd.f32 %v14331_v44, %v14330_v48  ;;  %v8339_v44 = vmul.f32 %v6307_v27, %v275_v24  ;;  %v8340_v9 = vmul.f32 %v6324_v51, %v276_v49  ;;  %v6343_v24 = vcombine.low %v2642_v62, %v2646_v1 }
 0x3f1   :  { %v14334_v59 = vadd.f32 %v14333_v52, %v14332_v53  ;;  %v6325_v52 = vcombine.low %v2618_v36, %v2622_v37  ;;  %v6326_v53 = vcombine.low %v2626_v38, %v2630_v40  ;;  %v10771_v56 = vcombine.high %v8339_v44, %v8339_v44 }
 0x3f2   :  { %v10778_v57 = vrot.slane %v8339_v44, %v15268_v20  ;;  %v10788_v27 = vcombine.high %v8340_v9, %v8340_v9  ;;  %v10795_v28 = vrot.slane %v8340_v9, %v15268_v20  ;;  %v6357_v37 = vrot.slane %v6343_v24, %v15268_v20 }
 0x3f3   :  { %v14336_v0 = vadd.f32 %v14335_v55, %v14334_v59  ;;  %v10770_v55 = vcombine.high %v10768_v45, %v10768_v45  ;;  %v6333_v3 = vrot.slane %v6325_v52, %v15268_v20  ;;  %v6340_v7 = vrot.slane %v6326_v53, %v15268_v20 }
 0x3f4   :  { %v10785_v10 = vrot.slane %v10771_v56, %v15268_v20  ;;  %v10786_v11 = vcombine.high %v10778_v57, %v10778_v57  ;;  %v14359_v19 = vsel %vm13367_vm0, %v10778_v57, 0.0  ;;  %v10802_v40 = vrot.slane %v10788_v27, %v15268_v20 }
 0x3f5   :  { %v14338_v13 = vadd.f32 %v14337_v63, %v14336_v0  ;;  %v14355_v63 = vsel %vm13367_vm0, %v10768_v45, 0.0  ;;  %v102_v0 = vld [vmem:[#allocation3 + $0x1f8] sm:$0xff]  ;;  %v14357_v12 = vsel %vm13367_vm0, %v10770_v55, 0.0  ;;  %v10803_v41 = vcombine.high %v10795_v28, %v10795_v28 }
 0x3f6   :  { %v277_v18 = vunpack.c.l.bf16 %v102_v0  ;;  %v10787_v26 = vcombine.high %v10785_v10, %v10785_v10  ;;  %v14361_v29 = vsel %vm13367_vm0, %v10786_v11, 0.0  ;;  %v278_v44 = vunpack.c.h.bf16 %v102_v0  ;;  %v440_v11 = vld [vmem:[#allocation5 + $0x208] sm:$0xff] }
 0x3f7   :  { %v14340_v23 = vadd.f32 %v14339_v8, %v14338_v13  ;;  %v14367_v45 = vsel %vm13367_vm0, %v10795_v28, 0.0  ;;  %v14369_v53 = vsel %vm13367_vm0, %v10803_v41, 0.0  ;;  %v2666_v55 = vrot.slane %v439_v21, %v15260_v14 }
 0x3f8   :  { %v14365_v42 = vsel %vm13367_vm0, %v10787_v26, 0.0  ;;  %v2670_v56 = vrot.slane %v439_v21, %v15262_v15  ;;  %v2674_v57 = vrot.slane %v439_v21, %v15264_v16  ;;  %v2682_v26 = vrot.slane %v440_v11, %v15248_v2 }
 0x3f9   :  { %v14342_v30 = vadd.f32 %v14341_v22, %v14340_v23  ;;  %v6341_v22 = vcombine.low %v6333_v3, %v6340_v7  ;;  %v6342_v23 = vcombine.low %v2634_v60, %v2638_v61  ;;  %v2678_v60 = vrot.slane %v439_v21, %v15266_v17 }
 0x3fa   :  { %v2686_v27 = vrot.slane %v440_v11, %v15250_v4  ;;  %v2690_v28 = vrot.slane %v440_v11, %v15252_v5 }
 0x3fb   :  { %v14344_v35 = vadd.f32 %v14343_v25, %v14342_v30  ;;  %v6350_v36 = vrot.slane %v6342_v23, %v15268_v20 }
 0x3fd   :  { %v14346_v43 = vadd.f32 %v14345_v34, %v14344_v35  ;;  %v14363_v34 = vsel %vm13367_vm0, %v10785_v10, 0.0  ;;  %v2662_v35 = vrot.slane %v439_v21, %v15254_v6  ;;  %v6358_v46 = vcombine.low %v6350_v36, %v6357_v37 }
 0x3ff   :  { %v14348_v48 = vadd.f32 %v14347_v39, %v14346_v43  ;;  %v8341_v39 = vmul.f32 %v6341_v22, %v277_v18  ;;  %v8342_v0 = vmul.f32 %v6358_v46, %v278_v44  ;;  %v6377_v18 = vcombine.low %v2674_v57, %v2678_v60 }
 0x401   :  { %v14350_v54 = vadd.f32 %v14349_v47, %v14348_v48  ;;  %v6359_v47 = vcombine.low %v2650_v31, %v2654_v32  ;;  %v6360_v48 = vcombine.low %v2658_v33, %v2662_v35  ;;  %v10805_v51 = vcombine.high %v8341_v39, %v8341_v39 }
 0x402   :  { %v10812_v52 = vrot.slane %v8341_v39, %v15268_v20  ;;  %v10822_v22 = vcombine.high %v8342_v0, %v8342_v0  ;;  %v10829_v23 = vrot.slane %v8342_v0, %v15268_v20  ;;  %v6391_v32 = vrot.slane %v6377_v18, %v15268_v20 }
 0x403   :  { %v14352_v59 = vadd.f32 %v14351_v50, %v14350_v54  ;;  %v10804_v50 = vcombine.high %v10802_v40, %v10802_v40  ;;  %v6367_v61 = vrot.slane %v6359_v47, %v15268_v20  ;;  %v6374_v62 = vrot.slane %v6360_v48, %v15268_v20 }
 0x404   :  { %v10819_v1 = vrot.slane %v10805_v51, %v15268_v20  ;;  %v10820_v3 = vcombine.high %v10812_v52, %v10812_v52  ;;  %v14375_v10 = vsel %vm13367_vm0, %v10812_v52, 0.0  ;;  %v10836_v35 = vrot.slane %v10822_v22, %v15268_v20 }
 0x405   :  { %v14354_v8 = vadd.f32 %v14353_v58, %v14352_v59  ;;  %v14371_v58 = vsel %vm13367_vm0, %v10802_v40, 0.0  ;;  %v103_v59 = vld [vmem:[#allocation3 + $0x200] sm:$0xff]  ;;  %v14373_v7 = vsel %vm13367_vm0, %v10804_v50, 0.0  ;;  %v10837_v36 = vcombine.high %v10829_v23, %v10829_v23 }
 0x406   :  { %v279_v9 = vunpack.c.l.bf16 %v103_v59  ;;  %v10821_v21 = vcombine.high %v10819_v1, %v10819_v1  ;;  %v14377_v24 = vsel %vm13367_vm0, %v10820_v3, 0.0  ;;  %v280_v39 = vunpack.c.h.bf16 %v103_v59  ;;  %v441_v3 = vld [vmem:[#allocation5 + $0x210] sm:$0xff] }
 0x407   :  { %v14356_v13 = vadd.f32 %v14355_v63, %v14354_v8  ;;  %v14383_v40 = vsel %vm13367_vm0, %v10829_v23, 0.0  ;;  %v14385_v48 = vsel %vm13367_vm0, %v10837_v36, 0.0  ;;  %v2698_v50 = vrot.slane %v440_v11, %v15260_v14 }
 0x408   :  { %v14381_v37 = vsel %vm13367_vm0, %v10821_v21, 0.0  ;;  %v2702_v51 = vrot.slane %v440_v11, %v15262_v15  ;;  %v2706_v52 = vrot.slane %v440_v11, %v15264_v16  ;;  %v2714_v21 = vrot.slane %v441_v3, %v15248_v2 }
 0x409   :  { %v14358_v25 = vadd.f32 %v14357_v12, %v14356_v13  ;;  %v6375_v12 = vcombine.low %v6367_v61, %v6374_v62  ;;  %v6376_v13 = vcombine.low %v2666_v55, %v2670_v56  ;;  %v2710_v55 = vrot.slane %v440_v11, %v15266_v17 }
 0x40a   :  { %v2718_v22 = vrot.slane %v441_v3, %v15250_v4  ;;  %v2722_v23 = vrot.slane %v441_v3, %v15252_v5 }
 0x40b   :  { %v14360_v30 = vadd.f32 %v14359_v19, %v14358_v25  ;;  %v6384_v31 = vrot.slane %v6376_v13, %v15268_v20 }
 0x40d   :  { %v14362_v38 = vadd.f32 %v14361_v29, %v14360_v30  ;;  %v14379_v29 = vsel %vm13367_vm0, %v10819_v1, 0.0  ;;  %v2694_v30 = vrot.slane %v440_v11, %v15254_v6  ;;  %v6392_v41 = vcombine.low %v6384_v31, %v6391_v32 }
 0x40f   :  { %v14364_v43 = vadd.f32 %v14363_v34, %v14362_v38  ;;  %v8343_v34 = vmul.f32 %v6375_v12, %v279_v9  ;;  %v8344_v59 = vmul.f32 %v6392_v41, %v280_v39  ;;  %v6411_v9 = vcombine.low %v2706_v52, %v2710_v55 }
 0x411   :  { %v14366_v49 = vadd.f32 %v14365_v42, %v14364_v43  ;;  %v6393_v42 = vcombine.low %v2682_v26, %v2686_v27  ;;  %v6394_v43 = vcombine.low %v2690_v28, %v2694_v30  ;;  %v10839_v46 = vcombine.high %v8343_v34, %v8343_v34 }
 0x412   :  { %v10846_v47 = vrot.slane %v8343_v34, %v15268_v20  ;;  %v10856_v12 = vcombine.high %v8344_v59, %v8344_v59  ;;  %v10863_v13 = vrot.slane %v8344_v59, %v15268_v20  ;;  %v6425_v27 = vrot.slane %v6411_v9, %v15268_v20 }
 0x413   :  { %v14368_v54 = vadd.f32 %v14367_v45, %v14366_v49  ;;  %v10838_v45 = vcombine.high %v10836_v35, %v10836_v35  ;;  %v6401_v56 = vrot.slane %v6393_v42, %v15268_v20  ;;  %v6408_v57 = vrot.slane %v6394_v43, %v15268_v20 }
 0x414   :  { %v10853_v60 = vrot.slane %v10839_v46, %v15268_v20  ;;  %v10854_v61 = vcombine.high %v10846_v47, %v10846_v47  ;;  %v14391_v1 = vsel %vm13367_vm0, %v10846_v47, 0.0  ;;  %v10870_v30 = vrot.slane %v10856_v12, %v15268_v20 }
 0x415   :  { %v14370_v63 = vadd.f32 %v14369_v53, %v14368_v54  ;;  %v14387_v53 = vsel %vm13367_vm0, %v10836_v35, 0.0  ;;  %v104_v54 = vld [vmem:[#allocation3 + $0x208] sm:$0xff]  ;;  %v14389_v62 = vsel %vm13367_vm0, %v10838_v45, 0.0  ;;  %v10871_v31 = vcombine.high %v10863_v13, %v10863_v13 }
 0x416   :  { %v281_v0 = vunpack.c.l.bf16 %v104_v54  ;;  %v10855_v11 = vcombine.high %v10853_v60, %v10853_v60  ;;  %v14393_v18 = vsel %vm13367_vm0, %v10854_v61, 0.0  ;;  %v282_v34 = vunpack.c.h.bf16 %v104_v54  ;;  %v442_v61 = vld [vmem:[#allocation5 + $0x218] sm:$0xff] }
 0x417   :  { %v14372_v8 = vadd.f32 %v14371_v58, %v14370_v63  ;;  %v14399_v35 = vsel %vm13367_vm0, %v10863_v13, 0.0  ;;  %v14401_v43 = vsel %vm13367_vm0, %v10871_v31, 0.0  ;;  %v2730_v45 = vrot.slane %v441_v3, %v15260_v14 }
 0x418   :  { %v14397_v32 = vsel %vm13367_vm0, %v10855_v11, 0.0  ;;  %v2734_v46 = vrot.slane %v441_v3, %v15262_v15  ;;  %v2738_v47 = vrot.slane %v441_v3, %v15264_v16  ;;  %v2746_v11 = vrot.slane %v442_v61, %v15248_v2 }
 0x419   :  { %v14374_v19 = vadd.f32 %v14373_v7, %v14372_v8  ;;  %v6409_v7 = vcombine.low %v6401_v56, %v6408_v57  ;;  %v6410_v8 = vcombine.low %v2698_v50, %v2702_v51  ;;  %v2742_v50 = vrot.slane %v441_v3, %v15266_v17 }
 0x41a   :  { %v2750_v12 = vrot.slane %v442_v61, %v15250_v4  ;;  %v2754_v13 = vrot.slane %v442_v61, %v15252_v5 }
 0x41b   :  { %v14376_v25 = vadd.f32 %v14375_v10, %v14374_v19  ;;  %v6418_v26 = vrot.slane %v6410_v8, %v15268_v20 }
 0x41d   :  { %v14378_v33 = vadd.f32 %v14377_v24, %v14376_v25  ;;  %v14395_v24 = vsel %vm13367_vm0, %v10853_v60, 0.0  ;;  %v2726_v25 = vrot.slane %v441_v3, %v15254_v6  ;;  %v6426_v36 = vcombine.low %v6418_v26, %v6425_v27 }
 0x41f   :  { %v14380_v38 = vadd.f32 %v14379_v29, %v14378_v33  ;;  %v8345_v29 = vmul.f32 %v6409_v7, %v281_v0  ;;  %v8346_v54 = vmul.f32 %v6426_v36, %v282_v34  ;;  %v6445_v0 = vcombine.low %v2738_v47, %v2742_v50 }
 0x421   :  { %v14382_v44 = vadd.f32 %v14381_v37, %v14380_v38  ;;  %v6427_v37 = vcombine.low %v2714_v21, %v2718_v22  ;;  %v6428_v38 = vcombine.low %v2722_v23, %v2726_v25  ;;  %v10873_v41 = vcombine.high %v8345_v29, %v8345_v29 }
 0x422   :  { %v10880_v42 = vrot.slane %v8345_v29, %v15268_v20  ;;  %v10890_v7 = vcombine.high %v8346_v54, %v8346_v54  ;;  %v10897_v8 = vrot.slane %v8346_v54, %v15268_v20  ;;  %v6459_v22 = vrot.slane %v6445_v0, %v15268_v20 }
 0x423   :  { %v14384_v49 = vadd.f32 %v14383_v40, %v14382_v44  ;;  %v10872_v40 = vcombine.high %v10870_v30, %v10870_v30  ;;  %v6435_v51 = vrot.slane %v6427_v37, %v15268_v20  ;;  %v6442_v52 = vrot.slane %v6428_v38, %v15268_v20 }
 0x424   :  { %v10887_v55 = vrot.slane %v10873_v41, %v15268_v20  ;;  %v10888_v56 = vcombine.high %v10880_v42, %v10880_v42  ;;  %v14407_v60 = vsel %vm13367_vm0, %v10880_v42, 0.0  ;;  %v10904_v25 = vrot.slane %v10890_v7, %v15268_v20 }
 0x425   :  { %v14386_v58 = vadd.f32 %v14385_v48, %v14384_v49  ;;  %v14403_v48 = vsel %vm13367_vm0, %v10870_v30, 0.0  ;;  %v105_v49 = vld [vmem:[#allocation3 + $0x210] sm:$0xff]  ;;  %v14405_v57 = vsel %vm13367_vm0, %v10872_v40, 0.0  ;;  %v10905_v26 = vcombine.high %v10897_v8, %v10897_v8 }
 0x426   :  { %v283_v59 = vunpack.c.l.bf16 %v105_v49  ;;  %v10889_v3 = vcombine.high %v10887_v55, %v10887_v55  ;;  %v14409_v9 = vsel %vm13367_vm0, %v10888_v56, 0.0  ;;  %v284_v29 = vunpack.c.h.bf16 %v105_v49  ;;  %v443_v56 = vld [vmem:[#allocation5 + $0x220] sm:$0xff] }
 0x427   :  { %v14388_v63 = vadd.f32 %v14387_v53, %v14386_v58  ;;  %v14415_v30 = vsel %vm13367_vm0, %v10897_v8, 0.0  ;;  %v14417_v38 = vsel %vm13367_vm0, %v10905_v26, 0.0  ;;  %v2762_v40 = vrot.slane %v442_v61, %v15260_v14 }
 0x428   :  { %v14413_v27 = vsel %vm13367_vm0, %v10889_v3, 0.0  ;;  %v2766_v41 = vrot.slane %v442_v61, %v15262_v15  ;;  %v2770_v42 = vrot.slane %v442_v61, %v15264_v16  ;;  %v2778_v3 = vrot.slane %v443_v56, %v15248_v2 }
 0x429   :  { %v14390_v10 = vadd.f32 %v14389_v62, %v14388_v63  ;;  %v6443_v62 = vcombine.low %v6435_v51, %v6442_v52  ;;  %v6444_v63 = vcombine.low %v2730_v45, %v2734_v46  ;;  %v2774_v45 = vrot.slane %v442_v61, %v15266_v17 }
 0x42a   :  { %v2782_v7 = vrot.slane %v443_v56, %v15250_v4  ;;  %v2786_v8 = vrot.slane %v443_v56, %v15252_v5 }
 0x42b   :  { %v14392_v19 = vadd.f32 %v14391_v1, %v14390_v10  ;;  %v6452_v21 = vrot.slane %v6444_v63, %v15268_v20 }
 0x42d   :  { %v14394_v28 = vadd.f32 %v14393_v18, %v14392_v19  ;;  %v14411_v18 = vsel %vm13367_vm0, %v10887_v55, 0.0  ;;  %v2758_v19 = vrot.slane %v442_v61, %v15254_v6  ;;  %v6460_v31 = vcombine.low %v6452_v21, %v6459_v22 }
 0x42f   :  { %v14396_v33 = vadd.f32 %v14395_v24, %v14394_v28  ;;  %v8347_v24 = vmul.f32 %v6443_v62, %v283_v59  ;;  %v8348_v49 = vmul.f32 %v6460_v31, %v284_v29  ;;  %v6479_v59 = vcombine.low %v2770_v42, %v2774_v45 }
 0x431   :  { %v14398_v39 = vadd.f32 %v14397_v32, %v14396_v33  ;;  %v6461_v32 = vcombine.low %v2746_v11, %v2750_v12  ;;  %v6462_v33 = vcombine.low %v2754_v13, %v2758_v19  ;;  %v10907_v36 = vcombine.high %v8347_v24, %v8347_v24 }
 0x432   :  { %v10914_v37 = vrot.slane %v8347_v24, %v15268_v20  ;;  %v10924_v62 = vcombine.high %v8348_v49, %v8348_v49  ;;  %v10931_v63 = vrot.slane %v8348_v49, %v15268_v20  ;;  %v6493_v12 = vrot.slane %v6479_v59, %v15268_v20 }
 0x433   :  { %v14400_v44 = vadd.f32 %v14399_v35, %v14398_v39  ;;  %v10906_v35 = vcombine.high %v10904_v25, %v10904_v25  ;;  %v6469_v46 = vrot.slane %v6461_v32, %v15268_v20  ;;  %v6476_v47 = vrot.slane %v6462_v33, %v15268_v20 }
 0x434   :  { %v10921_v50 = vrot.slane %v10907_v36, %v15268_v20  ;;  %v10922_v51 = vcombine.high %v10914_v37, %v10914_v37  ;;  %v14423_v55 = vsel %vm13367_vm0, %v10914_v37, 0.0  ;;  %v10938_v19 = vrot.slane %v10924_v62, %v15268_v20 }
 0x435   :  { %v14402_v53 = vadd.f32 %v14401_v43, %v14400_v44  ;;  %v14419_v43 = vsel %vm13367_vm0, %v10904_v25, 0.0  ;;  %v106_v44 = vld [vmem:[#allocation3 + $0x218] sm:$0xff]  ;;  %v14421_v52 = vsel %vm13367_vm0, %v10906_v35, 0.0  ;;  %v10939_v21 = vcombine.high %v10931_v63, %v10931_v63 }
 0x436   :  { %v285_v54 = vunpack.c.l.bf16 %v106_v44  ;;  %v10923_v61 = vcombine.high %v10921_v50, %v10921_v50  ;;  %v14425_v0 = vsel %vm13367_vm0, %v10922_v51, 0.0  ;;  %v286_v24 = vunpack.c.h.bf16 %v106_v44  ;;  %v444_v51 = vld [vmem:[#allocation5 + $0x228] sm:$0xff] }
 0x437   :  { %v14404_v58 = vadd.f32 %v14403_v48, %v14402_v53  ;;  %v14431_v25 = vsel %vm13367_vm0, %v10931_v63, 0.0  ;;  %v14433_v33 = vsel %vm13367_vm0, %v10939_v21, 0.0  ;;  %v2794_v35 = vrot.slane %v443_v56, %v15260_v14 }
 0x438   :  { %v14429_v22 = vsel %vm13367_vm0, %v10923_v61, 0.0  ;;  %v2798_v36 = vrot.slane %v443_v56, %v15262_v15  ;;  %v2802_v37 = vrot.slane %v443_v56, %v15264_v16  ;;  %v2810_v61 = vrot.slane %v444_v51, %v15248_v2 }
 0x439   :  { %v14406_v1 = vadd.f32 %v14405_v57, %v14404_v58  ;;  %v6477_v57 = vcombine.low %v6469_v46, %v6476_v47  ;;  %v6478_v58 = vcombine.low %v2762_v40, %v2766_v41  ;;  %v2806_v40 = vrot.slane %v443_v56, %v15266_v17 }
 0x43a   :  { %v2814_v62 = vrot.slane %v444_v51, %v15250_v4  ;;  %v2818_v63 = vrot.slane %v444_v51, %v15252_v5 }
 0x43b   :  { %v14408_v10 = vadd.f32 %v14407_v60, %v14406_v1  ;;  %v6486_v11 = vrot.slane %v6478_v58, %v15268_v20 }
 0x43d   :  { %v14410_v23 = vadd.f32 %v14409_v9, %v14408_v10  ;;  %v14427_v9 = vsel %vm13367_vm0, %v10921_v50, 0.0  ;;  %v2790_v10 = vrot.slane %v443_v56, %v15254_v6  ;;  %v6494_v26 = vcombine.low %v6486_v11, %v6493_v12 }
 0x43f   :  { %v14412_v28 = vadd.f32 %v14411_v18, %v14410_v23  ;;  %v8349_v18 = vmul.f32 %v6477_v57, %v285_v54  ;;  %v8350_v44 = vmul.f32 %v6494_v26, %v286_v24  ;;  %v6513_v54 = vcombine.low %v2802_v37, %v2806_v40 }
 0x441   :  { %v14414_v34 = vadd.f32 %v14413_v27, %v14412_v28  ;;  %v6495_v27 = vcombine.low %v2778_v3, %v2782_v7  ;;  %v6496_v28 = vcombine.low %v2786_v8, %v2790_v10  ;;  %v10941_v31 = vcombine.high %v8349_v18, %v8349_v18 }
 0x442   :  { %v10948_v32 = vrot.slane %v8349_v18, %v15268_v20  ;;  %v10958_v57 = vcombine.high %v8350_v44, %v8350_v44  ;;  %v10965_v58 = vrot.slane %v8350_v44, %v15268_v20  ;;  %v6527_v7 = vrot.slane %v6513_v54, %v15268_v20 }
 0x443   :  { %v14416_v39 = vadd.f32 %v14415_v30, %v14414_v34  ;;  %v10940_v30 = vcombine.high %v10938_v19, %v10938_v19  ;;  %v6503_v41 = vrot.slane %v6495_v27, %v15268_v20  ;;  %v6510_v42 = vrot.slane %v6496_v28, %v15268_v20 }
 0x444   :  { %v10955_v45 = vrot.slane %v10941_v31, %v15268_v20  ;;  %v10956_v46 = vcombine.high %v10948_v32, %v10948_v32  ;;  %v14439_v50 = vsel %vm13367_vm0, %v10948_v32, 0.0  ;;  %v10972_v10 = vrot.slane %v10958_v57, %v15268_v20 }
 0x445   :  { %v14418_v48 = vadd.f32 %v14417_v38, %v14416_v39  ;;  %v14435_v38 = vsel %vm13367_vm0, %v10938_v19, 0.0  ;;  %v107_v39 = vld [vmem:[#allocation3 + $0x220] sm:$0xff]  ;;  %v14437_v47 = vsel %vm13367_vm0, %v10940_v30, 0.0  ;;  %v10973_v11 = vcombine.high %v10965_v58, %v10965_v58 }
 0x446   :  { %v287_v49 = vunpack.c.l.bf16 %v107_v39  ;;  %v10957_v56 = vcombine.high %v10955_v45, %v10955_v45  ;;  %v14441_v59 = vsel %vm13367_vm0, %v10956_v46, 0.0  ;;  %v288_v18 = vunpack.c.h.bf16 %v107_v39  ;;  %v445_v46 = vld [vmem:[#allocation5 + $0x230] sm:$0xff] }
 0x447   :  { %v14420_v53 = vadd.f32 %v14419_v43, %v14418_v48  ;;  %v14447_v19 = vsel %vm13367_vm0, %v10965_v58, 0.0  ;;  %v14449_v28 = vsel %vm13367_vm0, %v10973_v11, 0.0  ;;  %v2826_v30 = vrot.slane %v444_v51, %v15260_v14 }
 0x448   :  { %v14445_v12 = vsel %vm13367_vm0, %v10957_v56, 0.0  ;;  %v2830_v31 = vrot.slane %v444_v51, %v15262_v15  ;;  %v2834_v32 = vrot.slane %v444_v51, %v15264_v16  ;;  %v2842_v56 = vrot.slane %v445_v46, %v15248_v2 }
 0x449   :  { %v14422_v60 = vadd.f32 %v14421_v52, %v14420_v53  ;;  %v6511_v52 = vcombine.low %v6503_v41, %v6510_v42  ;;  %v6512_v53 = vcombine.low %v2794_v35, %v2798_v36  ;;  %v2838_v35 = vrot.slane %v444_v51, %v15266_v17 }
 0x44a   :  { %v2846_v57 = vrot.slane %v445_v46, %v15250_v4  ;;  %v2850_v58 = vrot.slane %v445_v46, %v15252_v5 }
 0x44b   :  { %v14424_v1 = vadd.f32 %v14423_v55, %v14422_v60  ;;  %v6520_v3 = vrot.slane %v6512_v53, %v15268_v20 }
 0x44d   :  { %v14426_v13 = vadd.f32 %v14425_v0, %v14424_v1  ;;  %v14443_v0 = vsel %vm13367_vm0, %v10955_v45, 0.0  ;;  %v2822_v1 = vrot.slane %v444_v51, %v15254_v6  ;;  %v6528_v21 = vcombine.low %v6520_v3, %v6527_v7 }
 0x44f   :  { %v14428_v23 = vadd.f32 %v14427_v9, %v14426_v13  ;;  %v8351_v9 = vmul.f32 %v6511_v52, %v287_v49  ;;  %v8352_v39 = vmul.f32 %v6528_v21, %v288_v18  ;;  %v6547_v49 = vcombine.low %v2834_v32, %v2838_v35 }
 0x451   :  { %v14430_v29 = vadd.f32 %v14429_v22, %v14428_v23  ;;  %v6529_v22 = vcombine.low %v2810_v61, %v2814_v62  ;;  %v6530_v23 = vcombine.low %v2818_v63, %v2822_v1  ;;  %v10975_v26 = vcombine.high %v8351_v9, %v8351_v9 }
 0x452   :  { %v10982_v27 = vrot.slane %v8351_v9, %v15268_v20  ;;  %v10992_v52 = vcombine.high %v8352_v39, %v8352_v39  ;;  %v10999_v53 = vrot.slane %v8352_v39, %v15268_v20  ;;  %v6561_v62 = vrot.slane %v6547_v49, %v15268_v20 }
 0x453   :  { %v14432_v34 = vadd.f32 %v14431_v25, %v14430_v29  ;;  %v10974_v25 = vcombine.high %v10972_v10, %v10972_v10  ;;  %v6537_v36 = vrot.slane %v6529_v22, %v15268_v20  ;;  %v6544_v37 = vrot.slane %v6530_v23, %v15268_v20 }
 0x454   :  { %v10989_v40 = vrot.slane %v10975_v26, %v15268_v20  ;;  %v10990_v41 = vcombine.high %v10982_v27, %v10982_v27  ;;  %v14455_v45 = vsel %vm13367_vm0, %v10982_v27, 0.0  ;;  %v11006_v1 = vrot.slane %v10992_v52, %v15268_v20 }
 0x455   :  { %v14434_v43 = vadd.f32 %v14433_v33, %v14432_v34  ;;  %v14451_v33 = vsel %vm13367_vm0, %v10972_v10, 0.0  ;;  %v108_v34 = vld [vmem:[#allocation3 + $0x228] sm:$0xff]  ;;  %v14453_v42 = vsel %vm13367_vm0, %v10974_v25, 0.0  ;;  %v11007_v3 = vcombine.high %v10999_v53, %v10999_v53 }
 0x456   :  { %v289_v44 = vunpack.c.l.bf16 %v108_v34  ;;  %v10991_v51 = vcombine.high %v10989_v40, %v10989_v40  ;;  %v14457_v54 = vsel %vm13367_vm0, %v10990_v41, 0.0  ;;  %v290_v9 = vunpack.c.h.bf16 %v108_v34  ;;  %v446_v41 = vld [vmem:[#allocation5 + $0x238] sm:$0xff] }
 0x457   :  { %v14436_v48 = vadd.f32 %v14435_v38, %v14434_v43  ;;  %v14463_v10 = vsel %vm13367_vm0, %v10999_v53, 0.0  ;;  %v14465_v23 = vsel %vm13367_vm0, %v11007_v3, 0.0  ;;  %v2858_v25 = vrot.slane %v445_v46, %v15260_v14 }
 0x458   :  { %v14461_v7 = vsel %vm13367_vm0, %v10991_v51, 0.0  ;;  %v2862_v26 = vrot.slane %v445_v46, %v15262_v15  ;;  %v2866_v27 = vrot.slane %v445_v46, %v15264_v16  ;;  %v2874_v51 = vrot.slane %v446_v41, %v15248_v2 }
 0x459   :  { %v14438_v55 = vadd.f32 %v14437_v47, %v14436_v48  ;;  %v6545_v47 = vcombine.low %v6537_v36, %v6544_v37  ;;  %v6546_v48 = vcombine.low %v2826_v30, %v2830_v31  ;;  %v2870_v30 = vrot.slane %v445_v46, %v15266_v17 }
 0x45a   :  { %v2878_v52 = vrot.slane %v446_v41, %v15250_v4  ;;  %v2882_v53 = vrot.slane %v446_v41, %v15252_v5 }
 0x45b   :  { %v14440_v60 = vadd.f32 %v14439_v50, %v14438_v55  ;;  %v6554_v61 = vrot.slane %v6546_v48, %v15268_v20 }
 0x45d   :  { %v14442_v8 = vadd.f32 %v14441_v59, %v14440_v60  ;;  %v14459_v59 = vsel %vm13367_vm0, %v10989_v40, 0.0  ;;  %v2854_v60 = vrot.slane %v445_v46, %v15254_v6  ;;  %v6562_v11 = vcombine.low %v6554_v61, %v6561_v62 }
 0x45f   :  { %v14444_v13 = vadd.f32 %v14443_v0, %v14442_v8  ;;  %v8353_v0 = vmul.f32 %v6545_v47, %v289_v44  ;;  %v8354_v34 = vmul.f32 %v6562_v11, %v290_v9  ;;  %v6581_v44 = vcombine.low %v2866_v27, %v2870_v30 }
 0x461   :  { %v14446_v24 = vadd.f32 %v14445_v12, %v14444_v13  ;;  %v6563_v12 = vcombine.low %v2842_v56, %v2846_v57  ;;  %v6564_v13 = vcombine.low %v2850_v58, %v2854_v60  ;;  %v11009_v21 = vcombine.high %v8353_v0, %v8353_v0 }
 0x462   :  { %v11016_v22 = vrot.slane %v8353_v0, %v15268_v20  ;;  %v11026_v47 = vcombine.high %v8354_v34, %v8354_v34  ;;  %v11033_v48 = vrot.slane %v8354_v34, %v15268_v20  ;;  %v6595_v57 = vrot.slane %v6581_v44, %v15268_v20 }
 0x463   :  { %v14448_v29 = vadd.f32 %v14447_v19, %v14446_v24  ;;  %v11008_v19 = vcombine.high %v11006_v1, %v11006_v1  ;;  %v6571_v31 = vrot.slane %v6563_v12, %v15268_v20  ;;  %v6578_v32 = vrot.slane %v6564_v13, %v15268_v20 }
 0x464   :  { %v11023_v35 = vrot.slane %v11009_v21, %v15268_v20  ;;  %v11024_v36 = vcombine.high %v11016_v22, %v11016_v22  ;;  %v14471_v40 = vsel %vm13367_vm0, %v11016_v22, 0.0  ;;  %v11040_v60 = vrot.slane %v11026_v47, %v15268_v20 }
 0x465   :  { %v14450_v38 = vadd.f32 %v14449_v28, %v14448_v29  ;;  %v14467_v28 = vsel %vm13367_vm0, %v11006_v1, 0.0  ;;  %v109_v29 = vld [vmem:[#allocation3 + $0x230] sm:$0xff]  ;;  %v14469_v37 = vsel %vm13367_vm0, %v11008_v19, 0.0  ;;  %v11041_v61 = vcombine.high %v11033_v48, %v11033_v48 }
 0x466   :  { %v291_v39 = vunpack.c.l.bf16 %v109_v29  ;;  %v11025_v46 = vcombine.high %v11023_v35, %v11023_v35  ;;  %v14473_v49 = vsel %vm13367_vm0, %v11024_v36, 0.0  ;;  %v292_v0 = vunpack.c.h.bf16 %v109_v29  ;;  %v447_v36 = vld [vmem:[#allocation5 + $0x240] sm:$0xff] }
 0x467   :  { %v14452_v43 = vadd.f32 %v14451_v33, %v14450_v38  ;;  %v14479_v1 = vsel %vm13367_vm0, %v11033_v48, 0.0  ;;  %v14481_v13 = vsel %vm13367_vm0, %v11041_v61, 0.0  ;;  %v2890_v19 = vrot.slane %v446_v41, %v15260_v14 }
 0x468   :  { %v14477_v62 = vsel %vm13367_vm0, %v11025_v46, 0.0  ;;  %v2894_v21 = vrot.slane %v446_v41, %v15262_v15  ;;  %v2898_v22 = vrot.slane %v446_v41, %v15264_v16  ;;  %v2906_v46 = vrot.slane %v447_v36, %v15248_v2 }
 0x469   :  { %v14454_v50 = vadd.f32 %v14453_v42, %v14452_v43  ;;  %v6579_v42 = vcombine.low %v6571_v31, %v6578_v32  ;;  %v6580_v43 = vcombine.low %v2858_v25, %v2862_v26  ;;  %v2902_v25 = vrot.slane %v446_v41, %v15266_v17 }
 0x46a   :  { %v2910_v47 = vrot.slane %v447_v36, %v15250_v4  ;;  %v2914_v48 = vrot.slane %v447_v36, %v15252_v5 }
 0x46b   :  { %v14456_v55 = vadd.f32 %v14455_v45, %v14454_v50  ;;  %v6588_v56 = vrot.slane %v6580_v43, %v15268_v20 }
 0x46d   :  { %v14458_v63 = vadd.f32 %v14457_v54, %v14456_v55  ;;  %v14475_v54 = vsel %vm13367_vm0, %v11023_v35, 0.0  ;;  %v2886_v55 = vrot.slane %v446_v41, %v15254_v6  ;;  %v6596_v3 = vcombine.low %v6588_v56, %v6595_v57 }
 0x46f   :  { %v14460_v8 = vadd.f32 %v14459_v59, %v14458_v63  ;;  %v8355_v59 = vmul.f32 %v6579_v42, %v291_v39  ;;  %v8356_v29 = vmul.f32 %v6596_v3, %v292_v0  ;;  %v6615_v39 = vcombine.low %v2898_v22, %v2902_v25 }
 0x471   :  { %v14462_v18 = vadd.f32 %v14461_v7, %v14460_v8  ;;  %v6597_v7 = vcombine.low %v2874_v51, %v2878_v52  ;;  %v6598_v8 = vcombine.low %v2882_v53, %v2886_v55  ;;  %v11043_v11 = vcombine.high %v8355_v59, %v8355_v59 }
 0x472   :  { %v11050_v12 = vrot.slane %v8355_v59, %v15268_v20  ;;  %v11060_v42 = vcombine.high %v8356_v29, %v8356_v29  ;;  %v11067_v43 = vrot.slane %v8356_v29, %v15268_v20  ;;  %v6629_v52 = vrot.slane %v6615_v39, %v15268_v20 }
 0x473   :  { %v14464_v24 = vadd.f32 %v14463_v10, %v14462_v18  ;;  %v11042_v10 = vcombine.high %v11040_v60, %v11040_v60  ;;  %v6605_v26 = vrot.slane %v6597_v7, %v15268_v20  ;;  %v6612_v27 = vrot.slane %v6598_v8, %v15268_v20 }
 0x474   :  { %v11057_v30 = vrot.slane %v11043_v11, %v15268_v20  ;;  %v11058_v31 = vcombine.high %v11050_v12, %v11050_v12  ;;  %v14487_v35 = vsel %vm13367_vm0, %v11050_v12, 0.0  ;;  %v11074_v55 = vrot.slane %v11060_v42, %v15268_v20 }
 0x475   :  { %v14466_v33 = vadd.f32 %v14465_v23, %v14464_v24  ;;  %v14483_v23 = vsel %vm13367_vm0, %v11040_v60, 0.0  ;;  %v110_v24 = vld [vmem:[#allocation3 + $0x238] sm:$0xff]  ;;  %v14485_v32 = vsel %vm13367_vm0, %v11042_v10, 0.0  ;;  %v11075_v56 = vcombine.high %v11067_v43, %v11067_v43 }
 0x476   :  { %v293_v34 = vunpack.c.l.bf16 %v110_v24  ;;  %v11059_v41 = vcombine.high %v11057_v30, %v11057_v30  ;;  %v14489_v44 = vsel %vm13367_vm0, %v11058_v31, 0.0  ;;  %v294_v59 = vunpack.c.h.bf16 %v110_v24  ;;  %v448_v31 = vld [vmem:[#allocation5 + $0x248] sm:$0xff] }
 0x477   :  { %v14468_v38 = vadd.f32 %v14467_v28, %v14466_v33  ;;  %v14495_v60 = vsel %vm13367_vm0, %v11067_v43, 0.0  ;;  %v14497_v8 = vsel %vm13367_vm0, %v11075_v56, 0.0  ;;  %v2922_v10 = vrot.slane %v447_v36, %v15260_v14 }
 0x478   :  { %v14493_v57 = vsel %vm13367_vm0, %v11059_v41, 0.0  ;;  %v2926_v11 = vrot.slane %v447_v36, %v15262_v15  ;;  %v2930_v12 = vrot.slane %v447_v36, %v15264_v16  ;;  %v2938_v41 = vrot.slane %v448_v31, %v15248_v2 }
 0x479   :  { %v14470_v45 = vadd.f32 %v14469_v37, %v14468_v38  ;;  %v6613_v37 = vcombine.low %v6605_v26, %v6612_v27  ;;  %v6614_v38 = vcombine.low %v2890_v19, %v2894_v21  ;;  %v2934_v19 = vrot.slane %v447_v36, %v15266_v17 }
 0x47a   :  { %v2942_v42 = vrot.slane %v448_v31, %v15250_v4  ;;  %v2946_v43 = vrot.slane %v448_v31, %v15252_v5 }
 0x47b   :  { %v14472_v50 = vadd.f32 %v14471_v40, %v14470_v45  ;;  %v6622_v51 = vrot.slane %v6614_v38, %v15268_v20 }
 0x47d   :  { %v14474_v58 = vadd.f32 %v14473_v49, %v14472_v50  ;;  %v14491_v49 = vsel %vm13367_vm0, %v11057_v30, 0.0  ;;  %v2918_v50 = vrot.slane %v447_v36, %v15254_v6  ;;  %v6630_v61 = vcombine.low %v6622_v51, %v6629_v52 }
 0x47f   :  { %v14476_v63 = vadd.f32 %v14475_v54, %v14474_v58  ;;  %v8357_v54 = vmul.f32 %v6613_v37, %v293_v34  ;;  %v8358_v24 = vmul.f32 %v6630_v61, %v294_v59  ;;  %v6649_v34 = vcombine.low %v2930_v12, %v2934_v19 }
 0x481   :  { %v14478_v9 = vadd.f32 %v14477_v62, %v14476_v63  ;;  %v6631_v62 = vcombine.low %v2906_v46, %v2910_v47  ;;  %v6632_v63 = vcombine.low %v2914_v48, %v2918_v50  ;;  %v11077_v3 = vcombine.high %v8357_v54, %v8357_v54 }
 0x482   :  { %v11084_v7 = vrot.slane %v8357_v54, %v15268_v20  ;;  %v11094_v37 = vcombine.high %v8358_v24, %v8358_v24  ;;  %v11101_v38 = vrot.slane %v8358_v24, %v15268_v20  ;;  %v6663_v47 = vrot.slane %v6649_v34, %v15268_v20 }
 0x483   :  { %v14480_v18 = vadd.f32 %v14479_v1, %v14478_v9  ;;  %v11076_v1 = vcombine.high %v11074_v55, %v11074_v55  ;;  %v6639_v21 = vrot.slane %v6631_v62, %v15268_v20  ;;  %v6646_v22 = vrot.slane %v6632_v63, %v15268_v20 }
 0x484   :  { %v11091_v25 = vrot.slane %v11077_v3, %v15268_v20  ;;  %v11092_v26 = vcombine.high %v11084_v7, %v11084_v7  ;;  %v14503_v30 = vsel %vm13367_vm0, %v11084_v7, 0.0  ;;  %v11108_v50 = vrot.slane %v11094_v37, %v15268_v20 }
 0x485   :  { %v14482_v28 = vadd.f32 %v14481_v13, %v14480_v18  ;;  %v14499_v13 = vsel %vm13367_vm0, %v11074_v55, 0.0  ;;  %v111_v18 = vld [vmem:[#allocation3 + $0x240] sm:$0xff]  ;;  %v14501_v27 = vsel %vm13367_vm0, %v11076_v1, 0.0  ;;  %v11109_v51 = vcombine.high %v11101_v38, %v11101_v38 }
 0x486   :  { %v295_v29 = vunpack.c.l.bf16 %v111_v18  ;;  %v11093_v36 = vcombine.high %v11091_v25, %v11091_v25  ;;  %v14505_v39 = vsel %vm13367_vm0, %v11092_v26, 0.0  ;;  %v296_v54 = vunpack.c.h.bf16 %v111_v18  ;;  %v449_v26 = vld [vmem:[#allocation5 + $0x250] sm:$0xff] }
 0x487   :  { %v14484_v33 = vadd.f32 %v14483_v23, %v14482_v28  ;;  %v14511_v55 = vsel %vm13367_vm0, %v11101_v38, 0.0  ;;  %v14513_v63 = vsel %vm13367_vm0, %v11109_v51, 0.0  ;;  %v2954_v1 = vrot.slane %v448_v31, %v15260_v14 }
 0x488   :  { %v14509_v52 = vsel %vm13367_vm0, %v11093_v36, 0.0  ;;  %v2958_v3 = vrot.slane %v448_v31, %v15262_v15  ;;  %v2962_v7 = vrot.slane %v448_v31, %v15264_v16  ;;  %v2970_v36 = vrot.slane %v449_v26, %v15248_v2 }
 0x489   :  { %v14486_v40 = vadd.f32 %v14485_v32, %v14484_v33  ;;  %v6647_v32 = vcombine.low %v6639_v21, %v6646_v22  ;;  %v6648_v33 = vcombine.low %v2922_v10, %v2926_v11  ;;  %v2966_v10 = vrot.slane %v448_v31, %v15266_v17 }
 0x48a   :  { %v2974_v37 = vrot.slane %v449_v26, %v15250_v4  ;;  %v2978_v38 = vrot.slane %v449_v26, %v15252_v5 }
 0x48b   :  { %v14488_v45 = vadd.f32 %v14487_v35, %v14486_v40  ;;  %v6656_v46 = vrot.slane %v6648_v33, %v15268_v20 }
 0x48d   :  { %v14490_v53 = vadd.f32 %v14489_v44, %v14488_v45  ;;  %v14507_v44 = vsel %vm13367_vm0, %v11091_v25, 0.0  ;;  %v2950_v45 = vrot.slane %v448_v31, %v15254_v6  ;;  %v6664_v56 = vcombine.low %v6656_v46, %v6663_v47 }
 0x48f   :  { %v14492_v58 = vadd.f32 %v14491_v49, %v14490_v53  ;;  %v8359_v49 = vmul.f32 %v6647_v32, %v295_v29  ;;  %v8360_v18 = vmul.f32 %v6664_v56, %v296_v54  ;;  %v6683_v29 = vcombine.low %v2962_v7, %v2966_v10 }
 0x491   :  { %v14494_v0 = vadd.f32 %v14493_v57, %v14492_v58  ;;  %v6665_v57 = vcombine.low %v2938_v41, %v2942_v42  ;;  %v6666_v58 = vcombine.low %v2946_v43, %v2950_v45  ;;  %v11111_v61 = vcombine.high %v8359_v49, %v8359_v49 }
 0x492   :  { %v11118_v62 = vrot.slane %v8359_v49, %v15268_v20  ;;  %v11128_v32 = vcombine.high %v8360_v18, %v8360_v18  ;;  %v11135_v33 = vrot.slane %v8360_v18, %v15268_v20  ;;  %v6697_v42 = vrot.slane %v6683_v29, %v15268_v20 }
 0x493   :  { %v14496_v9 = vadd.f32 %v14495_v60, %v14494_v0  ;;  %v11110_v60 = vcombine.high %v11108_v50, %v11108_v50  ;;  %v6673_v11 = vrot.slane %v6665_v57, %v15268_v20  ;;  %v6680_v12 = vrot.slane %v6666_v58, %v15268_v20 }
 0x494   :  { %v11125_v19 = vrot.slane %v11111_v61, %v15268_v20  ;;  %v11126_v21 = vcombine.high %v11118_v62, %v11118_v62  ;;  %v14519_v25 = vsel %vm13367_vm0, %v11118_v62, 0.0  ;;  %v11142_v45 = vrot.slane %v11128_v32, %v15268_v20 }
 0x495   :  { %v14498_v23 = vadd.f32 %v14497_v8, %v14496_v9  ;;  %v14515_v8 = vsel %vm13367_vm0, %v11108_v50, 0.0  ;;  %v112_v9 = vld [vmem:[#allocation3 + $0x248] sm:$0xff]  ;;  %v14517_v22 = vsel %vm13367_vm0, %v11110_v60, 0.0  ;;  %v11143_v46 = vcombine.high %v11135_v33, %v11135_v33 }
 0x496   :  { %v297_v24 = vunpack.c.l.bf16 %v112_v9  ;;  %v11127_v31 = vcombine.high %v11125_v19, %v11125_v19  ;;  %v14521_v34 = vsel %vm13367_vm0, %v11126_v21, 0.0  ;;  %v298_v49 = vunpack.c.h.bf16 %v112_v9  ;;  %v450_v21 = vld [vmem:[#allocation5 + $0x258] sm:$0xff] }
 0x497   :  { %v14500_v28 = vadd.f32 %v14499_v13, %v14498_v23  ;;  %v14527_v50 = vsel %vm13367_vm0, %v11135_v33, 0.0  ;;  %v14529_v58 = vsel %vm13367_vm0, %v11143_v46, 0.0  ;;  %v2986_v60 = vrot.slane %v449_v26, %v15260_v14 }
 0x498   :  { %v14525_v47 = vsel %vm13367_vm0, %v11127_v31, 0.0  ;;  %v2990_v61 = vrot.slane %v449_v26, %v15262_v15  ;;  %v2994_v62 = vrot.slane %v449_v26, %v15264_v16  ;;  %v3002_v31 = vrot.slane %v450_v21, %v15248_v2 }
 0x499   :  { %v14502_v35 = vadd.f32 %v14501_v27, %v14500_v28  ;;  %v6681_v27 = vcombine.low %v6673_v11, %v6680_v12  ;;  %v6682_v28 = vcombine.low %v2954_v1, %v2958_v3  ;;  %v2998_v1 = vrot.slane %v449_v26, %v15266_v17 }
 0x49a   :  { %v3006_v32 = vrot.slane %v450_v21, %v15250_v4  ;;  %v3010_v33 = vrot.slane %v450_v21, %v15252_v5 }
 0x49b   :  { %v14504_v40 = vadd.f32 %v14503_v30, %v14502_v35  ;;  %v6690_v41 = vrot.slane %v6682_v28, %v15268_v20 }
 0x49d   :  { %v14506_v48 = vadd.f32 %v14505_v39, %v14504_v40  ;;  %v14523_v39 = vsel %vm13367_vm0, %v11125_v19, 0.0  ;;  %v2982_v40 = vrot.slane %v449_v26, %v15254_v6  ;;  %v6698_v51 = vcombine.low %v6690_v41, %v6697_v42 }
 0x49f   :  { %v14508_v53 = vadd.f32 %v14507_v44, %v14506_v48  ;;  %v8361_v44 = vmul.f32 %v6681_v27, %v297_v24  ;;  %v8362_v9 = vmul.f32 %v6698_v51, %v298_v49  ;;  %v6717_v24 = vcombine.low %v2994_v62, %v2998_v1 }
 0x4a1   :  { %v14510_v59 = vadd.f32 %v14509_v52, %v14508_v53  ;;  %v6699_v52 = vcombine.low %v2970_v36, %v2974_v37  ;;  %v6700_v53 = vcombine.low %v2978_v38, %v2982_v40  ;;  %v11145_v56 = vcombine.high %v8361_v44, %v8361_v44 }
 0x4a2   :  { %v11152_v57 = vrot.slane %v8361_v44, %v15268_v20  ;;  %v11162_v27 = vcombine.high %v8362_v9, %v8362_v9  ;;  %v11169_v28 = vrot.slane %v8362_v9, %v15268_v20  ;;  %v6731_v37 = vrot.slane %v6717_v24, %v15268_v20 }
 0x4a3   :  { %v14512_v0 = vadd.f32 %v14511_v55, %v14510_v59  ;;  %v11144_v55 = vcombine.high %v11142_v45, %v11142_v45  ;;  %v6707_v3 = vrot.slane %v6699_v52, %v15268_v20  ;;  %v6714_v7 = vrot.slane %v6700_v53, %v15268_v20 }
 0x4a4   :  { %v11159_v10 = vrot.slane %v11145_v56, %v15268_v20  ;;  %v11160_v11 = vcombine.high %v11152_v57, %v11152_v57  ;;  %v14535_v19 = vsel %vm13367_vm0, %v11152_v57, 0.0  ;;  %v11176_v40 = vrot.slane %v11162_v27, %v15268_v20 }
 0x4a5   :  { %v14514_v13 = vadd.f32 %v14513_v63, %v14512_v0  ;;  %v14531_v63 = vsel %vm13367_vm0, %v11142_v45, 0.0  ;;  %v113_v0 = vld [vmem:[#allocation3 + $0x250] sm:$0xff]  ;;  %v14533_v12 = vsel %vm13367_vm0, %v11144_v55, 0.0  ;;  %v11177_v41 = vcombine.high %v11169_v28, %v11169_v28 }
 0x4a6   :  { %v299_v18 = vunpack.c.l.bf16 %v113_v0  ;;  %v11161_v26 = vcombine.high %v11159_v10, %v11159_v10  ;;  %v14537_v29 = vsel %vm13367_vm0, %v11160_v11, 0.0  ;;  %v300_v44 = vunpack.c.h.bf16 %v113_v0  ;;  %v451_v11 = vld [vmem:[#allocation5 + $0x260] sm:$0xff] }
 0x4a7   :  { %v14516_v23 = vadd.f32 %v14515_v8, %v14514_v13  ;;  %v14543_v45 = vsel %vm13367_vm0, %v11169_v28, 0.0  ;;  %v14545_v53 = vsel %vm13367_vm0, %v11177_v41, 0.0  ;;  %v3018_v55 = vrot.slane %v450_v21, %v15260_v14 }
 0x4a8   :  { %v14541_v42 = vsel %vm13367_vm0, %v11161_v26, 0.0  ;;  %v3022_v56 = vrot.slane %v450_v21, %v15262_v15  ;;  %v3026_v57 = vrot.slane %v450_v21, %v15264_v16  ;;  %v3034_v26 = vrot.slane %v451_v11, %v15248_v2 }
 0x4a9   :  { %v14518_v30 = vadd.f32 %v14517_v22, %v14516_v23  ;;  %v6715_v22 = vcombine.low %v6707_v3, %v6714_v7  ;;  %v6716_v23 = vcombine.low %v2986_v60, %v2990_v61  ;;  %v3030_v60 = vrot.slane %v450_v21, %v15266_v17 }
 0x4aa   :  { %v3038_v27 = vrot.slane %v451_v11, %v15250_v4  ;;  %v3042_v28 = vrot.slane %v451_v11, %v15252_v5 }
 0x4ab   :  { %v14520_v35 = vadd.f32 %v14519_v25, %v14518_v30  ;;  %v6724_v36 = vrot.slane %v6716_v23, %v15268_v20 }
 0x4ad   :  { %v14522_v43 = vadd.f32 %v14521_v34, %v14520_v35  ;;  %v14539_v34 = vsel %vm13367_vm0, %v11159_v10, 0.0  ;;  %v3014_v35 = vrot.slane %v450_v21, %v15254_v6  ;;  %v6732_v46 = vcombine.low %v6724_v36, %v6731_v37 }
 0x4af   :  { %v14524_v48 = vadd.f32 %v14523_v39, %v14522_v43  ;;  %v8363_v39 = vmul.f32 %v6715_v22, %v299_v18  ;;  %v8364_v0 = vmul.f32 %v6732_v46, %v300_v44  ;;  %v6751_v18 = vcombine.low %v3026_v57, %v3030_v60 }
 0x4b1   :  { %v14526_v54 = vadd.f32 %v14525_v47, %v14524_v48  ;;  %v6733_v47 = vcombine.low %v3002_v31, %v3006_v32  ;;  %v6734_v48 = vcombine.low %v3010_v33, %v3014_v35  ;;  %v11179_v51 = vcombine.high %v8363_v39, %v8363_v39 }
 0x4b2   :  { %v11186_v52 = vrot.slane %v8363_v39, %v15268_v20  ;;  %v11196_v22 = vcombine.high %v8364_v0, %v8364_v0  ;;  %v11203_v23 = vrot.slane %v8364_v0, %v15268_v20  ;;  %v6765_v32 = vrot.slane %v6751_v18, %v15268_v20 }
 0x4b3   :  { %v14528_v59 = vadd.f32 %v14527_v50, %v14526_v54  ;;  %v11178_v50 = vcombine.high %v11176_v40, %v11176_v40  ;;  %v6741_v61 = vrot.slane %v6733_v47, %v15268_v20  ;;  %v6748_v62 = vrot.slane %v6734_v48, %v15268_v20 }
 0x4b4   :  { %v11193_v1 = vrot.slane %v11179_v51, %v15268_v20  ;;  %v11194_v3 = vcombine.high %v11186_v52, %v11186_v52  ;;  %v14551_v10 = vsel %vm13367_vm0, %v11186_v52, 0.0  ;;  %v11210_v35 = vrot.slane %v11196_v22, %v15268_v20 }
 0x4b5   :  { %v14530_v8 = vadd.f32 %v14529_v58, %v14528_v59  ;;  %v14547_v58 = vsel %vm13367_vm0, %v11176_v40, 0.0  ;;  %v114_v59 = vld [vmem:[#allocation3 + $0x258] sm:$0xff]  ;;  %v14549_v7 = vsel %vm13367_vm0, %v11178_v50, 0.0  ;;  %v11211_v36 = vcombine.high %v11203_v23, %v11203_v23 }
 0x4b6   :  { %v301_v9 = vunpack.c.l.bf16 %v114_v59  ;;  %v11195_v21 = vcombine.high %v11193_v1, %v11193_v1  ;;  %v14553_v24 = vsel %vm13367_vm0, %v11194_v3, 0.0  ;;  %v302_v39 = vunpack.c.h.bf16 %v114_v59  ;;  %v452_v3 = vld [vmem:[#allocation5 + $0x268] sm:$0xff] }
 0x4b7   :  { %v14532_v13 = vadd.f32 %v14531_v63, %v14530_v8  ;;  %v14559_v40 = vsel %vm13367_vm0, %v11203_v23, 0.0  ;;  %v14561_v48 = vsel %vm13367_vm0, %v11211_v36, 0.0  ;;  %v3050_v50 = vrot.slane %v451_v11, %v15260_v14 }
 0x4b8   :  { %v14557_v37 = vsel %vm13367_vm0, %v11195_v21, 0.0  ;;  %v3054_v51 = vrot.slane %v451_v11, %v15262_v15  ;;  %v3058_v52 = vrot.slane %v451_v11, %v15264_v16  ;;  %v3066_v21 = vrot.slane %v452_v3, %v15248_v2 }
 0x4b9   :  { %v14534_v25 = vadd.f32 %v14533_v12, %v14532_v13  ;;  %v6749_v12 = vcombine.low %v6741_v61, %v6748_v62  ;;  %v6750_v13 = vcombine.low %v3018_v55, %v3022_v56  ;;  %v3062_v55 = vrot.slane %v451_v11, %v15266_v17 }
 0x4ba   :  { %v3070_v22 = vrot.slane %v452_v3, %v15250_v4  ;;  %v3074_v23 = vrot.slane %v452_v3, %v15252_v5 }
 0x4bb   :  { %v14536_v30 = vadd.f32 %v14535_v19, %v14534_v25  ;;  %v6758_v31 = vrot.slane %v6750_v13, %v15268_v20 }
 0x4bd   :  { %v14538_v38 = vadd.f32 %v14537_v29, %v14536_v30  ;;  %v14555_v29 = vsel %vm13367_vm0, %v11193_v1, 0.0  ;;  %v3046_v30 = vrot.slane %v451_v11, %v15254_v6  ;;  %v6766_v41 = vcombine.low %v6758_v31, %v6765_v32 }
 0x4bf   :  { %v14540_v43 = vadd.f32 %v14539_v34, %v14538_v38  ;;  %v8365_v34 = vmul.f32 %v6749_v12, %v301_v9  ;;  %v8366_v59 = vmul.f32 %v6766_v41, %v302_v39  ;;  %v6785_v9 = vcombine.low %v3058_v52, %v3062_v55 }
 0x4c1   :  { %v14542_v49 = vadd.f32 %v14541_v42, %v14540_v43  ;;  %v6767_v42 = vcombine.low %v3034_v26, %v3038_v27  ;;  %v6768_v43 = vcombine.low %v3042_v28, %v3046_v30  ;;  %v11213_v46 = vcombine.high %v8365_v34, %v8365_v34 }
 0x4c2   :  { %v11220_v47 = vrot.slane %v8365_v34, %v15268_v20  ;;  %v11230_v12 = vcombine.high %v8366_v59, %v8366_v59  ;;  %v11237_v13 = vrot.slane %v8366_v59, %v15268_v20  ;;  %v6799_v27 = vrot.slane %v6785_v9, %v15268_v20 }
 0x4c3   :  { %v14544_v54 = vadd.f32 %v14543_v45, %v14542_v49  ;;  %v11212_v45 = vcombine.high %v11210_v35, %v11210_v35  ;;  %v6775_v56 = vrot.slane %v6767_v42, %v15268_v20  ;;  %v6782_v57 = vrot.slane %v6768_v43, %v15268_v20 }
 0x4c4   :  { %v11227_v60 = vrot.slane %v11213_v46, %v15268_v20  ;;  %v11228_v61 = vcombine.high %v11220_v47, %v11220_v47  ;;  %v14567_v1 = vsel %vm13367_vm0, %v11220_v47, 0.0  ;;  %v11244_v30 = vrot.slane %v11230_v12, %v15268_v20 }
 0x4c5   :  { %v14546_v63 = vadd.f32 %v14545_v53, %v14544_v54  ;;  %v14563_v53 = vsel %vm13367_vm0, %v11210_v35, 0.0  ;;  %v115_v54 = vld [vmem:[#allocation3 + $0x260] sm:$0xff]  ;;  %v14565_v62 = vsel %vm13367_vm0, %v11212_v45, 0.0  ;;  %v11245_v31 = vcombine.high %v11237_v13, %v11237_v13 }
 0x4c6   :  { %v303_v0 = vunpack.c.l.bf16 %v115_v54  ;;  %v11229_v11 = vcombine.high %v11227_v60, %v11227_v60  ;;  %v14569_v18 = vsel %vm13367_vm0, %v11228_v61, 0.0  ;;  %v304_v34 = vunpack.c.h.bf16 %v115_v54  ;;  %v453_v61 = vld [vmem:[#allocation5 + $0x270] sm:$0xff] }
 0x4c7   :  { %v14548_v8 = vadd.f32 %v14547_v58, %v14546_v63  ;;  %v14575_v35 = vsel %vm13367_vm0, %v11237_v13, 0.0  ;;  %v14577_v43 = vsel %vm13367_vm0, %v11245_v31, 0.0  ;;  %v3082_v45 = vrot.slane %v452_v3, %v15260_v14 }
 0x4c8   :  { %v14573_v32 = vsel %vm13367_vm0, %v11229_v11, 0.0  ;;  %v3086_v46 = vrot.slane %v452_v3, %v15262_v15  ;;  %v3090_v47 = vrot.slane %v452_v3, %v15264_v16  ;;  %v3098_v11 = vrot.slane %v453_v61, %v15248_v2 }
 0x4c9   :  { %v14550_v19 = vadd.f32 %v14549_v7, %v14548_v8  ;;  %v6783_v7 = vcombine.low %v6775_v56, %v6782_v57  ;;  %v6784_v8 = vcombine.low %v3050_v50, %v3054_v51  ;;  %v3094_v50 = vrot.slane %v452_v3, %v15266_v17 }
 0x4ca   :  { %v3102_v12 = vrot.slane %v453_v61, %v15250_v4  ;;  %v3106_v13 = vrot.slane %v453_v61, %v15252_v5 }
 0x4cb   :  { %v14552_v25 = vadd.f32 %v14551_v10, %v14550_v19  ;;  %v6792_v26 = vrot.slane %v6784_v8, %v15268_v20 }
 0x4cd   :  { %v14554_v33 = vadd.f32 %v14553_v24, %v14552_v25  ;;  %v14571_v24 = vsel %vm13367_vm0, %v11227_v60, 0.0  ;;  %v3078_v25 = vrot.slane %v452_v3, %v15254_v6  ;;  %v6800_v36 = vcombine.low %v6792_v26, %v6799_v27 }
 0x4cf   :  { %v14556_v38 = vadd.f32 %v14555_v29, %v14554_v33  ;;  %v8367_v29 = vmul.f32 %v6783_v7, %v303_v0  ;;  %v8368_v54 = vmul.f32 %v6800_v36, %v304_v34  ;;  %v6819_v0 = vcombine.low %v3090_v47, %v3094_v50 }
 0x4d1   :  { %v14558_v44 = vadd.f32 %v14557_v37, %v14556_v38  ;;  %v6801_v37 = vcombine.low %v3066_v21, %v3070_v22  ;;  %v6802_v38 = vcombine.low %v3074_v23, %v3078_v25  ;;  %v11247_v41 = vcombine.high %v8367_v29, %v8367_v29 }
 0x4d2   :  { %v11254_v42 = vrot.slane %v8367_v29, %v15268_v20  ;;  %v11264_v7 = vcombine.high %v8368_v54, %v8368_v54  ;;  %v11271_v8 = vrot.slane %v8368_v54, %v15268_v20  ;;  %v6833_v22 = vrot.slane %v6819_v0, %v15268_v20 }
 0x4d3   :  { %v14560_v49 = vadd.f32 %v14559_v40, %v14558_v44  ;;  %v11246_v40 = vcombine.high %v11244_v30, %v11244_v30  ;;  %v6809_v51 = vrot.slane %v6801_v37, %v15268_v20  ;;  %v6816_v52 = vrot.slane %v6802_v38, %v15268_v20 }
 0x4d4   :  { %v11261_v55 = vrot.slane %v11247_v41, %v15268_v20  ;;  %v11262_v56 = vcombine.high %v11254_v42, %v11254_v42  ;;  %v14583_v60 = vsel %vm13367_vm0, %v11254_v42, 0.0  ;;  %v11278_v25 = vrot.slane %v11264_v7, %v15268_v20 }
 0x4d5   :  { %v14562_v58 = vadd.f32 %v14561_v48, %v14560_v49  ;;  %v14579_v48 = vsel %vm13367_vm0, %v11244_v30, 0.0  ;;  %v116_v49 = vld [vmem:[#allocation3 + $0x268] sm:$0xff]  ;;  %v14581_v57 = vsel %vm13367_vm0, %v11246_v40, 0.0  ;;  %v11279_v26 = vcombine.high %v11271_v8, %v11271_v8 }
 0x4d6   :  { %v305_v59 = vunpack.c.l.bf16 %v116_v49  ;;  %v11263_v3 = vcombine.high %v11261_v55, %v11261_v55  ;;  %v14585_v9 = vsel %vm13367_vm0, %v11262_v56, 0.0  ;;  %v306_v29 = vunpack.c.h.bf16 %v116_v49  ;;  %v454_v56 = vld [vmem:[#allocation5 + $0x278] sm:$0xff] }
 0x4d7   :  { %v14564_v63 = vadd.f32 %v14563_v53, %v14562_v58  ;;  %v14591_v30 = vsel %vm13367_vm0, %v11271_v8, 0.0  ;;  %v14593_v38 = vsel %vm13367_vm0, %v11279_v26, 0.0  ;;  %v3114_v40 = vrot.slane %v453_v61, %v15260_v14 }
 0x4d8   :  { %v14589_v27 = vsel %vm13367_vm0, %v11263_v3, 0.0  ;;  %v3118_v41 = vrot.slane %v453_v61, %v15262_v15  ;;  %v3122_v42 = vrot.slane %v453_v61, %v15264_v16  ;;  %v3130_v3 = vrot.slane %v454_v56, %v15248_v2 }
 0x4d9   :  { %v14566_v10 = vadd.f32 %v14565_v62, %v14564_v63  ;;  %v6817_v62 = vcombine.low %v6809_v51, %v6816_v52  ;;  %v6818_v63 = vcombine.low %v3082_v45, %v3086_v46  ;;  %v3126_v45 = vrot.slane %v453_v61, %v15266_v17 }
 0x4da   :  { %v3134_v7 = vrot.slane %v454_v56, %v15250_v4  ;;  %v3138_v8 = vrot.slane %v454_v56, %v15252_v5 }
 0x4db   :  { %v14568_v19 = vadd.f32 %v14567_v1, %v14566_v10  ;;  %v6826_v21 = vrot.slane %v6818_v63, %v15268_v20 }
 0x4dd   :  { %v14570_v28 = vadd.f32 %v14569_v18, %v14568_v19  ;;  %v14587_v18 = vsel %vm13367_vm0, %v11261_v55, 0.0  ;;  %v3110_v19 = vrot.slane %v453_v61, %v15254_v6  ;;  %v6834_v31 = vcombine.low %v6826_v21, %v6833_v22 }
 0x4df   :  { %v14572_v33 = vadd.f32 %v14571_v24, %v14570_v28  ;;  %v8369_v24 = vmul.f32 %v6817_v62, %v305_v59  ;;  %v8370_v49 = vmul.f32 %v6834_v31, %v306_v29  ;;  %v6853_v59 = vcombine.low %v3122_v42, %v3126_v45 }
 0x4e1   :  { %v14574_v39 = vadd.f32 %v14573_v32, %v14572_v33  ;;  %v6835_v32 = vcombine.low %v3098_v11, %v3102_v12  ;;  %v6836_v33 = vcombine.low %v3106_v13, %v3110_v19  ;;  %v11281_v36 = vcombine.high %v8369_v24, %v8369_v24 }
 0x4e2   :  { %v11288_v37 = vrot.slane %v8369_v24, %v15268_v20  ;;  %v11298_v62 = vcombine.high %v8370_v49, %v8370_v49  ;;  %v11305_v63 = vrot.slane %v8370_v49, %v15268_v20  ;;  %v6867_v12 = vrot.slane %v6853_v59, %v15268_v20 }
 0x4e3   :  { %v14576_v44 = vadd.f32 %v14575_v35, %v14574_v39  ;;  %v11280_v35 = vcombine.high %v11278_v25, %v11278_v25  ;;  %v6843_v46 = vrot.slane %v6835_v32, %v15268_v20  ;;  %v6850_v47 = vrot.slane %v6836_v33, %v15268_v20 }
 0x4e4   :  { %v11295_v50 = vrot.slane %v11281_v36, %v15268_v20  ;;  %v11296_v51 = vcombine.high %v11288_v37, %v11288_v37  ;;  %v14599_v55 = vsel %vm13367_vm0, %v11288_v37, 0.0  ;;  %v11312_v19 = vrot.slane %v11298_v62, %v15268_v20 }
 0x4e5   :  { %v14578_v53 = vadd.f32 %v14577_v43, %v14576_v44  ;;  %v14595_v43 = vsel %vm13367_vm0, %v11278_v25, 0.0  ;;  %v117_v44 = vld [vmem:[#allocation3 + $0x270] sm:$0xff]  ;;  %v14597_v52 = vsel %vm13367_vm0, %v11280_v35, 0.0  ;;  %v11313_v21 = vcombine.high %v11305_v63, %v11305_v63 }
 0x4e6   :  { %v307_v54 = vunpack.c.l.bf16 %v117_v44  ;;  %v11297_v61 = vcombine.high %v11295_v50, %v11295_v50  ;;  %v14601_v0 = vsel %vm13367_vm0, %v11296_v51, 0.0  ;;  %v308_v24 = vunpack.c.h.bf16 %v117_v44  ;;  %v455_v51 = vld [vmem:[#allocation5 + $0x280] sm:$0xff] }
 0x4e7   :  { %v14580_v58 = vadd.f32 %v14579_v48, %v14578_v53  ;;  %v14607_v25 = vsel %vm13367_vm0, %v11305_v63, 0.0  ;;  %v14609_v33 = vsel %vm13367_vm0, %v11313_v21, 0.0  ;;  %v3146_v35 = vrot.slane %v454_v56, %v15260_v14 }
 0x4e8   :  { %v14605_v22 = vsel %vm13367_vm0, %v11297_v61, 0.0  ;;  %v3150_v36 = vrot.slane %v454_v56, %v15262_v15  ;;  %v3154_v37 = vrot.slane %v454_v56, %v15264_v16  ;;  %v3162_v61 = vrot.slane %v455_v51, %v15248_v2 }
 0x4e9   :  { %v14582_v1 = vadd.f32 %v14581_v57, %v14580_v58  ;;  %v6851_v57 = vcombine.low %v6843_v46, %v6850_v47  ;;  %v6852_v58 = vcombine.low %v3114_v40, %v3118_v41  ;;  %v3158_v40 = vrot.slane %v454_v56, %v15266_v17 }
 0x4ea   :  { %v3166_v62 = vrot.slane %v455_v51, %v15250_v4  ;;  %v3170_v63 = vrot.slane %v455_v51, %v15252_v5 }
 0x4eb   :  { %v14584_v10 = vadd.f32 %v14583_v60, %v14582_v1  ;;  %v6860_v11 = vrot.slane %v6852_v58, %v15268_v20 }
 0x4ed   :  { %v14586_v23 = vadd.f32 %v14585_v9, %v14584_v10  ;;  %v14603_v9 = vsel %vm13367_vm0, %v11295_v50, 0.0  ;;  %v3142_v10 = vrot.slane %v454_v56, %v15254_v6  ;;  %v6868_v26 = vcombine.low %v6860_v11, %v6867_v12 }
 0x4ef   :  { %v14588_v28 = vadd.f32 %v14587_v18, %v14586_v23  ;;  %v8371_v18 = vmul.f32 %v6851_v57, %v307_v54  ;;  %v8372_v44 = vmul.f32 %v6868_v26, %v308_v24  ;;  %v6887_v54 = vcombine.low %v3154_v37, %v3158_v40 }
 0x4f1   :  { %v14590_v34 = vadd.f32 %v14589_v27, %v14588_v28  ;;  %v6869_v27 = vcombine.low %v3130_v3, %v3134_v7  ;;  %v6870_v28 = vcombine.low %v3138_v8, %v3142_v10  ;;  %v11315_v31 = vcombine.high %v8371_v18, %v8371_v18 }
 0x4f2   :  { %v11322_v32 = vrot.slane %v8371_v18, %v15268_v20  ;;  %v11332_v57 = vcombine.high %v8372_v44, %v8372_v44  ;;  %v11339_v58 = vrot.slane %v8372_v44, %v15268_v20  ;;  %v6901_v7 = vrot.slane %v6887_v54, %v15268_v20 }
 0x4f3   :  { %v14592_v39 = vadd.f32 %v14591_v30, %v14590_v34  ;;  %v11314_v30 = vcombine.high %v11312_v19, %v11312_v19  ;;  %v6877_v41 = vrot.slane %v6869_v27, %v15268_v20  ;;  %v6884_v42 = vrot.slane %v6870_v28, %v15268_v20 }
 0x4f4   :  { %v11329_v45 = vrot.slane %v11315_v31, %v15268_v20  ;;  %v11330_v46 = vcombine.high %v11322_v32, %v11322_v32  ;;  %v14615_v50 = vsel %vm13367_vm0, %v11322_v32, 0.0  ;;  %v11346_v10 = vrot.slane %v11332_v57, %v15268_v20 }
 0x4f5   :  { %v14594_v48 = vadd.f32 %v14593_v38, %v14592_v39  ;;  %v14611_v38 = vsel %vm13367_vm0, %v11312_v19, 0.0  ;;  %v118_v39 = vld [vmem:[#allocation3 + $0x278] sm:$0xff]  ;;  %v14613_v47 = vsel %vm13367_vm0, %v11314_v30, 0.0  ;;  %v11347_v11 = vcombine.high %v11339_v58, %v11339_v58 }
 0x4f6   :  { %v309_v49 = vunpack.c.l.bf16 %v118_v39  ;;  %v11331_v56 = vcombine.high %v11329_v45, %v11329_v45  ;;  %v14617_v59 = vsel %vm13367_vm0, %v11330_v46, 0.0  ;;  %v310_v18 = vunpack.c.h.bf16 %v118_v39  ;;  %v456_v46 = vld [vmem:[#allocation5 + $0x288] sm:$0xff] }
 0x4f7   :  { %v14596_v53 = vadd.f32 %v14595_v43, %v14594_v48  ;;  %v14623_v19 = vsel %vm13367_vm0, %v11339_v58, 0.0  ;;  %v14625_v28 = vsel %vm13367_vm0, %v11347_v11, 0.0  ;;  %v3178_v30 = vrot.slane %v455_v51, %v15260_v14 }
 0x4f8   :  { %v14621_v12 = vsel %vm13367_vm0, %v11331_v56, 0.0  ;;  %v3182_v31 = vrot.slane %v455_v51, %v15262_v15  ;;  %v3186_v32 = vrot.slane %v455_v51, %v15264_v16  ;;  %v3194_v56 = vrot.slane %v456_v46, %v15248_v2 }
 0x4f9   :  { %v14598_v60 = vadd.f32 %v14597_v52, %v14596_v53  ;;  %v6885_v52 = vcombine.low %v6877_v41, %v6884_v42  ;;  %v6886_v53 = vcombine.low %v3146_v35, %v3150_v36  ;;  %v3190_v35 = vrot.slane %v455_v51, %v15266_v17 }
 0x4fa   :  { %v3198_v57 = vrot.slane %v456_v46, %v15250_v4  ;;  %v3202_v58 = vrot.slane %v456_v46, %v15252_v5 }
 0x4fb   :  { %v14600_v1 = vadd.f32 %v14599_v55, %v14598_v60  ;;  %v6894_v3 = vrot.slane %v6886_v53, %v15268_v20 }
 0x4fd   :  { %v14602_v13 = vadd.f32 %v14601_v0, %v14600_v1  ;;  %v14619_v0 = vsel %vm13367_vm0, %v11329_v45, 0.0  ;;  %v3174_v1 = vrot.slane %v455_v51, %v15254_v6  ;;  %v6902_v21 = vcombine.low %v6894_v3, %v6901_v7 }
 0x4ff   :  { %v14604_v23 = vadd.f32 %v14603_v9, %v14602_v13  ;;  %v8373_v9 = vmul.f32 %v6885_v52, %v309_v49  ;;  %v8374_v39 = vmul.f32 %v6902_v21, %v310_v18  ;;  %v6921_v49 = vcombine.low %v3186_v32, %v3190_v35 }
 0x501   :  { %v14606_v29 = vadd.f32 %v14605_v22, %v14604_v23  ;;  %v6903_v22 = vcombine.low %v3162_v61, %v3166_v62  ;;  %v6904_v23 = vcombine.low %v3170_v63, %v3174_v1  ;;  %v11349_v26 = vcombine.high %v8373_v9, %v8373_v9 }
 0x502   :  { %v11356_v27 = vrot.slane %v8373_v9, %v15268_v20  ;;  %v11366_v52 = vcombine.high %v8374_v39, %v8374_v39  ;;  %v11373_v53 = vrot.slane %v8374_v39, %v15268_v20  ;;  %v6935_v62 = vrot.slane %v6921_v49, %v15268_v20 }
 0x503   :  { %v14608_v34 = vadd.f32 %v14607_v25, %v14606_v29  ;;  %v11348_v25 = vcombine.high %v11346_v10, %v11346_v10  ;;  %v6911_v36 = vrot.slane %v6903_v22, %v15268_v20  ;;  %v6918_v37 = vrot.slane %v6904_v23, %v15268_v20 }
 0x504   :  { %v11363_v40 = vrot.slane %v11349_v26, %v15268_v20  ;;  %v11364_v41 = vcombine.high %v11356_v27, %v11356_v27  ;;  %v14631_v45 = vsel %vm13367_vm0, %v11356_v27, 0.0  ;;  %v11380_v1 = vrot.slane %v11366_v52, %v15268_v20 }
 0x505   :  { %v14610_v43 = vadd.f32 %v14609_v33, %v14608_v34  ;;  %v14627_v33 = vsel %vm13367_vm0, %v11346_v10, 0.0  ;;  %v119_v34 = vld [vmem:[#allocation3 + $0x280] sm:$0xff]  ;;  %v14629_v42 = vsel %vm13367_vm0, %v11348_v25, 0.0  ;;  %v11381_v3 = vcombine.high %v11373_v53, %v11373_v53 }
 0x506   :  { %v311_v44 = vunpack.c.l.bf16 %v119_v34  ;;  %v11365_v51 = vcombine.high %v11363_v40, %v11363_v40  ;;  %v14633_v54 = vsel %vm13367_vm0, %v11364_v41, 0.0  ;;  %v312_v9 = vunpack.c.h.bf16 %v119_v34  ;;  %v457_v41 = vld [vmem:[#allocation5 + $0x290] sm:$0xff] }
 0x507   :  { %v14612_v48 = vadd.f32 %v14611_v38, %v14610_v43  ;;  %v14639_v10 = vsel %vm13367_vm0, %v11373_v53, 0.0  ;;  %v14641_v23 = vsel %vm13367_vm0, %v11381_v3, 0.0  ;;  %v3210_v25 = vrot.slane %v456_v46, %v15260_v14 }
 0x508   :  { %v14637_v7 = vsel %vm13367_vm0, %v11365_v51, 0.0  ;;  %v3214_v26 = vrot.slane %v456_v46, %v15262_v15  ;;  %v3218_v27 = vrot.slane %v456_v46, %v15264_v16  ;;  %v3226_v51 = vrot.slane %v457_v41, %v15248_v2 }
 0x509   :  { %v14614_v55 = vadd.f32 %v14613_v47, %v14612_v48  ;;  %v6919_v47 = vcombine.low %v6911_v36, %v6918_v37  ;;  %v6920_v48 = vcombine.low %v3178_v30, %v3182_v31  ;;  %v3222_v30 = vrot.slane %v456_v46, %v15266_v17 }
 0x50a   :  { %v3230_v52 = vrot.slane %v457_v41, %v15250_v4  ;;  %v3234_v53 = vrot.slane %v457_v41, %v15252_v5 }
 0x50b   :  { %v14616_v60 = vadd.f32 %v14615_v50, %v14614_v55  ;;  %v6928_v61 = vrot.slane %v6920_v48, %v15268_v20 }
 0x50d   :  { %v14618_v8 = vadd.f32 %v14617_v59, %v14616_v60  ;;  %v14635_v59 = vsel %vm13367_vm0, %v11363_v40, 0.0  ;;  %v3206_v60 = vrot.slane %v456_v46, %v15254_v6  ;;  %v6936_v11 = vcombine.low %v6928_v61, %v6935_v62 }
 0x50f   :  { %v14620_v13 = vadd.f32 %v14619_v0, %v14618_v8  ;;  %v8375_v0 = vmul.f32 %v6919_v47, %v311_v44  ;;  %v8376_v34 = vmul.f32 %v6936_v11, %v312_v9  ;;  %v6955_v44 = vcombine.low %v3218_v27, %v3222_v30 }
 0x511   :  { %v14622_v24 = vadd.f32 %v14621_v12, %v14620_v13  ;;  %v6937_v12 = vcombine.low %v3194_v56, %v3198_v57  ;;  %v6938_v13 = vcombine.low %v3202_v58, %v3206_v60  ;;  %v11383_v21 = vcombine.high %v8375_v0, %v8375_v0 }
 0x512   :  { %v11390_v22 = vrot.slane %v8375_v0, %v15268_v20  ;;  %v11400_v47 = vcombine.high %v8376_v34, %v8376_v34  ;;  %v11407_v48 = vrot.slane %v8376_v34, %v15268_v20  ;;  %v6969_v57 = vrot.slane %v6955_v44, %v15268_v20 }
 0x513   :  { %v14624_v29 = vadd.f32 %v14623_v19, %v14622_v24  ;;  %v11382_v19 = vcombine.high %v11380_v1, %v11380_v1  ;;  %v6945_v31 = vrot.slane %v6937_v12, %v15268_v20  ;;  %v6952_v32 = vrot.slane %v6938_v13, %v15268_v20 }
 0x514   :  { %v11397_v35 = vrot.slane %v11383_v21, %v15268_v20  ;;  %v11398_v36 = vcombine.high %v11390_v22, %v11390_v22  ;;  %v14647_v40 = vsel %vm13367_vm0, %v11390_v22, 0.0  ;;  %v11414_v60 = vrot.slane %v11400_v47, %v15268_v20 }
 0x515   :  { %v14626_v38 = vadd.f32 %v14625_v28, %v14624_v29  ;;  %v14643_v28 = vsel %vm13367_vm0, %v11380_v1, 0.0  ;;  %v120_v29 = vld [vmem:[#allocation3 + $0x288] sm:$0xff]  ;;  %v14645_v37 = vsel %vm13367_vm0, %v11382_v19, 0.0  ;;  %v11415_v61 = vcombine.high %v11407_v48, %v11407_v48 }
 0x516   :  { %v313_v39 = vunpack.c.l.bf16 %v120_v29  ;;  %v11399_v46 = vcombine.high %v11397_v35, %v11397_v35  ;;  %v14649_v49 = vsel %vm13367_vm0, %v11398_v36, 0.0  ;;  %v314_v0 = vunpack.c.h.bf16 %v120_v29  ;;  %v458_v36 = vld [vmem:[#allocation5 + $0x298] sm:$0xff] }
 0x517   :  { %v14628_v43 = vadd.f32 %v14627_v33, %v14626_v38  ;;  %v14655_v1 = vsel %vm13367_vm0, %v11407_v48, 0.0  ;;  %v14657_v13 = vsel %vm13367_vm0, %v11415_v61, 0.0  ;;  %v3242_v19 = vrot.slane %v457_v41, %v15260_v14 }
 0x518   :  { %v14653_v62 = vsel %vm13367_vm0, %v11399_v46, 0.0  ;;  %v3246_v21 = vrot.slane %v457_v41, %v15262_v15  ;;  %v3250_v22 = vrot.slane %v457_v41, %v15264_v16  ;;  %v3258_v46 = vrot.slane %v458_v36, %v15248_v2 }
 0x519   :  { %v14630_v50 = vadd.f32 %v14629_v42, %v14628_v43  ;;  %v6953_v42 = vcombine.low %v6945_v31, %v6952_v32  ;;  %v6954_v43 = vcombine.low %v3210_v25, %v3214_v26  ;;  %v3254_v25 = vrot.slane %v457_v41, %v15266_v17 }
 0x51a   :  { %v3262_v47 = vrot.slane %v458_v36, %v15250_v4  ;;  %v3266_v48 = vrot.slane %v458_v36, %v15252_v5 }
 0x51b   :  { %v14632_v55 = vadd.f32 %v14631_v45, %v14630_v50  ;;  %v6962_v56 = vrot.slane %v6954_v43, %v15268_v20 }
 0x51d   :  { %v14634_v63 = vadd.f32 %v14633_v54, %v14632_v55  ;;  %v14651_v54 = vsel %vm13367_vm0, %v11397_v35, 0.0  ;;  %v3238_v55 = vrot.slane %v457_v41, %v15254_v6  ;;  %v6970_v3 = vcombine.low %v6962_v56, %v6969_v57 }
 0x51f   :  { %v14636_v8 = vadd.f32 %v14635_v59, %v14634_v63  ;;  %v8377_v59 = vmul.f32 %v6953_v42, %v313_v39  ;;  %v8378_v29 = vmul.f32 %v6970_v3, %v314_v0  ;;  %v6989_v39 = vcombine.low %v3250_v22, %v3254_v25 }
 0x521   :  { %v14638_v18 = vadd.f32 %v14637_v7, %v14636_v8  ;;  %v6971_v7 = vcombine.low %v3226_v51, %v3230_v52  ;;  %v6972_v8 = vcombine.low %v3234_v53, %v3238_v55  ;;  %v11417_v11 = vcombine.high %v8377_v59, %v8377_v59 }
 0x522   :  { %v11424_v12 = vrot.slane %v8377_v59, %v15268_v20  ;;  %v11434_v42 = vcombine.high %v8378_v29, %v8378_v29  ;;  %v11441_v43 = vrot.slane %v8378_v29, %v15268_v20  ;;  %v7003_v52 = vrot.slane %v6989_v39, %v15268_v20 }
 0x523   :  { %v14640_v24 = vadd.f32 %v14639_v10, %v14638_v18  ;;  %v11416_v10 = vcombine.high %v11414_v60, %v11414_v60  ;;  %v6979_v26 = vrot.slane %v6971_v7, %v15268_v20  ;;  %v6986_v27 = vrot.slane %v6972_v8, %v15268_v20 }
 0x524   :  { %v11431_v30 = vrot.slane %v11417_v11, %v15268_v20  ;;  %v11432_v31 = vcombine.high %v11424_v12, %v11424_v12  ;;  %v14663_v35 = vsel %vm13367_vm0, %v11424_v12, 0.0  ;;  %v11448_v55 = vrot.slane %v11434_v42, %v15268_v20 }
 0x525   :  { %v14642_v33 = vadd.f32 %v14641_v23, %v14640_v24  ;;  %v14659_v23 = vsel %vm13367_vm0, %v11414_v60, 0.0  ;;  %v121_v24 = vld [vmem:[#allocation3 + $0x290] sm:$0xff]  ;;  %v14661_v32 = vsel %vm13367_vm0, %v11416_v10, 0.0  ;;  %v11449_v56 = vcombine.high %v11441_v43, %v11441_v43 }
 0x526   :  { %v315_v34 = vunpack.c.l.bf16 %v121_v24  ;;  %v11433_v41 = vcombine.high %v11431_v30, %v11431_v30  ;;  %v14665_v44 = vsel %vm13367_vm0, %v11432_v31, 0.0  ;;  %v316_v59 = vunpack.c.h.bf16 %v121_v24  ;;  %v459_v31 = vld [vmem:[#allocation5 + $0x2a0] sm:$0xff] }
 0x527   :  { %v14644_v38 = vadd.f32 %v14643_v28, %v14642_v33  ;;  %v14671_v60 = vsel %vm13367_vm0, %v11441_v43, 0.0  ;;  %v14673_v8 = vsel %vm13367_vm0, %v11449_v56, 0.0  ;;  %v3274_v10 = vrot.slane %v458_v36, %v15260_v14 }
 0x528   :  { %v14669_v57 = vsel %vm13367_vm0, %v11433_v41, 0.0  ;;  %v3278_v11 = vrot.slane %v458_v36, %v15262_v15  ;;  %v3282_v12 = vrot.slane %v458_v36, %v15264_v16  ;;  %v3290_v41 = vrot.slane %v459_v31, %v15248_v2 }
 0x529   :  { %v14646_v45 = vadd.f32 %v14645_v37, %v14644_v38  ;;  %v6987_v37 = vcombine.low %v6979_v26, %v6986_v27  ;;  %v6988_v38 = vcombine.low %v3242_v19, %v3246_v21  ;;  %v3286_v19 = vrot.slane %v458_v36, %v15266_v17 }
 0x52a   :  { %v3294_v42 = vrot.slane %v459_v31, %v15250_v4  ;;  %v3298_v43 = vrot.slane %v459_v31, %v15252_v5 }
 0x52b   :  { %v14648_v50 = vadd.f32 %v14647_v40, %v14646_v45  ;;  %v6996_v51 = vrot.slane %v6988_v38, %v15268_v20 }
 0x52d   :  { %v14650_v58 = vadd.f32 %v14649_v49, %v14648_v50  ;;  %v14667_v49 = vsel %vm13367_vm0, %v11431_v30, 0.0  ;;  %v3270_v50 = vrot.slane %v458_v36, %v15254_v6  ;;  %v7004_v61 = vcombine.low %v6996_v51, %v7003_v52 }
 0x52f   :  { %v14652_v63 = vadd.f32 %v14651_v54, %v14650_v58  ;;  %v8379_v54 = vmul.f32 %v6987_v37, %v315_v34  ;;  %v8380_v24 = vmul.f32 %v7004_v61, %v316_v59  ;;  %v7023_v34 = vcombine.low %v3282_v12, %v3286_v19 }
 0x531   :  { %v14654_v9 = vadd.f32 %v14653_v62, %v14652_v63  ;;  %v7005_v62 = vcombine.low %v3258_v46, %v3262_v47  ;;  %v7006_v63 = vcombine.low %v3266_v48, %v3270_v50  ;;  %v11451_v3 = vcombine.high %v8379_v54, %v8379_v54 }
 0x532   :  { %v11458_v7 = vrot.slane %v8379_v54, %v15268_v20  ;;  %v11468_v37 = vcombine.high %v8380_v24, %v8380_v24  ;;  %v11475_v38 = vrot.slane %v8380_v24, %v15268_v20  ;;  %v7037_v47 = vrot.slane %v7023_v34, %v15268_v20 }
 0x533   :  { %v14656_v18 = vadd.f32 %v14655_v1, %v14654_v9  ;;  %v11450_v1 = vcombine.high %v11448_v55, %v11448_v55  ;;  %v7013_v21 = vrot.slane %v7005_v62, %v15268_v20  ;;  %v7020_v22 = vrot.slane %v7006_v63, %v15268_v20 }
 0x534   :  { %v11465_v25 = vrot.slane %v11451_v3, %v15268_v20  ;;  %v11466_v26 = vcombine.high %v11458_v7, %v11458_v7  ;;  %v14679_v30 = vsel %vm13367_vm0, %v11458_v7, 0.0  ;;  %v11482_v50 = vrot.slane %v11468_v37, %v15268_v20 }
 0x535   :  { %v14658_v28 = vadd.f32 %v14657_v13, %v14656_v18  ;;  %v14675_v13 = vsel %vm13367_vm0, %v11448_v55, 0.0  ;;  %v122_v18 = vld [vmem:[#allocation3 + $0x298] sm:$0xff]  ;;  %v14677_v27 = vsel %vm13367_vm0, %v11450_v1, 0.0  ;;  %v11483_v51 = vcombine.high %v11475_v38, %v11475_v38 }
 0x536   :  { %v317_v29 = vunpack.c.l.bf16 %v122_v18  ;;  %v11467_v36 = vcombine.high %v11465_v25, %v11465_v25  ;;  %v14681_v39 = vsel %vm13367_vm0, %v11466_v26, 0.0  ;;  %v318_v54 = vunpack.c.h.bf16 %v122_v18  ;;  %v460_v26 = vld [vmem:[#allocation5 + $0x2a8] sm:$0xff] }
 0x537   :  { %v14660_v33 = vadd.f32 %v14659_v23, %v14658_v28  ;;  %v14687_v55 = vsel %vm13367_vm0, %v11475_v38, 0.0  ;;  %v14689_v63 = vsel %vm13367_vm0, %v11483_v51, 0.0  ;;  %v3306_v1 = vrot.slane %v459_v31, %v15260_v14 }
 0x538   :  { %v14685_v52 = vsel %vm13367_vm0, %v11467_v36, 0.0  ;;  %v3310_v3 = vrot.slane %v459_v31, %v15262_v15  ;;  %v3314_v7 = vrot.slane %v459_v31, %v15264_v16  ;;  %v3322_v36 = vrot.slane %v460_v26, %v15248_v2 }
 0x539   :  { %v14662_v40 = vadd.f32 %v14661_v32, %v14660_v33  ;;  %v7021_v32 = vcombine.low %v7013_v21, %v7020_v22  ;;  %v7022_v33 = vcombine.low %v3274_v10, %v3278_v11  ;;  %v3318_v10 = vrot.slane %v459_v31, %v15266_v17 }
 0x53a   :  { %v3326_v37 = vrot.slane %v460_v26, %v15250_v4  ;;  %v3330_v38 = vrot.slane %v460_v26, %v15252_v5 }
 0x53b   :  { %v14664_v45 = vadd.f32 %v14663_v35, %v14662_v40  ;;  %v7030_v46 = vrot.slane %v7022_v33, %v15268_v20 }
 0x53d   :  { %v14666_v53 = vadd.f32 %v14665_v44, %v14664_v45  ;;  %v14683_v44 = vsel %vm13367_vm0, %v11465_v25, 0.0  ;;  %v3302_v45 = vrot.slane %v459_v31, %v15254_v6  ;;  %v7038_v56 = vcombine.low %v7030_v46, %v7037_v47 }
 0x53f   :  { %v14668_v58 = vadd.f32 %v14667_v49, %v14666_v53  ;;  %v8381_v49 = vmul.f32 %v7021_v32, %v317_v29  ;;  %v8382_v18 = vmul.f32 %v7038_v56, %v318_v54  ;;  %v7057_v29 = vcombine.low %v3314_v7, %v3318_v10 }
 0x541   :  { %v14670_v0 = vadd.f32 %v14669_v57, %v14668_v58  ;;  %v7039_v57 = vcombine.low %v3290_v41, %v3294_v42  ;;  %v7040_v58 = vcombine.low %v3298_v43, %v3302_v45  ;;  %v11485_v61 = vcombine.high %v8381_v49, %v8381_v49 }
 0x542   :  { %v11492_v62 = vrot.slane %v8381_v49, %v15268_v20  ;;  %v11502_v32 = vcombine.high %v8382_v18, %v8382_v18  ;;  %v11509_v33 = vrot.slane %v8382_v18, %v15268_v20  ;;  %v7071_v42 = vrot.slane %v7057_v29, %v15268_v20 }
 0x543   :  { %v14672_v9 = vadd.f32 %v14671_v60, %v14670_v0  ;;  %v11484_v60 = vcombine.high %v11482_v50, %v11482_v50  ;;  %v7047_v11 = vrot.slane %v7039_v57, %v15268_v20  ;;  %v7054_v12 = vrot.slane %v7040_v58, %v15268_v20 }
 0x544   :  { %v11499_v19 = vrot.slane %v11485_v61, %v15268_v20  ;;  %v11500_v21 = vcombine.high %v11492_v62, %v11492_v62  ;;  %v14695_v25 = vsel %vm13367_vm0, %v11492_v62, 0.0  ;;  %v11516_v45 = vrot.slane %v11502_v32, %v15268_v20 }
 0x545   :  { %v14674_v23 = vadd.f32 %v14673_v8, %v14672_v9  ;;  %v14691_v8 = vsel %vm13367_vm0, %v11482_v50, 0.0  ;;  %v123_v9 = vld [vmem:[#allocation3 + $0x2a0] sm:$0xff]  ;;  %v14693_v22 = vsel %vm13367_vm0, %v11484_v60, 0.0  ;;  %v11517_v46 = vcombine.high %v11509_v33, %v11509_v33 }
 0x546   :  { %v319_v24 = vunpack.c.l.bf16 %v123_v9  ;;  %v11501_v31 = vcombine.high %v11499_v19, %v11499_v19  ;;  %v14697_v34 = vsel %vm13367_vm0, %v11500_v21, 0.0  ;;  %v320_v49 = vunpack.c.h.bf16 %v123_v9  ;;  %v461_v21 = vld [vmem:[#allocation5 + $0x2b0] sm:$0xff] }
 0x547   :  { %v14676_v28 = vadd.f32 %v14675_v13, %v14674_v23  ;;  %v14703_v50 = vsel %vm13367_vm0, %v11509_v33, 0.0  ;;  %v14705_v58 = vsel %vm13367_vm0, %v11517_v46, 0.0  ;;  %v3338_v60 = vrot.slane %v460_v26, %v15260_v14 }
 0x548   :  { %v14701_v47 = vsel %vm13367_vm0, %v11501_v31, 0.0  ;;  %v3342_v61 = vrot.slane %v460_v26, %v15262_v15  ;;  %v3346_v62 = vrot.slane %v460_v26, %v15264_v16  ;;  %v3354_v31 = vrot.slane %v461_v21, %v15248_v2 }
 0x549   :  { %v14678_v35 = vadd.f32 %v14677_v27, %v14676_v28  ;;  %v7055_v27 = vcombine.low %v7047_v11, %v7054_v12  ;;  %v7056_v28 = vcombine.low %v3306_v1, %v3310_v3  ;;  %v3350_v1 = vrot.slane %v460_v26, %v15266_v17 }
 0x54a   :  { %v3358_v32 = vrot.slane %v461_v21, %v15250_v4  ;;  %v3362_v33 = vrot.slane %v461_v21, %v15252_v5 }
 0x54b   :  { %v14680_v40 = vadd.f32 %v14679_v30, %v14678_v35  ;;  %v7064_v41 = vrot.slane %v7056_v28, %v15268_v20 }
 0x54d   :  { %v14682_v48 = vadd.f32 %v14681_v39, %v14680_v40  ;;  %v14699_v39 = vsel %vm13367_vm0, %v11499_v19, 0.0  ;;  %v3334_v40 = vrot.slane %v460_v26, %v15254_v6  ;;  %v7072_v51 = vcombine.low %v7064_v41, %v7071_v42 }
 0x54f   :  { %v14684_v53 = vadd.f32 %v14683_v44, %v14682_v48  ;;  %v8383_v44 = vmul.f32 %v7055_v27, %v319_v24  ;;  %v8384_v9 = vmul.f32 %v7072_v51, %v320_v49  ;;  %v7091_v24 = vcombine.low %v3346_v62, %v3350_v1 }
 0x551   :  { %v14686_v59 = vadd.f32 %v14685_v52, %v14684_v53  ;;  %v7073_v52 = vcombine.low %v3322_v36, %v3326_v37  ;;  %v7074_v53 = vcombine.low %v3330_v38, %v3334_v40  ;;  %v11519_v56 = vcombine.high %v8383_v44, %v8383_v44 }
 0x552   :  { %v11526_v57 = vrot.slane %v8383_v44, %v15268_v20  ;;  %v11536_v27 = vcombine.high %v8384_v9, %v8384_v9  ;;  %v11543_v28 = vrot.slane %v8384_v9, %v15268_v20  ;;  %v7105_v37 = vrot.slane %v7091_v24, %v15268_v20 }
 0x553   :  { %v14688_v0 = vadd.f32 %v14687_v55, %v14686_v59  ;;  %v11518_v55 = vcombine.high %v11516_v45, %v11516_v45  ;;  %v7081_v3 = vrot.slane %v7073_v52, %v15268_v20  ;;  %v7088_v7 = vrot.slane %v7074_v53, %v15268_v20 }
 0x554   :  { %v11533_v10 = vrot.slane %v11519_v56, %v15268_v20  ;;  %v11534_v11 = vcombine.high %v11526_v57, %v11526_v57  ;;  %v14711_v19 = vsel %vm13367_vm0, %v11526_v57, 0.0  ;;  %v11550_v40 = vrot.slane %v11536_v27, %v15268_v20 }
 0x555   :  { %v14690_v13 = vadd.f32 %v14689_v63, %v14688_v0  ;;  %v14707_v63 = vsel %vm13367_vm0, %v11516_v45, 0.0  ;;  %v124_v0 = vld [vmem:[#allocation3 + $0x2a8] sm:$0xff]  ;;  %v14709_v12 = vsel %vm13367_vm0, %v11518_v55, 0.0  ;;  %v11551_v41 = vcombine.high %v11543_v28, %v11543_v28 }
 0x556   :  { %v321_v18 = vunpack.c.l.bf16 %v124_v0  ;;  %v11535_v26 = vcombine.high %v11533_v10, %v11533_v10  ;;  %v14713_v29 = vsel %vm13367_vm0, %v11534_v11, 0.0  ;;  %v322_v44 = vunpack.c.h.bf16 %v124_v0  ;;  %v462_v11 = vld [vmem:[#allocation5 + $0x2b8] sm:$0xff] }
 0x557   :  { %v14692_v23 = vadd.f32 %v14691_v8, %v14690_v13  ;;  %v14719_v45 = vsel %vm13367_vm0, %v11543_v28, 0.0  ;;  %v14721_v53 = vsel %vm13367_vm0, %v11551_v41, 0.0  ;;  %v3370_v55 = vrot.slane %v461_v21, %v15260_v14 }
 0x558   :  { %v14717_v42 = vsel %vm13367_vm0, %v11535_v26, 0.0  ;;  %v3374_v56 = vrot.slane %v461_v21, %v15262_v15  ;;  %v3378_v57 = vrot.slane %v461_v21, %v15264_v16  ;;  %v3386_v26 = vrot.slane %v462_v11, %v15248_v2 }
 0x559   :  { %v14694_v30 = vadd.f32 %v14693_v22, %v14692_v23  ;;  %v7089_v22 = vcombine.low %v7081_v3, %v7088_v7  ;;  %v7090_v23 = vcombine.low %v3338_v60, %v3342_v61  ;;  %v3382_v60 = vrot.slane %v461_v21, %v15266_v17 }
 0x55a   :  { %v3390_v27 = vrot.slane %v462_v11, %v15250_v4  ;;  %v3394_v28 = vrot.slane %v462_v11, %v15252_v5 }
 0x55b   :  { %v14696_v35 = vadd.f32 %v14695_v25, %v14694_v30  ;;  %v7098_v36 = vrot.slane %v7090_v23, %v15268_v20 }
 0x55d   :  { %v14698_v43 = vadd.f32 %v14697_v34, %v14696_v35  ;;  %v14715_v34 = vsel %vm13367_vm0, %v11533_v10, 0.0  ;;  %v3366_v35 = vrot.slane %v461_v21, %v15254_v6  ;;  %v7106_v46 = vcombine.low %v7098_v36, %v7105_v37 }
 0x55f   :  { %v14700_v48 = vadd.f32 %v14699_v39, %v14698_v43  ;;  %v8385_v39 = vmul.f32 %v7089_v22, %v321_v18  ;;  %v8386_v0 = vmul.f32 %v7106_v46, %v322_v44  ;;  %v7125_v18 = vcombine.low %v3378_v57, %v3382_v60 }
 0x561   :  { %v14702_v54 = vadd.f32 %v14701_v47, %v14700_v48  ;;  %v7107_v47 = vcombine.low %v3354_v31, %v3358_v32  ;;  %v7108_v48 = vcombine.low %v3362_v33, %v3366_v35  ;;  %v11553_v51 = vcombine.high %v8385_v39, %v8385_v39 }
 0x562   :  { %v11560_v52 = vrot.slane %v8385_v39, %v15268_v20  ;;  %v11570_v22 = vcombine.high %v8386_v0, %v8386_v0  ;;  %v11577_v23 = vrot.slane %v8386_v0, %v15268_v20  ;;  %v7139_v32 = vrot.slane %v7125_v18, %v15268_v20 }
 0x563   :  { %v14704_v59 = vadd.f32 %v14703_v50, %v14702_v54  ;;  %v11552_v50 = vcombine.high %v11550_v40, %v11550_v40  ;;  %v7115_v61 = vrot.slane %v7107_v47, %v15268_v20  ;;  %v7122_v62 = vrot.slane %v7108_v48, %v15268_v20 }
 0x564   :  { %v11567_v1 = vrot.slane %v11553_v51, %v15268_v20  ;;  %v11568_v3 = vcombine.high %v11560_v52, %v11560_v52  ;;  %v14727_v10 = vsel %vm13367_vm0, %v11560_v52, 0.0  ;;  %v11584_v35 = vrot.slane %v11570_v22, %v15268_v20 }
 0x565   :  { %v14706_v8 = vadd.f32 %v14705_v58, %v14704_v59  ;;  %v14723_v58 = vsel %vm13367_vm0, %v11550_v40, 0.0  ;;  %v125_v59 = vld [vmem:[#allocation3 + $0x2b0] sm:$0xff]  ;;  %v14725_v7 = vsel %vm13367_vm0, %v11552_v50, 0.0  ;;  %v11585_v36 = vcombine.high %v11577_v23, %v11577_v23 }
 0x566   :  { %v323_v9 = vunpack.c.l.bf16 %v125_v59  ;;  %v11569_v21 = vcombine.high %v11567_v1, %v11567_v1  ;;  %v14729_v24 = vsel %vm13367_vm0, %v11568_v3, 0.0  ;;  %v324_v39 = vunpack.c.h.bf16 %v125_v59  ;;  %v463_v3 = vld [vmem:[#allocation5 + $0x2c0] sm:$0xff] }
 0x567   :  { %v14708_v13 = vadd.f32 %v14707_v63, %v14706_v8  ;;  %v14735_v40 = vsel %vm13367_vm0, %v11577_v23, 0.0  ;;  %v14737_v48 = vsel %vm13367_vm0, %v11585_v36, 0.0  ;;  %v3402_v50 = vrot.slane %v462_v11, %v15260_v14 }
 0x568   :  { %v14733_v37 = vsel %vm13367_vm0, %v11569_v21, 0.0  ;;  %v3406_v51 = vrot.slane %v462_v11, %v15262_v15  ;;  %v3410_v52 = vrot.slane %v462_v11, %v15264_v16  ;;  %v3418_v21 = vrot.slane %v463_v3, %v15248_v2 }
 0x569   :  { %v14710_v25 = vadd.f32 %v14709_v12, %v14708_v13  ;;  %v7123_v12 = vcombine.low %v7115_v61, %v7122_v62  ;;  %v7124_v13 = vcombine.low %v3370_v55, %v3374_v56  ;;  %v3414_v55 = vrot.slane %v462_v11, %v15266_v17 }
 0x56a   :  { %v3422_v22 = vrot.slane %v463_v3, %v15250_v4  ;;  %v3426_v23 = vrot.slane %v463_v3, %v15252_v5 }
 0x56b   :  { %v14712_v30 = vadd.f32 %v14711_v19, %v14710_v25  ;;  %v7132_v31 = vrot.slane %v7124_v13, %v15268_v20 }
 0x56d   :  { %v14714_v38 = vadd.f32 %v14713_v29, %v14712_v30  ;;  %v14731_v29 = vsel %vm13367_vm0, %v11567_v1, 0.0  ;;  %v3398_v30 = vrot.slane %v462_v11, %v15254_v6  ;;  %v7140_v41 = vcombine.low %v7132_v31, %v7139_v32 }
 0x56f   :  { %v14716_v43 = vadd.f32 %v14715_v34, %v14714_v38  ;;  %v8387_v34 = vmul.f32 %v7123_v12, %v323_v9  ;;  %v8388_v59 = vmul.f32 %v7140_v41, %v324_v39  ;;  %v7159_v9 = vcombine.low %v3410_v52, %v3414_v55 }
 0x571   :  { %v14718_v49 = vadd.f32 %v14717_v42, %v14716_v43  ;;  %v7141_v42 = vcombine.low %v3386_v26, %v3390_v27  ;;  %v7142_v43 = vcombine.low %v3394_v28, %v3398_v30  ;;  %v11587_v46 = vcombine.high %v8387_v34, %v8387_v34 }
 0x572   :  { %v11594_v47 = vrot.slane %v8387_v34, %v15268_v20  ;;  %v11604_v12 = vcombine.high %v8388_v59, %v8388_v59  ;;  %v11611_v13 = vrot.slane %v8388_v59, %v15268_v20  ;;  %v7173_v27 = vrot.slane %v7159_v9, %v15268_v20 }
 0x573   :  { %v14720_v54 = vadd.f32 %v14719_v45, %v14718_v49  ;;  %v11586_v45 = vcombine.high %v11584_v35, %v11584_v35  ;;  %v7149_v56 = vrot.slane %v7141_v42, %v15268_v20  ;;  %v7156_v57 = vrot.slane %v7142_v43, %v15268_v20 }
 0x574   :  { %v11601_v60 = vrot.slane %v11587_v46, %v15268_v20  ;;  %v11602_v61 = vcombine.high %v11594_v47, %v11594_v47  ;;  %v14743_v1 = vsel %vm13367_vm0, %v11594_v47, 0.0  ;;  %v11618_v30 = vrot.slane %v11604_v12, %v15268_v20 }
 0x575   :  { %v14722_v63 = vadd.f32 %v14721_v53, %v14720_v54  ;;  %v14739_v53 = vsel %vm13367_vm0, %v11584_v35, 0.0  ;;  %v126_v54 = vld [vmem:[#allocation3 + $0x2b8] sm:$0xff]  ;;  %v14741_v62 = vsel %vm13367_vm0, %v11586_v45, 0.0  ;;  %v11619_v31 = vcombine.high %v11611_v13, %v11611_v13 }
 0x576   :  { %v325_v0 = vunpack.c.l.bf16 %v126_v54  ;;  %v11603_v11 = vcombine.high %v11601_v60, %v11601_v60  ;;  %v14745_v18 = vsel %vm13367_vm0, %v11602_v61, 0.0  ;;  %v326_v34 = vunpack.c.h.bf16 %v126_v54  ;;  %v464_v61 = vld [vmem:[#allocation5 + $0x2c8] sm:$0xff] }
 0x577   :  { %v14724_v8 = vadd.f32 %v14723_v58, %v14722_v63  ;;  %v14751_v35 = vsel %vm13367_vm0, %v11611_v13, 0.0  ;;  %v14753_v43 = vsel %vm13367_vm0, %v11619_v31, 0.0  ;;  %v3434_v45 = vrot.slane %v463_v3, %v15260_v14 }
 0x578   :  { %v14749_v32 = vsel %vm13367_vm0, %v11603_v11, 0.0  ;;  %v3438_v46 = vrot.slane %v463_v3, %v15262_v15  ;;  %v3442_v47 = vrot.slane %v463_v3, %v15264_v16  ;;  %v3450_v11 = vrot.slane %v464_v61, %v15248_v2 }
 0x579   :  { %v14726_v19 = vadd.f32 %v14725_v7, %v14724_v8  ;;  %v7157_v7 = vcombine.low %v7149_v56, %v7156_v57  ;;  %v7158_v8 = vcombine.low %v3402_v50, %v3406_v51  ;;  %v3446_v50 = vrot.slane %v463_v3, %v15266_v17 }
 0x57a   :  { %v3454_v12 = vrot.slane %v464_v61, %v15250_v4  ;;  %v3458_v13 = vrot.slane %v464_v61, %v15252_v5 }
 0x57b   :  { %v14728_v25 = vadd.f32 %v14727_v10, %v14726_v19  ;;  %v7166_v26 = vrot.slane %v7158_v8, %v15268_v20 }
 0x57d   :  { %v14730_v33 = vadd.f32 %v14729_v24, %v14728_v25  ;;  %v14747_v24 = vsel %vm13367_vm0, %v11601_v60, 0.0  ;;  %v3430_v25 = vrot.slane %v463_v3, %v15254_v6  ;;  %v7174_v36 = vcombine.low %v7166_v26, %v7173_v27 }
 0x57f   :  { %v14732_v38 = vadd.f32 %v14731_v29, %v14730_v33  ;;  %v8389_v29 = vmul.f32 %v7157_v7, %v325_v0  ;;  %v8390_v54 = vmul.f32 %v7174_v36, %v326_v34  ;;  %v7193_v0 = vcombine.low %v3442_v47, %v3446_v50 }
 0x581   :  { %v14734_v44 = vadd.f32 %v14733_v37, %v14732_v38  ;;  %v7175_v37 = vcombine.low %v3418_v21, %v3422_v22  ;;  %v7176_v38 = vcombine.low %v3426_v23, %v3430_v25  ;;  %v11621_v41 = vcombine.high %v8389_v29, %v8389_v29 }
 0x582   :  { %v11628_v42 = vrot.slane %v8389_v29, %v15268_v20  ;;  %v11638_v7 = vcombine.high %v8390_v54, %v8390_v54  ;;  %v11645_v8 = vrot.slane %v8390_v54, %v15268_v20  ;;  %v7207_v22 = vrot.slane %v7193_v0, %v15268_v20 }
 0x583   :  { %v14736_v49 = vadd.f32 %v14735_v40, %v14734_v44  ;;  %v11620_v40 = vcombine.high %v11618_v30, %v11618_v30  ;;  %v7183_v51 = vrot.slane %v7175_v37, %v15268_v20  ;;  %v7190_v52 = vrot.slane %v7176_v38, %v15268_v20 }
 0x584   :  { %v11635_v55 = vrot.slane %v11621_v41, %v15268_v20  ;;  %v11636_v56 = vcombine.high %v11628_v42, %v11628_v42  ;;  %v14759_v60 = vsel %vm13367_vm0, %v11628_v42, 0.0  ;;  %v11652_v25 = vrot.slane %v11638_v7, %v15268_v20 }
 0x585   :  { %v14738_v58 = vadd.f32 %v14737_v48, %v14736_v49  ;;  %v14755_v48 = vsel %vm13367_vm0, %v11618_v30, 0.0  ;;  %v127_v49 = vld [vmem:[#allocation3 + $0x2c0] sm:$0xff]  ;;  %v14757_v57 = vsel %vm13367_vm0, %v11620_v40, 0.0  ;;  %v11653_v26 = vcombine.high %v11645_v8, %v11645_v8 }
 0x586   :  { %v327_v59 = vunpack.c.l.bf16 %v127_v49  ;;  %v11637_v3 = vcombine.high %v11635_v55, %v11635_v55  ;;  %v14761_v9 = vsel %vm13367_vm0, %v11636_v56, 0.0  ;;  %v328_v29 = vunpack.c.h.bf16 %v127_v49  ;;  %v465_v56 = vld [vmem:[#allocation5 + $0x2d0] sm:$0xff] }
 0x587   :  { %v14740_v63 = vadd.f32 %v14739_v53, %v14738_v58  ;;  %v14767_v30 = vsel %vm13367_vm0, %v11645_v8, 0.0  ;;  %v14769_v38 = vsel %vm13367_vm0, %v11653_v26, 0.0  ;;  %v3466_v40 = vrot.slane %v464_v61, %v15260_v14 }
 0x588   :  { %v14765_v27 = vsel %vm13367_vm0, %v11637_v3, 0.0  ;;  %v3470_v41 = vrot.slane %v464_v61, %v15262_v15  ;;  %v3474_v42 = vrot.slane %v464_v61, %v15264_v16  ;;  %v3482_v3 = vrot.slane %v465_v56, %v15248_v2 }
 0x589   :  { %v14742_v10 = vadd.f32 %v14741_v62, %v14740_v63  ;;  %v7191_v62 = vcombine.low %v7183_v51, %v7190_v52  ;;  %v7192_v63 = vcombine.low %v3434_v45, %v3438_v46  ;;  %v3478_v45 = vrot.slane %v464_v61, %v15266_v17 }
 0x58a   :  { %v3486_v7 = vrot.slane %v465_v56, %v15250_v4  ;;  %v3490_v8 = vrot.slane %v465_v56, %v15252_v5 }
 0x58b   :  { %v14744_v19 = vadd.f32 %v14743_v1, %v14742_v10  ;;  %v7200_v21 = vrot.slane %v7192_v63, %v15268_v20 }
 0x58d   :  { %v14746_v28 = vadd.f32 %v14745_v18, %v14744_v19  ;;  %v14763_v18 = vsel %vm13367_vm0, %v11635_v55, 0.0  ;;  %v3462_v19 = vrot.slane %v464_v61, %v15254_v6  ;;  %v7208_v31 = vcombine.low %v7200_v21, %v7207_v22 }
 0x58f   :  { %v14748_v33 = vadd.f32 %v14747_v24, %v14746_v28  ;;  %v8391_v24 = vmul.f32 %v7191_v62, %v327_v59  ;;  %v8392_v49 = vmul.f32 %v7208_v31, %v328_v29  ;;  %v7227_v59 = vcombine.low %v3474_v42, %v3478_v45 }
 0x591   :  { %v14750_v39 = vadd.f32 %v14749_v32, %v14748_v33  ;;  %v7209_v32 = vcombine.low %v3450_v11, %v3454_v12  ;;  %v7210_v33 = vcombine.low %v3458_v13, %v3462_v19  ;;  %v11655_v36 = vcombine.high %v8391_v24, %v8391_v24 }
 0x592   :  { %v11662_v37 = vrot.slane %v8391_v24, %v15268_v20  ;;  %v11672_v62 = vcombine.high %v8392_v49, %v8392_v49  ;;  %v11679_v63 = vrot.slane %v8392_v49, %v15268_v20  ;;  %v7241_v12 = vrot.slane %v7227_v59, %v15268_v20 }
 0x593   :  { %v14752_v44 = vadd.f32 %v14751_v35, %v14750_v39  ;;  %v11654_v35 = vcombine.high %v11652_v25, %v11652_v25  ;;  %v7217_v46 = vrot.slane %v7209_v32, %v15268_v20  ;;  %v7224_v47 = vrot.slane %v7210_v33, %v15268_v20 }
 0x594   :  { %v11669_v50 = vrot.slane %v11655_v36, %v15268_v20  ;;  %v11670_v51 = vcombine.high %v11662_v37, %v11662_v37  ;;  %v14775_v55 = vsel %vm13367_vm0, %v11662_v37, 0.0  ;;  %v11686_v19 = vrot.slane %v11672_v62, %v15268_v20 }
 0x595   :  { %v14754_v53 = vadd.f32 %v14753_v43, %v14752_v44  ;;  %v14771_v43 = vsel %vm13367_vm0, %v11652_v25, 0.0  ;;  %v128_v44 = vld [vmem:[#allocation3 + $0x2c8] sm:$0xff]  ;;  %v14773_v52 = vsel %vm13367_vm0, %v11654_v35, 0.0  ;;  %v11687_v21 = vcombine.high %v11679_v63, %v11679_v63 }
 0x596   :  { %v329_v54 = vunpack.c.l.bf16 %v128_v44  ;;  %v11671_v61 = vcombine.high %v11669_v50, %v11669_v50  ;;  %v14777_v0 = vsel %vm13367_vm0, %v11670_v51, 0.0  ;;  %v330_v24 = vunpack.c.h.bf16 %v128_v44  ;;  %v466_v51 = vld [vmem:[#allocation5 + $0x2d8] sm:$0xff] }
 0x597   :  { %v14756_v58 = vadd.f32 %v14755_v48, %v14754_v53  ;;  %v14783_v25 = vsel %vm13367_vm0, %v11679_v63, 0.0  ;;  %v14785_v33 = vsel %vm13367_vm0, %v11687_v21, 0.0  ;;  %v3498_v35 = vrot.slane %v465_v56, %v15260_v14 }
 0x598   :  { %v14781_v22 = vsel %vm13367_vm0, %v11671_v61, 0.0  ;;  %v3502_v36 = vrot.slane %v465_v56, %v15262_v15  ;;  %v3506_v37 = vrot.slane %v465_v56, %v15264_v16  ;;  %v3514_v61 = vrot.slane %v466_v51, %v15248_v2 }
 0x599   :  { %v14758_v1 = vadd.f32 %v14757_v57, %v14756_v58  ;;  %v7225_v57 = vcombine.low %v7217_v46, %v7224_v47  ;;  %v7226_v58 = vcombine.low %v3466_v40, %v3470_v41  ;;  %v3510_v40 = vrot.slane %v465_v56, %v15266_v17 }
 0x59a   :  { %v3518_v62 = vrot.slane %v466_v51, %v15250_v4  ;;  %v3522_v63 = vrot.slane %v466_v51, %v15252_v5 }
 0x59b   :  { %v14760_v10 = vadd.f32 %v14759_v60, %v14758_v1  ;;  %v7234_v11 = vrot.slane %v7226_v58, %v15268_v20 }
 0x59d   :  { %v14762_v23 = vadd.f32 %v14761_v9, %v14760_v10  ;;  %v14779_v9 = vsel %vm13367_vm0, %v11669_v50, 0.0  ;;  %v3494_v10 = vrot.slane %v465_v56, %v15254_v6  ;;  %v7242_v26 = vcombine.low %v7234_v11, %v7241_v12 }
 0x59f   :  { %v14764_v28 = vadd.f32 %v14763_v18, %v14762_v23  ;;  %v8393_v18 = vmul.f32 %v7225_v57, %v329_v54  ;;  %v8394_v44 = vmul.f32 %v7242_v26, %v330_v24  ;;  %v7261_v54 = vcombine.low %v3506_v37, %v3510_v40 }
 0x5a1   :  { %v14766_v34 = vadd.f32 %v14765_v27, %v14764_v28  ;;  %v7243_v27 = vcombine.low %v3482_v3, %v3486_v7  ;;  %v7244_v28 = vcombine.low %v3490_v8, %v3494_v10  ;;  %v11689_v31 = vcombine.high %v8393_v18, %v8393_v18 }
 0x5a2   :  { %v11696_v32 = vrot.slane %v8393_v18, %v15268_v20  ;;  %v11706_v57 = vcombine.high %v8394_v44, %v8394_v44  ;;  %v11713_v58 = vrot.slane %v8394_v44, %v15268_v20  ;;  %v7275_v7 = vrot.slane %v7261_v54, %v15268_v20 }
 0x5a3   :  { %v14768_v39 = vadd.f32 %v14767_v30, %v14766_v34  ;;  %v11688_v30 = vcombine.high %v11686_v19, %v11686_v19  ;;  %v7251_v41 = vrot.slane %v7243_v27, %v15268_v20  ;;  %v7258_v42 = vrot.slane %v7244_v28, %v15268_v20 }
 0x5a4   :  { %v11703_v45 = vrot.slane %v11689_v31, %v15268_v20  ;;  %v11704_v46 = vcombine.high %v11696_v32, %v11696_v32  ;;  %v14791_v50 = vsel %vm13367_vm0, %v11696_v32, 0.0  ;;  %v11720_v10 = vrot.slane %v11706_v57, %v15268_v20 }
 0x5a5   :  { %v14770_v48 = vadd.f32 %v14769_v38, %v14768_v39  ;;  %v14787_v38 = vsel %vm13367_vm0, %v11686_v19, 0.0  ;;  %v129_v39 = vld [vmem:[#allocation3 + $0x2d0] sm:$0xff]  ;;  %v14789_v47 = vsel %vm13367_vm0, %v11688_v30, 0.0  ;;  %v11721_v11 = vcombine.high %v11713_v58, %v11713_v58 }
 0x5a6   :  { %v331_v49 = vunpack.c.l.bf16 %v129_v39  ;;  %v11705_v56 = vcombine.high %v11703_v45, %v11703_v45  ;;  %v14793_v59 = vsel %vm13367_vm0, %v11704_v46, 0.0  ;;  %v332_v18 = vunpack.c.h.bf16 %v129_v39  ;;  %v467_v46 = vld [vmem:[#allocation5 + $0x2e0] sm:$0xff] }
 0x5a7   :  { %v14772_v53 = vadd.f32 %v14771_v43, %v14770_v48  ;;  %v14799_v19 = vsel %vm13367_vm0, %v11713_v58, 0.0  ;;  %v14801_v28 = vsel %vm13367_vm0, %v11721_v11, 0.0  ;;  %v3530_v30 = vrot.slane %v466_v51, %v15260_v14 }
 0x5a8   :  { %v14797_v12 = vsel %vm13367_vm0, %v11705_v56, 0.0  ;;  %v3534_v31 = vrot.slane %v466_v51, %v15262_v15  ;;  %v3538_v32 = vrot.slane %v466_v51, %v15264_v16  ;;  %v3546_v56 = vrot.slane %v467_v46, %v15248_v2 }
 0x5a9   :  { %v14774_v60 = vadd.f32 %v14773_v52, %v14772_v53  ;;  %v7259_v52 = vcombine.low %v7251_v41, %v7258_v42  ;;  %v7260_v53 = vcombine.low %v3498_v35, %v3502_v36  ;;  %v3542_v35 = vrot.slane %v466_v51, %v15266_v17 }
 0x5aa   :  { %v3550_v57 = vrot.slane %v467_v46, %v15250_v4  ;;  %v3554_v58 = vrot.slane %v467_v46, %v15252_v5 }
 0x5ab   :  { %v14776_v1 = vadd.f32 %v14775_v55, %v14774_v60  ;;  %v7268_v3 = vrot.slane %v7260_v53, %v15268_v20 }
 0x5ad   :  { %v14778_v13 = vadd.f32 %v14777_v0, %v14776_v1  ;;  %v14795_v0 = vsel %vm13367_vm0, %v11703_v45, 0.0  ;;  %v3526_v1 = vrot.slane %v466_v51, %v15254_v6  ;;  %v7276_v21 = vcombine.low %v7268_v3, %v7275_v7 }
 0x5af   :  { %v14780_v23 = vadd.f32 %v14779_v9, %v14778_v13  ;;  %v8395_v9 = vmul.f32 %v7259_v52, %v331_v49  ;;  %v8396_v39 = vmul.f32 %v7276_v21, %v332_v18  ;;  %v7295_v49 = vcombine.low %v3538_v32, %v3542_v35 }
 0x5b1   :  { %v14782_v29 = vadd.f32 %v14781_v22, %v14780_v23  ;;  %v7277_v22 = vcombine.low %v3514_v61, %v3518_v62  ;;  %v7278_v23 = vcombine.low %v3522_v63, %v3526_v1  ;;  %v11723_v26 = vcombine.high %v8395_v9, %v8395_v9 }
 0x5b2   :  { %v11730_v27 = vrot.slane %v8395_v9, %v15268_v20  ;;  %v11740_v52 = vcombine.high %v8396_v39, %v8396_v39  ;;  %v11747_v53 = vrot.slane %v8396_v39, %v15268_v20  ;;  %v7309_v62 = vrot.slane %v7295_v49, %v15268_v20 }
 0x5b3   :  { %v14784_v34 = vadd.f32 %v14783_v25, %v14782_v29  ;;  %v11722_v25 = vcombine.high %v11720_v10, %v11720_v10  ;;  %v7285_v36 = vrot.slane %v7277_v22, %v15268_v20  ;;  %v7292_v37 = vrot.slane %v7278_v23, %v15268_v20 }
 0x5b4   :  { %v11737_v40 = vrot.slane %v11723_v26, %v15268_v20  ;;  %v11738_v41 = vcombine.high %v11730_v27, %v11730_v27  ;;  %v14807_v45 = vsel %vm13367_vm0, %v11730_v27, 0.0  ;;  %v11754_v1 = vrot.slane %v11740_v52, %v15268_v20 }
 0x5b5   :  { %v14786_v43 = vadd.f32 %v14785_v33, %v14784_v34  ;;  %v14803_v33 = vsel %vm13367_vm0, %v11720_v10, 0.0  ;;  %v130_v34 = vld [vmem:[#allocation3 + $0x2d8] sm:$0xff]  ;;  %v14805_v42 = vsel %vm13367_vm0, %v11722_v25, 0.0  ;;  %v11755_v3 = vcombine.high %v11747_v53, %v11747_v53 }
 0x5b6   :  { %v333_v44 = vunpack.c.l.bf16 %v130_v34  ;;  %v11739_v51 = vcombine.high %v11737_v40, %v11737_v40  ;;  %v14809_v54 = vsel %vm13367_vm0, %v11738_v41, 0.0  ;;  %v334_v9 = vunpack.c.h.bf16 %v130_v34  ;;  %v468_v41 = vld [vmem:[#allocation5 + $0x2e8] sm:$0xff] }
 0x5b7   :  { %v14788_v48 = vadd.f32 %v14787_v38, %v14786_v43  ;;  %v14815_v10 = vsel %vm13367_vm0, %v11747_v53, 0.0  ;;  %v14817_v23 = vsel %vm13367_vm0, %v11755_v3, 0.0  ;;  %v3562_v25 = vrot.slane %v467_v46, %v15260_v14 }
 0x5b8   :  { %v14813_v7 = vsel %vm13367_vm0, %v11739_v51, 0.0  ;;  %v3566_v26 = vrot.slane %v467_v46, %v15262_v15  ;;  %v3570_v27 = vrot.slane %v467_v46, %v15264_v16  ;;  %v3578_v51 = vrot.slane %v468_v41, %v15248_v2 }
 0x5b9   :  { %v14790_v55 = vadd.f32 %v14789_v47, %v14788_v48  ;;  %v7293_v47 = vcombine.low %v7285_v36, %v7292_v37  ;;  %v7294_v48 = vcombine.low %v3530_v30, %v3534_v31  ;;  %v3574_v30 = vrot.slane %v467_v46, %v15266_v17 }
 0x5ba   :  { %v3582_v52 = vrot.slane %v468_v41, %v15250_v4  ;;  %v3586_v53 = vrot.slane %v468_v41, %v15252_v5 }
 0x5bb   :  { %v14792_v60 = vadd.f32 %v14791_v50, %v14790_v55  ;;  %v7302_v61 = vrot.slane %v7294_v48, %v15268_v20 }
 0x5bd   :  { %v14794_v8 = vadd.f32 %v14793_v59, %v14792_v60  ;;  %v14811_v59 = vsel %vm13367_vm0, %v11737_v40, 0.0  ;;  %v3558_v60 = vrot.slane %v467_v46, %v15254_v6  ;;  %v7310_v11 = vcombine.low %v7302_v61, %v7309_v62 }
 0x5bf   :  { %v14796_v13 = vadd.f32 %v14795_v0, %v14794_v8  ;;  %v8397_v0 = vmul.f32 %v7293_v47, %v333_v44  ;;  %v8398_v34 = vmul.f32 %v7310_v11, %v334_v9  ;;  %v7329_v44 = vcombine.low %v3570_v27, %v3574_v30 }
 0x5c1   :  { %v14798_v24 = vadd.f32 %v14797_v12, %v14796_v13  ;;  %v7311_v12 = vcombine.low %v3546_v56, %v3550_v57  ;;  %v7312_v13 = vcombine.low %v3554_v58, %v3558_v60  ;;  %v11757_v21 = vcombine.high %v8397_v0, %v8397_v0 }
 0x5c2   :  { %v11764_v22 = vrot.slane %v8397_v0, %v15268_v20  ;;  %v11774_v47 = vcombine.high %v8398_v34, %v8398_v34  ;;  %v11781_v48 = vrot.slane %v8398_v34, %v15268_v20  ;;  %v7343_v57 = vrot.slane %v7329_v44, %v15268_v20 }
 0x5c3   :  { %v14800_v29 = vadd.f32 %v14799_v19, %v14798_v24  ;;  %v11756_v19 = vcombine.high %v11754_v1, %v11754_v1  ;;  %v7319_v31 = vrot.slane %v7311_v12, %v15268_v20  ;;  %v7326_v32 = vrot.slane %v7312_v13, %v15268_v20 }
 0x5c4   :  { %v11771_v35 = vrot.slane %v11757_v21, %v15268_v20  ;;  %v11772_v36 = vcombine.high %v11764_v22, %v11764_v22  ;;  %v14823_v40 = vsel %vm13367_vm0, %v11764_v22, 0.0  ;;  %v11788_v60 = vrot.slane %v11774_v47, %v15268_v20 }
 0x5c5   :  { %v14802_v38 = vadd.f32 %v14801_v28, %v14800_v29  ;;  %v14819_v28 = vsel %vm13367_vm0, %v11754_v1, 0.0  ;;  %v131_v29 = vld [vmem:[#allocation3 + $0x2e0] sm:$0xff]  ;;  %v14821_v37 = vsel %vm13367_vm0, %v11756_v19, 0.0  ;;  %v11789_v61 = vcombine.high %v11781_v48, %v11781_v48 }
 0x5c6   :  { %v335_v39 = vunpack.c.l.bf16 %v131_v29  ;;  %v11773_v46 = vcombine.high %v11771_v35, %v11771_v35  ;;  %v14825_v49 = vsel %vm13367_vm0, %v11772_v36, 0.0  ;;  %v336_v0 = vunpack.c.h.bf16 %v131_v29  ;;  %v469_v36 = vld [vmem:[#allocation5 + $0x2f0] sm:$0xff] }
 0x5c7   :  { %v14804_v43 = vadd.f32 %v14803_v33, %v14802_v38  ;;  %v14831_v1 = vsel %vm13367_vm0, %v11781_v48, 0.0  ;;  %v14833_v13 = vsel %vm13367_vm0, %v11789_v61, 0.0  ;;  %v3594_v19 = vrot.slane %v468_v41, %v15260_v14 }
 0x5c8   :  { %v14829_v62 = vsel %vm13367_vm0, %v11773_v46, 0.0  ;;  %v3598_v21 = vrot.slane %v468_v41, %v15262_v15  ;;  %v3602_v22 = vrot.slane %v468_v41, %v15264_v16  ;;  %v3610_v46 = vrot.slane %v469_v36, %v15248_v2 }
 0x5c9   :  { %v14806_v50 = vadd.f32 %v14805_v42, %v14804_v43  ;;  %v7327_v42 = vcombine.low %v7319_v31, %v7326_v32  ;;  %v7328_v43 = vcombine.low %v3562_v25, %v3566_v26  ;;  %v3606_v25 = vrot.slane %v468_v41, %v15266_v17 }
 0x5ca   :  { %v3614_v47 = vrot.slane %v469_v36, %v15250_v4  ;;  %v3618_v48 = vrot.slane %v469_v36, %v15252_v5 }
 0x5cb   :  { %v14808_v55 = vadd.f32 %v14807_v45, %v14806_v50  ;;  %v7336_v56 = vrot.slane %v7328_v43, %v15268_v20 }
 0x5cd   :  { %v14810_v63 = vadd.f32 %v14809_v54, %v14808_v55  ;;  %v14827_v54 = vsel %vm13367_vm0, %v11771_v35, 0.0  ;;  %v3590_v55 = vrot.slane %v468_v41, %v15254_v6  ;;  %v7344_v3 = vcombine.low %v7336_v56, %v7343_v57 }
 0x5cf   :  { %v14812_v8 = vadd.f32 %v14811_v59, %v14810_v63  ;;  %v8399_v59 = vmul.f32 %v7327_v42, %v335_v39  ;;  %v8400_v29 = vmul.f32 %v7344_v3, %v336_v0  ;;  %v7363_v39 = vcombine.low %v3602_v22, %v3606_v25 }
 0x5d1   :  { %v14814_v18 = vadd.f32 %v14813_v7, %v14812_v8  ;;  %v7345_v7 = vcombine.low %v3578_v51, %v3582_v52  ;;  %v7346_v8 = vcombine.low %v3586_v53, %v3590_v55  ;;  %v11791_v11 = vcombine.high %v8399_v59, %v8399_v59 }
 0x5d2   :  { %v11798_v12 = vrot.slane %v8399_v59, %v15268_v20  ;;  %v11808_v42 = vcombine.high %v8400_v29, %v8400_v29  ;;  %v11815_v43 = vrot.slane %v8400_v29, %v15268_v20  ;;  %v7377_v52 = vrot.slane %v7363_v39, %v15268_v20 }
 0x5d3   :  { %v14816_v24 = vadd.f32 %v14815_v10, %v14814_v18  ;;  %v11790_v10 = vcombine.high %v11788_v60, %v11788_v60  ;;  %v7353_v26 = vrot.slane %v7345_v7, %v15268_v20  ;;  %v7360_v27 = vrot.slane %v7346_v8, %v15268_v20 }
 0x5d4   :  { %v11805_v30 = vrot.slane %v11791_v11, %v15268_v20  ;;  %v11806_v31 = vcombine.high %v11798_v12, %v11798_v12  ;;  %v14839_v35 = vsel %vm13367_vm0, %v11798_v12, 0.0  ;;  %v11822_v55 = vrot.slane %v11808_v42, %v15268_v20 }
 0x5d5   :  { %v14818_v33 = vadd.f32 %v14817_v23, %v14816_v24  ;;  %v14835_v23 = vsel %vm13367_vm0, %v11788_v60, 0.0  ;;  %v132_v24 = vld [vmem:[#allocation3 + $0x2e8] sm:$0xff]  ;;  %v14837_v32 = vsel %vm13367_vm0, %v11790_v10, 0.0  ;;  %v11823_v56 = vcombine.high %v11815_v43, %v11815_v43 }
 0x5d6   :  { %v337_v34 = vunpack.c.l.bf16 %v132_v24  ;;  %v11807_v41 = vcombine.high %v11805_v30, %v11805_v30  ;;  %v14841_v44 = vsel %vm13367_vm0, %v11806_v31, 0.0  ;;  %v338_v59 = vunpack.c.h.bf16 %v132_v24  ;;  %v470_v31 = vld [vmem:[#allocation5 + $0x2f8] sm:$0xff] }
 0x5d7   :  { %v14820_v38 = vadd.f32 %v14819_v28, %v14818_v33  ;;  %v14847_v60 = vsel %vm13367_vm0, %v11815_v43, 0.0  ;;  %v14849_v8 = vsel %vm13367_vm0, %v11823_v56, 0.0  ;;  %v3626_v10 = vrot.slane %v469_v36, %v15260_v14 }
 0x5d8   :  { %v14845_v57 = vsel %vm13367_vm0, %v11807_v41, 0.0  ;;  %v3630_v11 = vrot.slane %v469_v36, %v15262_v15  ;;  %v3634_v12 = vrot.slane %v469_v36, %v15264_v16  ;;  %v3642_v41 = vrot.slane %v470_v31, %v15248_v2 }
 0x5d9   :  { %v14822_v45 = vadd.f32 %v14821_v37, %v14820_v38  ;;  %v7361_v37 = vcombine.low %v7353_v26, %v7360_v27  ;;  %v7362_v38 = vcombine.low %v3594_v19, %v3598_v21  ;;  %v3638_v19 = vrot.slane %v469_v36, %v15266_v17 }
 0x5da   :  { %v3646_v42 = vrot.slane %v470_v31, %v15250_v4  ;;  %v3650_v43 = vrot.slane %v470_v31, %v15252_v5 }
 0x5db   :  { %v14824_v50 = vadd.f32 %v14823_v40, %v14822_v45  ;;  %v7370_v51 = vrot.slane %v7362_v38, %v15268_v20 }
 0x5dd   :  { %v14826_v58 = vadd.f32 %v14825_v49, %v14824_v50  ;;  %v14843_v49 = vsel %vm13367_vm0, %v11805_v30, 0.0  ;;  %v3622_v50 = vrot.slane %v469_v36, %v15254_v6  ;;  %v7378_v61 = vcombine.low %v7370_v51, %v7377_v52 }
 0x5df   :  { %v14828_v63 = vadd.f32 %v14827_v54, %v14826_v58  ;;  %v8401_v54 = vmul.f32 %v7361_v37, %v337_v34  ;;  %v8402_v24 = vmul.f32 %v7378_v61, %v338_v59  ;;  %v7397_v34 = vcombine.low %v3634_v12, %v3638_v19 }
 0x5e1   :  { %v14830_v9 = vadd.f32 %v14829_v62, %v14828_v63  ;;  %v7379_v62 = vcombine.low %v3610_v46, %v3614_v47  ;;  %v7380_v63 = vcombine.low %v3618_v48, %v3622_v50  ;;  %v11825_v3 = vcombine.high %v8401_v54, %v8401_v54 }
 0x5e2   :  { %v11832_v7 = vrot.slane %v8401_v54, %v15268_v20  ;;  %v11842_v37 = vcombine.high %v8402_v24, %v8402_v24  ;;  %v11849_v38 = vrot.slane %v8402_v24, %v15268_v20  ;;  %v7411_v47 = vrot.slane %v7397_v34, %v15268_v20 }
 0x5e3   :  { %v14832_v18 = vadd.f32 %v14831_v1, %v14830_v9  ;;  %v11824_v1 = vcombine.high %v11822_v55, %v11822_v55  ;;  %v7387_v21 = vrot.slane %v7379_v62, %v15268_v20  ;;  %v7394_v22 = vrot.slane %v7380_v63, %v15268_v20 }
 0x5e4   :  { %v11839_v25 = vrot.slane %v11825_v3, %v15268_v20  ;;  %v11840_v26 = vcombine.high %v11832_v7, %v11832_v7  ;;  %v14855_v30 = vsel %vm13367_vm0, %v11832_v7, 0.0  ;;  %v11856_v50 = vrot.slane %v11842_v37, %v15268_v20 }
 0x5e5   :  { %v14834_v28 = vadd.f32 %v14833_v13, %v14832_v18  ;;  %v14851_v13 = vsel %vm13367_vm0, %v11822_v55, 0.0  ;;  %v133_v18 = vld [vmem:[#allocation3 + $0x2f0] sm:$0xff]  ;;  %v14853_v27 = vsel %vm13367_vm0, %v11824_v1, 0.0  ;;  %v11857_v51 = vcombine.high %v11849_v38, %v11849_v38 }
 0x5e6   :  { %v339_v29 = vunpack.c.l.bf16 %v133_v18  ;;  %v11841_v36 = vcombine.high %v11839_v25, %v11839_v25  ;;  %v14857_v39 = vsel %vm13367_vm0, %v11840_v26, 0.0  ;;  %v340_v54 = vunpack.c.h.bf16 %v133_v18  ;;  %v471_v26 = vld [vmem:[#allocation5 + $0x300] sm:$0xff] }
 0x5e7   :  { %v14836_v33 = vadd.f32 %v14835_v23, %v14834_v28  ;;  %v14863_v55 = vsel %vm13367_vm0, %v11849_v38, 0.0  ;;  %v14865_v63 = vsel %vm13367_vm0, %v11857_v51, 0.0  ;;  %v3658_v1 = vrot.slane %v470_v31, %v15260_v14 }
 0x5e8   :  { %v14861_v52 = vsel %vm13367_vm0, %v11841_v36, 0.0  ;;  %v3662_v3 = vrot.slane %v470_v31, %v15262_v15  ;;  %v3666_v7 = vrot.slane %v470_v31, %v15264_v16  ;;  %v3674_v36 = vrot.slane %v471_v26, %v15248_v2 }
 0x5e9   :  { %v14838_v40 = vadd.f32 %v14837_v32, %v14836_v33  ;;  %v7395_v32 = vcombine.low %v7387_v21, %v7394_v22  ;;  %v7396_v33 = vcombine.low %v3626_v10, %v3630_v11  ;;  %v3670_v10 = vrot.slane %v470_v31, %v15266_v17 }
 0x5ea   :  { %v3678_v37 = vrot.slane %v471_v26, %v15250_v4  ;;  %v3682_v38 = vrot.slane %v471_v26, %v15252_v5 }
 0x5eb   :  { %v14840_v45 = vadd.f32 %v14839_v35, %v14838_v40  ;;  %v7404_v46 = vrot.slane %v7396_v33, %v15268_v20 }
 0x5ed   :  { %v14842_v53 = vadd.f32 %v14841_v44, %v14840_v45  ;;  %v14859_v44 = vsel %vm13367_vm0, %v11839_v25, 0.0  ;;  %v3654_v45 = vrot.slane %v470_v31, %v15254_v6  ;;  %v7412_v56 = vcombine.low %v7404_v46, %v7411_v47 }
 0x5ef   :  { %v14844_v58 = vadd.f32 %v14843_v49, %v14842_v53  ;;  %v8403_v49 = vmul.f32 %v7395_v32, %v339_v29  ;;  %v8404_v18 = vmul.f32 %v7412_v56, %v340_v54  ;;  %v7431_v29 = vcombine.low %v3666_v7, %v3670_v10 }
 0x5f1   :  { %v14846_v0 = vadd.f32 %v14845_v57, %v14844_v58  ;;  %v7413_v57 = vcombine.low %v3642_v41, %v3646_v42  ;;  %v7414_v58 = vcombine.low %v3650_v43, %v3654_v45  ;;  %v11859_v61 = vcombine.high %v8403_v49, %v8403_v49 }
 0x5f2   :  { %v11866_v62 = vrot.slane %v8403_v49, %v15268_v20  ;;  %v11876_v32 = vcombine.high %v8404_v18, %v8404_v18  ;;  %v11883_v33 = vrot.slane %v8404_v18, %v15268_v20  ;;  %v7445_v42 = vrot.slane %v7431_v29, %v15268_v20 }
 0x5f3   :  { %v14848_v9 = vadd.f32 %v14847_v60, %v14846_v0  ;;  %v11858_v60 = vcombine.high %v11856_v50, %v11856_v50  ;;  %v7421_v11 = vrot.slane %v7413_v57, %v15268_v20  ;;  %v7428_v12 = vrot.slane %v7414_v58, %v15268_v20 }
 0x5f4   :  { %v11873_v19 = vrot.slane %v11859_v61, %v15268_v20  ;;  %v11874_v21 = vcombine.high %v11866_v62, %v11866_v62  ;;  %v14871_v25 = vsel %vm13367_vm0, %v11866_v62, 0.0  ;;  %v11890_v45 = vrot.slane %v11876_v32, %v15268_v20 }
 0x5f5   :  { %v14850_v23 = vadd.f32 %v14849_v8, %v14848_v9  ;;  %v14867_v8 = vsel %vm13367_vm0, %v11856_v50, 0.0  ;;  %v134_v9 = vld [vmem:[#allocation3 + $0x2f8] sm:$0xff]  ;;  %v14869_v22 = vsel %vm13367_vm0, %v11858_v60, 0.0  ;;  %v11891_v46 = vcombine.high %v11883_v33, %v11883_v33 }
 0x5f6   :  { %v341_v24 = vunpack.c.l.bf16 %v134_v9  ;;  %v11875_v31 = vcombine.high %v11873_v19, %v11873_v19  ;;  %v14873_v34 = vsel %vm13367_vm0, %v11874_v21, 0.0  ;;  %v342_v49 = vunpack.c.h.bf16 %v134_v9  ;;  %v472_v21 = vld [vmem:[#allocation5 + $0x308] sm:$0xff] }
 0x5f7   :  { %v14852_v28 = vadd.f32 %v14851_v13, %v14850_v23  ;;  %v14879_v50 = vsel %vm13367_vm0, %v11883_v33, 0.0  ;;  %v14881_v58 = vsel %vm13367_vm0, %v11891_v46, 0.0  ;;  %v3690_v60 = vrot.slane %v471_v26, %v15260_v14 }
 0x5f8   :  { %v14877_v47 = vsel %vm13367_vm0, %v11875_v31, 0.0  ;;  %v3694_v61 = vrot.slane %v471_v26, %v15262_v15  ;;  %v3698_v62 = vrot.slane %v471_v26, %v15264_v16  ;;  %v3706_v31 = vrot.slane %v472_v21, %v15248_v2 }
 0x5f9   :  { %v14854_v35 = vadd.f32 %v14853_v27, %v14852_v28  ;;  %v7429_v27 = vcombine.low %v7421_v11, %v7428_v12  ;;  %v7430_v28 = vcombine.low %v3658_v1, %v3662_v3  ;;  %v3702_v1 = vrot.slane %v471_v26, %v15266_v17 }
 0x5fa   :  { %v3710_v32 = vrot.slane %v472_v21, %v15250_v4  ;;  %v3714_v33 = vrot.slane %v472_v21, %v15252_v5 }
 0x5fb   :  { %v14856_v40 = vadd.f32 %v14855_v30, %v14854_v35  ;;  %v7438_v41 = vrot.slane %v7430_v28, %v15268_v20 }
 0x5fd   :  { %v14858_v48 = vadd.f32 %v14857_v39, %v14856_v40  ;;  %v14875_v39 = vsel %vm13367_vm0, %v11873_v19, 0.0  ;;  %v3686_v40 = vrot.slane %v471_v26, %v15254_v6  ;;  %v7446_v51 = vcombine.low %v7438_v41, %v7445_v42 }
 0x5ff   :  { %v14860_v53 = vadd.f32 %v14859_v44, %v14858_v48  ;;  %v8405_v44 = vmul.f32 %v7429_v27, %v341_v24  ;;  %v8406_v9 = vmul.f32 %v7446_v51, %v342_v49  ;;  %v7465_v24 = vcombine.low %v3698_v62, %v3702_v1 }
 0x601   :  { %v14862_v59 = vadd.f32 %v14861_v52, %v14860_v53  ;;  %v7447_v52 = vcombine.low %v3674_v36, %v3678_v37  ;;  %v7448_v53 = vcombine.low %v3682_v38, %v3686_v40  ;;  %v11893_v56 = vcombine.high %v8405_v44, %v8405_v44 }
 0x602   :  { %v11900_v57 = vrot.slane %v8405_v44, %v15268_v20  ;;  %v11910_v27 = vcombine.high %v8406_v9, %v8406_v9  ;;  %v11917_v28 = vrot.slane %v8406_v9, %v15268_v20  ;;  %v7479_v37 = vrot.slane %v7465_v24, %v15268_v20 }
 0x603   :  { %v14864_v0 = vadd.f32 %v14863_v55, %v14862_v59  ;;  %v11892_v55 = vcombine.high %v11890_v45, %v11890_v45  ;;  %v7455_v3 = vrot.slane %v7447_v52, %v15268_v20  ;;  %v7462_v7 = vrot.slane %v7448_v53, %v15268_v20 }
 0x604   :  { %v11907_v10 = vrot.slane %v11893_v56, %v15268_v20  ;;  %v11908_v11 = vcombine.high %v11900_v57, %v11900_v57  ;;  %v14887_v19 = vsel %vm13367_vm0, %v11900_v57, 0.0  ;;  %v11924_v40 = vrot.slane %v11910_v27, %v15268_v20 }
 0x605   :  { %v14866_v13 = vadd.f32 %v14865_v63, %v14864_v0  ;;  %v14883_v63 = vsel %vm13367_vm0, %v11890_v45, 0.0  ;;  %v135_v0 = vld [vmem:[#allocation3 + $0x300] sm:$0xff]  ;;  %v14885_v12 = vsel %vm13367_vm0, %v11892_v55, 0.0  ;;  %v11925_v41 = vcombine.high %v11917_v28, %v11917_v28 }
 0x606   :  { %v343_v18 = vunpack.c.l.bf16 %v135_v0  ;;  %v11909_v26 = vcombine.high %v11907_v10, %v11907_v10  ;;  %v14889_v29 = vsel %vm13367_vm0, %v11908_v11, 0.0  ;;  %v344_v44 = vunpack.c.h.bf16 %v135_v0  ;;  %v473_v11 = vld [vmem:[#allocation5 + $0x310] sm:$0xff] }
 0x607   :  { %v14868_v23 = vadd.f32 %v14867_v8, %v14866_v13  ;;  %v14895_v45 = vsel %vm13367_vm0, %v11917_v28, 0.0  ;;  %v14897_v53 = vsel %vm13367_vm0, %v11925_v41, 0.0  ;;  %v3722_v55 = vrot.slane %v472_v21, %v15260_v14 }
 0x608   :  { %v14893_v42 = vsel %vm13367_vm0, %v11909_v26, 0.0  ;;  %v3726_v56 = vrot.slane %v472_v21, %v15262_v15  ;;  %v3730_v57 = vrot.slane %v472_v21, %v15264_v16  ;;  %v3738_v26 = vrot.slane %v473_v11, %v15248_v2 }
 0x609   :  { %v14870_v30 = vadd.f32 %v14869_v22, %v14868_v23  ;;  %v7463_v22 = vcombine.low %v7455_v3, %v7462_v7  ;;  %v7464_v23 = vcombine.low %v3690_v60, %v3694_v61  ;;  %v3734_v60 = vrot.slane %v472_v21, %v15266_v17 }
 0x60a   :  { %v3742_v27 = vrot.slane %v473_v11, %v15250_v4  ;;  %v3746_v28 = vrot.slane %v473_v11, %v15252_v5 }
 0x60b   :  { %v14872_v35 = vadd.f32 %v14871_v25, %v14870_v30  ;;  %v7472_v36 = vrot.slane %v7464_v23, %v15268_v20 }
 0x60d   :  { %v14874_v43 = vadd.f32 %v14873_v34, %v14872_v35  ;;  %v14891_v34 = vsel %vm13367_vm0, %v11907_v10, 0.0  ;;  %v3718_v35 = vrot.slane %v472_v21, %v15254_v6  ;;  %v7480_v46 = vcombine.low %v7472_v36, %v7479_v37 }
 0x60f   :  { %v14876_v48 = vadd.f32 %v14875_v39, %v14874_v43  ;;  %v8407_v39 = vmul.f32 %v7463_v22, %v343_v18  ;;  %v8408_v0 = vmul.f32 %v7480_v46, %v344_v44  ;;  %v7499_v18 = vcombine.low %v3730_v57, %v3734_v60 }
 0x611   :  { %v14878_v54 = vadd.f32 %v14877_v47, %v14876_v48  ;;  %v7481_v47 = vcombine.low %v3706_v31, %v3710_v32  ;;  %v7482_v48 = vcombine.low %v3714_v33, %v3718_v35  ;;  %v11927_v51 = vcombine.high %v8407_v39, %v8407_v39 }
 0x612   :  { %v11934_v52 = vrot.slane %v8407_v39, %v15268_v20  ;;  %v11944_v22 = vcombine.high %v8408_v0, %v8408_v0  ;;  %v11951_v23 = vrot.slane %v8408_v0, %v15268_v20  ;;  %v7513_v32 = vrot.slane %v7499_v18, %v15268_v20 }
 0x613   :  { %v14880_v59 = vadd.f32 %v14879_v50, %v14878_v54  ;;  %v11926_v50 = vcombine.high %v11924_v40, %v11924_v40  ;;  %v7489_v61 = vrot.slane %v7481_v47, %v15268_v20  ;;  %v7496_v62 = vrot.slane %v7482_v48, %v15268_v20 }
 0x614   :  { %v11941_v1 = vrot.slane %v11927_v51, %v15268_v20  ;;  %v11942_v3 = vcombine.high %v11934_v52, %v11934_v52  ;;  %v14903_v10 = vsel %vm13367_vm0, %v11934_v52, 0.0  ;;  %v11958_v35 = vrot.slane %v11944_v22, %v15268_v20 }
 0x615   :  { %v14882_v8 = vadd.f32 %v14881_v58, %v14880_v59  ;;  %v14899_v58 = vsel %vm13367_vm0, %v11924_v40, 0.0  ;;  %v136_v59 = vld [vmem:[#allocation3 + $0x308] sm:$0xff]  ;;  %v14901_v7 = vsel %vm13367_vm0, %v11926_v50, 0.0  ;;  %v11959_v36 = vcombine.high %v11951_v23, %v11951_v23 }
 0x616   :  { %v345_v9 = vunpack.c.l.bf16 %v136_v59  ;;  %v11943_v21 = vcombine.high %v11941_v1, %v11941_v1  ;;  %v14905_v24 = vsel %vm13367_vm0, %v11942_v3, 0.0  ;;  %v346_v39 = vunpack.c.h.bf16 %v136_v59  ;;  %v474_v3 = vld [vmem:[#allocation5 + $0x318] sm:$0xff] }
 0x617   :  { %v14884_v13 = vadd.f32 %v14883_v63, %v14882_v8  ;;  %v14911_v40 = vsel %vm13367_vm0, %v11951_v23, 0.0  ;;  %v14913_v48 = vsel %vm13367_vm0, %v11959_v36, 0.0  ;;  %v3754_v50 = vrot.slane %v473_v11, %v15260_v14 }
 0x618   :  { %v14909_v37 = vsel %vm13367_vm0, %v11943_v21, 0.0  ;;  %v3758_v51 = vrot.slane %v473_v11, %v15262_v15  ;;  %v3762_v52 = vrot.slane %v473_v11, %v15264_v16  ;;  %v3770_v21 = vrot.slane %v474_v3, %v15248_v2 }
 0x619   :  { %v14886_v25 = vadd.f32 %v14885_v12, %v14884_v13  ;;  %v7497_v12 = vcombine.low %v7489_v61, %v7496_v62  ;;  %v7498_v13 = vcombine.low %v3722_v55, %v3726_v56  ;;  %v3766_v55 = vrot.slane %v473_v11, %v15266_v17 }
 0x61a   :  { %v3774_v22 = vrot.slane %v474_v3, %v15250_v4  ;;  %v3778_v23 = vrot.slane %v474_v3, %v15252_v5 }
 0x61b   :  { %v14888_v30 = vadd.f32 %v14887_v19, %v14886_v25  ;;  %v7506_v31 = vrot.slane %v7498_v13, %v15268_v20 }
 0x61d   :  { %v14890_v38 = vadd.f32 %v14889_v29, %v14888_v30  ;;  %v14907_v29 = vsel %vm13367_vm0, %v11941_v1, 0.0  ;;  %v3750_v30 = vrot.slane %v473_v11, %v15254_v6  ;;  %v7514_v41 = vcombine.low %v7506_v31, %v7513_v32 }
 0x61f   :  { %v14892_v43 = vadd.f32 %v14891_v34, %v14890_v38  ;;  %v8409_v34 = vmul.f32 %v7497_v12, %v345_v9  ;;  %v8410_v59 = vmul.f32 %v7514_v41, %v346_v39  ;;  %v7533_v9 = vcombine.low %v3762_v52, %v3766_v55 }
 0x621   :  { %v14894_v49 = vadd.f32 %v14893_v42, %v14892_v43  ;;  %v7515_v42 = vcombine.low %v3738_v26, %v3742_v27  ;;  %v7516_v43 = vcombine.low %v3746_v28, %v3750_v30  ;;  %v11961_v46 = vcombine.high %v8409_v34, %v8409_v34 }
 0x622   :  { %v11968_v47 = vrot.slane %v8409_v34, %v15268_v20  ;;  %v11978_v12 = vcombine.high %v8410_v59, %v8410_v59  ;;  %v11985_v13 = vrot.slane %v8410_v59, %v15268_v20  ;;  %v7547_v27 = vrot.slane %v7533_v9, %v15268_v20 }
 0x623   :  { %v14896_v54 = vadd.f32 %v14895_v45, %v14894_v49  ;;  %v11960_v45 = vcombine.high %v11958_v35, %v11958_v35  ;;  %v7523_v56 = vrot.slane %v7515_v42, %v15268_v20  ;;  %v7530_v57 = vrot.slane %v7516_v43, %v15268_v20 }
 0x624   :  { %v11975_v60 = vrot.slane %v11961_v46, %v15268_v20  ;;  %v11976_v61 = vcombine.high %v11968_v47, %v11968_v47  ;;  %v14919_v1 = vsel %vm13367_vm0, %v11968_v47, 0.0  ;;  %v11992_v30 = vrot.slane %v11978_v12, %v15268_v20 }
 0x625   :  { %v14898_v63 = vadd.f32 %v14897_v53, %v14896_v54  ;;  %v14915_v53 = vsel %vm13367_vm0, %v11958_v35, 0.0  ;;  %v137_v54 = vld [vmem:[#allocation3 + $0x310] sm:$0xff]  ;;  %v14917_v62 = vsel %vm13367_vm0, %v11960_v45, 0.0  ;;  %v11993_v31 = vcombine.high %v11985_v13, %v11985_v13 }
 0x626   :  { %v347_v0 = vunpack.c.l.bf16 %v137_v54  ;;  %v11977_v11 = vcombine.high %v11975_v60, %v11975_v60  ;;  %v14921_v18 = vsel %vm13367_vm0, %v11976_v61, 0.0  ;;  %v348_v34 = vunpack.c.h.bf16 %v137_v54  ;;  %v475_v61 = vld [vmem:[#allocation5 + $0x320] sm:$0xff] }
 0x627   :  { %v14900_v8 = vadd.f32 %v14899_v58, %v14898_v63  ;;  %v14927_v35 = vsel %vm13367_vm0, %v11985_v13, 0.0  ;;  %v14929_v43 = vsel %vm13367_vm0, %v11993_v31, 0.0  ;;  %v3786_v45 = vrot.slane %v474_v3, %v15260_v14 }
 0x628   :  { %v14925_v32 = vsel %vm13367_vm0, %v11977_v11, 0.0  ;;  %v3790_v46 = vrot.slane %v474_v3, %v15262_v15  ;;  %v3794_v47 = vrot.slane %v474_v3, %v15264_v16  ;;  %v3802_v11 = vrot.slane %v475_v61, %v15248_v2 }
 0x629   :  { %v14902_v19 = vadd.f32 %v14901_v7, %v14900_v8  ;;  %v7531_v7 = vcombine.low %v7523_v56, %v7530_v57  ;;  %v7532_v8 = vcombine.low %v3754_v50, %v3758_v51  ;;  %v3798_v50 = vrot.slane %v474_v3, %v15266_v17 }
 0x62a   :  { %v3806_v12 = vrot.slane %v475_v61, %v15250_v4  ;;  %v3810_v13 = vrot.slane %v475_v61, %v15252_v5 }
 0x62b   :  { %v14904_v25 = vadd.f32 %v14903_v10, %v14902_v19  ;;  %v7540_v26 = vrot.slane %v7532_v8, %v15268_v20 }
 0x62d   :  { %v14906_v33 = vadd.f32 %v14905_v24, %v14904_v25  ;;  %v14923_v24 = vsel %vm13367_vm0, %v11975_v60, 0.0  ;;  %v3782_v25 = vrot.slane %v474_v3, %v15254_v6  ;;  %v7548_v36 = vcombine.low %v7540_v26, %v7547_v27 }
 0x62f   :  { %v14908_v38 = vadd.f32 %v14907_v29, %v14906_v33  ;;  %v8411_v29 = vmul.f32 %v7531_v7, %v347_v0  ;;  %v8412_v54 = vmul.f32 %v7548_v36, %v348_v34  ;;  %v7567_v0 = vcombine.low %v3794_v47, %v3798_v50 }
 0x631   :  { %v14910_v44 = vadd.f32 %v14909_v37, %v14908_v38  ;;  %v7549_v37 = vcombine.low %v3770_v21, %v3774_v22  ;;  %v7550_v38 = vcombine.low %v3778_v23, %v3782_v25  ;;  %v11995_v41 = vcombine.high %v8411_v29, %v8411_v29 }
 0x632   :  { %v12002_v42 = vrot.slane %v8411_v29, %v15268_v20  ;;  %v12012_v7 = vcombine.high %v8412_v54, %v8412_v54  ;;  %v12019_v8 = vrot.slane %v8412_v54, %v15268_v20  ;;  %v7581_v22 = vrot.slane %v7567_v0, %v15268_v20 }
 0x633   :  { %v14912_v49 = vadd.f32 %v14911_v40, %v14910_v44  ;;  %v11994_v40 = vcombine.high %v11992_v30, %v11992_v30  ;;  %v7557_v51 = vrot.slane %v7549_v37, %v15268_v20  ;;  %v7564_v52 = vrot.slane %v7550_v38, %v15268_v20 }
 0x634   :  { %v12009_v55 = vrot.slane %v11995_v41, %v15268_v20  ;;  %v12010_v56 = vcombine.high %v12002_v42, %v12002_v42  ;;  %v14935_v60 = vsel %vm13367_vm0, %v12002_v42, 0.0  ;;  %v12026_v25 = vrot.slane %v12012_v7, %v15268_v20 }
 0x635   :  { %v14914_v58 = vadd.f32 %v14913_v48, %v14912_v49  ;;  %v14931_v48 = vsel %vm13367_vm0, %v11992_v30, 0.0  ;;  %v138_v49 = vld [vmem:[#allocation3 + $0x318] sm:$0xff]  ;;  %v14933_v57 = vsel %vm13367_vm0, %v11994_v40, 0.0  ;;  %v12027_v26 = vcombine.high %v12019_v8, %v12019_v8 }
 0x636   :  { %v349_v59 = vunpack.c.l.bf16 %v138_v49  ;;  %v12011_v3 = vcombine.high %v12009_v55, %v12009_v55  ;;  %v14937_v9 = vsel %vm13367_vm0, %v12010_v56, 0.0  ;;  %v350_v29 = vunpack.c.h.bf16 %v138_v49  ;;  %v476_v56 = vld [vmem:[#allocation5 + $0x328] sm:$0xff] }
 0x637   :  { %v14916_v63 = vadd.f32 %v14915_v53, %v14914_v58  ;;  %v14943_v30 = vsel %vm13367_vm0, %v12019_v8, 0.0  ;;  %v14945_v38 = vsel %vm13367_vm0, %v12027_v26, 0.0  ;;  %v3818_v40 = vrot.slane %v475_v61, %v15260_v14 }
 0x638   :  { %v14941_v27 = vsel %vm13367_vm0, %v12011_v3, 0.0  ;;  %v3822_v41 = vrot.slane %v475_v61, %v15262_v15  ;;  %v3826_v42 = vrot.slane %v475_v61, %v15264_v16  ;;  %v3834_v3 = vrot.slane %v476_v56, %v15248_v2 }
 0x639   :  { %v14918_v10 = vadd.f32 %v14917_v62, %v14916_v63  ;;  %v7565_v62 = vcombine.low %v7557_v51, %v7564_v52  ;;  %v7566_v63 = vcombine.low %v3786_v45, %v3790_v46  ;;  %v3830_v45 = vrot.slane %v475_v61, %v15266_v17 }
 0x63a   :  { %v3838_v7 = vrot.slane %v476_v56, %v15250_v4  ;;  %v3842_v8 = vrot.slane %v476_v56, %v15252_v5 }
 0x63b   :  { %v14920_v19 = vadd.f32 %v14919_v1, %v14918_v10  ;;  %v7574_v21 = vrot.slane %v7566_v63, %v15268_v20 }
 0x63d   :  { %v14922_v28 = vadd.f32 %v14921_v18, %v14920_v19  ;;  %v14939_v18 = vsel %vm13367_vm0, %v12009_v55, 0.0  ;;  %v3814_v19 = vrot.slane %v475_v61, %v15254_v6  ;;  %v7582_v31 = vcombine.low %v7574_v21, %v7581_v22 }
 0x63f   :  { %v14924_v33 = vadd.f32 %v14923_v24, %v14922_v28  ;;  %v8413_v24 = vmul.f32 %v7565_v62, %v349_v59  ;;  %v8414_v49 = vmul.f32 %v7582_v31, %v350_v29  ;;  %v7601_v59 = vcombine.low %v3826_v42, %v3830_v45 }
 0x641   :  { %v14926_v39 = vadd.f32 %v14925_v32, %v14924_v33  ;;  %v7583_v32 = vcombine.low %v3802_v11, %v3806_v12  ;;  %v7584_v33 = vcombine.low %v3810_v13, %v3814_v19  ;;  %v12029_v36 = vcombine.high %v8413_v24, %v8413_v24 }
 0x642   :  { %v12036_v37 = vrot.slane %v8413_v24, %v15268_v20  ;;  %v12046_v62 = vcombine.high %v8414_v49, %v8414_v49  ;;  %v12053_v63 = vrot.slane %v8414_v49, %v15268_v20  ;;  %v7615_v12 = vrot.slane %v7601_v59, %v15268_v20 }
 0x643   :  { %v14928_v44 = vadd.f32 %v14927_v35, %v14926_v39  ;;  %v12028_v35 = vcombine.high %v12026_v25, %v12026_v25  ;;  %v7591_v46 = vrot.slane %v7583_v32, %v15268_v20  ;;  %v7598_v47 = vrot.slane %v7584_v33, %v15268_v20 }
 0x644   :  { %v12043_v50 = vrot.slane %v12029_v36, %v15268_v20  ;;  %v12044_v51 = vcombine.high %v12036_v37, %v12036_v37  ;;  %v14951_v55 = vsel %vm13367_vm0, %v12036_v37, 0.0  ;;  %v12060_v19 = vrot.slane %v12046_v62, %v15268_v20 }
 0x645   :  { %v14930_v53 = vadd.f32 %v14929_v43, %v14928_v44  ;;  %v14947_v43 = vsel %vm13367_vm0, %v12026_v25, 0.0  ;;  %v139_v44 = vld [vmem:[#allocation3 + $0x320] sm:$0xff]  ;;  %v14949_v52 = vsel %vm13367_vm0, %v12028_v35, 0.0  ;;  %v12061_v21 = vcombine.high %v12053_v63, %v12053_v63 }
 0x646   :  { %v351_v54 = vunpack.c.l.bf16 %v139_v44  ;;  %v12045_v61 = vcombine.high %v12043_v50, %v12043_v50  ;;  %v14953_v0 = vsel %vm13367_vm0, %v12044_v51, 0.0  ;;  %v352_v24 = vunpack.c.h.bf16 %v139_v44  ;;  %v477_v51 = vld [vmem:[#allocation5 + $0x330] sm:$0xff] }
 0x647   :  { %v14932_v58 = vadd.f32 %v14931_v48, %v14930_v53  ;;  %v14959_v25 = vsel %vm13367_vm0, %v12053_v63, 0.0  ;;  %v14961_v33 = vsel %vm13367_vm0, %v12061_v21, 0.0  ;;  %v3850_v35 = vrot.slane %v476_v56, %v15260_v14 }
 0x648   :  { %v14957_v22 = vsel %vm13367_vm0, %v12045_v61, 0.0  ;;  %v3854_v36 = vrot.slane %v476_v56, %v15262_v15  ;;  %v3858_v37 = vrot.slane %v476_v56, %v15264_v16  ;;  %v3866_v61 = vrot.slane %v477_v51, %v15248_v2 }
 0x649   :  { %v14934_v1 = vadd.f32 %v14933_v57, %v14932_v58  ;;  %v7599_v57 = vcombine.low %v7591_v46, %v7598_v47  ;;  %v7600_v58 = vcombine.low %v3818_v40, %v3822_v41  ;;  %v3862_v40 = vrot.slane %v476_v56, %v15266_v17 }
 0x64a   :  { %v3870_v62 = vrot.slane %v477_v51, %v15250_v4  ;;  %v3874_v63 = vrot.slane %v477_v51, %v15252_v5 }
 0x64b   :  { %v14936_v10 = vadd.f32 %v14935_v60, %v14934_v1  ;;  %v7608_v11 = vrot.slane %v7600_v58, %v15268_v20 }
 0x64d   :  { %v14938_v23 = vadd.f32 %v14937_v9, %v14936_v10  ;;  %v14955_v9 = vsel %vm13367_vm0, %v12043_v50, 0.0  ;;  %v3846_v10 = vrot.slane %v476_v56, %v15254_v6  ;;  %v7616_v26 = vcombine.low %v7608_v11, %v7615_v12 }
 0x64f   :  { %v14940_v28 = vadd.f32 %v14939_v18, %v14938_v23  ;;  %v8415_v18 = vmul.f32 %v7599_v57, %v351_v54  ;;  %v8416_v44 = vmul.f32 %v7616_v26, %v352_v24  ;;  %v7635_v54 = vcombine.low %v3858_v37, %v3862_v40 }
 0x651   :  { %v14942_v34 = vadd.f32 %v14941_v27, %v14940_v28  ;;  %v7617_v27 = vcombine.low %v3834_v3, %v3838_v7  ;;  %v7618_v28 = vcombine.low %v3842_v8, %v3846_v10  ;;  %v12063_v31 = vcombine.high %v8415_v18, %v8415_v18 }
 0x652   :  { %v12070_v32 = vrot.slane %v8415_v18, %v15268_v20  ;;  %v12080_v57 = vcombine.high %v8416_v44, %v8416_v44  ;;  %v12087_v58 = vrot.slane %v8416_v44, %v15268_v20  ;;  %v7649_v7 = vrot.slane %v7635_v54, %v15268_v20 }
 0x653   :  { %v14944_v39 = vadd.f32 %v14943_v30, %v14942_v34  ;;  %v12062_v30 = vcombine.high %v12060_v19, %v12060_v19  ;;  %v7625_v41 = vrot.slane %v7617_v27, %v15268_v20  ;;  %v7632_v42 = vrot.slane %v7618_v28, %v15268_v20 }
 0x654   :  { %v12077_v45 = vrot.slane %v12063_v31, %v15268_v20  ;;  %v12078_v46 = vcombine.high %v12070_v32, %v12070_v32  ;;  %v14967_v50 = vsel %vm13367_vm0, %v12070_v32, 0.0  ;;  %v12094_v10 = vrot.slane %v12080_v57, %v15268_v20 }
 0x655   :  { %v14946_v48 = vadd.f32 %v14945_v38, %v14944_v39  ;;  %v14963_v38 = vsel %vm13367_vm0, %v12060_v19, 0.0  ;;  %v140_v39 = vld [vmem:[#allocation3 + $0x328] sm:$0xff]  ;;  %v14965_v47 = vsel %vm13367_vm0, %v12062_v30, 0.0  ;;  %v12095_v11 = vcombine.high %v12087_v58, %v12087_v58 }
 0x656   :  { %v353_v49 = vunpack.c.l.bf16 %v140_v39  ;;  %v12079_v56 = vcombine.high %v12077_v45, %v12077_v45  ;;  %v14969_v59 = vsel %vm13367_vm0, %v12078_v46, 0.0  ;;  %v354_v18 = vunpack.c.h.bf16 %v140_v39  ;;  %v478_v46 = vld [vmem:[#allocation5 + $0x338] sm:$0xff] }
 0x657   :  { %v14948_v53 = vadd.f32 %v14947_v43, %v14946_v48  ;;  %v14975_v19 = vsel %vm13367_vm0, %v12087_v58, 0.0  ;;  %v14977_v28 = vsel %vm13367_vm0, %v12095_v11, 0.0  ;;  %v3882_v30 = vrot.slane %v477_v51, %v15260_v14 }
 0x658   :  { %v14973_v12 = vsel %vm13367_vm0, %v12079_v56, 0.0  ;;  %v3886_v31 = vrot.slane %v477_v51, %v15262_v15  ;;  %v3890_v32 = vrot.slane %v477_v51, %v15264_v16  ;;  %v3898_v56 = vrot.slane %v478_v46, %v15248_v2 }
 0x659   :  { %v14950_v60 = vadd.f32 %v14949_v52, %v14948_v53  ;;  %v7633_v52 = vcombine.low %v7625_v41, %v7632_v42  ;;  %v7634_v53 = vcombine.low %v3850_v35, %v3854_v36  ;;  %v3894_v35 = vrot.slane %v477_v51, %v15266_v17 }
 0x65a   :  { %v3902_v57 = vrot.slane %v478_v46, %v15250_v4  ;;  %v3906_v58 = vrot.slane %v478_v46, %v15252_v5 }
 0x65b   :  { %v14952_v1 = vadd.f32 %v14951_v55, %v14950_v60  ;;  %v7642_v3 = vrot.slane %v7634_v53, %v15268_v20 }
 0x65d   :  { %v14954_v13 = vadd.f32 %v14953_v0, %v14952_v1  ;;  %v14971_v0 = vsel %vm13367_vm0, %v12077_v45, 0.0  ;;  %v3878_v1 = vrot.slane %v477_v51, %v15254_v6  ;;  %v7650_v21 = vcombine.low %v7642_v3, %v7649_v7 }
 0x65f   :  { %v14956_v23 = vadd.f32 %v14955_v9, %v14954_v13  ;;  %v8417_v9 = vmul.f32 %v7633_v52, %v353_v49  ;;  %v8418_v39 = vmul.f32 %v7650_v21, %v354_v18  ;;  %v7669_v49 = vcombine.low %v3890_v32, %v3894_v35 }
 0x661   :  { %v14958_v29 = vadd.f32 %v14957_v22, %v14956_v23  ;;  %v7651_v22 = vcombine.low %v3866_v61, %v3870_v62  ;;  %v7652_v23 = vcombine.low %v3874_v63, %v3878_v1  ;;  %v12097_v26 = vcombine.high %v8417_v9, %v8417_v9 }
 0x662   :  { %v12104_v27 = vrot.slane %v8417_v9, %v15268_v20  ;;  %v12114_v52 = vcombine.high %v8418_v39, %v8418_v39  ;;  %v12121_v53 = vrot.slane %v8418_v39, %v15268_v20  ;;  %v7683_v62 = vrot.slane %v7669_v49, %v15268_v20 }
 0x663   :  { %v14960_v34 = vadd.f32 %v14959_v25, %v14958_v29  ;;  %v12096_v25 = vcombine.high %v12094_v10, %v12094_v10  ;;  %v7659_v36 = vrot.slane %v7651_v22, %v15268_v20  ;;  %v7666_v37 = vrot.slane %v7652_v23, %v15268_v20 }
 0x664   :  { %v12111_v40 = vrot.slane %v12097_v26, %v15268_v20  ;;  %v12112_v41 = vcombine.high %v12104_v27, %v12104_v27  ;;  %v14983_v45 = vsel %vm13367_vm0, %v12104_v27, 0.0  ;;  %v12128_v1 = vrot.slane %v12114_v52, %v15268_v20 }
 0x665   :  { %v14962_v43 = vadd.f32 %v14961_v33, %v14960_v34  ;;  %v14979_v33 = vsel %vm13367_vm0, %v12094_v10, 0.0  ;;  %v141_v34 = vld [vmem:[#allocation3 + $0x330] sm:$0xff]  ;;  %v14981_v42 = vsel %vm13367_vm0, %v12096_v25, 0.0  ;;  %v12129_v3 = vcombine.high %v12121_v53, %v12121_v53 }
 0x666   :  { %v355_v44 = vunpack.c.l.bf16 %v141_v34  ;;  %v12113_v51 = vcombine.high %v12111_v40, %v12111_v40  ;;  %v14985_v54 = vsel %vm13367_vm0, %v12112_v41, 0.0  ;;  %v356_v9 = vunpack.c.h.bf16 %v141_v34  ;;  %v479_v41 = vld [vmem:[#allocation5 + $0x340] sm:$0xff] }
 0x667   :  { %v14964_v48 = vadd.f32 %v14963_v38, %v14962_v43  ;;  %v14991_v10 = vsel %vm13367_vm0, %v12121_v53, 0.0  ;;  %v14993_v23 = vsel %vm13367_vm0, %v12129_v3, 0.0  ;;  %v3914_v25 = vrot.slane %v478_v46, %v15260_v14 }
 0x668   :  { %v14989_v7 = vsel %vm13367_vm0, %v12113_v51, 0.0  ;;  %v3918_v26 = vrot.slane %v478_v46, %v15262_v15  ;;  %v3922_v27 = vrot.slane %v478_v46, %v15264_v16  ;;  %v3930_v51 = vrot.slane %v479_v41, %v15248_v2 }
 0x669   :  { %v14966_v55 = vadd.f32 %v14965_v47, %v14964_v48  ;;  %v7667_v47 = vcombine.low %v7659_v36, %v7666_v37  ;;  %v7668_v48 = vcombine.low %v3882_v30, %v3886_v31  ;;  %v3926_v30 = vrot.slane %v478_v46, %v15266_v17 }
 0x66a   :  { %v3934_v52 = vrot.slane %v479_v41, %v15250_v4  ;;  %v3938_v53 = vrot.slane %v479_v41, %v15252_v5 }
 0x66b   :  { %v14968_v60 = vadd.f32 %v14967_v50, %v14966_v55  ;;  %v7676_v61 = vrot.slane %v7668_v48, %v15268_v20 }
 0x66d   :  { %v14970_v8 = vadd.f32 %v14969_v59, %v14968_v60  ;;  %v14987_v59 = vsel %vm13367_vm0, %v12111_v40, 0.0  ;;  %v3910_v60 = vrot.slane %v478_v46, %v15254_v6  ;;  %v7684_v11 = vcombine.low %v7676_v61, %v7683_v62 }
 0x66f   :  { %v14972_v13 = vadd.f32 %v14971_v0, %v14970_v8  ;;  %v8419_v0 = vmul.f32 %v7667_v47, %v355_v44  ;;  %v8420_v34 = vmul.f32 %v7684_v11, %v356_v9  ;;  %v7703_v44 = vcombine.low %v3922_v27, %v3926_v30 }
 0x671   :  { %v14974_v24 = vadd.f32 %v14973_v12, %v14972_v13  ;;  %v7685_v12 = vcombine.low %v3898_v56, %v3902_v57  ;;  %v7686_v13 = vcombine.low %v3906_v58, %v3910_v60  ;;  %v12131_v21 = vcombine.high %v8419_v0, %v8419_v0 }
 0x672   :  { %v12138_v22 = vrot.slane %v8419_v0, %v15268_v20  ;;  %v12148_v47 = vcombine.high %v8420_v34, %v8420_v34  ;;  %v12155_v48 = vrot.slane %v8420_v34, %v15268_v20  ;;  %v7717_v57 = vrot.slane %v7703_v44, %v15268_v20 }
 0x673   :  { %v14976_v29 = vadd.f32 %v14975_v19, %v14974_v24  ;;  %v12130_v19 = vcombine.high %v12128_v1, %v12128_v1  ;;  %v7693_v31 = vrot.slane %v7685_v12, %v15268_v20  ;;  %v7700_v32 = vrot.slane %v7686_v13, %v15268_v20 }
 0x674   :  { %v12145_v35 = vrot.slane %v12131_v21, %v15268_v20  ;;  %v12146_v36 = vcombine.high %v12138_v22, %v12138_v22  ;;  %v14999_v40 = vsel %vm13367_vm0, %v12138_v22, 0.0  ;;  %v12162_v60 = vrot.slane %v12148_v47, %v15268_v20 }
 0x675   :  { %v14978_v38 = vadd.f32 %v14977_v28, %v14976_v29  ;;  %v14995_v28 = vsel %vm13367_vm0, %v12128_v1, 0.0  ;;  %v142_v29 = vld [vmem:[#allocation3 + $0x338] sm:$0xff]  ;;  %v14997_v37 = vsel %vm13367_vm0, %v12130_v19, 0.0  ;;  %v12163_v61 = vcombine.high %v12155_v48, %v12155_v48 }
 0x676   :  { %v357_v39 = vunpack.c.l.bf16 %v142_v29  ;;  %v12147_v46 = vcombine.high %v12145_v35, %v12145_v35  ;;  %v15001_v49 = vsel %vm13367_vm0, %v12146_v36, 0.0  ;;  %v358_v0 = vunpack.c.h.bf16 %v142_v29  ;;  %v480_v36 = vld [vmem:[#allocation5 + $0x348] sm:$0xff] }
 0x677   :  { %v14980_v43 = vadd.f32 %v14979_v33, %v14978_v38  ;;  %v15007_v1 = vsel %vm13367_vm0, %v12155_v48, 0.0  ;;  %v15009_v13 = vsel %vm13367_vm0, %v12163_v61, 0.0  ;;  %v3946_v19 = vrot.slane %v479_v41, %v15260_v14 }
 0x678   :  { %v15005_v62 = vsel %vm13367_vm0, %v12147_v46, 0.0  ;;  %v3950_v21 = vrot.slane %v479_v41, %v15262_v15  ;;  %v3954_v22 = vrot.slane %v479_v41, %v15264_v16  ;;  %v3962_v46 = vrot.slane %v480_v36, %v15248_v2 }
 0x679   :  { %v14982_v50 = vadd.f32 %v14981_v42, %v14980_v43  ;;  %v7701_v42 = vcombine.low %v7693_v31, %v7700_v32  ;;  %v7702_v43 = vcombine.low %v3914_v25, %v3918_v26  ;;  %v3958_v25 = vrot.slane %v479_v41, %v15266_v17 }
 0x67a   :  { %v3966_v47 = vrot.slane %v480_v36, %v15250_v4  ;;  %v3970_v48 = vrot.slane %v480_v36, %v15252_v5 }
 0x67b   :  { %v14984_v55 = vadd.f32 %v14983_v45, %v14982_v50  ;;  %v7710_v56 = vrot.slane %v7702_v43, %v15268_v20 }
 0x67d   :  { %v14986_v63 = vadd.f32 %v14985_v54, %v14984_v55  ;;  %v15003_v54 = vsel %vm13367_vm0, %v12145_v35, 0.0  ;;  %v3942_v55 = vrot.slane %v479_v41, %v15254_v6  ;;  %v7718_v3 = vcombine.low %v7710_v56, %v7717_v57 }
 0x67f   :  { %v14988_v8 = vadd.f32 %v14987_v59, %v14986_v63  ;;  %v8421_v59 = vmul.f32 %v7701_v42, %v357_v39  ;;  %v8422_v29 = vmul.f32 %v7718_v3, %v358_v0  ;;  %v7737_v39 = vcombine.low %v3954_v22, %v3958_v25 }
 0x681   :  { %v14990_v18 = vadd.f32 %v14989_v7, %v14988_v8  ;;  %v7719_v7 = vcombine.low %v3930_v51, %v3934_v52  ;;  %v7720_v8 = vcombine.low %v3938_v53, %v3942_v55  ;;  %v12165_v11 = vcombine.high %v8421_v59, %v8421_v59 }
 0x682   :  { %v12172_v12 = vrot.slane %v8421_v59, %v15268_v20  ;;  %v12182_v42 = vcombine.high %v8422_v29, %v8422_v29  ;;  %v12189_v43 = vrot.slane %v8422_v29, %v15268_v20  ;;  %v7751_v52 = vrot.slane %v7737_v39, %v15268_v20 }
 0x683   :  { %v14992_v24 = vadd.f32 %v14991_v10, %v14990_v18  ;;  %v12164_v10 = vcombine.high %v12162_v60, %v12162_v60  ;;  %v7727_v26 = vrot.slane %v7719_v7, %v15268_v20  ;;  %v7734_v27 = vrot.slane %v7720_v8, %v15268_v20 }
 0x684   :  { %v12179_v30 = vrot.slane %v12165_v11, %v15268_v20  ;;  %v12180_v31 = vcombine.high %v12172_v12, %v12172_v12  ;;  %v15015_v35 = vsel %vm13367_vm0, %v12172_v12, 0.0  ;;  %v12196_v55 = vrot.slane %v12182_v42, %v15268_v20 }
 0x685   :  { %v14994_v33 = vadd.f32 %v14993_v23, %v14992_v24  ;;  %v15011_v23 = vsel %vm13367_vm0, %v12162_v60, 0.0  ;;  %v143_v24 = vld [vmem:[#allocation3 + $0x340] sm:$0xff]  ;;  %v15013_v32 = vsel %vm13367_vm0, %v12164_v10, 0.0  ;;  %v12197_v56 = vcombine.high %v12189_v43, %v12189_v43 }
 0x686   :  { %v359_v34 = vunpack.c.l.bf16 %v143_v24  ;;  %v12181_v41 = vcombine.high %v12179_v30, %v12179_v30  ;;  %v15017_v44 = vsel %vm13367_vm0, %v12180_v31, 0.0  ;;  %v360_v59 = vunpack.c.h.bf16 %v143_v24  ;;  %v481_v31 = vld [vmem:[#allocation5 + $0x350] sm:$0xff] }
 0x687   :  { %v14996_v38 = vadd.f32 %v14995_v28, %v14994_v33  ;;  %v15023_v60 = vsel %vm13367_vm0, %v12189_v43, 0.0  ;;  %v15025_v8 = vsel %vm13367_vm0, %v12197_v56, 0.0  ;;  %v3978_v10 = vrot.slane %v480_v36, %v15260_v14 }
 0x688   :  { %v15021_v57 = vsel %vm13367_vm0, %v12181_v41, 0.0  ;;  %v3982_v11 = vrot.slane %v480_v36, %v15262_v15  ;;  %v3986_v12 = vrot.slane %v480_v36, %v15264_v16  ;;  %v3994_v41 = vrot.slane %v481_v31, %v15248_v2 }
 0x689   :  { %v14998_v45 = vadd.f32 %v14997_v37, %v14996_v38  ;;  %v7735_v37 = vcombine.low %v7727_v26, %v7734_v27  ;;  %v7736_v38 = vcombine.low %v3946_v19, %v3950_v21  ;;  %v3990_v19 = vrot.slane %v480_v36, %v15266_v17 }
 0x68a   :  { %v3998_v42 = vrot.slane %v481_v31, %v15250_v4  ;;  %v4002_v43 = vrot.slane %v481_v31, %v15252_v5 }
 0x68b   :  { %v15000_v50 = vadd.f32 %v14999_v40, %v14998_v45  ;;  %v7744_v51 = vrot.slane %v7736_v38, %v15268_v20 }
 0x68d   :  { %v15002_v58 = vadd.f32 %v15001_v49, %v15000_v50  ;;  %v15019_v49 = vsel %vm13367_vm0, %v12179_v30, 0.0  ;;  %v3974_v50 = vrot.slane %v480_v36, %v15254_v6  ;;  %v7752_v61 = vcombine.low %v7744_v51, %v7751_v52 }
 0x68f   :  { %v15004_v63 = vadd.f32 %v15003_v54, %v15002_v58  ;;  %v8423_v54 = vmul.f32 %v7735_v37, %v359_v34  ;;  %v8424_v24 = vmul.f32 %v7752_v61, %v360_v59  ;;  %v7771_v34 = vcombine.low %v3986_v12, %v3990_v19 }
 0x691   :  { %v15006_v9 = vadd.f32 %v15005_v62, %v15004_v63  ;;  %v7753_v62 = vcombine.low %v3962_v46, %v3966_v47  ;;  %v7754_v63 = vcombine.low %v3970_v48, %v3974_v50  ;;  %v12199_v3 = vcombine.high %v8423_v54, %v8423_v54 }
 0x692   :  { %v12206_v7 = vrot.slane %v8423_v54, %v15268_v20  ;;  %v12216_v37 = vcombine.high %v8424_v24, %v8424_v24  ;;  %v12223_v38 = vrot.slane %v8424_v24, %v15268_v20  ;;  %v7785_v47 = vrot.slane %v7771_v34, %v15268_v20 }
 0x693   :  { %v15008_v18 = vadd.f32 %v15007_v1, %v15006_v9  ;;  %v12198_v1 = vcombine.high %v12196_v55, %v12196_v55  ;;  %v7761_v21 = vrot.slane %v7753_v62, %v15268_v20  ;;  %v7768_v22 = vrot.slane %v7754_v63, %v15268_v20 }
 0x694   :  { %v12213_v25 = vrot.slane %v12199_v3, %v15268_v20  ;;  %v12214_v26 = vcombine.high %v12206_v7, %v12206_v7  ;;  %v15031_v30 = vsel %vm13367_vm0, %v12206_v7, 0.0  ;;  %v12230_v50 = vrot.slane %v12216_v37, %v15268_v20 }
 0x695   :  { %v15010_v28 = vadd.f32 %v15009_v13, %v15008_v18  ;;  %v15027_v13 = vsel %vm13367_vm0, %v12196_v55, 0.0  ;;  %v144_v18 = vld [vmem:[#allocation3 + $0x348] sm:$0xff]  ;;  %v15029_v27 = vsel %vm13367_vm0, %v12198_v1, 0.0  ;;  %v12231_v51 = vcombine.high %v12223_v38, %v12223_v38 }
 0x696   :  { %v361_v29 = vunpack.c.l.bf16 %v144_v18  ;;  %v12215_v36 = vcombine.high %v12213_v25, %v12213_v25  ;;  %v15033_v39 = vsel %vm13367_vm0, %v12214_v26, 0.0  ;;  %v362_v54 = vunpack.c.h.bf16 %v144_v18  ;;  %v482_v26 = vld [vmem:[#allocation5 + $0x358] sm:$0xff] }
 0x697   :  { %v15012_v33 = vadd.f32 %v15011_v23, %v15010_v28  ;;  %v15039_v55 = vsel %vm13367_vm0, %v12223_v38, 0.0  ;;  %v15041_v63 = vsel %vm13367_vm0, %v12231_v51, 0.0  ;;  %v4010_v1 = vrot.slane %v481_v31, %v15260_v14 }
 0x698   :  { %v15037_v52 = vsel %vm13367_vm0, %v12215_v36, 0.0  ;;  %v4014_v3 = vrot.slane %v481_v31, %v15262_v15  ;;  %v4018_v7 = vrot.slane %v481_v31, %v15264_v16  ;;  %v4026_v36 = vrot.slane %v482_v26, %v15248_v2 }
 0x699   :  { %v15014_v40 = vadd.f32 %v15013_v32, %v15012_v33  ;;  %v7769_v32 = vcombine.low %v7761_v21, %v7768_v22  ;;  %v7770_v33 = vcombine.low %v3978_v10, %v3982_v11  ;;  %v4022_v10 = vrot.slane %v481_v31, %v15266_v17 }
 0x69a   :  { %v4030_v37 = vrot.slane %v482_v26, %v15250_v4  ;;  %v4034_v38 = vrot.slane %v482_v26, %v15252_v5 }
 0x69b   :  { %v15016_v45 = vadd.f32 %v15015_v35, %v15014_v40  ;;  %v7778_v46 = vrot.slane %v7770_v33, %v15268_v20 }
 0x69d   :  { %v15018_v53 = vadd.f32 %v15017_v44, %v15016_v45  ;;  %v15035_v44 = vsel %vm13367_vm0, %v12213_v25, 0.0  ;;  %v4006_v45 = vrot.slane %v481_v31, %v15254_v6  ;;  %v7786_v56 = vcombine.low %v7778_v46, %v7785_v47 }
 0x69f   :  { %v15020_v58 = vadd.f32 %v15019_v49, %v15018_v53  ;;  %v8425_v49 = vmul.f32 %v7769_v32, %v361_v29  ;;  %v8426_v18 = vmul.f32 %v7786_v56, %v362_v54  ;;  %v7805_v29 = vcombine.low %v4018_v7, %v4022_v10 }
 0x6a1   :  { %v15022_v0 = vadd.f32 %v15021_v57, %v15020_v58  ;;  %v7787_v57 = vcombine.low %v3994_v41, %v3998_v42  ;;  %v7788_v58 = vcombine.low %v4002_v43, %v4006_v45  ;;  %v12233_v61 = vcombine.high %v8425_v49, %v8425_v49 }
 0x6a2   :  { %v12240_v62 = vrot.slane %v8425_v49, %v15268_v20  ;;  %v12250_v32 = vcombine.high %v8426_v18, %v8426_v18  ;;  %v12257_v33 = vrot.slane %v8426_v18, %v15268_v20  ;;  %v7819_v42 = vrot.slane %v7805_v29, %v15268_v20 }
 0x6a3   :  { %v15024_v9 = vadd.f32 %v15023_v60, %v15022_v0  ;;  %v12232_v60 = vcombine.high %v12230_v50, %v12230_v50  ;;  %v7795_v11 = vrot.slane %v7787_v57, %v15268_v20  ;;  %v7802_v12 = vrot.slane %v7788_v58, %v15268_v20 }
 0x6a4   :  { %v12247_v19 = vrot.slane %v12233_v61, %v15268_v20  ;;  %v12248_v21 = vcombine.high %v12240_v62, %v12240_v62  ;;  %v15047_v25 = vsel %vm13367_vm0, %v12240_v62, 0.0  ;;  %v12264_v45 = vrot.slane %v12250_v32, %v15268_v20 }
 0x6a5   :  { %v15026_v23 = vadd.f32 %v15025_v8, %v15024_v9  ;;  %v15043_v8 = vsel %vm13367_vm0, %v12230_v50, 0.0  ;;  %v145_v9 = vld [vmem:[#allocation3 + $0x350] sm:$0xff]  ;;  %v15045_v22 = vsel %vm13367_vm0, %v12232_v60, 0.0  ;;  %v12265_v46 = vcombine.high %v12257_v33, %v12257_v33 }
 0x6a6   :  { %v363_v24 = vunpack.c.l.bf16 %v145_v9  ;;  %v12249_v31 = vcombine.high %v12247_v19, %v12247_v19  ;;  %v15049_v34 = vsel %vm13367_vm0, %v12248_v21, 0.0  ;;  %v364_v49 = vunpack.c.h.bf16 %v145_v9  ;;  %v483_v21 = vld [vmem:[#allocation5 + $0x360] sm:$0xff] }
 0x6a7   :  { %v15028_v28 = vadd.f32 %v15027_v13, %v15026_v23  ;;  %v15055_v50 = vsel %vm13367_vm0, %v12257_v33, 0.0  ;;  %v15057_v58 = vsel %vm13367_vm0, %v12265_v46, 0.0  ;;  %v4042_v60 = vrot.slane %v482_v26, %v15260_v14 }
 0x6a8   :  { %v15053_v47 = vsel %vm13367_vm0, %v12249_v31, 0.0  ;;  %v4046_v61 = vrot.slane %v482_v26, %v15262_v15  ;;  %v4050_v62 = vrot.slane %v482_v26, %v15264_v16  ;;  %v4058_v31 = vrot.slane %v483_v21, %v15248_v2 }
 0x6a9   :  { %v15030_v35 = vadd.f32 %v15029_v27, %v15028_v28  ;;  %v7803_v27 = vcombine.low %v7795_v11, %v7802_v12  ;;  %v7804_v28 = vcombine.low %v4010_v1, %v4014_v3  ;;  %v4054_v1 = vrot.slane %v482_v26, %v15266_v17 }
 0x6aa   :  { %v4062_v32 = vrot.slane %v483_v21, %v15250_v4  ;;  %v4066_v33 = vrot.slane %v483_v21, %v15252_v5 }
 0x6ab   :  { %v15032_v40 = vadd.f32 %v15031_v30, %v15030_v35  ;;  %v7812_v41 = vrot.slane %v7804_v28, %v15268_v20 }
 0x6ad   :  { %v15034_v48 = vadd.f32 %v15033_v39, %v15032_v40  ;;  %v15051_v39 = vsel %vm13367_vm0, %v12247_v19, 0.0  ;;  %v4038_v40 = vrot.slane %v482_v26, %v15254_v6  ;;  %v7820_v51 = vcombine.low %v7812_v41, %v7819_v42 }
 0x6af   :  { %v15036_v53 = vadd.f32 %v15035_v44, %v15034_v48  ;;  %v8427_v44 = vmul.f32 %v7803_v27, %v363_v24  ;;  %v8428_v9 = vmul.f32 %v7820_v51, %v364_v49  ;;  %v7839_v24 = vcombine.low %v4050_v62, %v4054_v1 }
 0x6b1   :  { %v15038_v59 = vadd.f32 %v15037_v52, %v15036_v53  ;;  %v7821_v52 = vcombine.low %v4026_v36, %v4030_v37  ;;  %v7822_v53 = vcombine.low %v4034_v38, %v4038_v40  ;;  %v12267_v56 = vcombine.high %v8427_v44, %v8427_v44 }
 0x6b2   :  { %v12274_v57 = vrot.slane %v8427_v44, %v15268_v20  ;;  %v12284_v27 = vcombine.high %v8428_v9, %v8428_v9  ;;  %v12291_v28 = vrot.slane %v8428_v9, %v15268_v20  ;;  %v7853_v37 = vrot.slane %v7839_v24, %v15268_v20 }
 0x6b3   :  { %v15040_v0 = vadd.f32 %v15039_v55, %v15038_v59  ;;  %v12266_v55 = vcombine.high %v12264_v45, %v12264_v45  ;;  %v7829_v3 = vrot.slane %v7821_v52, %v15268_v20  ;;  %v7836_v7 = vrot.slane %v7822_v53, %v15268_v20 }
 0x6b4   :  { %v12281_v10 = vrot.slane %v12267_v56, %v15268_v20  ;;  %v12282_v11 = vcombine.high %v12274_v57, %v12274_v57  ;;  %v15063_v19 = vsel %vm13367_vm0, %v12274_v57, 0.0  ;;  %v12298_v40 = vrot.slane %v12284_v27, %v15268_v20 }
 0x6b5   :  { %v15042_v13 = vadd.f32 %v15041_v63, %v15040_v0  ;;  %v15059_v63 = vsel %vm13367_vm0, %v12264_v45, 0.0  ;;  %v146_v0 = vld [vmem:[#allocation3 + $0x358] sm:$0xff]  ;;  %v15061_v12 = vsel %vm13367_vm0, %v12266_v55, 0.0  ;;  %v12299_v41 = vcombine.high %v12291_v28, %v12291_v28 }
 0x6b6   :  { %v365_v18 = vunpack.c.l.bf16 %v146_v0  ;;  %v12283_v26 = vcombine.high %v12281_v10, %v12281_v10  ;;  %v15065_v29 = vsel %vm13367_vm0, %v12282_v11, 0.0  ;;  %v366_v44 = vunpack.c.h.bf16 %v146_v0  ;;  %v484_v11 = vld [vmem:[#allocation5 + $0x368] sm:$0xff] }
 0x6b7   :  { %v15044_v23 = vadd.f32 %v15043_v8, %v15042_v13  ;;  %v15071_v45 = vsel %vm13367_vm0, %v12291_v28, 0.0  ;;  %v15073_v53 = vsel %vm13367_vm0, %v12299_v41, 0.0  ;;  %v4074_v55 = vrot.slane %v483_v21, %v15260_v14 }
 0x6b8   :  { %v15069_v42 = vsel %vm13367_vm0, %v12283_v26, 0.0  ;;  %v4078_v56 = vrot.slane %v483_v21, %v15262_v15  ;;  %v4082_v57 = vrot.slane %v483_v21, %v15264_v16  ;;  %v4090_v26 = vrot.slane %v484_v11, %v15248_v2 }
 0x6b9   :  { %v15046_v30 = vadd.f32 %v15045_v22, %v15044_v23  ;;  %v7837_v22 = vcombine.low %v7829_v3, %v7836_v7  ;;  %v7838_v23 = vcombine.low %v4042_v60, %v4046_v61  ;;  %v4086_v60 = vrot.slane %v483_v21, %v15266_v17 }
 0x6ba   :  { %v4094_v27 = vrot.slane %v484_v11, %v15250_v4  ;;  %v4098_v28 = vrot.slane %v484_v11, %v15252_v5 }
 0x6bb   :  { %v15048_v35 = vadd.f32 %v15047_v25, %v15046_v30  ;;  %v7846_v36 = vrot.slane %v7838_v23, %v15268_v20 }
 0x6bd   :  { %v15050_v43 = vadd.f32 %v15049_v34, %v15048_v35  ;;  %v15067_v34 = vsel %vm13367_vm0, %v12281_v10, 0.0  ;;  %v4070_v35 = vrot.slane %v483_v21, %v15254_v6  ;;  %v7854_v46 = vcombine.low %v7846_v36, %v7853_v37 }
 0x6bf   :  { %v15052_v48 = vadd.f32 %v15051_v39, %v15050_v43  ;;  %v8429_v39 = vmul.f32 %v7837_v22, %v365_v18  ;;  %v8430_v0 = vmul.f32 %v7854_v46, %v366_v44  ;;  %v7873_v18 = vcombine.low %v4082_v57, %v4086_v60 }
 0x6c1   :  { %v15054_v54 = vadd.f32 %v15053_v47, %v15052_v48  ;;  %v7855_v47 = vcombine.low %v4058_v31, %v4062_v32  ;;  %v7856_v48 = vcombine.low %v4066_v33, %v4070_v35  ;;  %v12301_v51 = vcombine.high %v8429_v39, %v8429_v39 }
 0x6c2   :  { %v12308_v52 = vrot.slane %v8429_v39, %v15268_v20  ;;  %v12318_v22 = vcombine.high %v8430_v0, %v8430_v0  ;;  %v12325_v23 = vrot.slane %v8430_v0, %v15268_v20  ;;  %v7887_v32 = vrot.slane %v7873_v18, %v15268_v20 }
 0x6c3   :  { %v15056_v59 = vadd.f32 %v15055_v50, %v15054_v54  ;;  %v12300_v50 = vcombine.high %v12298_v40, %v12298_v40  ;;  %v7863_v61 = vrot.slane %v7855_v47, %v15268_v20  ;;  %v7870_v62 = vrot.slane %v7856_v48, %v15268_v20 }
 0x6c4   :  { %v12315_v1 = vrot.slane %v12301_v51, %v15268_v20  ;;  %v12316_v3 = vcombine.high %v12308_v52, %v12308_v52  ;;  %v15079_v10 = vsel %vm13367_vm0, %v12308_v52, 0.0  ;;  %v12332_v35 = vrot.slane %v12318_v22, %v15268_v20 }
 0x6c5   :  { %v15058_v8 = vadd.f32 %v15057_v58, %v15056_v59  ;;  %v15075_v58 = vsel %vm13367_vm0, %v12298_v40, 0.0  ;;  %v147_v59 = vld [vmem:[#allocation3 + $0x360] sm:$0xff]  ;;  %v15077_v7 = vsel %vm13367_vm0, %v12300_v50, 0.0  ;;  %v12333_v36 = vcombine.high %v12325_v23, %v12325_v23 }
 0x6c6   :  { %v367_v9 = vunpack.c.l.bf16 %v147_v59  ;;  %v12317_v21 = vcombine.high %v12315_v1, %v12315_v1  ;;  %v15081_v24 = vsel %vm13367_vm0, %v12316_v3, 0.0  ;;  %v368_v39 = vunpack.c.h.bf16 %v147_v59  ;;  %v485_v3 = vld [vmem:[#allocation5 + $0x370] sm:$0xff] }
 0x6c7   :  { %v15060_v13 = vadd.f32 %v15059_v63, %v15058_v8  ;;  %v15087_v40 = vsel %vm13367_vm0, %v12325_v23, 0.0  ;;  %v15089_v48 = vsel %vm13367_vm0, %v12333_v36, 0.0  ;;  %v4106_v50 = vrot.slane %v484_v11, %v15260_v14 }
 0x6c8   :  { %v15085_v37 = vsel %vm13367_vm0, %v12317_v21, 0.0  ;;  %v4110_v51 = vrot.slane %v484_v11, %v15262_v15  ;;  %v4114_v52 = vrot.slane %v484_v11, %v15264_v16  ;;  %v4122_v21 = vrot.slane %v485_v3, %v15248_v2 }
 0x6c9   :  { %v15062_v25 = vadd.f32 %v15061_v12, %v15060_v13  ;;  %v7871_v12 = vcombine.low %v7863_v61, %v7870_v62  ;;  %v7872_v13 = vcombine.low %v4074_v55, %v4078_v56  ;;  %v4118_v55 = vrot.slane %v484_v11, %v15266_v17 }
 0x6ca   :  { %v4126_v22 = vrot.slane %v485_v3, %v15250_v4  ;;  %v4130_v23 = vrot.slane %v485_v3, %v15252_v5 }
 0x6cb   :  { %v15064_v30 = vadd.f32 %v15063_v19, %v15062_v25  ;;  %v7880_v31 = vrot.slane %v7872_v13, %v15268_v20 }
 0x6cd   :  { %v15066_v38 = vadd.f32 %v15065_v29, %v15064_v30  ;;  %v15083_v29 = vsel %vm13367_vm0, %v12315_v1, 0.0  ;;  %v4102_v30 = vrot.slane %v484_v11, %v15254_v6  ;;  %v7888_v41 = vcombine.low %v7880_v31, %v7887_v32 }
 0x6cf   :  { %v15068_v43 = vadd.f32 %v15067_v34, %v15066_v38  ;;  %v8431_v34 = vmul.f32 %v7871_v12, %v367_v9  ;;  %v8432_v59 = vmul.f32 %v7888_v41, %v368_v39  ;;  %v7907_v9 = vcombine.low %v4114_v52, %v4118_v55 }
 0x6d1   :  { %v15070_v49 = vadd.f32 %v15069_v42, %v15068_v43  ;;  %v7889_v42 = vcombine.low %v4090_v26, %v4094_v27  ;;  %v7890_v43 = vcombine.low %v4098_v28, %v4102_v30  ;;  %v12335_v46 = vcombine.high %v8431_v34, %v8431_v34 }
 0x6d2   :  { %v12342_v47 = vrot.slane %v8431_v34, %v15268_v20  ;;  %v12352_v12 = vcombine.high %v8432_v59, %v8432_v59  ;;  %v12359_v13 = vrot.slane %v8432_v59, %v15268_v20  ;;  %v7921_v27 = vrot.slane %v7907_v9, %v15268_v20 }
 0x6d3   :  { %v15072_v54 = vadd.f32 %v15071_v45, %v15070_v49  ;;  %v12334_v45 = vcombine.high %v12332_v35, %v12332_v35  ;;  %v7897_v56 = vrot.slane %v7889_v42, %v15268_v20  ;;  %v7904_v57 = vrot.slane %v7890_v43, %v15268_v20 }
 0x6d4   :  { %v12349_v60 = vrot.slane %v12335_v46, %v15268_v20  ;;  %v12350_v61 = vcombine.high %v12342_v47, %v12342_v47  ;;  %v15095_v1 = vsel %vm13367_vm0, %v12342_v47, 0.0  ;;  %v12366_v30 = vrot.slane %v12352_v12, %v15268_v20 }
 0x6d5   :  { %v15074_v63 = vadd.f32 %v15073_v53, %v15072_v54  ;;  %v15091_v53 = vsel %vm13367_vm0, %v12332_v35, 0.0  ;;  %v148_v54 = vld [vmem:[#allocation3 + $0x368] sm:$0xff]  ;;  %v15093_v62 = vsel %vm13367_vm0, %v12334_v45, 0.0  ;;  %v12367_v31 = vcombine.high %v12359_v13, %v12359_v13 }
 0x6d6   :  { %v369_v0 = vunpack.c.l.bf16 %v148_v54  ;;  %v12351_v11 = vcombine.high %v12349_v60, %v12349_v60  ;;  %v15097_v18 = vsel %vm13367_vm0, %v12350_v61, 0.0  ;;  %v370_v34 = vunpack.c.h.bf16 %v148_v54  ;;  %v486_v61 = vld [vmem:[#allocation5 + $0x378] sm:$0xff] }
 0x6d7   :  { %v15076_v8 = vadd.f32 %v15075_v58, %v15074_v63  ;;  %v15103_v35 = vsel %vm13367_vm0, %v12359_v13, 0.0  ;;  %v15105_v43 = vsel %vm13367_vm0, %v12367_v31, 0.0  ;;  %v4138_v45 = vrot.slane %v485_v3, %v15260_v14 }
 0x6d8   :  { %v15101_v32 = vsel %vm13367_vm0, %v12351_v11, 0.0  ;;  %v4142_v46 = vrot.slane %v485_v3, %v15262_v15  ;;  %v4146_v47 = vrot.slane %v485_v3, %v15264_v16  ;;  %v4154_v11 = vrot.slane %v486_v61, %v15248_v2 }
 0x6d9   :  { %v15078_v19 = vadd.f32 %v15077_v7, %v15076_v8  ;;  %v7905_v7 = vcombine.low %v7897_v56, %v7904_v57  ;;  %v7906_v8 = vcombine.low %v4106_v50, %v4110_v51  ;;  %v4150_v50 = vrot.slane %v485_v3, %v15266_v17 }
 0x6da   :  { %v4158_v12 = vrot.slane %v486_v61, %v15250_v4  ;;  %v4162_v13 = vrot.slane %v486_v61, %v15252_v5 }
 0x6db   :  { %v15080_v25 = vadd.f32 %v15079_v10, %v15078_v19  ;;  %v7914_v26 = vrot.slane %v7906_v8, %v15268_v20 }
 0x6dd   :  { %v15082_v33 = vadd.f32 %v15081_v24, %v15080_v25  ;;  %v15099_v24 = vsel %vm13367_vm0, %v12349_v60, 0.0  ;;  %v4134_v25 = vrot.slane %v485_v3, %v15254_v6  ;;  %v7922_v36 = vcombine.low %v7914_v26, %v7921_v27 }
 0x6df   :  { %v15084_v38 = vadd.f32 %v15083_v29, %v15082_v33  ;;  %v8433_v29 = vmul.f32 %v7905_v7, %v369_v0  ;;  %v8434_v54 = vmul.f32 %v7922_v36, %v370_v34  ;;  %v7941_v0 = vcombine.low %v4146_v47, %v4150_v50 }
 0x6e0   :  { %v4170_v36 = vrot.slane %v486_v61, %v15260_v14 }
 0x6e1   :  { %v15086_v44 = vadd.f32 %v15085_v37, %v15084_v38  ;;  %v7923_v37 = vcombine.low %v4122_v21, %v4126_v22  ;;  %v7924_v38 = vcombine.low %v4130_v23, %v4134_v25  ;;  %v12369_v41 = vcombine.high %v8433_v29, %v8433_v29 }
 0x6e2   :  { %v12376_v42 = vrot.slane %v8433_v29, %v15268_v20  ;;  %v12386_v7 = vcombine.high %v8434_v54, %v8434_v54  ;;  %v12393_v8 = vrot.slane %v8434_v54, %v15268_v20  ;;  %v7955_v22 = vrot.slane %v7941_v0, %v15268_v20 }
 0x6e3   :  { %v15088_v49 = vadd.f32 %v15087_v40, %v15086_v44  ;;  %v12368_v40 = vcombine.high %v12366_v30, %v12366_v30  ;;  %v7931_v51 = vrot.slane %v7923_v37, %v15268_v20  ;;  %v7938_v52 = vrot.slane %v7924_v38, %v15268_v20 }
 0x6e4   :  { %v12383_v55 = vrot.slane %v12369_v41, %v15268_v20  ;;  %v12384_v56 = vcombine.high %v12376_v42, %v12376_v42  ;;  %v15111_v60 = vsel %vm13367_vm0, %v12376_v42, 0.0  ;;  %v12400_v25 = vrot.slane %v12386_v7, %v15268_v20 }
 0x6e5   :  { %v15090_v58 = vadd.f32 %v15089_v48, %v15088_v49  ;;  %v15107_v48 = vsel %vm13367_vm0, %v12366_v30, 0.0  ;;  %v149_v49 = vld [vmem:[#allocation3 + $0x370] sm:$0xff]  ;;  %v15109_v57 = vsel %vm13367_vm0, %v12368_v40, 0.0  ;;  %v12401_v26 = vcombine.high %v12393_v8, %v12393_v8  ;;  %v150_v40 = vld [vmem:[#allocation3 + $0x378] sm:$0xff] }
 0x6e6   :  { %v371_v59 = vunpack.c.l.bf16 %v149_v49  ;;  %v12385_v3 = vcombine.high %v12383_v55, %v12383_v55  ;;  %v15113_v9 = vsel %vm13367_vm0, %v12384_v56, 0.0  ;;  %v15119_v4 = vsel %vm13367_vm0, %v12393_v8, 0.0 }
 0x6e7   :  { %v15092_v63 = vadd.f32 %v15091_v53, %v15090_v58  ;;  %v7957_v29 = vcombine.low %v4154_v11, %v4158_v12  ;;  %v15121_v34 = vsel %vm13367_vm0, %v12401_v26, 0.0  ;;  %v4174_v37 = vrot.slane %v486_v61, %v15262_v15 }
 0x6e8   :  { %v15117_v27 = vsel %vm13367_vm0, %v12385_v3, 0.0  ;;  %v4178_v38 = vrot.slane %v486_v61, %v15264_v16  ;;  %v4182_v41 = vrot.slane %v486_v61, %v15266_v17  ;;  %v373_v15 = vunpack.c.l.bf16 %v150_v40 }
 0x6e9   :  { %v15094_v10 = vadd.f32 %v15093_v62, %v15092_v63  ;;  %v7939_v62 = vcombine.low %v7931_v51, %v7938_v52  ;;  %v7940_v63 = vcombine.low %v4138_v45, %v4142_v46  ;;  %v7965_v42 = vrot.slane %v7957_v29, %v15268_v20 }
 0x6ea   :  { %v7974_v50 = vcombine.low %v4170_v36, %v4174_v37  ;;  %v7975_v51 = vcombine.low %v4178_v38, %v4182_v41  ;;  %v374_v7 = vunpack.c.h.bf16 %v150_v40 }
 0x6eb   :  { %v15096_v19 = vadd.f32 %v15095_v1, %v15094_v10  ;;  %v7948_v21 = vrot.slane %v7940_v63, %v15268_v20 }
 0x6ed   :  { %v15098_v28 = vadd.f32 %v15097_v18, %v15096_v19  ;;  %v15115_v18 = vsel %vm13367_vm0, %v12383_v55, 0.0  ;;  %v4166_v19 = vrot.slane %v486_v61, %v15254_v6  ;;  %v7956_v5 = vcombine.low %v7948_v21, %v7955_v22 }
 0x6ee   :  { %v12402_v6 = vcombine.high %v12400_v25, %v12400_v25 }
 0x6ef   :  { %v15100_v33 = vadd.f32 %v15099_v24, %v15098_v28  ;;  %v8435_v24 = vmul.f32 %v7939_v62, %v371_v59  ;;  %v372_v28 = vunpack.c.h.bf16 %v149_v49  ;;  %v7958_v30 = vcombine.low %v4162_v13, %v4166_v19 }
 0x6f0   :  { %v15125_v14 = vsel %vm13367_vm0, %v12402_v6, 0.0  ;;  %v7989_v59 = vrot.slane %v7975_v51, %v15268_v20 }
 0x6f1   :  { %v15102_v39 = vadd.f32 %v15101_v32, %v15100_v33  ;;  %v12403_v32 = vcombine.high %v8435_v24, %v8435_v24  ;;  %v12410_v33 = vrot.slane %v8435_v24, %v15268_v20  ;;  %v8436_v45 = vmul.f32 %v7956_v5, %v372_v28 }
 0x6f3   :  { %v15104_v44 = vadd.f32 %v15103_v35, %v15102_v39  ;;  %v15123_v39 = vsel %vm13367_vm0, %v12400_v25, 0.0  ;;  %v12417_v46 = vrot.slane %v12403_v32, %v15268_v20  ;;  %v12418_v47 = vcombine.high %v12410_v33, %v12410_v33 }
 0x6f4   :  { %v15127_v16 = vsel %vm13367_vm0, %v12410_v33, 0.0  ;;  %v12427_v54 = vrot.slane %v8436_v45, %v15268_v20 }
 0x6f5   :  { %v15106_v53 = vadd.f32 %v15105_v43, %v15104_v44  ;;  %v7972_v43 = vrot.slane %v7958_v30, %v15268_v20  ;;  %v12419_v17 = vcombine.high %v12417_v46, %v12417_v46  ;;  %v15129_v55 = vsel %vm13367_vm0, %v12418_v47, 0.0 }
 0x6f6   :  { %v12435_v63 = vcombine.high %v12427_v54, %v12427_v54  ;;  %v15135_v3 = vsel %vm13367_vm0, %v12427_v54, 0.0 }
 0x6f7   :  { %v15108_v58 = vadd.f32 %v15107_v48, %v15106_v53  ;;  %v7973_v49 = vcombine.low %v7965_v42, %v7972_v43  ;;  %v12420_v53 = vcombine.high %v8436_v45, %v8436_v45  ;;  %v15133_v0 = vsel %vm13367_vm0, %v12419_v17, 0.0 }
 0x6f8   :  { %v15137_v13 = vsel %vm13367_vm0, %v12435_v63, 0.0 }
 0x6f9   :  { %v15110_v1 = vadd.f32 %v15109_v57, %v15108_v58  ;;  %v15131_v57 = vsel %vm13367_vm0, %v12417_v46, 0.0  ;;  %v7982_v58 = vrot.slane %v7974_v50, %v15268_v20  ;;  %v8437_v61 = vmul.f32 %v7973_v49, %v373_v15 }
 0x6fa   :  { %v12434_v62 = vrot.slane %v12420_v53, %v15268_v20 }
 0x6fb   :  { %v15112_v10 = vadd.f32 %v15111_v60, %v15110_v1  ;;  %v7990_v8 = vcombine.low %v7982_v58, %v7989_v59  ;;  %v12437_v11 = vcombine.high %v8437_v61, %v8437_v61  ;;  %v12444_v12 = vrot.slane %v8437_v61, %v15268_v20 }
 0x6fc   :  { %v15139_v19 = vsel %vm13367_vm0, %v12434_v62, 0.0 }
 0x6fd   :  { %v15114_v23 = vadd.f32 %v15113_v9, %v15112_v10  ;;  %v12436_v10 = vcombine.high %v12434_v62, %v12434_v62  ;;  %v8438_v22 = vmul.f32 %v7990_v8, %v374_v7  ;;  %v12452_v24 = vcombine.high %v12444_v12, %v12444_v12 }
 0x6ff   :  { %v15116_v2 = vadd.f32 %v15115_v18, %v15114_v23  ;;  %v12451_v23 = vrot.slane %v12437_v11, %v15268_v20  ;;  %v15141_v25 = vsel %vm13367_vm0, %v12436_v10, 0.0  ;;  %v12461_v5 = vrot.slane %v8438_v22, %v15268_v20 }
 0x700   :  { %v15145_v29 = vsel %vm13367_vm0, %v12452_v24, 0.0 }
 0x701   :  { %v15118_v31 = vadd.f32 %v15117_v27, %v15116_v2  ;;  %v15143_v27 = vsel %vm13367_vm0, %v12444_v12, 0.0  ;;  %v12453_v28 = vcombine.high %v12451_v23, %v12451_v23  ;;  %v12469_v33 = vcombine.high %v12461_v5, %v12461_v5 }
 0x702   :  { %v15151_v36 = vsel %vm13367_vm0, %v12461_v5, 0.0 }
 0x703   :  { %v15120_v35 = vadd.f32 %v15119_v4, %v15118_v31  ;;  %v12454_v4 = vcombine.high %v8438_v22, %v8438_v22  ;;  %v15147_v31 = vsel %vm13367_vm0, %v12451_v23, 0.0 }
 0x705   :  { %v15122_v44 = vadd.f32 %v15121_v34, %v15120_v35  ;;  %v12468_v32 = vrot.slane %v12454_v4, %v15268_v20  ;;  %v15149_v34 = vsel %vm13367_vm0, %v12453_v28, 0.0  ;;  %v15162_v20 = vstv %s17962_s2 }
 0x707   :  { %v15124_v48 = vadd.f32 %v15123_v39, %v15122_v44  ;;  %v12470_v38 = vcombine.high %v12468_v32, %v12468_v32  ;;  %v15153_v39 = vsel %vm13367_vm0, %v12469_v33, 0.0  ;;  %v15155_v41 = vsel %vm13367_vm0, %v12468_v32, 0.0 }
 0x709   :  { %v15126_v52 = vadd.f32 %v15125_v14, %v15124_v48  ;;  %v15157_v43 = vsel %vm13367_vm0, %v12470_v38, 0.0 }
 0x70b   :  { %v15128_v56 = vadd.f32 %v15127_v16, %v15126_v52 }
 0x70d   :  { %v15130_v60 = vadd.f32 %v15129_v55, %v15128_v56 }
 0x70f   :  { %v15132_v1 = vadd.f32 %v15131_v57, %v15130_v60 }
 0x711   :  { %v15134_v9 = vadd.f32 %v15133_v0, %v15132_v1 }
 0x713   :  { %v15136_v18 = vadd.f32 %v15135_v3, %v15134_v9 }
 0x715   :  { %v15138_v21 = vadd.f32 %v15137_v13, %v15136_v18 }
 0x717   :  { %v15140_v26 = vadd.f32 %v15139_v19, %v15138_v21 }
 0x719   :  { %v15142_v2 = vadd.f32 %v15141_v25, %v15140_v26 }
 0x71b   :  { %v15144_v30 = vadd.f32 %v15143_v27, %v15142_v2 }
 0x71d   :  { %v15146_v6 = vadd.f32 %v15145_v29, %v15144_v30 }
 0x71f   :  { %v15148_v35 = vadd.f32 %v15147_v31, %v15146_v6 }
 0x721   :  { %v15150_v37 = vadd.f32 %v15149_v34, %v15148_v35 }
 0x723   :  { %v15152_v40 = vadd.f32 %v15151_v36, %v15150_v37 }
 0x725   :  { %v15154_v42 = vadd.f32 %v15153_v39, %v15152_v40 }
 0x727   :  { %v15156_v44 = vadd.f32 %v15155_v41, %v15154_v42 }
 0x729   :  { %v15158_v45 = vadd.f32 %v15157_v43, %v15156_v44 }
 0x72b   :  { %15159 = vadd.xlane.f32.xlu0 %v15158_v45 }
 0x7b4   :  { %v15160_v46 = vpop.xlane.xlu0 %15159 }
 0x7b5   :  { %v15163_v47 = vadd.f32 %v15162_v20, %v15160_v46 }
 0x7b7   :  { %15165 = vst.msk [vmem:[%s17963_s3] sm:$0x3] %vm15164_vm1, %v15163_v47 }
 0x7b8   :  { %15170 = vsyncpa [#allocation4], 1 }
 0x7b9   :  { %15171 = vsyncpa [#allocation6], 1 }

</bundles_post_ra>
